<compile_context>
chip_gen: v5e
topology: v5e:2x2
jax: 0.10.0
libtpu: 0.0.40
codegen_flags: <defaults>
</compile_context>

<pallas_src>
import functools
import math

import numpy as np
import jax
import jax.numpy as jnp
from jax.experimental import pallas as pl
from jax.experimental.pallas import tpu as pltpu

VMEM = pltpu.MemorySpace.VMEM
F32 = jnp.float32
BF16 = jnp.bfloat16


def vspec():
    return pl.BlockSpec(memory_space=VMEM)


# --------------------------------------------------------------------------
# In-kernel helpers
# --------------------------------------------------------------------------
def _layernorm(x, g, b, eps=1e-5):
    mu = jnp.mean(x, axis=-1, keepdims=True)
    var = jnp.mean(jnp.square(x - mu), axis=-1, keepdims=True)
    return (x - mu) * jax.lax.rsqrt(var + eps) * g + b


def _gcn_relu(a_bf16, x, w, b):
    # relu(A_norm @ (X @ W) + b); the N^2-flop A @ H runs with bf16 operands
    # on the MXU (f32 accumulation), the small X @ W stays f32.
    h = jnp.dot(x, w, preferred_element_type=F32)
    ah = jnp.dot(a_bf16, h.astype(BF16), preferred_element_type=F32)
    return jnp.maximum(ah + b, 0.0)


# --------------------------------------------------------------------------
# Kernel A: encoders + cross-attention + align loss (single block)
# --------------------------------------------------------------------------
def _encode_attend_kernel(
    a_sub_ref, a_full_ref, x_ref, s_vis_ref, s_msk_ref, tok_ref,
    e1w_ref, e1b_ref, e2w_ref, e2b_ref,
    lnq_g_ref, lnq_b_ref, lnk_g_ref, lnk_b_ref, lnv_g_ref, lnv_b_ref,
    lnc_g_ref, lnc_b_ref,
    wq_ref, bq_ref, wk_ref, bk_ref, wv_ref, bv_ref, wo_ref, bo_ref,
    f1w_ref, f1b_ref, f2w_ref, f2b_ref,
    x_vis_ref, x_masked_ref, loss_ref,
    *, num_heads):
    n_msk = s_msk_ref.shape[1]
    hid = tok_ref.shape[1]
    dh = hid // num_heads
    scale = 1.0 / math.sqrt(dh)
    gather = (((0,), (0,)), ((), ()))          # contract node axis (one-hot)
    lane_contract = (((1,), (1,)), ((), ()))   # contract feature axis

    # ---- shared_encoder on the visible induced subgraph -------------------
    # x_sub = x[mask] via transposed contraction with the one-hot S_vis (f32).
    x_sub = jax.lax.dot_general(s_vis_ref[...], x_ref[...], gather,
                                preferred_element_type=F32)
    a_sub = a_sub_ref[...]
    x_vis = _gcn_relu(a_sub, x_sub, e1w_ref[...], e1b_ref[...])
    x_vis = _gcn_relu(a_sub, x_vis, e2w_ref[...], e2b_ref[...])
    x_vis_ref[...] = x_vis

    # ---- LatentContextualRegressor: LN(q/k/v) + MHA + LN -------------------
    q0 = jnp.broadcast_to(tok_ref[...], (n_msk, hid))   # mask_token.expand
    qn = _layernorm(q0, lnq_g_ref[...], lnq_b_ref[...])
    kn = _layernorm(x_vis, lnk_g_ref[...], lnk_b_ref[...])
    vn = _layernorm(x_vis, lnv_g_ref[...], lnv_b_ref[...])

    # Full-width Q/K/V projections: three well-shaped MXU matmuls.
    q = jnp.dot(qn, wq_ref[...], preferred_element_type=F32) + bq_ref[...]
    k = jnp.dot(kn, wk_ref[...], preferred_element_type=F32) + bk_ref[...]
    v = jnp.dot(vn, wv_ref[...], preferred_element_type=F32) + bv_ref[...]
    wo = wo_ref[...]

    # Static head unroll (tiny scores; fori_loop only needed once n_msk*n_vis
    # outgrows a few vregs -- see review note).
    acc = jnp.zeros((n_msk, hid), F32)
    for h in range(num_heads):
        lo = h * dh
        qh = q[:, lo:lo + dh]
        kh = k[:, lo:lo + dh]
        vh = v[:, lo:lo + dh]
        s = jax.lax.dot_general(qh, kh, lane_contract,
                                preferred_element_type=F32) * scale
        s = s - jnp.max(s, axis=-1, keepdims=True)
        p = jnp.exp(s)
        p = p / jnp.sum(p, axis=-1, keepdims=True)      # exact normalization
        oh = jnp.dot(p, vh, preferred_element_type=F32)
        # output projection folded per head: concat_h(o_h) @ Wo == sum_h o_h @ Wo_rows
        acc = acc + jnp.dot(oh, wo[lo:lo + dh, :], preferred_element_type=F32)
    x_masked = _layernorm(acc + bo_ref[...], lnc_g_ref[...], lnc_b_ref[...])
    x_masked_ref[...] = x_masked

    # ---- extra_loss: shared_encoder_ on full graph + align loss ------------
    a_full = a_full_ref[...]
    z = _gcn_relu(a_full, x_ref[...], f1w_ref[...], f1b_ref[...])
    z = _gcn_relu(a_full, z, f2w_ref[...], f2b_ref[...])
    z_msk = jax.lax.dot_general(s_msk_ref[...], z, gather,
                                preferred_element_type=F32)   # z[~mask]
    d = z_msk - x_masked
    row_err = jnp.sqrt(jnp.sum(d * d, axis=1, keepdims=True))   # (n_msk, 1)
    loss_ref[...] = jnp.sum(row_err, axis=0, keepdims=True) * (1.0 / n_msk)


# --------------------------------------------------------------------------
# Kernel B: row-tiled compose + mlp_processor + LinkPredictor ("parallel")
# --------------------------------------------------------------------------
def _decode_kernel(s_vis_ref, s_msk_ref, x_vis_ref, x_masked_ref,
                   m1w_ref, m1b_ref, m2w_ref, m2b_ref,
                   c1w_ref, c1b_ref, cfw_ref, cfb_ref,
                   x_hat_ref, adj_ref):
    # compose latent x for this node-row tile (one-hot scatter, exact f32)
    xz = (jnp.dot(s_vis_ref[...], x_vis_ref[...], preferred_element_type=F32)
          + jnp.dot(s_msk_ref[...], x_masked_ref[...], preferred_element_type=F32))
    # mlp_processor: hid -> hid//2 (relu) -> feat
    h1 = jnp.maximum(
        jnp.dot(xz, m1w_ref[...], preferred_element_type=F32) + m1b_ref[...], 0.0)
    x_hat = jnp.dot(h1, m2w_ref[...], preferred_element_type=F32) + m2b_ref[...]
    x_hat_ref[...] = x_hat
    # cross_decoder (LinkPredictor): sigmoid(relu((x*x)W1 + b1) Wf + bf)
    xx = x_hat * x_hat                                  # x_i == x_j == x_hat
    h2 = jnp.maximum(
        jnp.dot(xx, c1w_ref[...], preferred_element_type=F32) + c1b_ref[...], 0.0)
    logits = jnp.dot(h2.astype(BF16), cfw_ref[...],
                     preferred_element_type=F32) + cfb_ref[...]
    adj_ref[...] = jax.nn.sigmoid(logits)


# --------------------------------------------------------------------------
# Host-side sizing helpers
# --------------------------------------------------------------------------
def _nbytes(objs):
    return sum(int(np.prod(o.shape)) * np.dtype(o.dtype).itemsize for o in objs)


def _vmem_limit(args, outs, headroom=8 << 20):
    est = 2 * (_nbytes(args) + _nbytes(outs)) + headroom
    return int(min(max(est, 16 << 20), 64 << 20))


def _pick_row_tile(n):
    for t in (512, 256, 128, 64, 32, 16, 8):
        if n % t == 0 and n // t >= 2:
            return t
    return n


# --------------------------------------------------------------------------
# Wrapper: two pallas_calls for the whole forward
# --------------------------------------------------------------------------
def model_forward(x, a_full, a_sub, s_vis, s_msk, params, num_heads):
    n, feat = x.shape
    n_vis = s_vis.shape[1]
    n_msk = s_msk.shape[1]
    hid = params["mask_token"].shape[1]
    assert n_vis > 0 and n_msk > 0, "mask must leave both visible and masked nodes"

    def b2(v):
        return v.reshape(1, -1)

    # ---------------- kernel A ----------------
    args_a = [
        a_sub, a_full, x, s_vis, s_msk, params["mask_token"],
        params["enc1_w"], b2(params["enc1_b"]),
        params["enc2_w"], b2(params["enc2_b"]),
        b2(params["ln_q_g"]), b2(params["ln_q_b"]),
        b2(params["ln_k_g"]), b2(params["ln_k_b"]),
        b2(params["ln_v_g"]), b2(params["ln_v_b"]),
        b2(params["ln_c_g"]), b2(params["ln_c_b"]),
        params["wq"], b2(params["bq"]), params["wk"], b2(params["bk"]),
        params["wv"], b2(params["bv"]), params["wo"], b2(params["bo"]),
        params["enc1__w"], b2(params["enc1__b"]),
        params["enc2__w"], b2(params["enc2__b"]),
    ]
    out_a = (jax.ShapeDtypeStruct((n_vis, hid), jnp.float32),
             jax.ShapeDtypeStruct((n_msk, hid), jnp.float32),
             jax.ShapeDtypeStruct((1, 1), jnp.float32))
    flops_a = 2 * (n_vis * n * feat + n_msk * n * hid
                   + n_vis * hid * (feat + hid) + 2 * n_vis * n_vis * hid
                   + (2 * n_vis + 2 * n_msk) * hid * hid
                   + 2 * num_heads * n_msk * n_vis * (hid // num_heads)
                   + n * hid * (feat + hid) + 2 * n * n * hid)
    trans_a = num_heads * n_msk * n_vis + 4 * (n + n_vis + n_msk) * hid
    x_vis, x_masked, loss = pl.pallas_call(
        functools.partial(_encode_attend_kernel, num_heads=num_heads),
        out_shape=out_a,
        in_specs=[vspec()] * len(args_a),
        out_specs=(vspec(), vspec(), vspec()),
        compiler_params=pltpu.CompilerParams(
            vmem_limit_bytes=_vmem_limit(args_a, out_a)),
        cost_estimate=pl.CostEstimate(
            flops=int(flops_a), transcendentals=int(trans_a),
            bytes_accessed=int(_nbytes(args_a) + _nbytes(out_a))),
    )(*args_a)

    # ---------------- kernel B ----------------
    tm = _pick_row_tile(n)
    cfw_bf = params["cd_wf"].astype(BF16)
    args_b = [
        s_vis, s_msk, x_vis, x_masked,
        params["mlp_w1"], b2(params["mlp_b1"]),
        params["mlp_w2"], b2(params["mlp_b2"]),
        params["cd_w1"], b2(params["cd_b1"]),
        cfw_bf, b2(params["cd_bf"]),
    ]

    def full_spec(a):
        return pl.BlockSpec(a.shape, lambda i: (0,) * a.ndim)

    in_specs_b = ([pl.BlockSpec((tm, n_vis), lambda i: (i, 0)),
                   pl.BlockSpec((tm, n_msk), lambda i: (i, 0))]
                  + [full_spec(a) for a in args_b[2:]])
    out_b = (jax.ShapeDtypeStruct((n, feat), jnp.float32),
             jax.ShapeDtypeStruct((n, n), jnp.float32))
    out_specs_b = (pl.BlockSpec((tm, feat), lambda i: (i, 0)),
                   pl.BlockSpec((tm, n), lambda i: (i, 0)))
    flops_b = 2 * n * (n_vis * hid + n_msk * hid + hid * (hid // 2)
                       + (hid // 2) * feat + feat * hid + hid * n)
    x_hat, adj = pl.pallas_call(
        _decode_kernel,
        out_shape=out_b,
        grid=(n // tm,),
        in_specs=in_specs_b,
        out_specs=out_specs_b,
        compiler_params=pltpu.CompilerParams(
            dimension_semantics=("parallel",),
            vmem_limit_bytes=_vmem_limit(args_b, out_b)),
        cost_estimate=pl.CostEstimate(
            flops=int(flops_b), transcendentals=int(n * n),
            bytes_accessed=int(_nbytes(args_b) + _nbytes(out_b))),
    )(*args_b)
    return adj, x_hat, loss[0, 0]


# --------------------------------------------------------------------------
# Host-side glue (graph preprocessing, parameter init)
# --------------------------------------------------------------------------
def dense_gcn_norm(edge_index, n, dtype=jnp.bfloat16):
    """D^{-1/2} (A + I) D^{-1/2} as a dense matrix (bf16 for the MXU)."""
    a = np.zeros((n, n), np.float32)
    if edge_index.size:
        a[edge_index[0], edge_index[1]] = 1.0
    a = a + np.eye(n, dtype=np.float32)
    deg = a.sum(axis=1)
    dinv = 1.0 / np.sqrt(np.clip(deg, 1.0, None))
    return jnp.asarray(dinv[:, None] * a * dinv[None, :], dtype=dtype)


def init_linear(key, in_dim, out_dim, scale=0.1):
    kw, kb = jax.random.split(key)
    w_t = jax.random.normal(kw, (in_dim, out_dim), jnp.float32) * scale
    b = jax.random.normal(kb, (out_dim,), jnp.float32) * scale
    return w_t, b


# --------------------------------------------------------------------------
if __name__ == "__main__":
    N, FEAT, HID, HEADS = 128, 16, 32, 8   # N multiple of 128 -> lane-dense adj

    # ---- deterministic synthetic graph data ------------------------------
    rng = np.random.RandomState(0)
    n_edges = 512
    src = rng.randint(0, N, n_edges)
    dst = rng.randint(0, N, n_edges)
    keep = src != dst
    src, dst = src[keep], dst[keep]
    edge_index = np.stack([np.concatenate([src, dst]),
                           np.concatenate([dst, src])]).astype(np.int64)

    # deterministic node mask (stand-in for bernoulli(mask_weight))
    mask_weight = 0.3 + 0.5 * rng.rand(N)
    mask = rng.rand(N) < mask_weight
    if mask.all():
        mask[0] = False
    if not mask.any():
        mask[0] = True
    vis_idx_np = np.where(mask)[0]
    msk_idx_np = np.where(~mask)[0]
    n_vis, n_msk = len(vis_idx_np), len(msk_idx_np)

    # induced subgraph on visible nodes
    in_sub = mask[edge_index[0]] & mask[edge_index[1]]
    sub_e = edge_index[:, in_sub]
    relabel = -np.ones(N, np.int64)
    relabel[vis_idx_np] = np.arange(n_vis)
    sub_e = relabel[sub_e]

    a_full = dense_gcn_norm(edge_index, N)
    a_sub = dense_gcn_norm(sub_e, n_vis)

    # one-hot scatter matrices (f32; also reused transposed in-kernel as gathers)
    s_vis_np = np.zeros((N, n_vis), np.float32)
    s_vis_np[vis_idx_np, np.arange(n_vis)] = 1.0
    s_msk_np = np.zeros((N, n_msk), np.float32)
    s_msk_np[msk_idx_np, np.arange(n_msk)] = 1.0
    s_vis = jnp.asarray(s_vis_np)
    s_msk = jnp.asarray(s_msk_np)

    # ---- features + deterministic parameters -----------------------------
    key = jax.random.PRNGKey(0)
    keys = jax.random.split(key, 16)
    x = jax.random.normal(keys[0], (N, FEAT), jnp.float32)

    params = {}
    params["enc1_w"], params["enc1_b"] = init_linear(keys[1], FEAT, HID)
    params["enc2_w"], params["enc2_b"] = init_linear(keys[2], HID, HID)
    params["enc1__w"], params["enc1__b"] = init_linear(keys[3], FEAT, HID)
    params["enc2__w"], params["enc2__b"] = init_linear(keys[4], HID, HID)
    for name in ("ln_q", "ln_k", "ln_v", "ln_c"):   # PyTorch LayerNorm defaults
        params[name + "_g"] = jnp.ones((HID,), jnp.float32)
        params[name + "_b"] = jnp.zeros((HID,), jnp.float32)
    params["mask_token"] = jnp.zeros((1, HID), jnp.float32)
    # MultiheadAttention projections (full-width; heads are split in-kernel)
    params["wq"], params["bq"] = init_linear(keys[5], HID, HID)
    params["wk"], params["bk"] = init_linear(keys[6], HID, HID)
    params["wv"], params["bv"] = init_linear(keys[7], HID, HID)
    params["wo"], params["bo"] = init_linear(keys[8], HID, HID)
    # mlp_processor: HID -> HID//2 -> FEAT
    params["mlp_w1"], params["mlp_b1"] = init_linear(keys[9], HID, HID // 2)
    params["mlp_w2"], params["mlp_b2"] = init_linear(keys[10], HID // 2, FEAT)
    # cross_decoder (LinkPredictor): FEAT -> HID (relu) -> N (sigmoid)
    params["cd_w1"], params["cd_b1"] = init_linear(keys[11], FEAT, HID)
    params["cd_wf"], params["cd_bf"] = init_linear(keys[12], HID, N)

    adj, x_hat, loss = model_forward(x, a_full, a_sub, s_vis, s_msk,
                                     params, HEADS)
    jax.block_until_ready(adj)
    jax.block_until_ready(x_hat)
    jax.block_until_ready(loss)

    assert adj.shape == (N, N)
    assert x_hat.shape == (N, FEAT)
    assert loss.shape == ()
    assert bool(jnp.isfinite(loss))
    assert bool(jnp.all(jnp.isfinite(adj)))
    assert bool(jnp.all(jnp.isfinite(x_hat)))
    print("KERNEL_OK")
</pallas_src>

<mosaic_0001>
module attributes {stable_mosaic.version = 11 : i64} {
  func.func @_encode_attend_kernel(%arg0: memref<77x77xbf16, #tpu.memory_space<vmem>>, %arg1: memref<128x128xbf16, #tpu.memory_space<vmem>>, %arg2: memref<128x16xf32, #tpu.memory_space<vmem>>, %arg3: memref<128x77xf32, #tpu.memory_space<vmem>>, %arg4: memref<128x51xf32, #tpu.memory_space<vmem>>, %arg5: memref<1x32xf32, #tpu.memory_space<vmem>>, %arg6: memref<16x32xf32, #tpu.memory_space<vmem>>, %arg7: memref<1x32xf32, #tpu.memory_space<vmem>>, %arg8: memref<32x32xf32, #tpu.memory_space<vmem>>, %arg9: memref<1x32xf32, #tpu.memory_space<vmem>>, %arg10: memref<1x32xf32, #tpu.memory_space<vmem>>, %arg11: memref<1x32xf32, #tpu.memory_space<vmem>>, %arg12: memref<1x32xf32, #tpu.memory_space<vmem>>, %arg13: memref<1x32xf32, #tpu.memory_space<vmem>>, %arg14: memref<1x32xf32, #tpu.memory_space<vmem>>, %arg15: memref<1x32xf32, #tpu.memory_space<vmem>>, %arg16: memref<1x32xf32, #tpu.memory_space<vmem>>, %arg17: memref<1x32xf32, #tpu.memory_space<vmem>>, %arg18: memref<32x32xf32, #tpu.memory_space<vmem>>, %arg19: memref<1x32xf32, #tpu.memory_space<vmem>>, %arg20: memref<32x32xf32, #tpu.memory_space<vmem>>, %arg21: memref<1x32xf32, #tpu.memory_space<vmem>>, %arg22: memref<32x32xf32, #tpu.memory_space<vmem>>, %arg23: memref<1x32xf32, #tpu.memory_space<vmem>>, %arg24: memref<32x32xf32, #tpu.memory_space<vmem>>, %arg25: memref<1x32xf32, #tpu.memory_space<vmem>>, %arg26: memref<16x32xf32, #tpu.memory_space<vmem>>, %arg27: memref<1x32xf32, #tpu.memory_space<vmem>>, %arg28: memref<32x32xf32, #tpu.memory_space<vmem>>, %arg29: memref<1x32xf32, #tpu.memory_space<vmem>>, %arg30: memref<77x32xf32, #tpu.memory_space<vmem>>, %arg31: memref<51x32xf32, #tpu.memory_space<vmem>>, %arg32: memref<1x1xf32, #tpu.memory_space<vmem>>) attributes {dimension_semantics = [], scalar_prefetch = 0 : i64, scratch_operands = 0 : i64, tpu.core_type = #tpu.core_type<tc>} {
    %c0 = arith.constant 0 : index
    %c0_0 = arith.constant 0 : index
    %0 = vector.load %arg3[%c0, %c0_0] : memref<128x77xf32, #tpu.memory_space<vmem>>, vector<128x77xf32>
    %c0_1 = arith.constant 0 : index
    %c0_2 = arith.constant 0 : index
    %1 = vector.load %arg2[%c0_1, %c0_2] : memref<128x16xf32, #tpu.memory_space<vmem>>, vector<128x16xf32>
    %cst = arith.constant dense<0.000000e+00> : vector<77x16xf32>
    %2 = tpu.matmul %0, %1, %cst {dimension_numbers = #tpu.dot_dimension_numbers<[0], [0], [1], [1], [0, 1, 1, 1], [], []>} : vector<128x77xf32>, vector<128x16xf32>, vector<77x16xf32> -> vector<77x16xf32>
    %c0_3 = arith.constant 0 : index
    %c0_4 = arith.constant 0 : index
    %3 = vector.load %arg0[%c0_3, %c0_4] : memref<77x77xbf16, #tpu.memory_space<vmem>>, vector<77x77xbf16>
    %c0_5 = arith.constant 0 : index
    %c0_6 = arith.constant 0 : index
    %4 = vector.load %arg6[%c0_5, %c0_6] : memref<16x32xf32, #tpu.memory_space<vmem>>, vector<16x32xf32>
    %c0_7 = arith.constant 0 : index
    %c0_8 = arith.constant 0 : index
    %5 = vector.load %arg7[%c0_7, %c0_8] : memref<1x32xf32, #tpu.memory_space<vmem>>, vector<1x32xf32>
    %cst_9 = arith.constant dense<0.000000e+00> : vector<77x32xf32>
    %6 = tpu.matmul %2, %4, %cst_9 {dimension_numbers = #tpu.dot_dimension_numbers<[1], [0], [0], [1], [0, 0, 1, 1], [], []>} : vector<77x16xf32>, vector<16x32xf32>, vector<77x32xf32> -> vector<77x32xf32>
    %7 = arith.truncf %6 : vector<77x32xf32> to vector<77x32xbf16>
    %cst_10 = arith.constant dense<0.000000e+00> : vector<77x32xf32>
    %8 = tpu.matmul %3, %7, %cst_10 {dimension_numbers = #tpu.dot_dimension_numbers<[1], [0], [0], [1], [0, 0, 1, 1], [], []>} : vector<77x77xbf16>, vector<77x32xbf16>, vector<77x32xf32> -> vector<77x32xf32>
    %9 = vector.broadcast %5 : vector<1x32xf32> to vector<77x32xf32>
    %10 = arith.addf %8, %9 : vector<77x32xf32>
    %cst_11 = arith.constant 0.000000e+00 : f32
    %11 = vector.broadcast %cst_11 : f32 to vector<77x32xf32>
    %12 = arith.maximumf %10, %11 : vector<77x32xf32>
    %c0_12 = arith.constant 0 : index
    %c0_13 = arith.constant 0 : index
    %13 = vector.load %arg8[%c0_12, %c0_13] : memref<32x32xf32, #tpu.memory_space<vmem>>, vector<32x32xf32>
    %c0_14 = arith.constant 0 : index
    %c0_15 = arith.constant 0 : index
    %14 = vector.load %arg9[%c0_14, %c0_15] : memref<1x32xf32, #tpu.memory_space<vmem>>, vector<1x32xf32>
    %cst_16 = arith.constant dense<0.000000e+00> : vector<77x32xf32>
    %15 = tpu.matmul %12, %13, %cst_16 {dimension_numbers = #tpu.dot_dimension_numbers<[1], [0], [0], [1], [0, 0, 1, 1], [], []>} : vector<77x32xf32>, vector<32x32xf32>, vector<77x32xf32> -> vector<77x32xf32>
    %16 = arith.truncf %15 : vector<77x32xf32> to vector<77x32xbf16>
    %cst_17 = arith.constant dense<0.000000e+00> : vector<77x32xf32>
    %17 = tpu.matmul %3, %16, %cst_17 {dimension_numbers = #tpu.dot_dimension_numbers<[1], [0], [0], [1], [0, 0, 1, 1], [], []>} : vector<77x77xbf16>, vector<77x32xbf16>, vector<77x32xf32> -> vector<77x32xf32>
    %18 = vector.broadcast %14 : vector<1x32xf32> to vector<77x32xf32>
    %19 = arith.addf %17, %18 : vector<77x32xf32>
    %cst_18 = arith.constant 0.000000e+00 : f32
    %20 = vector.broadcast %cst_18 : f32 to vector<77x32xf32>
    %21 = arith.maximumf %19, %20 : vector<77x32xf32>
    %c0_19 = arith.constant 0 : index
    %c0_20 = arith.constant 0 : index
    %22 = vector.load %arg30[%c0_19, %c0_20] : memref<77x32xf32, #tpu.memory_space<vmem>>, vector<77x32xf32>
    tpu.vector_store %arg30[%c0_19, %c0_20], %21 {strides = array<i32>} : memref<77x32xf32, #tpu.memory_space<vmem>>, vector<77x32xf32>,
    %c0_21 = arith.constant 0 : index
    %c0_22 = arith.constant 0 : index
    %23 = vector.load %arg5[%c0_21, %c0_22] : memref<1x32xf32, #tpu.memory_space<vmem>>, vector<1x32xf32>
    %24 = vector.shape_cast %23 : vector<1x32xf32> to vector<1x32xf32>
    %25 = vector.broadcast %24 : vector<1x32xf32> to vector<51x32xf32>
    %c0_23 = arith.constant 0 : index
    %c0_24 = arith.constant 0 : index
    %26 = vector.load %arg10[%c0_23, %c0_24] : memref<1x32xf32, #tpu.memory_space<vmem>>, vector<1x32xf32>
    %c0_25 = arith.constant 0 : index
    %c0_26 = arith.constant 0 : index
    %27 = vector.load %arg11[%c0_25, %c0_26] : memref<1x32xf32, #tpu.memory_space<vmem>>, vector<1x32xf32>
    %cst_27 = arith.constant dense<0.000000e+00> : vector<51xf32>
    %28 = vector.multi_reduction <add>, %25, %cst_27 [1] : vector<51x32xf32> to vector<51xf32>
    %29 = vector.shape_cast %28 : vector<51xf32> to vector<51x1xf32>
    %cst_28 = arith.constant 3.200000e+01 : f32
    %30 = vector.broadcast %cst_28 : f32 to vector<51x1xf32>
    %31 = arith.divf %29, %30 : vector<51x1xf32>
    %32 = vector.broadcast %31 : vector<51x1xf32> to vector<51x32xf32>
    %33 = arith.subf %25, %32 : vector<51x32xf32>
    %34 = arith.mulf %33, %33 : vector<51x32xf32>
    %cst_29 = arith.constant dense<0.000000e+00> : vector<51xf32>
    %35 = vector.multi_reduction <add>, %34, %cst_29 [1] : vector<51x32xf32> to vector<51xf32>
    %36 = vector.shape_cast %35 : vector<51xf32> to vector<51x1xf32>
    %cst_30 = arith.constant 3.200000e+01 : f32
    %37 = vector.broadcast %cst_30 : f32 to vector<51x1xf32>
    %38 = arith.divf %36, %37 : vector<51x1xf32>
    %39 = vector.broadcast %31 : vector<51x1xf32> to vector<51x32xf32>
    %40 = arith.subf %25, %39 : vector<51x32xf32>
    %cst_31 = arith.constant 9.99999974E-6 : f32
    %41 = vector.broadcast %cst_31 : f32 to vector<51x1xf32>
    %42 = arith.addf %38, %41 : vector<51x1xf32>
    %43 = math.rsqrt %42 : vector<51x1xf32>
    %44 = vector.broadcast %43 : vector<51x1xf32> to vector<51x32xf32>
    %45 = arith.mulf %40, %44 : vector<51x32xf32>
    %46 = vector.broadcast %26 : vector<1x32xf32> to vector<51x32xf32>
    %47 = arith.mulf %45, %46 : vector<51x32xf32>
    %48 = vector.broadcast %27 : vector<1x32xf32> to vector<51x32xf32>
    %49 = arith.addf %47, %48 : vector<51x32xf32>
    %c0_32 = arith.constant 0 : index
    %c0_33 = arith.constant 0 : index
    %50 = vector.load %arg12[%c0_32, %c0_33] : memref<1x32xf32, #tpu.memory_space<vmem>>, vector<1x32xf32>
    %c0_34 = arith.constant 0 : index
    %c0_35 = arith.constant 0 : index
    %51 = vector.load %arg13[%c0_34, %c0_35] : memref<1x32xf32, #tpu.memory_space<vmem>>, vector<1x32xf32>
    %cst_36 = arith.constant dense<0.000000e+00> : vector<77xf32>
    %52 = vector.multi_reduction <add>, %21, %cst_36 [1] : vector<77x32xf32> to vector<77xf32>
    %53 = vector.shape_cast %52 : vector<77xf32> to vector<77x1xf32>
    %cst_37 = arith.constant 3.200000e+01 : f32
    %54 = vector.broadcast %cst_37 : f32 to vector<77x1xf32>
    %55 = arith.divf %53, %54 : vector<77x1xf32>
    %56 = vector.broadcast %55 : vector<77x1xf32> to vector<77x32xf32>
    %57 = arith.subf %21, %56 : vector<77x32xf32>
    %58 = arith.mulf %57, %57 : vector<77x32xf32>
    %cst_38 = arith.constant dense<0.000000e+00> : vector<77xf32>
    %59 = vector.multi_reduction <add>, %58, %cst_38 [1] : vector<77x32xf32> to vector<77xf32>
    %60 = vector.shape_cast %59 : vector<77xf32> to vector<77x1xf32>
    %cst_39 = arith.constant 3.200000e+01 : f32
    %61 = vector.broadcast %cst_39 : f32 to vector<77x1xf32>
    %62 = arith.divf %60, %61 : vector<77x1xf32>
    %63 = vector.broadcast %55 : vector<77x1xf32> to vector<77x32xf32>
    %64 = arith.subf %21, %63 : vector<77x32xf32>
    %cst_40 = arith.constant 9.99999974E-6 : f32
    %65 = vector.broadcast %cst_40 : f32 to vector<77x1xf32>
    %66 = arith.addf %62, %65 : vector<77x1xf32>
    %67 = math.rsqrt %66 : vector<77x1xf32>
    %68 = vector.broadcast %67 : vector<77x1xf32> to vector<77x32xf32>
    %69 = arith.mulf %64, %68 : vector<77x32xf32>
    %70 = vector.broadcast %50 : vector<1x32xf32> to vector<77x32xf32>
    %71 = arith.mulf %69, %70 : vector<77x32xf32>
    %72 = vector.broadcast %51 : vector<1x32xf32> to vector<77x32xf32>
    %73 = arith.addf %71, %72 : vector<77x32xf32>
    %c0_41 = arith.constant 0 : index
    %c0_42 = arith.constant 0 : index
    %74 = vector.load %arg14[%c0_41, %c0_42] : memref<1x32xf32, #tpu.memory_space<vmem>>, vector<1x32xf32>
    %c0_43 = arith.constant 0 : index
    %c0_44 = arith.constant 0 : index
    %75 = vector.load %arg15[%c0_43, %c0_44] : memref<1x32xf32, #tpu.memory_space<vmem>>, vector<1x32xf32>
    %cst_45 = arith.constant dense<0.000000e+00> : vector<77xf32>
    %76 = vector.multi_reduction <add>, %21, %cst_45 [1] : vector<77x32xf32> to vector<77xf32>
    %77 = vector.shape_cast %76 : vector<77xf32> to vector<77x1xf32>
    %cst_46 = arith.constant 3.200000e+01 : f32
    %78 = vector.broadcast %cst_46 : f32 to vector<77x1xf32>
    %79 = arith.divf %77, %78 : vector<77x1xf32>
    %80 = vector.broadcast %79 : vector<77x1xf32> to vector<77x32xf32>
    %81 = arith.subf %21, %80 : vector<77x32xf32>
    %82 = arith.mulf %81, %81 : vector<77x32xf32>
    %cst_47 = arith.constant dense<0.000000e+00> : vector<77xf32>
    %83 = vector.multi_reduction <add>, %82, %cst_47 [1] : vector<77x32xf32> to vector<77xf32>
    %84 = vector.shape_cast %83 : vector<77xf32> to vector<77x1xf32>
    %cst_48 = arith.constant 3.200000e+01 : f32
    %85 = vector.broadcast %cst_48 : f32 to vector<77x1xf32>
    %86 = arith.divf %84, %85 : vector<77x1xf32>
    %87 = vector.broadcast %79 : vector<77x1xf32> to vector<77x32xf32>
    %88 = arith.subf %21, %87 : vector<77x32xf32>
    %cst_49 = arith.constant 9.99999974E-6 : f32
    %89 = vector.broadcast %cst_49 : f32 to vector<77x1xf32>
    %90 = arith.addf %86, %89 : vector<77x1xf32>
    %91 = math.rsqrt %90 : vector<77x1xf32>
    %92 = vector.broadcast %91 : vector<77x1xf32> to vector<77x32xf32>
    %93 = arith.mulf %88, %92 : vector<77x32xf32>
    %94 = vector.broadcast %74 : vector<1x32xf32> to vector<77x32xf32>
    %95 = arith.mulf %93, %94 : vector<77x32xf32>
    %96 = vector.broadcast %75 : vector<1x32xf32> to vector<77x32xf32>
    %97 = arith.addf %95, %96 : vector<77x32xf32>
    %c0_50 = arith.constant 0 : index
    %c0_51 = arith.constant 0 : index
    %98 = vector.load %arg18[%c0_50, %c0_51] : memref<32x32xf32, #tpu.memory_space<vmem>>, vector<32x32xf32>
    %cst_52 = arith.constant dense<0.000000e+00> : vector<51x32xf32>
    %99 = tpu.matmul %49, %98, %cst_52 {dimension_numbers = #tpu.dot_dimension_numbers<[1], [0], [0], [1], [0, 0, 1, 1], [], []>} : vector<51x32xf32>, vector<32x32xf32>, vector<51x32xf32> -> vector<51x32xf32>
    %c0_53 = arith.constant 0 : index
    %c0_54 = arith.constant 0 : index
    %100 = vector.load %arg19[%c0_53, %c0_54] : memref<1x32xf32, #tpu.memory_space<vmem>>, vector<1x32xf32>
    %101 = vector.broadcast %100 : vector<1x32xf32> to vector<51x32xf32>
    %102 = arith.addf %99, %101 : vector<51x32xf32>
    %c0_55 = arith.constant 0 : index
    %c0_56 = arith.constant 0 : index
    %103 = vector.load %arg20[%c0_55, %c0_56] : memref<32x32xf32, #tpu.memory_space<vmem>>, vector<32x32xf32>
    %cst_57 = arith.constant dense<0.000000e+00> : vector<77x32xf32>
    %104 = tpu.matmul %73, %103, %cst_57 {dimension_numbers = #tpu.dot_dimension_numbers<[1], [0], [0], [1], [0, 0, 1, 1], [], []>} : vector<77x32xf32>, vector<32x32xf32>, vector<77x32xf32> -> vector<77x32xf32>
    %c0_58 = arith.constant 0 : index
    %c0_59 = arith.constant 0 : index
    %105 = vector.load %arg21[%c0_58, %c0_59] : memref<1x32xf32, #tpu.memory_space<vmem>>, vector<1x32xf32>
    %106 = vector.broadcast %105 : vector<1x32xf32> to vector<77x32xf32>
    %107 = arith.addf %104, %106 : vector<77x32xf32>
    %c0_60 = arith.constant 0 : index
    %c0_61 = arith.constant 0 : index
    %108 = vector.load %arg22[%c0_60, %c0_61] : memref<32x32xf32, #tpu.memory_space<vmem>>, vector<32x32xf32>
    %cst_62 = arith.constant dense<0.000000e+00> : vector<77x32xf32>
    %109 = tpu.matmul %97, %108, %cst_62 {dimension_numbers = #tpu.dot_dimension_numbers<[1], [0], [0], [1], [0, 0, 1, 1], [], []>} : vector<77x32xf32>, vector<32x32xf32>, vector<77x32xf32> -> vector<77x32xf32>
    %c0_63 = arith.constant 0 : index
    %c0_64 = arith.constant 0 : index
    %110 = vector.load %arg23[%c0_63, %c0_64] : memref<1x32xf32, #tpu.memory_space<vmem>>, vector<1x32xf32>
    %111 = vector.broadcast %110 : vector<1x32xf32> to vector<77x32xf32>
    %112 = arith.addf %109, %111 : vector<77x32xf32>
    %c0_65 = arith.constant 0 : index
    %c0_66 = arith.constant 0 : index
    %113 = vector.load %arg24[%c0_65, %c0_66] : memref<32x32xf32, #tpu.memory_space<vmem>>, vector<32x32xf32>
    %cst_67 = arith.constant 0.000000e+00 : f32
    %114 = vector.broadcast %cst_67 : f32 to vector<51x32xf32>
    %115 = vector.extract_strided_slice %102 {offsets = [0, 0], sizes = [51, 4], strides = [1, 1]} : vector<51x32xf32> to vector<51x4xf32>
    %116 = vector.extract_strided_slice %107 {offsets = [0, 0], sizes = [77, 4], strides = [1, 1]} : vector<77x32xf32> to vector<77x4xf32>
    %117 = vector.extract_strided_slice %112 {offsets = [0, 0], sizes = [77, 4], strides = [1, 1]} : vector<77x32xf32> to vector<77x4xf32>
    %cst_68 = arith.constant dense<0.000000e+00> : vector<51x77xf32>
    %118 = tpu.matmul %115, %116, %cst_68 {dimension_numbers = #tpu.dot_dimension_numbers<[1], [1], [0], [0], [0, 0, 1, 0], [], []>} : vector<51x4xf32>, vector<77x4xf32>, vector<51x77xf32> -> vector<51x77xf32>
    %cst_69 = arith.constant 5.000000e-01 : f32
    %119 = vector.broadcast %cst_69 : f32 to vector<51x77xf32>
    %120 = arith.mulf %118, %119 : vector<51x77xf32>
    %cst_70 = arith.constant dense<0xFF800000> : vector<51xf32>
    %121 = vector.multi_reduction <maximumf>, %120, %cst_70 [1] : vector<51x77xf32> to vector<51xf32>
    %122 = vector.shape_cast %121 : vector<51xf32> to vector<51x1xf32>
    %123 = vector.broadcast %122 : vector<51x1xf32> to vector<51x77xf32>
    %124 = arith.subf %120, %123 : vector<51x77xf32>
    %125 = math.exp %124 : vector<51x77xf32>
    %cst_71 = arith.constant dense<0.000000e+00> : vector<51xf32>
    %126 = vector.multi_reduction <add>, %125, %cst_71 [1] : vector<51x77xf32> to vector<51xf32>
    %127 = vector.shape_cast %126 : vector<51xf32> to vector<51x1xf32>
    %128 = vector.broadcast %127 : vector<51x1xf32> to vector<51x77xf32>
    %129 = arith.divf %125, %128 : vector<51x77xf32>
    %cst_72 = arith.constant dense<0.000000e+00> : vector<51x4xf32>
    %130 = tpu.matmul %129, %117, %cst_72 {dimension_numbers = #tpu.dot_dimension_numbers<[1], [0], [0], [1], [0, 0, 1, 1], [], []>} : vector<51x77xf32>, vector<77x4xf32>, vector<51x4xf32> -> vector<51x4xf32>
    %131 = vector.extract_strided_slice %113 {offsets = [0, 0], sizes = [4, 32], strides = [1, 1]} : vector<32x32xf32> to vector<4x32xf32>
    %cst_73 = arith.constant dense<0.000000e+00> : vector<51x32xf32>
    %132 = tpu.matmul %130, %131, %cst_73 {dimension_numbers = #tpu.dot_dimension_numbers<[1], [0], [0], [1], [0, 0, 1, 1], [], []>} : vector<51x4xf32>, vector<4x32xf32>, vector<51x32xf32> -> vector<51x32xf32>
    %133 = arith.addf %114, %132 : vector<51x32xf32>
    %134 = vector.extract_strided_slice %102 {offsets = [0, 4], sizes = [51, 4], strides = [1, 1]} : vector<51x32xf32> to vector<51x4xf32>
    %135 = vector.extract_strided_slice %107 {offsets = [0, 4], sizes = [77, 4], strides = [1, 1]} : vector<77x32xf32> to vector<77x4xf32>
    %136 = vector.extract_strided_slice %112 {offsets = [0, 4], sizes = [77, 4], strides = [1, 1]} : vector<77x32xf32> to vector<77x4xf32>
    %cst_74 = arith.constant dense<0.000000e+00> : vector<51x77xf32>
    %137 = tpu.matmul %134, %135, %cst_74 {dimension_numbers = #tpu.dot_dimension_numbers<[1], [1], [0], [0], [0, 0, 1, 0], [], []>} : vector<51x4xf32>, vector<77x4xf32>, vector<51x77xf32> -> vector<51x77xf32>
    %cst_75 = arith.constant 5.000000e-01 : f32
    %138 = vector.broadcast %cst_75 : f32 to vector<51x77xf32>
    %139 = arith.mulf %137, %138 : vector<51x77xf32>
    %cst_76 = arith.constant dense<0xFF800000> : vector<51xf32>
    %140 = vector.multi_reduction <maximumf>, %139, %cst_76 [1] : vector<51x77xf32> to vector<51xf32>
    %141 = vector.shape_cast %140 : vector<51xf32> to vector<51x1xf32>
    %142 = vector.broadcast %141 : vector<51x1xf32> to vector<51x77xf32>
    %143 = arith.subf %139, %142 : vector<51x77xf32>
    %144 = math.exp %143 : vector<51x77xf32>
    %cst_77 = arith.constant dense<0.000000e+00> : vector<51xf32>
    %145 = vector.multi_reduction <add>, %144, %cst_77 [1] : vector<51x77xf32> to vector<51xf32>
    %146 = vector.shape_cast %145 : vector<51xf32> to vector<51x1xf32>
    %147 = vector.broadcast %146 : vector<51x1xf32> to vector<51x77xf32>
    %148 = arith.divf %144, %147 : vector<51x77xf32>
    %cst_78 = arith.constant dense<0.000000e+00> : vector<51x4xf32>
    %149 = tpu.matmul %148, %136, %cst_78 {dimension_numbers = #tpu.dot_dimension_numbers<[1], [0], [0], [1], [0, 0, 1, 1], [], []>} : vector<51x77xf32>, vector<77x4xf32>, vector<51x4xf32> -> vector<51x4xf32>
    %150 = vector.extract_strided_slice %113 {offsets = [4, 0], sizes = [4, 32], strides = [1, 1]} : vector<32x32xf32> to vector<4x32xf32>
    %cst_79 = arith.constant dense<0.000000e+00> : vector<51x32xf32>
    %151 = tpu.matmul %149, %150, %cst_79 {dimension_numbers = #tpu.dot_dimension_numbers<[1], [0], [0], [1], [0, 0, 1, 1], [], []>} : vector<51x4xf32>, vector<4x32xf32>, vector<51x32xf32> -> vector<51x32xf32>
    %152 = arith.addf %133, %151 : vector<51x32xf32>
    %153 = vector.extract_strided_slice %102 {offsets = [0, 8], sizes = [51, 4], strides = [1, 1]} : vector<51x32xf32> to vector<51x4xf32>
    %154 = vector.extract_strided_slice %107 {offsets = [0, 8], sizes = [77, 4], strides = [1, 1]} : vector<77x32xf32> to vector<77x4xf32>
    %155 = vector.extract_strided_slice %112 {offsets = [0, 8], sizes = [77, 4], strides = [1, 1]} : vector<77x32xf32> to vector<77x4xf32>
    %cst_80 = arith.constant dense<0.000000e+00> : vector<51x77xf32>
    %156 = tpu.matmul %153, %154, %cst_80 {dimension_numbers = #tpu.dot_dimension_numbers<[1], [1], [0], [0], [0, 0, 1, 0], [], []>} : vector<51x4xf32>, vector<77x4xf32>, vector<51x77xf32> -> vector<51x77xf32>
    %cst_81 = arith.constant 5.000000e-01 : f32
    %157 = vector.broadcast %cst_81 : f32 to vector<51x77xf32>
    %158 = arith.mulf %156, %157 : vector<51x77xf32>
    %cst_82 = arith.constant dense<0xFF800000> : vector<51xf32>
    %159 = vector.multi_reduction <maximumf>, %158, %cst_82 [1] : vector<51x77xf32> to vector<51xf32>
    %160 = vector.shape_cast %159 : vector<51xf32> to vector<51x1xf32>
    %161 = vector.broadcast %160 : vector<51x1xf32> to vector<51x77xf32>
    %162 = arith.subf %158, %161 : vector<51x77xf32>
    %163 = math.exp %162 : vector<51x77xf32>
    %cst_83 = arith.constant dense<0.000000e+00> : vector<51xf32>
    %164 = vector.multi_reduction <add>, %163, %cst_83 [1] : vector<51x77xf32> to vector<51xf32>
    %165 = vector.shape_cast %164 : vector<51xf32> to vector<51x1xf32>
    %166 = vector.broadcast %165 : vector<51x1xf32> to vector<51x77xf32>
    %167 = arith.divf %163, %166 : vector<51x77xf32>
    %cst_84 = arith.constant dense<0.000000e+00> : vector<51x4xf32>
    %168 = tpu.matmul %167, %155, %cst_84 {dimension_numbers = #tpu.dot_dimension_numbers<[1], [0], [0], [1], [0, 0, 1, 1], [], []>} : vector<51x77xf32>, vector<77x4xf32>, vector<51x4xf32> -> vector<51x4xf32>
    %169 = vector.extract_strided_slice %113 {offsets = [8, 0], sizes = [4, 32], strides = [1, 1]} : vector<32x32xf32> to vector<4x32xf32>
    %cst_85 = arith.constant dense<0.000000e+00> : vector<51x32xf32>
    %170 = tpu.matmul %168, %169, %cst_85 {dimension_numbers = #tpu.dot_dimension_numbers<[1], [0], [0], [1], [0, 0, 1, 1], [], []>} : vector<51x4xf32>, vector<4x32xf32>, vector<51x32xf32> -> vector<51x32xf32>
    %171 = arith.addf %152, %170 : vector<51x32xf32>
    %172 = vector.extract_strided_slice %102 {offsets = [0, 12], sizes = [51, 4], strides = [1, 1]} : vector<51x32xf32> to vector<51x4xf32>
    %173 = vector.extract_strided_slice %107 {offsets = [0, 12], sizes = [77, 4], strides = [1, 1]} : vector<77x32xf32> to vector<77x4xf32>
    %174 = vector.extract_strided_slice %112 {offsets = [0, 12], sizes = [77, 4], strides = [1, 1]} : vector<77x32xf32> to vector<77x4xf32>
    %cst_86 = arith.constant dense<0.000000e+00> : vector<51x77xf32>
    %175 = tpu.matmul %172, %173, %cst_86 {dimension_numbers = #tpu.dot_dimension_numbers<[1], [1], [0], [0], [0, 0, 1, 0], [], []>} : vector<51x4xf32>, vector<77x4xf32>, vector<51x77xf32> -> vector<51x77xf32>
    %cst_87 = arith.constant 5.000000e-01 : f32
    %176 = vector.broadcast %cst_87 : f32 to vector<51x77xf32>
    %177 = arith.mulf %175, %176 : vector<51x77xf32>
    %cst_88 = arith.constant dense<0xFF800000> : vector<51xf32>
    %178 = vector.multi_reduction <maximumf>, %177, %cst_88 [1] : vector<51x77xf32> to vector<51xf32>
    %179 = vector.shape_cast %178 : vector<51xf32> to vector<51x1xf32>
    %180 = vector.broadcast %179 : vector<51x1xf32> to vector<51x77xf32>
    %181 = arith.subf %177, %180 : vector<51x77xf32>
    %182 = math.exp %181 : vector<51x77xf32>
    %cst_89 = arith.constant dense<0.000000e+00> : vector<51xf32>
    %183 = vector.multi_reduction <add>, %182, %cst_89 [1] : vector<51x77xf32> to vector<51xf32>
    %184 = vector.shape_cast %183 : vector<51xf32> to vector<51x1xf32>
    %185 = vector.broadcast %184 : vector<51x1xf32> to vector<51x77xf32>
    %186 = arith.divf %182, %185 : vector<51x77xf32>
    %cst_90 = arith.constant dense<0.000000e+00> : vector<51x4xf32>
    %187 = tpu.matmul %186, %174, %cst_90 {dimension_numbers = #tpu.dot_dimension_numbers<[1], [0], [0], [1], [0, 0, 1, 1], [], []>} : vector<51x77xf32>, vector<77x4xf32>, vector<51x4xf32> -> vector<51x4xf32>
    %188 = vector.extract_strided_slice %113 {offsets = [12, 0], sizes = [4, 32], strides = [1, 1]} : vector<32x32xf32> to vector<4x32xf32>
    %cst_91 = arith.constant dense<0.000000e+00> : vector<51x32xf32>
    %189 = tpu.matmul %187, %188, %cst_91 {dimension_numbers = #tpu.dot_dimension_numbers<[1], [0], [0], [1], [0, 0, 1, 1], [], []>} : vector<51x4xf32>, vector<4x32xf32>, vector<51x32xf32> -> vector<51x32xf32>
    %190 = arith.addf %171, %189 : vector<51x32xf32>
    %191 = vector.extract_strided_slice %102 {offsets = [0, 16], sizes = [51, 4], strides = [1, 1]} : vector<51x32xf32> to vector<51x4xf32>
    %192 = vector.extract_strided_slice %107 {offsets = [0, 16], sizes = [77, 4], strides = [1, 1]} : vector<77x32xf32> to vector<77x4xf32>
    %193 = vector.extract_strided_slice %112 {offsets = [0, 16], sizes = [77, 4], strides = [1, 1]} : vector<77x32xf32> to vector<77x4xf32>
    %cst_92 = arith.constant dense<0.000000e+00> : vector<51x77xf32>
    %194 = tpu.matmul %191, %192, %cst_92 {dimension_numbers = #tpu.dot_dimension_numbers<[1], [1], [0], [0], [0, 0, 1, 0], [], []>} : vector<51x4xf32>, vector<77x4xf32>, vector<51x77xf32> -> vector<51x77xf32>
    %cst_93 = arith.constant 5.000000e-01 : f32
    %195 = vector.broadcast %cst_93 : f32 to vector<51x77xf32>
    %196 = arith.mulf %194, %195 : vector<51x77xf32>
    %cst_94 = arith.constant dense<0xFF800000> : vector<51xf32>
    %197 = vector.multi_reduction <maximumf>, %196, %cst_94 [1] : vector<51x77xf32> to vector<51xf32>
    %198 = vector.shape_cast %197 : vector<51xf32> to vector<51x1xf32>
    %199 = vector.broadcast %198 : vector<51x1xf32> to vector<51x77xf32>
    %200 = arith.subf %196, %199 : vector<51x77xf32>
    %201 = math.exp %200 : vector<51x77xf32>
    %cst_95 = arith.constant dense<0.000000e+00> : vector<51xf32>
    %202 = vector.multi_reduction <add>, %201, %cst_95 [1] : vector<51x77xf32> to vector<51xf32>
    %203 = vector.shape_cast %202 : vector<51xf32> to vector<51x1xf32>
    %204 = vector.broadcast %203 : vector<51x1xf32> to vector<51x77xf32>
    %205 = arith.divf %201, %204 : vector<51x77xf32>
    %cst_96 = arith.constant dense<0.000000e+00> : vector<51x4xf32>
    %206 = tpu.matmul %205, %193, %cst_96 {dimension_numbers = #tpu.dot_dimension_numbers<[1], [0], [0], [1], [0, 0, 1, 1], [], []>} : vector<51x77xf32>, vector<77x4xf32>, vector<51x4xf32> -> vector<51x4xf32>
    %207 = vector.extract_strided_slice %113 {offsets = [16, 0], sizes = [4, 32], strides = [1, 1]} : vector<32x32xf32> to vector<4x32xf32>
    %cst_97 = arith.constant dense<0.000000e+00> : vector<51x32xf32>
    %208 = tpu.matmul %206, %207, %cst_97 {dimension_numbers = #tpu.dot_dimension_numbers<[1], [0], [0], [1], [0, 0, 1, 1], [], []>} : vector<51x4xf32>, vector<4x32xf32>, vector<51x32xf32> -> vector<51x32xf32>
    %209 = arith.addf %190, %208 : vector<51x32xf32>
    %210 = vector.extract_strided_slice %102 {offsets = [0, 20], sizes = [51, 4], strides = [1, 1]} : vector<51x32xf32> to vector<51x4xf32>
    %211 = vector.extract_strided_slice %107 {offsets = [0, 20], sizes = [77, 4], strides = [1, 1]} : vector<77x32xf32> to vector<77x4xf32>
    %212 = vector.extract_strided_slice %112 {offsets = [0, 20], sizes = [77, 4], strides = [1, 1]} : vector<77x32xf32> to vector<77x4xf32>
    %cst_98 = arith.constant dense<0.000000e+00> : vector<51x77xf32>
    %213 = tpu.matmul %210, %211, %cst_98 {dimension_numbers = #tpu.dot_dimension_numbers<[1], [1], [0], [0], [0, 0, 1, 0], [], []>} : vector<51x4xf32>, vector<77x4xf32>, vector<51x77xf32> -> vector<51x77xf32>
    %cst_99 = arith.constant 5.000000e-01 : f32
    %214 = vector.broadcast %cst_99 : f32 to vector<51x77xf32>
    %215 = arith.mulf %213, %214 : vector<51x77xf32>
    %cst_100 = arith.constant dense<0xFF800000> : vector<51xf32>
    %216 = vector.multi_reduction <maximumf>, %215, %cst_100 [1] : vector<51x77xf32> to vector<51xf32>
    %217 = vector.shape_cast %216 : vector<51xf32> to vector<51x1xf32>
    %218 = vector.broadcast %217 : vector<51x1xf32> to vector<51x77xf32>
    %219 = arith.subf %215, %218 : vector<51x77xf32>
    %220 = math.exp %219 : vector<51x77xf32>
    %cst_101 = arith.constant dense<0.000000e+00> : vector<51xf32>
    %221 = vector.multi_reduction <add>, %220, %cst_101 [1] : vector<51x77xf32> to vector<51xf32>
    %222 = vector.shape_cast %221 : vector<51xf32> to vector<51x1xf32>
    %223 = vector.broadcast %222 : vector<51x1xf32> to vector<51x77xf32>
    %224 = arith.divf %220, %223 : vector<51x77xf32>
    %cst_102 = arith.constant dense<0.000000e+00> : vector<51x4xf32>
    %225 = tpu.matmul %224, %212, %cst_102 {dimension_numbers = #tpu.dot_dimension_numbers<[1], [0], [0], [1], [0, 0, 1, 1], [], []>} : vector<51x77xf32>, vector<77x4xf32>, vector<51x4xf32> -> vector<51x4xf32>
    %226 = vector.extract_strided_slice %113 {offsets = [20, 0], sizes = [4, 32], strides = [1, 1]} : vector<32x32xf32> to vector<4x32xf32>
    %cst_103 = arith.constant dense<0.000000e+00> : vector<51x32xf32>
    %227 = tpu.matmul %225, %226, %cst_103 {dimension_numbers = #tpu.dot_dimension_numbers<[1], [0], [0], [1], [0, 0, 1, 1], [], []>} : vector<51x4xf32>, vector<4x32xf32>, vector<51x32xf32> -> vector<51x32xf32>
    %228 = arith.addf %209, %227 : vector<51x32xf32>
    %229 = vector.extract_strided_slice %102 {offsets = [0, 24], sizes = [51, 4], strides = [1, 1]} : vector<51x32xf32> to vector<51x4xf32>
    %230 = vector.extract_strided_slice %107 {offsets = [0, 24], sizes = [77, 4], strides = [1, 1]} : vector<77x32xf32> to vector<77x4xf32>
    %231 = vector.extract_strided_slice %112 {offsets = [0, 24], sizes = [77, 4], strides = [1, 1]} : vector<77x32xf32> to vector<77x4xf32>
    %cst_104 = arith.constant dense<0.000000e+00> : vector<51x77xf32>
    %232 = tpu.matmul %229, %230, %cst_104 {dimension_numbers = #tpu.dot_dimension_numbers<[1], [1], [0], [0], [0, 0, 1, 0], [], []>} : vector<51x4xf32>, vector<77x4xf32>, vector<51x77xf32> -> vector<51x77xf32>
    %cst_105 = arith.constant 5.000000e-01 : f32
    %233 = vector.broadcast %cst_105 : f32 to vector<51x77xf32>
    %234 = arith.mulf %232, %233 : vector<51x77xf32>
    %cst_106 = arith.constant dense<0xFF800000> : vector<51xf32>
    %235 = vector.multi_reduction <maximumf>, %234, %cst_106 [1] : vector<51x77xf32> to vector<51xf32>
    %236 = vector.shape_cast %235 : vector<51xf32> to vector<51x1xf32>
    %237 = vector.broadcast %236 : vector<51x1xf32> to vector<51x77xf32>
    %238 = arith.subf %234, %237 : vector<51x77xf32>
    %239 = math.exp %238 : vector<51x77xf32>
    %cst_107 = arith.constant dense<0.000000e+00> : vector<51xf32>
    %240 = vector.multi_reduction <add>, %239, %cst_107 [1] : vector<51x77xf32> to vector<51xf32>
    %241 = vector.shape_cast %240 : vector<51xf32> to vector<51x1xf32>
    %242 = vector.broadcast %241 : vector<51x1xf32> to vector<51x77xf32>
    %243 = arith.divf %239, %242 : vector<51x77xf32>
    %cst_108 = arith.constant dense<0.000000e+00> : vector<51x4xf32>
    %244 = tpu.matmul %243, %231, %cst_108 {dimension_numbers = #tpu.dot_dimension_numbers<[1], [0], [0], [1], [0, 0, 1, 1], [], []>} : vector<51x77xf32>, vector<77x4xf32>, vector<51x4xf32> -> vector<51x4xf32>
    %245 = vector.extract_strided_slice %113 {offsets = [24, 0], sizes = [4, 32], strides = [1, 1]} : vector<32x32xf32> to vector<4x32xf32>
    %cst_109 = arith.constant dense<0.000000e+00> : vector<51x32xf32>
    %246 = tpu.matmul %244, %245, %cst_109 {dimension_numbers = #tpu.dot_dimension_numbers<[1], [0], [0], [1], [0, 0, 1, 1], [], []>} : vector<51x4xf32>, vector<4x32xf32>, vector<51x32xf32> -> vector<51x32xf32>
    %247 = arith.addf %228, %246 : vector<51x32xf32>
    %248 = vector.extract_strided_slice %102 {offsets = [0, 28], sizes = [51, 4], strides = [1, 1]} : vector<51x32xf32> to vector<51x4xf32>
    %249 = vector.extract_strided_slice %107 {offsets = [0, 28], sizes = [77, 4], strides = [1, 1]} : vector<77x32xf32> to vector<77x4xf32>
    %250 = vector.extract_strided_slice %112 {offsets = [0, 28], sizes = [77, 4], strides = [1, 1]} : vector<77x32xf32> to vector<77x4xf32>
    %cst_110 = arith.constant dense<0.000000e+00> : vector<51x77xf32>
    %251 = tpu.matmul %248, %249, %cst_110 {dimension_numbers = #tpu.dot_dimension_numbers<[1], [1], [0], [0], [0, 0, 1, 0], [], []>} : vector<51x4xf32>, vector<77x4xf32>, vector<51x77xf32> -> vector<51x77xf32>
    %cst_111 = arith.constant 5.000000e-01 : f32
    %252 = vector.broadcast %cst_111 : f32 to vector<51x77xf32>
    %253 = arith.mulf %251, %252 : vector<51x77xf32>
    %cst_112 = arith.constant dense<0xFF800000> : vector<51xf32>
    %254 = vector.multi_reduction <maximumf>, %253, %cst_112 [1] : vector<51x77xf32> to vector<51xf32>
    %255 = vector.shape_cast %254 : vector<51xf32> to vector<51x1xf32>
    %256 = vector.broadcast %255 : vector<51x1xf32> to vector<51x77xf32>
    %257 = arith.subf %253, %256 : vector<51x77xf32>
    %258 = math.exp %257 : vector<51x77xf32>
    %cst_113 = arith.constant dense<0.000000e+00> : vector<51xf32>
    %259 = vector.multi_reduction <add>, %258, %cst_113 [1] : vector<51x77xf32> to vector<51xf32>
    %260 = vector.shape_cast %259 : vector<51xf32> to vector<51x1xf32>
    %261 = vector.broadcast %260 : vector<51x1xf32> to vector<51x77xf32>
    %262 = arith.divf %258, %261 : vector<51x77xf32>
    %cst_114 = arith.constant dense<0.000000e+00> : vector<51x4xf32>
    %263 = tpu.matmul %262, %250, %cst_114 {dimension_numbers = #tpu.dot_dimension_numbers<[1], [0], [0], [1], [0, 0, 1, 1], [], []>} : vector<51x77xf32>, vector<77x4xf32>, vector<51x4xf32> -> vector<51x4xf32>
    %264 = vector.extract_strided_slice %113 {offsets = [28, 0], sizes = [4, 32], strides = [1, 1]} : vector<32x32xf32> to vector<4x32xf32>
    %cst_115 = arith.constant dense<0.000000e+00> : vector<51x32xf32>
    %265 = tpu.matmul %263, %264, %cst_115 {dimension_numbers = #tpu.dot_dimension_numbers<[1], [0], [0], [1], [0, 0, 1, 1], [], []>} : vector<51x4xf32>, vector<4x32xf32>, vector<51x32xf32> -> vector<51x32xf32>
    %266 = arith.addf %247, %265 : vector<51x32xf32>
    %c0_116 = arith.constant 0 : index
    %c0_117 = arith.constant 0 : index
    %267 = vector.load %arg25[%c0_116, %c0_117] : memref<1x32xf32, #tpu.memory_space<vmem>>, vector<1x32xf32>
    %268 = vector.broadcast %267 : vector<1x32xf32> to vector<51x32xf32>
    %269 = arith.addf %266, %268 : vector<51x32xf32>
    %c0_118 = arith.constant 0 : index
    %c0_119 = arith.constant 0 : index
    %270 = vector.load %arg16[%c0_118, %c0_119] : memref<1x32xf32, #tpu.memory_space<vmem>>, vector<1x32xf32>
    %c0_120 = arith.constant 0 : index
    %c0_121 = arith.constant 0 : index
    %271 = vector.load %arg17[%c0_120, %c0_121] : memref<1x32xf32, #tpu.memory_space<vmem>>, vector<1x32xf32>
    %cst_122 = arith.constant dense<0.000000e+00> : vector<51xf32>
    %272 = vector.multi_reduction <add>, %269, %cst_122 [1] : vector<51x32xf32> to vector<51xf32>
    %273 = vector.shape_cast %272 : vector<51xf32> to vector<51x1xf32>
    %cst_123 = arith.constant 3.200000e+01 : f32
    %274 = vector.broadcast %cst_123 : f32 to vector<51x1xf32>
    %275 = arith.divf %273, %274 : vector<51x1xf32>
    %276 = vector.broadcast %275 : vector<51x1xf32> to vector<51x32xf32>
    %277 = arith.subf %269, %276 : vector<51x32xf32>
    %278 = arith.mulf %277, %277 : vector<51x32xf32>
    %cst_124 = arith.constant dense<0.000000e+00> : vector<51xf32>
    %279 = vector.multi_reduction <add>, %278, %cst_124 [1] : vector<51x32xf32> to vector<51xf32>
    %280 = vector.shape_cast %279 : vector<51xf32> to vector<51x1xf32>
    %cst_125 = arith.constant 3.200000e+01 : f32
    %281 = vector.broadcast %cst_125 : f32 to vector<51x1xf32>
    %282 = arith.divf %280, %281 : vector<51x1xf32>
    %283 = vector.broadcast %275 : vector<51x1xf32> to vector<51x32xf32>
    %284 = arith.subf %269, %283 : vector<51x32xf32>
    %cst_126 = arith.constant 9.99999974E-6 : f32
    %285 = vector.broadcast %cst_126 : f32 to vector<51x1xf32>
    %286 = arith.addf %282, %285 : vector<51x1xf32>
    %287 = math.rsqrt %286 : vector<51x1xf32>
    %288 = vector.broadcast %287 : vector<51x1xf32> to vector<51x32xf32>
    %289 = arith.mulf %284, %288 : vector<51x32xf32>
    %290 = vector.broadcast %270 : vector<1x32xf32> to vector<51x32xf32>
    %291 = arith.mulf %289, %290 : vector<51x32xf32>
    %292 = vector.broadcast %271 : vector<1x32xf32> to vector<51x32xf32>
    %293 = arith.addf %291, %292 : vector<51x32xf32>
    %c0_127 = arith.constant 0 : index
    %c0_128 = arith.constant 0 : index
    %294 = vector.load %arg31[%c0_127, %c0_128] : memref<51x32xf32, #tpu.memory_space<vmem>>, vector<51x32xf32>
    tpu.vector_store %arg31[%c0_127, %c0_128], %293 {strides = array<i32>} : memref<51x32xf32, #tpu.memory_space<vmem>>, vector<51x32xf32>,
    %c0_129 = arith.constant 0 : index
    %c0_130 = arith.constant 0 : index
    %295 = vector.load %arg1[%c0_129, %c0_130] : memref<128x128xbf16, #tpu.memory_space<vmem>>, vector<128x128xbf16>
    %c0_131 = arith.constant 0 : index
    %c0_132 = arith.constant 0 : index
    %296 = vector.load %arg2[%c0_131, %c0_132] : memref<128x16xf32, #tpu.memory_space<vmem>>, vector<128x16xf32>
    %c0_133 = arith.constant 0 : index
    %c0_134 = arith.constant 0 : index
    %297 = vector.load %arg26[%c0_133, %c0_134] : memref<16x32xf32, #tpu.memory_space<vmem>>, vector<16x32xf32>
    %c0_135 = arith.constant 0 : index
    %c0_136 = arith.constant 0 : index
    %298 = vector.load %arg27[%c0_135, %c0_136] : memref<1x32xf32, #tpu.memory_space<vmem>>, vector<1x32xf32>
    %cst_137 = arith.constant dense<0.000000e+00> : vector<128x32xf32>
    %299 = tpu.matmul %296, %297, %cst_137 {dimension_numbers = #tpu.dot_dimension_numbers<[1], [0], [0], [1], [0, 0, 1, 1], [], []>} : vector<128x16xf32>, vector<16x32xf32>, vector<128x32xf32> -> vector<128x32xf32>
    %300 = arith.truncf %299 : vector<128x32xf32> to vector<128x32xbf16>
    %cst_138 = arith.constant dense<0.000000e+00> : vector<128x32xf32>
    %301 = tpu.matmul %295, %300, %cst_138 {dimension_numbers = #tpu.dot_dimension_numbers<[1], [0], [0], [1], [0, 0, 1, 1], [], []>} : vector<128x128xbf16>, vector<128x32xbf16>, vector<128x32xf32> -> vector<128x32xf32>
    %302 = vector.broadcast %298 : vector<1x32xf32> to vector<128x32xf32>
    %303 = arith.addf %301, %302 : vector<128x32xf32>
    %cst_139 = arith.constant 0.000000e+00 : f32
    %304 = vector.broadcast %cst_139 : f32 to vector<128x32xf32>
    %305 = arith.maximumf %303, %304 : vector<128x32xf32>
    %c0_140 = arith.constant 0 : index
    %c0_141 = arith.constant 0 : index
    %306 = vector.load %arg28[%c0_140, %c0_141] : memref<32x32xf32, #tpu.memory_space<vmem>>, vector<32x32xf32>
    %c0_142 = arith.constant 0 : index
    %c0_143 = arith.constant 0 : index
    %307 = vector.load %arg29[%c0_142, %c0_143] : memref<1x32xf32, #tpu.memory_space<vmem>>, vector<1x32xf32>
    %cst_144 = arith.constant dense<0.000000e+00> : vector<128x32xf32>
    %308 = tpu.matmul %305, %306, %cst_144 {dimension_numbers = #tpu.dot_dimension_numbers<[1], [0], [0], [1], [0, 0, 1, 1], [], []>} : vector<128x32xf32>, vector<32x32xf32>, vector<128x32xf32> -> vector<128x32xf32>
    %309 = arith.truncf %308 : vector<128x32xf32> to vector<128x32xbf16>
    %cst_145 = arith.constant dense<0.000000e+00> : vector<128x32xf32>
    %310 = tpu.matmul %295, %309, %cst_145 {dimension_numbers = #tpu.dot_dimension_numbers<[1], [0], [0], [1], [0, 0, 1, 1], [], []>} : vector<128x128xbf16>, vector<128x32xbf16>, vector<128x32xf32> -> vector<128x32xf32>
    %311 = vector.broadcast %307 : vector<1x32xf32> to vector<128x32xf32>
    %312 = arith.addf %310, %311 : vector<128x32xf32>
    %cst_146 = arith.constant 0.000000e+00 : f32
    %313 = vector.broadcast %cst_146 : f32 to vector<128x32xf32>
    %314 = arith.maximumf %312, %313 : vector<128x32xf32>
    %c0_147 = arith.constant 0 : index
    %c0_148 = arith.constant 0 : index
    %315 = vector.load %arg4[%c0_147, %c0_148] : memref<128x51xf32, #tpu.memory_space<vmem>>, vector<128x51xf32>
    %cst_149 = arith.constant dense<0.000000e+00> : vector<51x32xf32>
    %316 = tpu.matmul %315, %314, %cst_149 {dimension_numbers = #tpu.dot_dimension_numbers<[0], [0], [1], [1], [0, 1, 1, 1], [], []>} : vector<128x51xf32>, vector<128x32xf32>, vector<51x32xf32> -> vector<51x32xf32>
    %317 = arith.subf %316, %293 : vector<51x32xf32>
    %318 = arith.mulf %317, %317 : vector<51x32xf32>
    %cst_150 = arith.constant dense<0.000000e+00> : vector<51xf32>
    %319 = vector.multi_reduction <add>, %318, %cst_150 [1] : vector<51x32xf32> to vector<51xf32>
    %320 = vector.shape_cast %319 : vector<51xf32> to vector<51x1xf32>
    %321 = math.sqrt %320 : vector<51x1xf32>
    %cst_151 = arith.constant dense<0.000000e+00> : vector<1xf32>
    %322 = vector.multi_reduction <add>, %321, %cst_151 [0] : vector<51x1xf32> to vector<1xf32>
    %323 = vector.shape_cast %322 : vector<1xf32> to vector<1x1xf32>
    %cst_152 = arith.constant 0.0196078438 : f32
    %324 = vector.broadcast %cst_152 : f32 to vector<1x1xf32>
    %325 = arith.mulf %323, %324 : vector<1x1xf32>
    %c0_153 = arith.constant 0 : index
    %c0_154 = arith.constant 0 : index
    %326 = vector.load %arg32[%c0_153, %c0_154] : memref<1x1xf32, #tpu.memory_space<vmem>>, vector<1x1xf32>
    tpu.vector_store %arg32[%c0_153, %c0_154], %325 {strides = array<i32>} : memref<1x1xf32, #tpu.memory_space<vmem>>, vector<1x1xf32>,
    return
  }
}

</mosaic_0001>

<bundles_post_ra>
// kernel: tpu_custom_call.1
= control target key start
LH: loop header
LB: loop body
LE: loop exit
PB: predicated region body
PF: predicated region fallthrough
CT: control target
= control target key end

     0   :  { %s6492_s6 = smov 1   ;;  %s6493_s10 = smov 2   ;;  %s9214_s0 = inlined_call_operand.smem [shape: u32[33], index: -1, kind: input, shape index: {}] }
   0x1   :  { %s6543_s5 = sld [smem:[%s9214_s0]]   ;;  %s6494_s14 = smov 3  }
   0x2   :  { %s6548_s9 = sld [smem:[%s9214_s0 + %s6492_s6]]   ;;  %s6495_s18 = smov 4  }
   0x3   :  { %s6553_s13 = sld [smem:[%s9214_s0 + %s6493_s10]]   ;;  %s6496_s22 = smov 5  }
   0x4   :  { %s6558_s17 = sld [smem:[%s9214_s0 + %s6494_s14]]   ;;  %s6497_s26 = smov 6  }
   0x5   :  { %s6563_s21 = sld [smem:[%s9214_s0 + %s6495_s18]]   ;;  %s6498_s30 = smov 7  }
   0x6   :  { %s6568_s25 = sld [smem:[%s9214_s0 + %s6496_s22]]   ;;  %s6499_s4 = smov 8  }
   0x7   :  { %s6573_s29 = sld [smem:[%s9214_s0 + %s6497_s26]]   ;;  %s6500_s10 = smov 9  }
   0x8   :  { %9224 = sst [smem:[#allocation5_spill]] %s6548_s9  ;;  %s6501_s15 = smov 10  }
   0x9   :  { %s6578_s3 = sld [smem:[%s9214_s0 + %s6498_s30]]   ;;  %s6502_s20 = smov 11  }
   0xa   :  { %s6583_s8 = sld [smem:[%s9214_s0 + %s6499_s4]]   ;;  %s6503_s26 = smov 12  }
   0xb   :  { %9225 = sst [smem:[#allocation6_spill]] %s6563_s21  ;;  %s6504_s1 = smov 13  }
   0xc   :  { %s6588_s14 = sld [smem:[%s9214_s0 + %s6500_s10]]   ;;  %s6505_s7 = smov 14  }
   0xd   :  { %s6593_s19 = sld [smem:[%s9214_s0 + %s6501_s15]]   ;;  %s6506_s15 = smov 15  }
   0xe   :  { %s6598_s24 = sld [smem:[%s9214_s0 + %s6502_s20]]   ;;  %s6507_s22 = smov 16  }
   0xf   :  { %s6603_s30 = sld [smem:[%s9214_s0 + %s6503_s26]]   ;;  %s6508_s28 = smov 17  }
  0x10   :  { %s6608_s6 = sld [smem:[%s9214_s0 + %s6504_s1]]  }
  0x11   :  { %s6613_s12 = sld [smem:[%s9214_s0 + %s6505_s7]]   ;;  %s6509_s7 = smov 18  }
  0x12   :  { %s6618_s20 = sld [smem:[%s9214_s0 + %s6506_s15]]   ;;  %s6510_s15 = smov 19  }
  0x13   :  { %9226 = sst [smem:[#allocation7_spill]] %s6593_s19 }
  0x14   :  { %9227 = sst [smem:[#allocation8_spill]] %s6598_s24 }
  0x15   :  { %s6623_s27 = sld [smem:[%s9214_s0 + %s6507_s22]]   ;;  %s6511_s22 = smov 20  }
  0x16   :  { %s6628_s4 = sld [smem:[%s9214_s0 + %s6508_s28]]   ;;  %s6512_s28 = smov 21  }
  0x17   :  { %s6633_s21 = sld [smem:[%s9214_s0 + %s6509_s7]]   ;;  %s6513_s7 = smov 22  }
  0x18   :  { %s6638_s9 = sld [smem:[%s9214_s0 + %s6510_s15]]   ;;  %s6514_s15 = smov 23  }
  0x19   :  { %s6653_s24 = sld [smem:[%s9214_s0 + %s6513_s7]]   ;;  %s6517_s7 = smov 26  }
  0x1b   :  { %9228 = sst [smem:[#allocation9_spill]] %s6623_s27 }
  0x1c   :  { %9229 = sst [smem:[#allocation10_spill]] %s6628_s4 }
  0x1d   :  { %9230 = sst [smem:[#allocation11_spill]] %s6633_s21 }
  0x1e   :  { %9231 = sst [smem:[#allocation12_spill]] %s6638_s9 }
  0x1f   :  { %s6643_s27 = sld [smem:[%s9214_s0 + %s6511_s22]]   ;;  %s6515_s22 = smov 24  }
  0x20   :  { %s6648_s4 = sld [smem:[%s9214_s0 + %s6512_s28]]   ;;  %s6516_s28 = smov 25  }
  0x21   :  { %s6658_s9 = sld [smem:[%s9214_s0 + %s6514_s15]]   ;;  %s6518_s15 = smov 27  }
  0x22   :  { %s6663_s19 = sld [smem:[%s9214_s0 + %s6515_s22]]   ;;  %s6519_s22 = smov 28  }
  0x23   :  { %s6673_s21 = sld [smem:[%s9214_s0 + %s6517_s7]]   ;;  %s6521_s7 = smov 30  }
  0x26   :  { %9232 = sst [smem:[#allocation13_spill]] %s6648_s4 }
  0x27   :  { %9233 = sst [smem:[#allocation14_spill]] %s6658_s9 }
  0x28   :  { %9234 = sst [smem:[#allocation15_spill]] %s6663_s19 }
  0x29   :  { %s6668_s4 = sld [smem:[%s9214_s0 + %s6516_s28]]   ;;  %s6520_s28 = smov 29  }
  0x2a   :  { %9236 = sst [smem:[#allocation17_spill]] %s6673_s21 }
  0x2b   :  { %s6678_s9 = sld [smem:[%s9214_s0 + %s6518_s15]]   ;;  %s6522_s15 = smov 31  }
  0x2c   :  { %s6683_s19 = sld [smem:[%s9214_s0 + %s6519_s22]]   ;;  %s6523_s22 = smov 32  }
  0x2d   :  { %s6693_s21 = sld [smem:[%s9214_s0 + %s6521_s7]]  }
  0x2f   :  { %9235 = sst [smem:[#allocation16_spill]] %s6668_s4 }
  0x30   :  { %s6688_s4 = sld [smem:[%s9214_s0 + %s6520_s28]]  }
  0x31   :  { %9237 = sst [smem:[#allocation18_spill]] %s6678_s9 }
  0x32   :  { %9238 = sst [smem:[#allocation19_spill]] %s6683_s19 }
  0x33   :  { %s6698_s9 = sld [smem:[%s9214_s0 + %s6522_s15]]  }
  0x34   :  { %s6703_s19 = sld [smem:[%s9214_s0 + %s6523_s22]]  }
  0x35   :  { %v133_v0 = vld [vmem:[%s6558_s17] sm:$0xff]  ;;  %v134_v1 = vld [vmem:[%s6558_s17 + $0x8] sm:$0xff] }
  0x36   :  { %165 = vxpose.xlu0.b32.start [1/16] (narrow) %v133_v0, 80 }
  0x37   :  { %71 = vsyncpa [#allocation3], 0  ;;  %v135_v2 = vld [vmem:[%s6558_s17 + $0x10] sm:$0xff]  ;;  %v136_v3 = vld [vmem:[%s6558_s17 + $0x18] sm:$0xff]  ;;  %vm257_vm0 = vcmask 130048   ;;  %vm384_vm1 = vcmask 1045504  }
  0x38   :  { %v137_v4 = vld [vmem:[%s6558_s17 + $0x20] sm:$0xff]  ;;  %v138_v5 = vld [vmem:[%s6558_s17 + $0x28] sm:$0xff]  ;;  %v139_v6 = vld [vmem:[%s6558_s17 + $0x30] sm:$0xff]  ;;  %vm385_vm2 = vcmask 1046528   ;;  %v6524_v63 = vmov 65535   ;;  %vm368_vm3 = vcmask 629760  }
  0x39   :  { %v140_v7 = vld [vmem:[%s6558_s17 + $0x38] sm:$0xff]  ;;  %v141_v8 = vld [vmem:[%s6558_s17 + $0x40] sm:$0xff]  ;;  %v142_v9 = vld [vmem:[%s6558_s17 + $0x48] sm:$0xff]  ;;  %v386_v0 = vsel %vm384_vm1, 4294967295, %v6524_v63  ;;  %vm440_vm4 = vcmask 261120   ;;  %vm582_vm5 = vcmask 258048  }
  0x3a   :  { %v143_v10 = vld [vmem:[%s6558_s17 + $0x50] sm:$0xff]  ;;  %v144_v11 = vld [vmem:[%s6558_s17 + $0x58] sm:$0xff]  ;;  %v162_v14 = vld [vmem:[%s6553_s13 + $0x68] sm:$0xff]  ;;  %s9240_s0 = sld [smem:[#allocation11_spill]]  ;;  %s5494_s15 = sshll.u32 %s6703_s19, 4  ;;  %s5495_s15 = int_to_ptr.hbm [resolvable:$true] %s5494_s15 }
  0x3b   :  { %v164_v12 = vld [vmem:[%s6553_s13 + $0x78] sm:$0xff]  ;;  %v163_v13 = vld [vmem:[%s6553_s13 + $0x70] sm:$0xff]  ;;  %v161_v15 = vld [vmem:[%s6553_s13 + $0x60] sm:$0xff]  ;;  %s9280_s28 = sld [smem:[#allocation19_spill]]  ;;  %s6478_s16 = sshra.s32 %s5495_s15, 4  ;;  %s6479_s16 = int_to_ptr.hbm [resolvable:$true] %s6478_s16 }
  0x3c   :  { %197 = vmatpush.msra.mxu0 %v164_v12  ;;  %v145_v16 = vld [vmem:[%s6558_s17 + $0x60] sm:$0xff]  ;;  %v160_v17 = vld [vmem:[%s6553_s13 + $0x58] sm:$0xff]  ;;  %v159_v18 = vld [vmem:[%s6553_s13 + $0x50] sm:$0xff]  ;;  %s9281_s1 = sld [smem:[#allocation18_spill]]  ;;  %s6480_s18 = scalar_lea.hbm %s6479_s16, 1 }
  0x3d   :  { %v158_v19 = vld [vmem:[%s6553_s13 + $0x48] sm:$0xff]  ;;  %v157_v20 = vld [vmem:[%s6553_s13 + $0x40] sm:$0xff]  ;;  %v156_v22 = vld [vmem:[%s6553_s13 + $0x38] sm:$0xff]  ;;  %s9282_s2 = sld [smem:[#allocation16_spill]]  ;;  %p6481_p0 = scmp.ne.s32.totalorder %s6479_s16, %s6480_s18 }
  0x3e   :  { %166 = vxpose.xlu0.b32.cont [2/16] (narrow) %v134_v1, 80  ;;  %198 = vmatpush.msra.mxu0 %v163_v13  ;;  %v146_v21 = vld [vmem:[%s6558_s17 + $0x68] sm:$0xff]  ;;  %v155_v23 = vld [vmem:[%s6553_s13 + $0x30] sm:$0xff]  ;;  %v153_v25 = vld [vmem:[%s6553_s13 + $0x20] sm:$0xff]  ;;  %s9309_s7 = sld [smem:[#allocation9_spill]]  ;;  %s6482_s22 = scalar_lea.hbm %s6703_s19, 1 }
  0x3f   :  { %v154_v24 = vld [vmem:[%s6553_s13 + $0x28] sm:$0xff]  ;;  %v147_v26 = vld [vmem:[%s6558_s17 + $0x70] sm:$0xff]  ;;  %v152_v27 = vld [vmem:[%s6553_s13 + $0x18] sm:$0xff]  ;;  %s9310_s10 = sld [smem:[#allocation10_spill]]  ;;  %p6483_p1 = scmp.lt.s32.totalorder %s6479_s16, %s6703_s19 }
  0x40   :  { %199 = vmatpush.msra.mxu0 %v162_v14  ;;  %v151_v28 = vld [vmem:[%s6553_s13 + $0x10] sm:$0xff]  ;;  %v150_v29 = vld [vmem:[%s6553_s13 + $0x8] sm:$0xff]  ;;  %v149_v30 = vld [vmem:[%s6553_s13] sm:$0xff]  ;;  %s9311_s11 = sld [smem:[#allocation6_spill]]  ;;  %p6484_p2 = scmp.lt.s32.totalorder %s6482_s22, %s6480_s18 }
  0x41   :  { %v148_v31 = vld [vmem:[%s6558_s17 + $0x78] sm:$0xff]  ;;  %v255_v38 = vld [vmem:[%s6573_s29 + $0x8] sm:$0xff]  ;;  %v254_v43 = vld [vmem:[%s6573_s29] sm:$0xff]  ;;  %s9242_s17 = sld [smem:[#allocation14_spill]] }
  0x42   :  { %200 = vmatpush.msra.mxu0 %v161_v15  ;;  %302 = vmatpush.msra.mxu1 %v255_v38  ;;  %v438_v12 = vld [vmem:[%s6583_s8 + $0x18] sm:$0xff]  ;;  %v5567_v14 = vld [vmem:[%s6543_s5 + $0x20] sm:$0xf]  ;;  %v5948_v15 = vld [vmem:[%s6543_s5 + $0x20] sm:$0x70]  ;;  %s9244_s29 = sld [smem:[#allocation8_spill]]  ;;  %p6485_p3 = por %p6484_p2, %p6483_p1 }
  0x43   :  { %483 = vmatpush.msra.mxu3 %v438_v12  ;;  %v6769_v13 = vld [vmem:[%s6543_s5 + $0x18] sm:$0xff] }
  0x44   :  { %201 = vmatpush.msra.mxu0 %v160_v17  ;;  %303 = vmatpush.msra.mxu1 %v254_v43  ;;  %v437_v17 = vld [vmem:[%s6583_s8 + $0x10] sm:$0xff]  ;;  %p6486_p4 = pnand %p6485_p3, %p6481_p0 }
  0x45   :  { %484 = vmatpush.msra.mxu3 %v437_v17 }
  0x46   :  { %167 = vxpose.xlu0.b32.cont [3/16] (narrow) %v135_v2, 80  ;;  %202 = vmatpush.msra.mxu0 %v159_v18  ;;  %v6749_v2 = vsel %vm385_vm2, %v386_v0, 0  ;;  %v436_v18 = vld [vmem:[%s6583_s8 + $0x8] sm:$0xff] }
  0x47   :  { %485 = vmatpush.msra.mxu3 %v436_v18 }
  0x48   :  { %203 = vmatpush.msra.mxu0 %v158_v19  ;;  %v435_v19 = vld [vmem:[%s6583_s8] sm:$0xff]  ;;  %s6527_s8 = smov 120  }
  0x49   :  { %486 = vmatpush.msra.mxu3 %v435_v19 }
  0x4a   :  { %204 = vmatpush.msra.mxu0 %v157_v20  ;;  %v6173_v20 = vld [vmem:[%s6578_s3] ss:$0 sm:$0xff]  ;;  %s9245_s3 = sld [smem:[#allocation12_spill]] }
  0x4c   :  { %205 = vmatpush.msra.mxu0 %v156_v22 }
  0x4e   :  { %168 = vxpose.xlu0.b32.cont [4/16] (narrow) %v136_v3, 80  ;;  %206 = vmatpush.msra.mxu0 %v155_v23 }
  0x50   :  { %207 = vmatpush.msra.mxu0 %v154_v24 }
  0x52   :  { %208 = vmatpush.msra.mxu0 %v153_v25 }
  0x54   :  { %209 = vmatpush.msra.mxu0 %v152_v27 }
  0x56   :  { %169 = vxpose.xlu0.b32.cont [5/16] (narrow) %v137_v4, 80  ;;  %210 = vmatpush.msra.mxu0 %v151_v28 }
  0x58   :  { %211 = vmatpush.msra.mxu0 %v150_v29 }
  0x5a   :  { %212 = vmatpush.msra.mxu0 %v149_v30 }
  0x5e   :  { %170 = vxpose.xlu0.b32.cont [6/16] (narrow) %v138_v5, 80 }
  0x66   :  { %171 = vxpose.xlu0.b32.cont [7/16] (narrow) %v139_v6, 80 }
  0x6e   :  { %172 = vxpose.xlu0.b32.cont [8/16] (narrow) %v140_v7, 80 }
  0x76   :  { %173 = vxpose.xlu0.b32.cont [9/16] (narrow) %v141_v8, 80 }
  0x7e   :  { %174 = vxpose.xlu0.b32.cont [10/16] (narrow) %v142_v9, 80  ;;  %v6753_v9 = vld [vmem:[%s6543_s5] sm:$0xff] }
  0x86   :  { %175 = vxpose.xlu0.b32.cont [11/16] (narrow) %v143_v10, 80  ;;  %v6758_v10 = vld [vmem:[%s6543_s5 + $0x8] sm:$0xff] }
  0x8e   :  { %176 = vxpose.xlu0.b32.cont [12/16] (narrow) %v144_v11, 80  ;;  %v6763_v11 = vld [vmem:[%s6543_s5 + $0x10] sm:$0xff]  ;;  %s9241_s5 = sld [smem:[#allocation13_spill]] }
  0x96   :  { %177 = vxpose.xlu0.b32.cont [13/16] (narrow) %v145_v16, 80  ;;  %v6775_v16 = vor.u32 %v5948_v15, %v5567_v14 }
  0x9e   :  { %178 = vxpose.xlu0.b32.cont [14/16] (narrow) %v146_v21, 80 }
  0xa6   :  { %179 = vxpose.xlu0.b32.cont [15/16] (narrow) %v147_v26, 80 }
  0xae   :  { %180 = vxpose.xlu0.b32.end [16/16] (narrow) %v148_v31, 80 }
  0xda   :  { %v181_v32 = vpop.trf.xlu0 }
  0xdb   :  { %213 = vmatmul.f32.vlgmr.msra.gmra.mxu0 %v181_v32 }
  0xe2   :  { %v182_v33 = vpop.trf.xlu0 }
  0xe3   :  { %216 = vmatmul.f32.gmra.mxu0 %v182_v33 }
  0xea   :  { %v183_v34 = vpop.trf.xlu0 }
  0xeb   :  { %219 = vmatmul.f32.gmra.mxu0 %v183_v34 }
  0xf2   :  { %v184_v35 = vpop.trf.xlu0 }
  0xf3   :  { %222 = vmatmul.f32.gmra.mxu0 %v184_v35 }
  0xfa   :  { %v185_v36 = vpop.trf.xlu0 }
  0xfb   :  { %225 = vmatmul.f32.gmra.mxu0 %v185_v36 }
 0x102   :  { %v186_v37 = vpop.trf.xlu0 }
 0x103   :  { %228 = vmatmul.f32.gmra.mxu0 %v186_v37 }
 0x10a   :  { %v187_v39 = vpop.trf.xlu0 }
 0x10b   :  { %231 = vmatmul.f32.gmra.mxu0 %v187_v39 }
 0x112   :  { %v188_v40 = vpop.trf.xlu0 }
 0x113   :  { %234 = vmatmul.f32.gmra.mxu0 %v188_v40 }
 0x11a   :  { %v189_v41 = vpop.trf.xlu0 }
 0x11b   :  { %237 = vmatmul.f32.gmra.mxu0 %v189_v41 }
 0x122   :  { %v190_v42 = vpop.trf.xlu0 }
 0x123   :  { %240 = vmatmul.f32.gmra.mxu0 %v190_v42 }
 0x158   :  { %v214_v44 = vpop.f32.mrf.mxu0 }
 0x159   :  { %5539 = vmatmul.msk.f32.vlgmr.msra.gmra.mxu1 %vm257_vm0, %v214_v44 }
 0x160   :  { %v217_v45 = vpop.f32.mrf.mxu0 }
 0x161   :  { %5540 = vmatmul.msk.f32.gmra.mxu1 %vm257_vm0, %v217_v45 }
 0x168   :  { %v220_v46 = vpop.f32.mrf.mxu0 }
 0x169   :  { %5541 = vmatmul.msk.f32.gmra.mxu1 %vm257_vm0, %v220_v46 }
 0x170   :  { %v223_v47 = vpop.f32.mrf.mxu0 }
 0x171   :  { %5542 = vmatmul.msk.f32.gmra.mxu1 %vm257_vm0, %v223_v47 }
 0x178   :  { %v226_v48 = vpop.f32.mrf.mxu0 }
 0x179   :  { %5543 = vmatmul.msk.f32.gmra.mxu1 %vm257_vm0, %v226_v48 }
 0x180   :  { %v229_v49 = vpop.f32.mrf.mxu0 }
 0x181   :  { %5544 = vmatmul.msk.f32.gmra.mxu1 %vm257_vm0, %v229_v49 }
 0x188   :  { %v232_v50 = vpop.f32.mrf.mxu0 }
 0x189   :  { %5545 = vmatmul.msk.f32.gmra.mxu1 %vm257_vm0, %v232_v50 }
 0x190   :  { %v235_v51 = vpop.f32.mrf.mxu0 }
 0x191   :  { %5546 = vmatmul.msk.f32.gmra.mxu1 %vm257_vm0, %v235_v51 }
 0x198   :  { %v238_v52 = vpop.f32.mrf.mxu0 }
 0x199   :  { %5547 = vmatmul.msk.f32.gmra.mxu1 %vm257_vm0, %v238_v52 }
 0x1a0   :  { %v241_v53 = vpop.f32.mrf.mxu0 }
 0x1a1   :  { %5548 = vmatmul.msk.f32.gmra.mxu1 %vm257_vm0, %v241_v53 }
 0x1d6   :  { %v305_v54 = vpop.f32.mrf.mxu1 }
 0x1de   :  { %v308_v55 = vpop.f32.mrf.mxu1 }
 0x1df   :  { %v335_v8 = vpack.c.bf16 %v308_v55, %v305_v54 }
 0x1e6   :  { %v311_v56 = vpop.f32.mrf.mxu1 }
 0x1ee   :  { %v314_v57 = vpop.f32.mrf.mxu1 }
 0x1ef   :  { %v336_v7 = vpack.c.bf16 %v314_v57, %v311_v56 }
 0x1f6   :  { %v317_v58 = vpop.f32.mrf.mxu1 }
 0x1fe   :  { %v320_v59 = vpop.f32.mrf.mxu1 }
 0x1ff   :  { %v337_v6 = vpack.c.bf16 %v320_v59, %v317_v58 }
 0x206   :  { %v323_v60 = vpop.f32.mrf.mxu1 }
 0x20e   :  { %v326_v61 = vpop.f32.mrf.mxu1 }
 0x20f   :  { %v338_v5 = vpack.c.bf16 %v326_v61, %v323_v60 }
 0x216   :  { %v329_v62 = vpop.f32.mrf.mxu1 }
 0x21e   :  { %v332_v1 = vpop.f32.mrf.mxu1 }
 0x21f   :  { %v339_v3 = vpack.c.bf16 %v332_v1, %v329_v62 }
 0x221   :  { %v389_v4 = vand.u32 %v6749_v2, %v339_v3 }
 0x223   :  { %394 = vmatpush.bf16.msra.mxu2 %v389_v4 }
 0x227   :  { %395 = vmatpush.bf16.msra.mxu2 %v338_v5 }
 0x22b   :  { %396 = vmatpush.bf16.msra.mxu2 %v337_v6 }
 0x22f   :  { %397 = vmatpush.bf16.msra.mxu2 %v336_v7 }
 0x233   :  { %398 = vmatpush.bf16.msra.mxu2 %v335_v8 }
 0x236   :  { %5569 = vmatmul.msk.bf16.vlgmr.msra.gmra.mxu2 %vm368_vm3, %v6753_v9 }
 0x246   :  { %5570 = vmatmul.msk.bf16.gmra.mxu2 %vm368_vm3, %v6758_v10 }
 0x256   :  { %5571 = vmatmul.msk.bf16.gmra.mxu2 %vm368_vm3, %v6763_v11 }
 0x266   :  { %5572 = vmatmul.msk.bf16.gmra.mxu2 %vm368_vm3, %v6769_v13 }
 0x276   :  { %5573 = vmatmul.msk.bf16.gmra.mxu2 %vm368_vm3, %v6775_v16 }
 0x2b9   :  { %v400_v21 = vpop.f32.mrf.mxu2 }
 0x2ba   :  { %v401_v22 = vadd.f32 %v6173_v20, %v400_v21 }
 0x2bc   :  { %v425_v23 = vmax.f32 %v401_v22, 0.0 }
 0x2be   :  { %5574 = vmatmul.msk.f32.vlgmr.msra.gmra.mxu3 %vm440_vm4, %v425_v23 }
 0x2c1   :  { %v402_v24 = vpop.f32.mrf.mxu2 }
 0x2c2   :  { %v403_v25 = vadd.f32 %v6173_v20, %v402_v24 }
 0x2c4   :  { %v426_v26 = vmax.f32 %v403_v25, 0.0 }
 0x2c6   :  { %5575 = vmatmul.msk.f32.gmra.mxu3 %vm440_vm4, %v426_v26 }
 0x2c9   :  { %v405_v27 = vpop.f32.mrf.mxu2 }
 0x2ca   :  { %v406_v28 = vadd.f32 %v6173_v20, %v405_v27 }
 0x2cc   :  { %v427_v29 = vmax.f32 %v406_v28, 0.0 }
 0x2ce   :  { %5576 = vmatmul.msk.f32.gmra.mxu3 %vm440_vm4, %v427_v29 }
 0x2d1   :  { %v407_v30 = vpop.f32.mrf.mxu2 }
 0x2d2   :  { %v408_v31 = vadd.f32 %v6173_v20, %v407_v30 }
 0x2d4   :  { %v428_v32 = vmax.f32 %v408_v31, 0.0 }
 0x2d6   :  { %5577 = vmatmul.msk.f32.gmra.mxu3 %vm440_vm4, %v428_v32 }
 0x2d9   :  { %v410_v33 = vpop.f32.mrf.mxu2 }
 0x2da   :  { %v411_v34 = vadd.f32 %v6173_v20, %v410_v33 }
 0x2dc   :  { %v429_v35 = vmax.f32 %v411_v34, 0.0 }
 0x2de   :  { %5578 = vmatmul.msk.f32.gmra.mxu3 %vm440_vm4, %v429_v35 }
 0x2e1   :  { %v412_v36 = vpop.f32.mrf.mxu2 }
 0x2e2   :  { %v413_v37 = vadd.f32 %v6173_v20, %v412_v36 }
 0x2e4   :  { %v430_v38 = vmax.f32 %v413_v37, 0.0 }
 0x2e6   :  { %5579 = vmatmul.msk.f32.gmra.mxu3 %vm440_vm4, %v430_v38 }
 0x2e9   :  { %v415_v39 = vpop.f32.mrf.mxu2 }
 0x2ea   :  { %v416_v40 = vadd.f32 %v6173_v20, %v415_v39 }
 0x2ec   :  { %v431_v41 = vmax.f32 %v416_v40, 0.0 }
 0x2ee   :  { %5580 = vmatmul.msk.f32.gmra.mxu3 %vm440_vm4, %v431_v41 }
 0x2f1   :  { %v417_v42 = vpop.f32.mrf.mxu2 }
 0x2f2   :  { %v418_v43 = vadd.f32 %v6173_v20, %v417_v42 }
 0x2f4   :  { %v432_v44 = vmax.f32 %v418_v43, 0.0 }
 0x2f6   :  { %5581 = vmatmul.msk.f32.gmra.mxu3 %vm440_vm4, %v432_v44  ;;  %v6525_v44 = vmov 32.0  }
 0x2f7   :  { %6190 = vrcp.f32 %v6525_v44  ;;  %v953_v44 = vld [vmem:[%s6643_s27 + $0x8] sm:$0xff] }
 0x2f9   :  { %v420_v45 = vpop.f32.mrf.mxu2 }
 0x2fa   :  { %v421_v46 = vadd.f32 %v6173_v20, %v420_v45 }
 0x2fc   :  { %v433_v47 = vmax.f32 %v421_v46, 0.0 }
 0x2fd   :  { %v6191_v45 = vpop.eup %6190 }
 0x2fe   :  { %5582 = vmatmul.msk.f32.gmra.mxu3 %vm440_vm4, %v433_v47  ;;  %v594_v46 = vmul.f32 32.0, %v6191_v45  ;;  %vm598_vm6 = vweird.f32 %v6191_v45 }
 0x300   :  { %v595_v47 = vsub.f32 1.0, %v594_v46  ;;  %v1037_v46 = vld [vmem:[%s6653_s24] sm:$0xff] }
 0x301   :  { %v422_v48 = vpop.f32.mrf.mxu2 }
 0x302   :  { %v423_v49 = vadd.f32 %v6173_v20, %v422_v48  ;;  %v596_v48 = vmul.f32 %v6191_v45, %v595_v47 }
 0x304   :  { %v434_v50 = vmax.f32 %v423_v49, 0.0  ;;  %v597_v49 = vadd.f32 %v6191_v45, %v596_v48 }
 0x306   :  { %5583 = vmatmul.msk.f32.gmra.mxu3 %vm440_vm4, %v434_v50  ;;  %v6875_v50 = vsel %vm598_vm6, %v6191_v45, %v597_v49  ;;  %v1038_v45 = vld [vmem:[%s6653_s24 + $0x8] sm:$0xff] }
 0x307   :  { %9239 = vst [vmem:[#allocation20_spill] sm:$0xff] %v6875_v50 }
 0x341   :  { %v488_v51 = vpop.f32.mrf.mxu3 }
 0x349   :  { %v491_v52 = vpop.f32.mrf.mxu3 }
 0x34a   :  { %v518_v3 = vpack.c.bf16 %v491_v52, %v488_v51 }
 0x351   :  { %v494_v53 = vpop.f32.mrf.mxu3 }
 0x359   :  { %v497_v54 = vpop.f32.mrf.mxu3 }
 0x35a   :  { %v519_v1 = vpack.c.bf16 %v497_v54, %v494_v53 }
 0x361   :  { %v500_v55 = vpop.f32.mrf.mxu3 }
 0x369   :  { %v503_v56 = vpop.f32.mrf.mxu3 }
 0x36a   :  { %v520_v0 = vpack.c.bf16 %v503_v56, %v500_v55 }
 0x371   :  { %v506_v57 = vpop.f32.mrf.mxu3 }
 0x379   :  { %v509_v58 = vpop.f32.mrf.mxu3 }
 0x37a   :  { %v521_v63 = vpack.c.bf16 %v509_v58, %v506_v57 }
 0x381   :  { %v512_v59 = vpop.f32.mrf.mxu3 }
 0x389   :  { %v515_v60 = vpop.f32.mrf.mxu3 }
 0x38a   :  { %v522_v61 = vpack.c.bf16 %v515_v60, %v512_v59 }
 0x38c   :  { %v527_v62 = vand.u32 %v522_v61, %v6749_v2  ;;  %v6174_v2 = vld [vmem:[%s6588_s14] ss:$0 sm:$0xff]  ;;  %s9247_s14 = sld [smem:[#allocation15_spill]] }
 0x38e   :  { %532 = vmatpush.bf16.msrb.mxu1 %v527_v62 }
 0x392   :  { %533 = vmatpush.bf16.msrb.mxu1 %v521_v63 }
 0x396   :  { %534 = vmatpush.bf16.msrb.mxu1 %v520_v0 }
 0x39a   :  { %535 = vmatpush.bf16.msrb.mxu1 %v519_v1 }
 0x39e   :  { %536 = vmatpush.bf16.msrb.mxu1 %v518_v3 }
 0x3a1   :  { %5584 = vmatmul.msk.bf16.vlgmr.msrb.gmra.mxu1 %vm368_vm3, %v6753_v9 }
 0x3b1   :  { %5585 = vmatmul.msk.bf16.gmra.mxu1 %vm368_vm3, %v6758_v10 }
 0x3c1   :  { %5586 = vmatmul.msk.bf16.gmra.mxu1 %vm368_vm3, %v6763_v11 }
 0x3d1   :  { %5587 = vmatmul.msk.bf16.gmra.mxu1 %vm368_vm3, %v6769_v13 }
 0x3e1   :  { %5588 = vmatmul.msk.bf16.gmra.mxu1 %vm368_vm3, %v6775_v16 }
 0x41e   :  { %v538_v4 = vpop.f32.mrf.mxu1 }
 0x41f   :  { %v539_v5 = vadd.f32 %v6174_v2, %v538_v4 }
 0x421   :  { %v6805_v6 = vmax.f32 %v539_v5, 0.0 }
 0x423   :  { %573 = vst.msk [vmem:[%s6693_s21] sm:$0xff] %vm440_vm4, %v6805_v6  ;;  %v629_v7 = vsel %vm440_vm4, %v6805_v6, 0.0 }
 0x424   :  { %630 = vadd.xlane.f32.xlu1 %v629_v7 }
 0x426   :  { %v540_v8 = vpop.f32.mrf.mxu1 }
 0x427   :  { %v541_v9 = vadd.f32 %v6174_v2, %v540_v8 }
 0x429   :  { %v6812_v10 = vmax.f32 %v541_v9, 0.0 }
 0x42b   :  { %574 = vst.msk [vmem:[%s6693_s21 + $0x8] sm:$0xff] %vm440_vm4, %v6812_v10  ;;  %v632_v11 = vsel %vm440_vm4, %v6812_v10, 0.0 }
 0x42c   :  { %633 = vadd.xlane.f32.xlu1 %v632_v11 }
 0x42e   :  { %v543_v12 = vpop.f32.mrf.mxu1 }
 0x42f   :  { %v544_v13 = vadd.f32 %v6174_v2, %v543_v12 }
 0x431   :  { %v6819_v14 = vmax.f32 %v544_v13, 0.0 }
 0x433   :  { %575 = vst.msk [vmem:[%s6693_s21 + $0x10] sm:$0xff] %vm440_vm4, %v6819_v14  ;;  %v635_v15 = vsel %vm440_vm4, %v6819_v14, 0.0 }
 0x434   :  { %636 = vadd.xlane.f32.xlu2 %v635_v15 }
 0x436   :  { %v545_v16 = vpop.f32.mrf.mxu1 }
 0x437   :  { %v546_v17 = vadd.f32 %v6174_v2, %v545_v16 }
 0x439   :  { %v6826_v18 = vmax.f32 %v546_v17, 0.0 }
 0x43b   :  { %576 = vst.msk [vmem:[%s6693_s21 + $0x18] sm:$0xff] %vm440_vm4, %v6826_v18  ;;  %v638_v19 = vsel %vm440_vm4, %v6826_v18, 0.0 }
 0x43c   :  { %639 = vadd.xlane.f32.xlu2 %v638_v19 }
 0x43e   :  { %v548_v20 = vpop.f32.mrf.mxu1 }
 0x43f   :  { %v549_v21 = vadd.f32 %v6174_v2, %v548_v20 }
 0x441   :  { %v6833_v22 = vmax.f32 %v549_v21, 0.0 }
 0x443   :  { %577 = vst.msk [vmem:[%s6693_s21 + $0x20] sm:$0xff] %vm440_vm4, %v6833_v22  ;;  %v641_v23 = vsel %vm440_vm4, %v6833_v22, 0.0 }
 0x444   :  { %642 = vadd.xlane.f32.xlu1 %v641_v23 }
 0x446   :  { %v550_v24 = vpop.f32.mrf.mxu1 }
 0x447   :  { %v551_v25 = vadd.f32 %v6174_v2, %v550_v24 }
 0x449   :  { %v6840_v26 = vmax.f32 %v551_v25, 0.0 }
 0x44b   :  { %578 = vst.msk [vmem:[%s6693_s21 + $0x28] sm:$0xff] %vm440_vm4, %v6840_v26  ;;  %v644_v27 = vsel %vm440_vm4, %v6840_v26, 0.0 }
 0x44c   :  { %645 = vadd.xlane.f32.xlu2 %v644_v27 }
 0x44e   :  { %v553_v28 = vpop.f32.mrf.mxu1 }
 0x44f   :  { %v554_v29 = vadd.f32 %v6174_v2, %v553_v28 }
 0x451   :  { %v6847_v30 = vmax.f32 %v554_v29, 0.0  ;;  %v6935_v29 = vld [vmem:[%s6568_s25] ss:$0 sm:$0xff]  ;;  %s9243_s25 = sld [smem:[#allocation7_spill]] }
 0x453   :  { %579 = vst.msk [vmem:[%s6693_s21 + $0x30] sm:$0xff] %vm440_vm4, %v6847_v30  ;;  %v647_v31 = vsel %vm440_vm4, %v6847_v30, 0.0 }
 0x454   :  { %648 = vadd.xlane.f32.xlu2 %v647_v31  ;;  %v590_v31 = vsel %vm440_vm4, %v6935_v29, 0.0 }
 0x456   :  { %v555_v32 = vpop.f32.mrf.mxu1 }
 0x457   :  { %v556_v33 = vadd.f32 %v6174_v2, %v555_v32 }
 0x459   :  { %v6854_v34 = vmax.f32 %v556_v33, 0.0 }
 0x45b   :  { %580 = vst.msk [vmem:[%s6693_s21 + $0x38] sm:$0xff] %vm440_vm4, %v6854_v34  ;;  %v650_v35 = vsel %vm440_vm4, %v6854_v34, 0.0 }
 0x45c   :  { %651 = vadd.xlane.f32.xlu2 %v650_v35 }
 0x45e   :  { %v558_v36 = vpop.f32.mrf.mxu1 }
 0x45f   :  { %v559_v37 = vadd.f32 %v6174_v2, %v558_v36 }
 0x461   :  { %v6861_v38 = vmax.f32 %v559_v37, 0.0 }
 0x463   :  { %581 = vst.msk [vmem:[%s6693_s21 + $0x40] sm:$0xff] %vm440_vm4, %v6861_v38  ;;  %v653_v39 = vsel %vm440_vm4, %v6861_v38, 0.0 }
 0x464   :  { %654 = vadd.xlane.f32.xlu2 %v653_v39  ;;  %v955_v39 = vld [vmem:[%s6643_s27 + $0x18] sm:$0xff] }
 0x465   :  { %1002 = vmatpush.msrb.mxu2 %v955_v39 }
 0x466   :  { %v560_v40 = vpop.f32.mrf.mxu1 }
 0x467   :  { %v561_v41 = vadd.f32 %v6174_v2, %v560_v40  ;;  %v1040_v40 = vld [vmem:[%s6653_s24 + $0x18] sm:$0xff] }
 0x468   :  { %1087 = vmatpush.msrb.mxu0 %v1040_v40 }
 0x469   :  { %v6868_v42 = vmax.f32 %v561_v41, 0.0  ;;  %v954_v41 = vld [vmem:[%s6643_s27 + $0x10] sm:$0xff] }
 0x46a   :  { %1003 = vmatpush.msrb.mxu2 %v954_v41 }
 0x46b   :  { %583 = vst.msk [vmem:[%s6693_s21 + $0x48] sm:$0x1f] %vm582_vm5, %v6868_v42  ;;  %v656_v43 = vsel %vm582_vm5, %v6868_v42, 0.0  ;;  %s6526_s21 = smov 124  }
 0x46c   :  { %657 = vadd.xlane.f32.xlu2 %v656_v43  ;;  %v1039_v43 = vld [vmem:[%s6653_s24 + $0x10] sm:$0xff]  ;;  %1004 = vmatpush.msrb.mxu2 %v953_v44  ;;  %s6528_s24 = smov 112  }
 0x46d   :  { %1088 = vmatpush.msrb.mxu0 %v1039_v43 }
 0x46f   :  { %1089 = vmatpush.msrb.mxu0 %v1038_v45 }
 0x471   :  { %1090 = vmatpush.msrb.mxu0 %v1037_v46 }
 0x497   :  { %v631_v51 = vpop.xlane.xlu1 %630 }
 0x498   :  { %v659_v52 = vmul.f32 %v631_v51, %v6875_v50 }
 0x49a   :  { %v6879_v53 = vsub.f32 %v6805_v6, %v659_v52 }
 0x49c   :  { %v679_v54 = vmul.f32 %v6879_v53, %v6879_v53 }
 0x49e   :  { %v689_v55 = vsel %vm440_vm4, %v679_v54, 0.0 }
 0x49f   :  { %690 = vadd.xlane.f32.xlu1 %v689_v55  ;;  %v634_v56 = vpop.xlane.xlu1 %633 }
 0x4a0   :  { %v660_v57 = vmul.f32 %v634_v56, %v6875_v50 }
 0x4a2   :  { %v6886_v58 = vsub.f32 %v6812_v10, %v660_v57 }
 0x4a4   :  { %v680_v59 = vmul.f32 %v6886_v58, %v6886_v58 }
 0x4a6   :  { %v692_v60 = vsel %vm440_vm4, %v680_v59, 0.0 }
 0x4a7   :  { %v637_v61 = vpop.xlane.xlu2 %636  ;;  %693 = vadd.xlane.f32.xlu1 %v692_v60 }
 0x4a8   :  { %v661_v62 = vmul.f32 %v637_v61, %v6875_v50 }
 0x4aa   :  { %v6893_v63 = vsub.f32 %v6819_v14, %v661_v62 }
 0x4ac   :  { %v681_v0 = vmul.f32 %v6893_v63, %v6893_v63 }
 0x4ae   :  { %v695_v1 = vsel %vm440_vm4, %v681_v0, 0.0 }
 0x4af   :  { %v640_v3 = vpop.xlane.xlu2 %639  ;;  %696 = vadd.xlane.f32.xlu1 %v695_v1 }
 0x4b0   :  { %v662_v2 = vmul.f32 %v640_v3, %v6875_v50 }
 0x4b2   :  { %v6900_v4 = vsub.f32 %v6826_v18, %v662_v2 }
 0x4b4   :  { %v682_v5 = vmul.f32 %v6900_v4, %v6900_v4 }
 0x4b6   :  { %v698_v6 = vsel %vm440_vm4, %v682_v5, 0.0  ;;  %v6964_v5 = vld [vmem:[%s6603_s30] ss:$0 sm:$0xff]  ;;  %s6529_s30 = smov 116  }
 0x4b7   :  { %699 = vadd.xlane.f32.xlu1 %v698_v6  ;;  %v643_v7 = vpop.xlane.xlu1 %642  ;;  %v6967_v6 = vld [vmem:[%s6613_s12] ss:$0 sm:$0xff]  ;;  %s6531_s12 = smov 108  }
 0x4b8   :  { %v663_v8 = vmul.f32 %v643_v7, %v6875_v50 }
 0x4ba   :  { %v6907_v9 = vsub.f32 %v6833_v22, %v663_v8 }
 0x4bc   :  { %v683_v10 = vmul.f32 %v6907_v9, %v6907_v9 }
 0x4be   :  { %v701_v11 = vsel %vm440_vm4, %v683_v10, 0.0 }
 0x4bf   :  { %v646_v12 = vpop.xlane.xlu2 %645  ;;  %702 = vadd.xlane.f32.xlu1 %v701_v11  ;;  %v6971_v11 = vld [vmem:[%s6608_s6] ss:$0 sm:$0xff]  ;;  %s6530_s6 = smov 104  }
 0x4c0   :  { %v664_v13 = vmul.f32 %v646_v12, %v6875_v50  ;;  %v6974_v12 = vld [vmem:[%s6618_s20] ss:$0 sm:$0xff]  ;;  %s6532_s20 = smov 100  }
 0x4c2   :  { %v6914_v14 = vsub.f32 %v6840_v26, %v664_v13 }
 0x4c4   :  { %v684_v15 = vmul.f32 %v6914_v14, %v6914_v14 }
 0x4c6   :  { %v704_v16 = vsel %vm440_vm4, %v684_v15, 0.0 }
 0x4c7   :  { %705 = vadd.xlane.f32.xlu2 %v704_v16  ;;  %v649_v17 = vpop.xlane.xlu2 %648 }
 0x4c8   :  { %v665_v18 = vmul.f32 %v649_v17, %v6875_v50 }
 0x4ca   :  { %v6921_v19 = vsub.f32 %v6847_v30, %v665_v18 }
 0x4cc   :  { %v685_v20 = vmul.f32 %v6921_v19, %v6921_v19 }
 0x4ce   :  { %v707_v21 = vsel %vm440_vm4, %v685_v20, 0.0 }
 0x4cf   :  { %v652_v22 = vpop.xlane.xlu2 %651  ;;  %708 = vadd.xlane.f32.xlu1 %v707_v21 }
 0x4d0   :  { %v666_v23 = vmul.f32 %v652_v22, %v6875_v50 }
 0x4d2   :  { %v6928_v24 = vsub.f32 %v6854_v34, %v666_v23 }
 0x4d4   :  { %v686_v25 = vmul.f32 %v6928_v24, %v6928_v24 }
 0x4d6   :  { %v710_v26 = vsel %vm440_vm4, %v686_v25, 0.0 }
 0x4d7   :  { %711 = vadd.xlane.f32.xlu2 %v710_v26  ;;  %v655_v27 = vpop.xlane.xlu2 %654 }
 0x4d8   :  { %v667_v28 = vmul.f32 %v655_v27, %v6875_v50 }
 0x4da   :  { %v6938_v30 = vsub.f32 %v6861_v38, %v667_v28 }
 0x4dc   :  { %v687_v32 = vmul.f32 %v6938_v30, %v6938_v30 }
 0x4de   :  { %v713_v33 = vsel %vm440_vm4, %v687_v32, 0.0 }
 0x4df   :  { %591 = vadd.xlane.f32.xlu2 %v590_v31  ;;  %v658_v34 = vpop.xlane.xlu2 %657  ;;  %714 = vadd.xlane.f32.xlu1 %v713_v33 }
 0x4e0   :  { %v668_v35 = vmul.f32 %v658_v34, %v6875_v50 }
 0x4e2   :  { %v6947_v36 = vsub.f32 %v6868_v42, %v668_v35  ;;  %v952_v42 = vld [vmem:[%s6643_s27] sm:$0xff]  ;;  %s9277_s27 = sld [smem:[#allocation17_spill]] }
 0x4e3   :  { %1005 = vmatpush.msrb.mxu2 %v952_v42 }
 0x4e4   :  { %v688_v37 = vmul.f32 %v6947_v36, %v6947_v36 }
 0x4e6   :  { %v716_v38 = vsel %vm582_vm5, %v688_v37, 0.0 }
 0x4e7   :  { %717 = vadd.xlane.f32.xlu1 %v716_v38 }
 0x512   :  { %v691_v47 = vpop.xlane.xlu1 %690 }
 0x513   :  { %v719_v48 = vmul.f32 %v691_v47, %v6875_v50 }
 0x515   :  { %v729_v49 = vadd.f32 1e-05, %v719_v48 }
 0x517   :  { %6192 = vrsqrt.f32 %v729_v49  ;;  %vm745_vm8 = vweird.f32 %v729_v49 }
 0x51a   :  { %v694_v51 = vpop.xlane.xlu1 %693 }
 0x51b   :  { %v720_v52 = vmul.f32 %v694_v51, %v6875_v50 }
 0x51d   :  { %v6193_v54 = vpop.eup %6192  ;;  %v730_v55 = vadd.f32 1e-05, %v720_v52 }
 0x51e   :  { %v740_v56 = vmul.f32 %v6193_v54, %v729_v49  ;;  %vm746_vm7 = vweird.f32 %v6193_v54 }
 0x51f   :  { %6194 = vrsqrt.f32 %v730_v55  ;;  %vm747_vm9 = vmor %vm745_vm8, %vm746_vm7  ;;  %vm755_vm11 = vweird.f32 %v730_v55 }
 0x520   :  { %v741_v57 = vmul.f32 %v6193_v54, %v740_v56 }
 0x522   :  { %v742_v59 = vmul.f32 0.5, %v741_v57  ;;  %v697_v60 = vpop.xlane.xlu1 %696 }
 0x523   :  { %v721_v61 = vmul.f32 %v697_v60, %v6875_v50 }
 0x524   :  { %v743_v62 = vsub.f32 1.5, %v742_v59 }
 0x525   :  { %v6195_v0 = vpop.eup %6194  ;;  %v731_v1 = vadd.f32 1e-05, %v721_v61 }
 0x526   :  { %v744_v3 = vmul.f32 %v6193_v54, %v743_v62  ;;  %v750_v2 = vmul.f32 %v6195_v0, %v730_v55  ;;  %vm756_vm10 = vweird.f32 %v6195_v0 }
 0x527   :  { %6196 = vrsqrt.f32 %v731_v1  ;;  %vm757_vm12 = vmor %vm755_vm11, %vm756_vm10  ;;  %vm765_vm14 = vweird.f32 %v731_v1 }
 0x528   :  { %v748_v7 = vsel %vm747_vm9, %v6193_v54, %v744_v3  ;;  %v751_v8 = vmul.f32 %v6195_v0, %v750_v2 }
 0x529   :  { %v839_v10 = vmul.f32 %v748_v7, %v6879_v53 }
 0x52a   :  { %v752_v13 = vmul.f32 0.5, %v751_v8  ;;  %v700_v15 = vpop.xlane.xlu1 %699 }
 0x52b   :  { %v722_v16 = vmul.f32 %v700_v15, %v6875_v50  ;;  %v852_v17 = vmul.f32 %v6964_v5, %v839_v10  ;;  %v880_v18 = vmul.f32 %v6967_v6, %v839_v10 }
 0x52c   :  { %v753_v20 = vsub.f32 1.5, %v752_v13 }
 0x52d   :  { %v6197_v21 = vpop.eup %6196  ;;  %v732_v22 = vadd.f32 1e-05, %v722_v16  ;;  %v865_v23 = vadd.f32 %v6971_v11, %v852_v17  ;;  %v893_v53 = vadd.f32 %v6974_v12, %v880_v18 }
 0x52e   :  { %v754_v25 = vmul.f32 %v6195_v0, %v753_v20  ;;  %v760_v26 = vmul.f32 %v6197_v21, %v731_v1  ;;  %vm766_vm13 = vweird.f32 %v6197_v21 }
 0x52f   :  { %6198 = vrsqrt.f32 %v732_v22  ;;  %5596 = vmatmul.msk.f32.vlgmr.msrb.gmra.mxu2 %vm440_vm4, %v865_v23  ;;  %5606 = vmatmul.msk.f32.vlgmr.msrb.gmra.mxu0 %vm440_vm4, %v893_v53  ;;  %vm767_vm15 = vmor %vm765_vm14, %vm766_vm13  ;;  %vm775_vm2 = vweird.f32 %v732_v22 }
 0x530   :  { %v761_v27 = vmul.f32 %v6197_v21, %v760_v26  ;;  %v758_v28 = vsel %vm757_vm12, %v6195_v0, %v754_v25 }
 0x531   :  { %v840_v31 = vmul.f32 %v758_v28, %v6886_v58 }
 0x532   :  { %v762_v32 = vmul.f32 0.5, %v761_v27  ;;  %v703_v33 = vpop.xlane.xlu1 %702 }
 0x533   :  { %v723_v34 = vmul.f32 %v703_v33, %v6875_v50  ;;  %v853_v35 = vmul.f32 %v6964_v5, %v840_v31  ;;  %v881_v37 = vmul.f32 %v6967_v6, %v840_v31 }
 0x534   :  { %v763_v38 = vsub.f32 1.5, %v762_v32 }
 0x535   :  { %v6199_v39 = vpop.eup %6198  ;;  %v733_v40 = vadd.f32 1e-05, %v723_v34  ;;  %v866_v41 = vadd.f32 %v6971_v11, %v853_v35  ;;  %v894_v43 = vadd.f32 %v6974_v12, %v881_v37 }
 0x536   :  { %v764_v44 = vmul.f32 %v6197_v21, %v763_v38  ;;  %v770_v45 = vmul.f32 %v6199_v39, %v732_v22  ;;  %vm776_vm1 = vweird.f32 %v6199_v39 }
 0x537   :  { %6200 = vrsqrt.f32 %v733_v40  ;;  %5597 = vmatmul.msk.f32.gmra.mxu2 %vm440_vm4, %v866_v41  ;;  %5607 = vmatmul.msk.f32.gmra.mxu0 %vm440_vm4, %v894_v43  ;;  %vm777_vm5 = vmor %vm775_vm2, %vm776_vm1  ;;  %vm785_vm7 = vweird.f32 %v733_v40 }
 0x538   :  { %v771_v58 = vmul.f32 %v6199_v39, %v770_v45  ;;  %v768_v42 = vsel %vm767_vm15, %v6197_v21, %v764_v44 }
 0x539   :  { %v841_v46 = vmul.f32 %v768_v42, %v6893_v63 }
 0x53a   :  { %v772_v47 = vmul.f32 0.5, %v771_v58  ;;  %v706_v48 = vpop.xlane.xlu2 %705 }
 0x53b   :  { %v724_v49 = vmul.f32 %v706_v48, %v6875_v50  ;;  %v854_v51 = vmul.f32 %v6964_v5, %v841_v46  ;;  %v882_v52 = vmul.f32 %v6967_v6, %v841_v46 }
 0x53c   :  { %v773_v54 = vsub.f32 1.5, %v772_v47 }
 0x53d   :  { %v6201_v55 = vpop.eup %6200  ;;  %v734_v56 = vadd.f32 1e-05, %v724_v49  ;;  %v867_v57 = vadd.f32 %v6971_v11, %v854_v51  ;;  %v895_v59 = vadd.f32 %v6974_v12, %v882_v52 }
 0x53e   :  { %v774_v60 = vmul.f32 %v6199_v39, %v773_v54  ;;  %v780_v61 = vmul.f32 %v6201_v55, %v733_v40  ;;  %vm786_vm6 = vweird.f32 %v6201_v55 }
 0x53f   :  { %6202 = vrsqrt.f32 %v734_v56  ;;  %5598 = vmatmul.msk.f32.gmra.mxu2 %vm440_vm4, %v867_v57  ;;  %5608 = vmatmul.msk.f32.gmra.mxu0 %vm440_vm4, %v895_v59  ;;  %vm787_vm8 = vmor %vm785_vm7, %vm786_vm6  ;;  %vm795_vm10 = vweird.f32 %v734_v56 }
 0x540   :  { %v781_v63 = vmul.f32 %v6201_v55, %v780_v61  ;;  %v778_v62 = vsel %vm777_vm5, %v6199_v39, %v774_v60 }
 0x541   :  { %v842_v0 = vmul.f32 %v778_v62, %v6900_v4 }
 0x542   :  { %v782_v1 = vmul.f32 0.5, %v781_v63  ;;  %v709_v3 = vpop.xlane.xlu1 %708 }
 0x543   :  { %v725_v2 = vmul.f32 %v709_v3, %v6875_v50  ;;  %v855_v7 = vmul.f32 %v6964_v5, %v842_v0  ;;  %v883_v8 = vmul.f32 %v6967_v6, %v842_v0 }
 0x544   :  { %v783_v10 = vsub.f32 1.5, %v782_v1 }
 0x545   :  { %v6203_v13 = vpop.eup %6202  ;;  %v735_v15 = vadd.f32 1e-05, %v725_v2  ;;  %v868_v16 = vadd.f32 %v6971_v11, %v855_v7  ;;  %v896_v17 = vadd.f32 %v6974_v12, %v883_v8 }
 0x546   :  { %v784_v18 = vmul.f32 %v6201_v55, %v783_v10  ;;  %v790_v20 = vmul.f32 %v6203_v13, %v734_v56  ;;  %vm796_vm9 = vweird.f32 %v6203_v13 }
 0x547   :  { %6204 = vrsqrt.f32 %v735_v15  ;;  %5599 = vmatmul.msk.f32.gmra.mxu2 %vm440_vm4, %v868_v16  ;;  %5609 = vmatmul.msk.f32.gmra.mxu0 %vm440_vm4, %v896_v17  ;;  %vm797_vm11 = vmor %vm795_vm10, %vm796_vm9  ;;  %vm805_vm13 = vweird.f32 %v735_v15 }
 0x548   :  { %v791_v4 = vmul.f32 %v6203_v13, %v790_v20  ;;  %v788_v21 = vsel %vm787_vm8, %v6201_v55, %v784_v18 }
 0x549   :  { %v843_v22 = vmul.f32 %v788_v21, %v6907_v9 }
 0x54a   :  { %v792_v23 = vmul.f32 0.5, %v791_v4  ;;  %v712_v53 = vpop.xlane.xlu2 %711 }
 0x54b   :  { %v726_v25 = vmul.f32 %v712_v53, %v6875_v50  ;;  %v856_v26 = vmul.f32 %v6964_v5, %v843_v22  ;;  %v884_v27 = vmul.f32 %v6967_v6, %v843_v22 }
 0x54c   :  { %v793_v28 = vsub.f32 1.5, %v792_v23 }
 0x54d   :  { %v6205_v31 = vpop.eup %6204  ;;  %v736_v32 = vadd.f32 1e-05, %v726_v25  ;;  %v869_v33 = vadd.f32 %v6971_v11, %v856_v26  ;;  %v897_v34 = vadd.f32 %v6974_v12, %v884_v27 }
 0x54e   :  { %v794_v35 = vmul.f32 %v6203_v13, %v793_v28  ;;  %v800_v37 = vmul.f32 %v6205_v31, %v735_v15  ;;  %vm806_vm12 = vweird.f32 %v6205_v31 }
 0x54f   :  { %6206 = vrsqrt.f32 %v736_v32  ;;  %5600 = vmatmul.msk.f32.gmra.mxu2 %vm440_vm4, %v869_v33  ;;  %5610 = vmatmul.msk.f32.gmra.mxu0 %vm440_vm4, %v897_v34  ;;  %vm807_vm14 = vmor %vm805_vm13, %vm806_vm12  ;;  %vm815_vm1 = vweird.f32 %v736_v32 }
 0x550   :  { %v801_v9 = vmul.f32 %v6205_v31, %v800_v37  ;;  %v798_v38 = vsel %vm797_vm11, %v6203_v13, %v794_v35 }
 0x551   :  { %v844_v39 = vmul.f32 %v798_v38, %v6914_v14 }
 0x552   :  { %v802_v40 = vmul.f32 0.5, %v801_v9  ;;  %v592_v41 = vpop.xlane.xlu2 %591  ;;  %v715_v43 = vpop.xlane.xlu1 %714 }
 0x553   :  { %v600_v44 = vmul.f32 %v6875_v50, %v592_v41  ;;  %v727_v45 = vmul.f32 %v715_v43, %v6875_v50  ;;  %v857_v58 = vmul.f32 %v6964_v5, %v844_v39  ;;  %v885_v42 = vmul.f32 %v6967_v6, %v844_v39 }
 0x554   :  { %v803_v46 = vsub.f32 1.5, %v802_v40 }
 0x555   :  { %v6207_v47 = vpop.eup %6206  ;;  %v7021_v48 = vsub.f32 %v6935_v29, %v600_v44  ;;  %v737_v49 = vadd.f32 1e-05, %v727_v45  ;;  %v870_v14 = vadd.f32 %v6971_v11, %v857_v58  ;;  %v898_v51 = vadd.f32 %v6974_v12, %v885_v42  ;;  %v905_v58 = vld [vmem:[%s9240_s0 + $0x10] sm:$0xff]  ;;  %v904_v42 = vld [vmem:[%s9240_s0 + $0x8] sm:$0xff] }
 0x556   :  { %v804_v52 = vmul.f32 %v6205_v31, %v803_v46  ;;  %v810_v54 = vmul.f32 %v6207_v47, %v736_v32  ;;  %vm816_vm15 = vweird.f32 %v6207_v47  ;;  %v903_v46 = vld [vmem:[%s9240_s0] sm:$0xff] }
 0x557   :  { %6208 = vrsqrt.f32 %v737_v49  ;;  %5601 = vmatmul.msk.f32.gmra.mxu2 %vm440_vm4, %v870_v14  ;;  %5611 = vmatmul.msk.f32.gmra.mxu0 %vm440_vm4, %v898_v51  ;;  %v602_v55 = vmul.f32 %v7021_v48, %v7021_v48  ;;  %vm817_vm2 = vmor %vm815_vm1, %vm816_vm15  ;;  %vm825_vm6 = vweird.f32 %v737_v49  ;;  %v7079_v14 = vld [vmem:[%s9242_s17] ss:$0 sm:$0xff]  ;;  %vm1126_vm15 = vcmask 31744  }
 0x558   :  { %v811_v56 = vmul.f32 %v6207_v47, %v810_v54  ;;  %v808_v29 = vsel %vm807_vm14, %v6205_v31, %v804_v52  ;;  %vm1413_vm14 = vcmask 1044480   ;;  %vm1241_vm1 = vcmask 624640  }
 0x559   :  { %v603_v57 = vsel %vm440_vm4, %v602_v55, 0.0  ;;  %v845_v59 = vmul.f32 %v808_v29, %v6921_v19 }
 0x55a   :  { %v812_v60 = vmul.f32 0.5, %v811_v56  ;;  %604 = vadd.xlane.f32.xlu2 %v603_v57  ;;  %v718_v61 = vpop.xlane.xlu1 %717 }
 0x55b   :  { %v728_v63 = vmul.f32 %v718_v61, %v6875_v50  ;;  %v858_v62 = vmul.f32 %v6964_v5, %v845_v59  ;;  %v886_v0 = vmul.f32 %v6967_v6, %v845_v59 }
 0x55c   :  { %v813_v1 = vsub.f32 1.5, %v812_v60 }
 0x55d   :  { %v6209_v3 = vpop.eup %6208  ;;  %v738_v2 = vadd.f32 1e-05, %v728_v63  ;;  %v871_v7 = vadd.f32 %v6971_v11, %v858_v62  ;;  %v899_v8 = vadd.f32 %v6974_v12, %v886_v0 }
 0x55e   :  { %v814_v10 = vmul.f32 %v6207_v47, %v813_v1  ;;  %v820_v19 = vmul.f32 %v6209_v3, %v737_v49  ;;  %vm826_vm5 = vweird.f32 %v6209_v3 }
 0x55f   :  { %6210 = vrsqrt.f32 %v738_v2  ;;  %5602 = vmatmul.msk.f32.gmra.mxu2 %vm440_vm4, %v871_v7  ;;  %5612 = vmatmul.msk.f32.gmra.mxu0 %vm440_vm4, %v899_v8  ;;  %vm827_vm7 = vmor %vm825_vm6, %vm826_vm5  ;;  %vm835_vm9 = vweird.f32 %v738_v2 }
 0x560   :  { %v821_v13 = vmul.f32 %v6209_v3, %v820_v19  ;;  %v818_v15 = vsel %vm817_vm2, %v6207_v47, %v814_v10  ;;  %v7076_v47 = vld [vmem:[%s9241_s5] ss:$0 sm:$0xff] }
 0x561   :  { %v846_v16 = vmul.f32 %v818_v15, %v6928_v24  ;;  %v6182_v15 = vld [vmem:[%s9243_s25] ss:$0 sm:$0xff] }
 0x562   :  { %v822_v17 = vmul.f32 0.5, %v821_v13 }
 0x563   :  { %v859_v18 = vmul.f32 %v6964_v5, %v846_v16  ;;  %v887_v20 = vmul.f32 %v6967_v6, %v846_v16 }
 0x564   :  { %v823_v4 = vsub.f32 1.5, %v822_v17 }
 0x565   :  { %v6211_v21 = vpop.eup %6210  ;;  %v872_v22 = vadd.f32 %v6971_v11, %v859_v18  ;;  %v900_v23 = vadd.f32 %v6974_v12, %v887_v20  ;;  %v6183_v20 = vld [vmem:[%s9244_s29] ss:$0 sm:$0xff] }
 0x566   :  { %v824_v53 = vmul.f32 %v6209_v3, %v823_v4  ;;  %v830_v25 = vmul.f32 %v6211_v21, %v738_v2  ;;  %vm836_vm8 = vweird.f32 %v6211_v21 }
 0x567   :  { %5603 = vmatmul.msk.f32.gmra.mxu2 %vm440_vm4, %v872_v22  ;;  %5613 = vmatmul.msk.f32.gmra.mxu0 %vm440_vm4, %v900_v23  ;;  %vm837_vm10 = vmor %vm835_vm9, %vm836_vm8 }
 0x568   :  { %v831_v24 = vmul.f32 %v6211_v21, %v830_v25  ;;  %v828_v26 = vsel %vm827_vm7, %v6209_v3, %v824_v53 }
 0x569   :  { %v847_v27 = vmul.f32 %v828_v26, %v6938_v30 }
 0x56a   :  { %v832_v28 = vmul.f32 0.5, %v831_v24 }
 0x56b   :  { %v860_v31 = vmul.f32 %v6964_v5, %v847_v27  ;;  %v888_v32 = vmul.f32 %v6967_v6, %v847_v27 }
 0x56c   :  { %v833_v33 = vsub.f32 1.5, %v832_v28 }
 0x56d   :  { %v873_v34 = vadd.f32 %v6971_v11, %v860_v31  ;;  %v901_v35 = vadd.f32 %v6974_v12, %v888_v32 }
 0x56e   :  { %v834_v37 = vmul.f32 %v6211_v21, %v833_v33 }
 0x56f   :  { %5604 = vmatmul.msk.f32.gmra.mxu2 %vm440_vm4, %v873_v34  ;;  %5614 = vmatmul.msk.f32.gmra.mxu0 %vm440_vm4, %v901_v35 }
 0x570   :  { %v838_v30 = vsel %vm837_vm10, %v6211_v21, %v834_v37 }
 0x571   :  { %v848_v9 = vmul.f32 %v838_v30, %v6947_v36 }
 0x573   :  { %v861_v38 = vmul.f32 %v6964_v5, %v848_v9  ;;  %v889_v39 = vmul.f32 %v6967_v6, %v848_v9 }
 0x575   :  { %v874_v40 = vadd.f32 %v6971_v11, %v861_v38  ;;  %v902_v41 = vadd.f32 %v6974_v12, %v889_v39  ;;  %v906_v12 = vld [vmem:[%s9240_s0 + $0x18] sm:$0xff] }
 0x576   :  { %926 = vmatpush.msra.mxu1 %v906_v12  ;;  %5957 = vmatpush.msra.mxu3 %v906_v12 }
 0x577   :  { %5605 = vmatmul.msk.f32.gmra.mxu2 %vm440_vm4, %v874_v40  ;;  %5615 = vmatmul.msk.f32.gmra.mxu0 %vm440_vm4, %v902_v41 }
 0x578   :  { %927 = vmatpush.msra.mxu1 %v905_v58  ;;  %5958 = vmatpush.msra.mxu3 %v905_v58 }
 0x57a   :  { %928 = vmatpush.msra.mxu1 %v904_v42  ;;  %5959 = vmatpush.msra.mxu3 %v904_v42 }
 0x57c   :  { %929 = vmatpush.msra.mxu1 %v903_v46  ;;  %5960 = vmatpush.msra.mxu3 %v903_v46 }
 0x5ac   :  { %v7059_v43 = vpop.f32.mrf.mxu0 }
 0x5ad   :  { %v7182_v41 = vadd.f32 %v7079_v14, %v7059_v43 }
 0x5af   :  { %9246 = vst [vmem:[#allocation21_spill] sm:$0xff] %v7182_v41 }
 0x5b2   :  { %v7061_v44 = vpop.f32.mrf.mxu2 }
 0x5b4   :  { %v7063_v36 = vpop.f32.mrf.mxu0 }
 0x5b5   :  { %v7171_v40 = vadd.f32 %v7079_v14, %v7063_v36  ;;  %v7190_v36 = vadd.f32 %v7076_v47, %v7061_v44  ;;  %v6184_v44 = vld [vmem:[%s9245_s3] ss:$0 sm:$0xff] }
 0x5ba   :  { %v7065_v5 = vpop.f32.mrf.mxu2 }
 0x5bb   :  { %v7167_v39 = vadd.f32 %v7076_v47, %v7065_v5 }
 0x5bc   :  { %v7067_v6 = vpop.f32.mrf.mxu0 }
 0x5bd   :  { %v7157_v9 = vadd.f32 %v7079_v14, %v7067_v6 }
 0x5c2   :  { %v7069_v11 = vpop.f32.mrf.mxu2 }
 0x5c3   :  { %v7161_v38 = vadd.f32 %v7076_v47, %v7069_v11 }
 0x5c4   :  { %v1101_v45 = vpop.f32.mrf.mxu0 }
 0x5c5   :  { %v7085_v54 = vadd.f32 %v7079_v14, %v1101_v45 }
 0x5ca   :  { %v1016_v49 = vpop.f32.mrf.mxu2 }
 0x5cb   :  { %v7082_v51 = vadd.f32 %v7076_v47, %v1016_v49 }
 0x5cc   :  { %v1104_v52 = vpop.f32.mrf.mxu0 }
 0x5cd   :  { %v7088_v55 = vadd.f32 %v7079_v14, %v1104_v52  ;;  %v605_v56 = vpop.xlane.xlu2 %604  ;;  %1475 = vrot.lane.b32.xlu0 %v7082_v51, %s6526_s21 }
 0x5ce   :  { %v606_v29 = vmul.f32 %v605_v56, %v6875_v50 }
 0x5cf   :  { %v7095_v57 = vpack.i.bf16 %v7085_v54, %v7088_v55 }
 0x5d0   :  { %v607_v59 = vadd.f32 1e-05, %v606_v29 }
 0x5d2   :  { %6212 = vrsqrt.f32 %v607_v59  ;;  %v1019_v60 = vpop.f32.mrf.mxu2  ;;  %vm614_vm12 = vweird.f32 %v607_v59 }
 0x5d3   :  { %v7114_v25 = vadd.f32 %v7076_v47, %v1019_v60 }
 0x5d4   :  { %v1107_v61 = vpop.f32.mrf.mxu0 }
 0x5d5   :  { %v1108_v7 = vadd.f32 %v7079_v14, %v1107_v61 }
 0x5d8   :  { %v6213_v63 = vpop.eup %6212 }
 0x5d9   :  { %v609_v62 = vmul.f32 %v6213_v63, %v607_v59  ;;  %vm615_vm11 = vweird.f32 %v6213_v63 }
 0x5da   :  { %v1022_v0 = vpop.f32.mrf.mxu2  ;;  %vm616_vm13 = vmor %vm614_vm12, %vm615_vm11 }
 0x5db   :  { %v610_v1 = vmul.f32 %v6213_v63, %v609_v62  ;;  %v7141_v37 = vadd.f32 %v7076_v47, %v1022_v0 }
 0x5dc   :  { %v1110_v3 = vpop.f32.mrf.mxu0 }
 0x5dd   :  { %v611_v2 = vmul.f32 0.5, %v610_v1  ;;  %v1111_v8 = vadd.f32 %v7079_v14, %v1110_v3 }
 0x5df   :  { %v612_v10 = vsub.f32 1.5, %v611_v2  ;;  %v7099_v19 = vpack.i.bf16 %v1108_v7, %v1111_v8 }
 0x5e1   :  { %v613_v13 = vmul.f32 %v6213_v63, %v612_v10  ;;  %6039 = vrot.lane.b32.xlu0 %v7099_v19, %s6526_s21 }
 0x5e2   :  { %v1025_v16 = vpop.f32.mrf.mxu2 }
 0x5e3   :  { %v617_v17 = vsel %vm616_vm13, %v6213_v63, %v613_v13  ;;  %v7105_v18 = vadd.f32 %v7076_v47, %v1025_v16 }
 0x5e4   :  { %v618_v4 = vmul.f32 %v617_v17, %v7021_v48  ;;  %v1113_v21 = vpop.f32.mrf.mxu0 }
 0x5e5   :  { %1481 = vrot.lane.b32.xlu1 %v7105_v18, %s6526_s21  ;;  %v1114_v48 = vadd.f32 %v7079_v14, %v1113_v21 }
 0x5e6   :  { %v622_v22 = vmul.f32 %v6182_v15, %v618_v4 }
 0x5e8   :  { %v626_v23 = vadd.f32 %v6183_v20, %v622_v22 }
 0x5ea   :  { %5589 = vmatmul.msk.f32.vlgmr.msra.gmra.mxu1 %vm440_vm4, %v626_v23  ;;  %5591 = vmatmul.msk.f32.vlgmr.msra.gmra.mxu3 %vm440_vm4, %v626_v23  ;;  %v1028_v53 = vpop.f32.mrf.mxu2 }
 0x5eb   :  { %v7117_v24 = vadd.f32 %v7076_v47, %v1028_v53 }
 0x5ec   :  { %v1116_v26 = vpop.f32.mrf.mxu0 }
 0x5ed   :  { %v1117_v27 = vadd.f32 %v7079_v14, %v1116_v26  ;;  %1483 = vrot.lane.b32.xlu2 %v7117_v24, %s6526_s21  ;;  %1477 = vrot.lane.b32.xlu1 %v7114_v25, %s6526_s21 }
 0x5ef   :  { %v7125_v28 = vpack.i.bf16 %v1114_v48, %v1117_v27 }
 0x5f2   :  { %5590 = vmatmul.msk.f32.gmra.mxu1 %vm440_vm4, %v626_v23  ;;  %5592 = vmatmul.msk.f32.gmra.mxu3 %vm440_vm4, %v626_v23  ;;  %v1031_v31 = vpop.f32.mrf.mxu2 }
 0x5f3   :  { %v7130_v32 = vadd.f32 %v7076_v47, %v1031_v31 }
 0x5f4   :  { %v1119_v33 = vpop.f32.mrf.mxu0 }
 0x5f5   :  { %v7133_v34 = vadd.f32 %v7079_v14, %v1119_v33  ;;  %1485 = vrot.lane.b32.xlu2 %v7130_v32, %s6526_s21 }
 0x5f7   :  { %5633 = vmatpush.msk.msrb.mxu1 %vm1413_vm14, %v7133_v34 }
 0x5f9   :  { %1424 = vmatpush.msrb.mxu1 %v1117_v27 }
 0x5fa   :  { %5593 = vmatmul.msk.f32.gmra.mxu3 %vm440_vm4, %v626_v23  ;;  %v1034_v35 = vpop.f32.mrf.mxu2 }
 0x5fb   :  { %v7144_v30 = vadd.f32 %v7076_v47, %v1034_v35  ;;  %1425 = vmatpush.msrb.mxu1 %v1114_v48 }
 0x5fd   :  { %1479 = vrot.lane.b32.xlu2 %v7141_v37, %s6526_s21  ;;  %1426 = vmatpush.msrb.mxu1 %v1111_v8 }
 0x5fe   :  { %1487 = vrot.lane.b32.xlu1 %v7144_v30, %s6526_s21  ;;  %5616 = vmatpush.xpose.msk.msra.mxu3 %vm1126_vm15, %v7144_v30 }
 0x5ff   :  { %1427 = vmatpush.msrb.mxu1 %v1108_v7  ;;  %v7302_v7 = vpack.i.bf16 %v7171_v40, %v7157_v9 }
 0x601   :  { %1428 = vmatpush.msrb.mxu1 %v7088_v55 }
 0x602   :  { %5617 = vmatpush.xpose.msk.msra.mxu3 %vm1126_vm15, %v7130_v32 }
 0x603   :  { %5594 = vmatmul.msk.f32.gmra.mxu3 %vm440_vm4, %v626_v23  ;;  %1429 = vmatpush.msrb.mxu1 %v7085_v54 }
 0x605   :  { %1473 = vrot.lane.b32.xlu2 %v7161_v38, %s6526_s21  ;;  %1430 = vmatpush.msrb.mxu1 %v7157_v9 }
 0x606   :  { %1471 = vrot.lane.b32.xlu1 %v7167_v39, %s6526_s21  ;;  %5618 = vmatpush.xpose.msk.msra.mxu3 %vm1126_vm15, %v7117_v24 }
 0x607   :  { %1431 = vmatpush.msrb.mxu1 %v7171_v40 }
 0x609   :  { %1432 = vmatpush.msrb.mxu1 %v7182_v41 }
 0x60a   :  { %5619 = vmatpush.xpose.msk.msra.mxu3 %vm1126_vm15, %v7105_v18 }
 0x60b   :  { %5595 = vmatmul.msk.f32.gmra.mxu3 %vm440_vm4, %v626_v23 }
 0x60d   :  { %1469 = vrot.lane.b32.xlu2 %v7190_v36, %s6526_s21 }
 0x60e   :  { %5620 = vmatpush.xpose.msk.msra.mxu3 %vm1126_vm15, %v7141_v37 }
 0x612   :  { %5621 = vmatpush.xpose.msk.msra.mxu3 %vm1126_vm15, %v7114_v25 }
 0x616   :  { %5622 = vmatpush.xpose.msk.msra.mxu3 %vm1126_vm15, %v7082_v51 }
 0x61a   :  { %5623 = vmatpush.xpose.msk.msra.mxu3 %vm1126_vm15, %v7161_v38 }
 0x61e   :  { %5624 = vmatpush.xpose.msk.msra.mxu3 %vm1126_vm15, %v7167_v39 }
 0x622   :  { %5625 = vmatpush.xpose.msk.msra.mxu3 %vm1126_vm15, %v7190_v36 }
 0x63f   :  { %v1476_v56 = vpop.permute.xlu0 %1475 }
 0x647   :  { %v1484_v12 = vpop.permute.xlu2 %1483 }
 0x64f   :  { %v1486_v49 = vpop.permute.xlu2 %1485 }
 0x657   :  { %v1482_v43 = vpop.permute.xlu1 %1481  ;;  %v1480_v54 = vpop.permute.xlu2 %1479 }
 0x65f   :  { %v1478_v6 = vpop.permute.xlu1 %1477  ;;  %v1474_v59 = vpop.permute.xlu2 %1473 }
 0x667   :  { %v931_v5 = vpop.f32.mrf.mxu1  ;;  %v1470_v62 = vpop.permute.xlu2 %1469 }
 0x668   :  { %v7208_v11 = vadd.f32 %v6184_v44, %v931_v5 }
 0x66a   :  { %1455 = vrot.lane.b32.xlu1 %v7208_v11, %s6526_s21  ;;  %5626 = vmatmul.msk.f32.vlgmr.msra.gmra.mxu3 %vm1126_vm15, %v7208_v11 }
 0x66d   :  { %v937_v45 = vpop.f32.mrf.mxu3 }
 0x66e   :  { %v7214_v42 = vadd.f32 %v6184_v44, %v937_v45  ;;  %v6040_v45 = vpop.permute.xlu0 %6039 }
 0x66f   :  { %v934_v58 = vpop.f32.mrf.mxu1 }
 0x670   :  { %v7216_v46 = vadd.f32 %v6184_v44, %v934_v58  ;;  %v1488_v47 = vpop.permute.xlu1 %1487 }
 0x671   :  { %5641 = vmatpush.xpose.msk.msra.mxu2 %vm1126_vm15, %v1488_v47  ;;  %v6041_v47 = vunpack.i.l.bf16 %v6040_v45 }
 0x672   :  { %1457 = vrot.lane.b32.xlu2 %v7216_v46, %s6526_s21  ;;  %1459 = vrot.lane.b32.xlu1 %v7214_v42, %s6526_s21 }
 0x673   :  { %5627 = vmatmul.msk.f32.gmra.mxu3 %vm1126_vm15, %v7216_v46 }
 0x675   :  { %5642 = vmatpush.xpose.msk.msra.mxu2 %vm1126_vm15, %v1486_v49  ;;  %v940_v14 = vpop.f32.mrf.mxu3  ;;  %v6042_v49 = vunpack.i.h.bf16 %v6040_v45 }
 0x676   :  { %v7226_v52 = vadd.f32 %v6184_v44, %v940_v14 }
 0x678   :  { %v1472_v61 = vpop.permute.xlu1 %1471 }
 0x679   :  { %5643 = vmatpush.xpose.msk.msra.mxu2 %vm1126_vm15, %v1484_v12 }
 0x67a   :  { %1461 = vrot.lane.b32.xlu2 %v7226_v52, %s6526_s21  ;;  %1990 = vrot.lane.b32.xlu1 %v7130_v32, %s6527_s8 }
 0x67b   :  { %5628 = vmatmul.msk.f32.gmra.mxu3 %vm1126_vm15, %v7214_v42 }
 0x67d   :  { %5644 = vmatpush.xpose.msk.msra.mxu2 %vm1126_vm15, %v1482_v43  ;;  %v943_v55 = vpop.f32.mrf.mxu3 }
 0x67e   :  { %v7244_v29 = vadd.f32 %v6184_v44, %v943_v55 }
 0x681   :  { %5645 = vmatpush.xpose.msk.msra.mxu2 %vm1126_vm15, %v1480_v54 }
 0x682   :  { %1986 = vrot.lane.b32.xlu2 %v7105_v18, %s6527_s8  ;;  %1988 = vrot.lane.b32.xlu1 %v7117_v24, %s6527_s8 }
 0x683   :  { %5629 = vmatmul.msk.f32.gmra.mxu3 %vm1126_vm15, %v7226_v52 }
 0x685   :  { %5646 = vmatpush.xpose.msk.msra.mxu2 %vm1126_vm15, %v1478_v6 }
 0x686   :  { %v946_v60 = vpop.f32.mrf.mxu3 }
 0x687   :  { %v7254_v63 = vadd.f32 %v6184_v44, %v946_v60 }
 0x689   :  { %5647 = vmatpush.xpose.msk.msra.mxu2 %vm1126_vm15, %v1476_v56 }
 0x68a   :  { %1992 = vrot.lane.b32.xlu2 %v7144_v30, %s6527_s8  ;;  %1463 = vrot.lane.b32.xlu1 %v7244_v29, %s6526_s21 }
 0x68b   :  { %5630 = vmatmul.msk.f32.gmra.mxu3 %vm1126_vm15, %v7244_v29 }
 0x68d   :  { %5648 = vmatpush.xpose.msk.msra.mxu2 %vm1126_vm15, %v1474_v59 }
 0x68e   :  { %v949_v0 = vpop.f32.mrf.mxu3 }
 0x68f   :  { %v7264_v1 = vadd.f32 %v6184_v44, %v949_v0 }
 0x691   :  { %5649 = vmatpush.xpose.msk.msra.mxu2 %vm1126_vm15, %v1472_v61 }
 0x692   :  { %1984 = vrot.lane.b32.xlu2 %v7141_v37, %s6527_s8  ;;  %1982 = vrot.lane.b32.xlu1 %v7114_v25, %s6527_s8 }
 0x693   :  { %5631 = vmatmul.msk.f32.gmra.mxu3 %vm1126_vm15, %v7254_v63 }
 0x695   :  { %5650 = vmatpush.xpose.msk.msra.mxu2 %vm1126_vm15, %v1470_v62 }
 0x69a   :  { %1465 = vrot.lane.b32.xlu2 %v7254_v63, %s6526_s21  ;;  %1980 = vrot.lane.b32.xlu1 %v7082_v51, %s6527_s8 }
 0x69b   :  { %5632 = vmatmul.msk.f32.gmra.mxu3 %vm1126_vm15, %v7264_v1 }
 0x6a2   :  { %1978 = vrot.lane.b32.xlu2 %v7161_v38, %s6527_s8  ;;  %1467 = vrot.lane.b32.xlu1 %v7264_v1, %s6526_s21 }
 0x6aa   :  { %1976 = vrot.lane.b32.xlu2 %v7167_v39, %s6527_s8  ;;  %1974 = vrot.lane.b32.xlu1 %v7190_v36, %s6527_s8 }
 0x6b2   :  { %1960 = vrot.lane.b32.xlu2 %v7208_v11, %s6527_s8  ;;  %1962 = vrot.lane.b32.xlu1 %v7216_v46, %s6527_s8 }
 0x6ba   :  { %1964 = vrot.lane.b32.xlu2 %v7214_v42, %s6527_s8  ;;  %1966 = vrot.lane.b32.xlu1 %v7226_v52, %s6527_s8 }
 0x6c2   :  { %1968 = vrot.lane.b32.xlu2 %v7244_v29, %s6527_s8  ;;  %1970 = vrot.lane.b32.xlu1 %v7254_v63, %s6527_s8 }
 0x6ca   :  { %1972 = vrot.lane.b32.xlu2 %v7264_v1, %s6527_s8  ;;  %6034 = vrot.lane.b32.xlu1 %v7125_v28, %s6526_s21 }
 0x6cc   :  { %v1458_v3 = vpop.permute.xlu2 %1457 }
 0x6d2   :  { %1763 = vrot.lane.b32.xlu2 %v7133_v34, %s6526_s21  ;;  %6044 = vrot.lane.b32.xlu1 %v7095_v57, %s6526_s21 }
 0x6d4   :  { %v1462_v2 = vpop.permute.xlu2 %1461 }
 0x6da   :  { %6049 = vrot.lane.b32.xlu1 %v7302_v7, %s6526_s21 }
 0x6dc   :  { %v1987_v8 = vpop.permute.xlu2 %1986  ;;  %v1456_v10 = vpop.permute.xlu1 %1455 }
 0x6dd   :  { %5651 = vmatmul.msk.f32.vlgmr.msra.gmra.mxu2 %vm1126_vm15, %v1456_v10 }
 0x6e4   :  { %v1993_v13 = vpop.permute.xlu2 %1992  ;;  %v1460_v15 = vpop.permute.xlu1 %1459 }
 0x6e5   :  { %5652 = vmatmul.msk.f32.gmra.mxu2 %vm1126_vm15, %v1458_v3 }
 0x6e6   :  { %5682 = vmatpush.xpose.msk.msrb.mxu2 %vm1126_vm15, %v1993_v13 }
 0x6ec   :  { %v1985_v16 = vpop.permute.xlu2 %1984  ;;  %v1991_v17 = vpop.permute.xlu1 %1990 }
 0x6ed   :  { %5653 = vmatmul.msk.f32.gmra.mxu2 %vm1126_vm15, %v1460_v15 }
 0x6ee   :  { %5683 = vmatpush.xpose.msk.msrb.mxu2 %vm1126_vm15, %v1991_v17 }
 0x6f4   :  { %v1466_v20 = vpop.permute.xlu2 %1465  ;;  %v1989_v4 = vpop.permute.xlu1 %1988 }
 0x6f5   :  { %5654 = vmatmul.msk.f32.gmra.mxu2 %vm1126_vm15, %v1462_v2 }
 0x6f6   :  { %5684 = vmatpush.xpose.msk.msrb.mxu2 %vm1126_vm15, %v1989_v4 }
 0x6fa   :  { %5685 = vmatpush.xpose.msk.msrb.mxu2 %vm1126_vm15, %v1987_v8 }
 0x6fc   :  { %v1979_v21 = vpop.permute.xlu2 %1978  ;;  %v1464_v22 = vpop.permute.xlu1 %1463 }
 0x6fd   :  { %5655 = vmatmul.msk.f32.gmra.mxu2 %vm1126_vm15, %v1464_v22 }
 0x6fe   :  { %5686 = vmatpush.xpose.msk.msrb.mxu2 %vm1126_vm15, %v1985_v16 }
 0x704   :  { %v1977_v23 = vpop.permute.xlu2 %1976  ;;  %v1983_v53 = vpop.permute.xlu1 %1982 }
 0x705   :  { %5656 = vmatmul.msk.f32.gmra.mxu2 %vm1126_vm15, %v1466_v20 }
 0x706   :  { %5687 = vmatpush.xpose.msk.msrb.mxu2 %vm1126_vm15, %v1983_v53 }
 0x70c   :  { %v1961_v26 = vpop.permute.xlu2 %1960  ;;  %v1981_v48 = vpop.permute.xlu1 %1980 }
 0x70d   :  { %5688 = vmatpush.xpose.msk.msrb.mxu2 %vm1126_vm15, %v1981_v48 }
 0x711   :  { %5689 = vmatpush.xpose.msk.msrb.mxu2 %vm1126_vm15, %v1979_v21 }
 0x714   :  { %v1965_v27 = vpop.permute.xlu2 %1964  ;;  %v1468_v31 = vpop.permute.xlu1 %1467 }
 0x715   :  { %5657 = vmatmul.msk.f32.gmra.mxu2 %vm1126_vm15, %v1468_v31 }
 0x716   :  { %5690 = vmatpush.xpose.msk.msrb.mxu2 %vm1126_vm15, %v1977_v23 }
 0x71c   :  { %v1969_v33 = vpop.permute.xlu2 %1968  ;;  %v1975_v35 = vpop.permute.xlu1 %1974 }
 0x71d   :  { %5691 = vmatpush.xpose.msk.msrb.mxu2 %vm1126_vm15, %v1975_v35 }
 0x720   :  { %5692 = vmatmul.msk.f32.vlgmr.msrb.gmra.mxu2 %vm1126_vm15, %v1961_v26 }
 0x724   :  { %v1973_v9 = vpop.permute.xlu2 %1972  ;;  %v1963_v40 = vpop.permute.xlu1 %1962 }
 0x728   :  { %5693 = vmatmul.msk.f32.gmra.mxu2 %vm1126_vm15, %v1963_v40 }
 0x72c   :  { %v1764_v43 = vpop.permute.xlu2 %1763  ;;  %v1967_v44 = vpop.permute.xlu1 %1966 }
 0x72d   :  { %5658 = vmatpush.msk.msra.mxu0 %vm1413_vm14, %v1764_v43 }
 0x730   :  { %5694 = vmatmul.msk.f32.gmra.mxu2 %vm1126_vm15, %v1965_v27 }
 0x734   :  { %v1971_v5 = vpop.permute.xlu1 %1970 }
 0x738   :  { %5695 = vmatmul.msk.f32.gmra.mxu2 %vm1126_vm15, %v1967_v44 }
 0x73c   :  { %v6035_v6 = vpop.permute.xlu1 %6034 }
 0x73d   :  { %v6036_v12 = vunpack.i.l.bf16 %v6035_v6  ;;  %v6037_v58 = vunpack.i.h.bf16 %v6035_v6 }
 0x73f   :  { %1804 = vmatpush.msra.mxu0 %v6036_v12 }
 0x740   :  { %5696 = vmatmul.msk.f32.gmra.mxu2 %vm1126_vm15, %v1969_v33 }
 0x741   :  { %1805 = vmatpush.msra.mxu0 %v6037_v58 }
 0x743   :  { %1806 = vmatpush.msra.mxu0 %v6041_v47 }
 0x744   :  { %v6045_v14 = vpop.permute.xlu1 %6044 }
 0x745   :  { %v6046_v54 = vunpack.i.l.bf16 %v6045_v14  ;;  %1807 = vmatpush.msra.mxu0 %v6042_v49  ;;  %v6047_v55 = vunpack.i.h.bf16 %v6045_v14 }
 0x747   :  { %1808 = vmatpush.msra.mxu0 %v6046_v54 }
 0x748   :  { %5697 = vmatmul.msk.f32.gmra.mxu2 %vm1126_vm15, %v1971_v5 }
 0x749   :  { %1809 = vmatpush.msra.mxu0 %v6047_v55 }
 0x74c   :  { %v6050_v56 = vpop.permute.xlu1 %6049 }
 0x74d   :  { %v6051_v59 = vunpack.i.l.bf16 %v6050_v56  ;;  %v6052_v60 = vunpack.i.h.bf16 %v6050_v56 }
 0x74f   :  { %1810 = vmatpush.msra.mxu0 %v6051_v59 }
 0x750   :  { %5698 = vmatmul.msk.f32.gmra.mxu2 %vm1126_vm15, %v1973_v9 }
 0x751   :  { %1811 = vmatpush.msra.mxu0 %v6052_v60 }
 0x760   :  { %v1540_v61 = vpop.f32.mrf.mxu2 }
 0x761   :  { %v1561_v62 = vmul.f32 0.5, %v1540_v61 }
 0x763   :  { %v1568_v0 = vsel %vm368_vm3, %v1561_v62, -inf }
 0x764   :  { %1569 = vmax.xlane.f32.xlu1 %v1568_v0 }
 0x768   :  { %v1543_v3 = vpop.f32.mrf.mxu2 }
 0x769   :  { %v1562_v2 = vmul.f32 0.5, %v1543_v3 }
 0x76b   :  { %v1571_v8 = vsel %vm368_vm3, %v1562_v2, -inf }
 0x76c   :  { %1572 = vmax.xlane.f32.xlu0 %v1571_v8 }
 0x770   :  { %v1546_v10 = vpop.f32.mrf.mxu2 }
 0x771   :  { %v7333_v13 = vmul.f32 0.5, %v1546_v10 }
 0x773   :  { %v1574_v15 = vsel %vm368_vm3, %v7333_v13, -inf }
 0x774   :  { %1575 = vmax.xlane.f32.xlu2 %v1574_v15 }
 0x778   :  { %v1549_v16 = vpop.f32.mrf.mxu2 }
 0x779   :  { %v7337_v17 = vmul.f32 0.5, %v1549_v16 }
 0x77b   :  { %v1577_v20 = vsel %vm368_vm3, %v7337_v17, -inf }
 0x77c   :  { %1578 = vmax.xlane.f32.xlu1 %v1577_v20 }
 0x780   :  { %v1552_v4 = vpop.f32.mrf.mxu2 }
 0x781   :  { %v7341_v21 = vmul.f32 0.5, %v1552_v4 }
 0x783   :  { %v1580_v22 = vsel %vm368_vm3, %v7341_v21, -inf }
 0x784   :  { %1581 = vmax.xlane.f32.xlu0 %v1580_v22 }
 0x788   :  { %v1555_v23 = vpop.f32.mrf.mxu2 }
 0x789   :  { %v7345_v53 = vmul.f32 0.5, %v1555_v23 }
 0x78b   :  { %v1583_v26 = vsel %vm368_vm3, %v7345_v53, -inf }
 0x78c   :  { %1584 = vmax.xlane.f32.xlu2 %v1583_v26 }
 0x798   :  { %v1558_v48 = vpop.f32.mrf.mxu2 }
 0x799   :  { %v7349_v27 = vmul.f32 0.5, %v1558_v48 }
 0x79b   :  { %v1586_v31 = vsel %vm1241_vm1, %v7349_v27, -inf }
 0x79c   :  { %1587 = vmax.xlane.f32.xlu1 %v1586_v31 }
 0x7a3   :  { %v2045_v33 = vpop.f32.mrf.mxu2 }
 0x7a4   :  { %v7353_v35 = vmul.f32 0.5, %v2045_v33  ;;  %1745 = vrot.lane.b32.xlu2 %v7182_v41, %s6526_s21 }
 0x7a6   :  { %v2073_v9 = vsel %vm368_vm3, %v7353_v35, -inf }
 0x7a7   :  { %2074 = vmax.xlane.f32.xlu0 %v2073_v9 }
 0x7ab   :  { %v2048_v40 = vpop.f32.mrf.mxu2 }
 0x7ac   :  { %v7359_v43 = vmul.f32 0.5, %v2048_v40 }
 0x7ae   :  { %v2076_v44 = vsel %vm368_vm3, %v7359_v43, -inf }
 0x7af   :  { %2077 = vmax.xlane.f32.xlu0 %v2076_v44 }
 0x7b3   :  { %v2051_v5 = vpop.f32.mrf.mxu2 }
 0x7b4   :  { %v7363_v6 = vmul.f32 0.5, %v2051_v5 }
 0x7b6   :  { %v2079_v12 = vsel %vm368_vm3, %v7363_v6, -inf }
 0x7b7   :  { %2080 = vmax.xlane.f32.xlu0 %v2079_v12 }
 0x7bb   :  { %v2054_v45 = vpop.f32.mrf.mxu2 }
 0x7bc   :  { %v7367_v58 = vmul.f32 0.5, %v2054_v45 }
 0x7be   :  { %v2082_v47 = vsel %vm368_vm3, %v7367_v58, -inf }
 0x7bf   :  { %2083 = vmax.xlane.f32.xlu1 %v2082_v47 }
 0x7c3   :  { %v2057_v49 = vpop.f32.mrf.mxu2 }
 0x7c4   :  { %v7371_v14 = vmul.f32 0.5, %v2057_v49 }
 0x7c6   :  { %v2085_v54 = vsel %vm368_vm3, %v7371_v14, -inf }
 0x7c7   :  { %2086 = vmax.xlane.f32.xlu0 %v2085_v54 }
 0x7cb   :  { %v2060_v55 = vpop.f32.mrf.mxu2 }
 0x7cc   :  { %v7375_v56 = vmul.f32 0.5, %v2060_v55 }
 0x7ce   :  { %v2088_v59 = vsel %vm368_vm3, %v7375_v56, -inf }
 0x7cf   :  { %2089 = vmax.xlane.f32.xlu0 %v2088_v59  ;;  %v7416_v59 = vpop.f32.mrf.mxu3 }
 0x7d3   :  { %v2063_v60 = vpop.f32.mrf.mxu2 }
 0x7d4   :  { %v7379_v61 = vmul.f32 0.5, %v2063_v60 }
 0x7d6   :  { %v2091_v0 = vsel %vm1241_vm1, %v7379_v61, -inf }
 0x7d7   :  { %2092 = vmax.xlane.f32.xlu0 %v2091_v0  ;;  %v1570_v3 = vpop.xlane.xlu1 %1569 }
 0x7d8   :  { %v1589_v8 = vsub.f32 %v1561_v62, %v1570_v3 }
 0x7da   :  { %v1596_v10 = vmul.f32 1.442695, %v1589_v8  ;;  %v1198_v8 = vpop.f32.mrf.mxu3 }
 0x7dc   :  { %6214 = vpow2.f32 %v1596_v10 }
 0x7df   :  { %v1573_v15 = vpop.xlane.xlu0 %1572 }
 0x7e0   :  { %v1590_v16 = vsub.f32 %v1562_v2, %v1573_v15 }
 0x7e2   :  { %v7383_v20 = vpop.eup %6214  ;;  %v1598_v4 = vmul.f32 1.442695, %v1590_v16 }
 0x7e3   :  { %v1610_v22 = vsel %vm368_vm3, %v7383_v20, 0.0 }
 0x7e4   :  { %6216 = vpow2.f32 %v1598_v4  ;;  %1611 = vadd.xlane.f32.xlu0 %v1610_v22 }
 0x7e7   :  { %v1576_v23 = vpop.xlane.xlu2 %1575 }
 0x7e8   :  { %v1591_v26 = vsub.f32 %v7333_v13, %v1576_v23 }
 0x7ea   :  { %v7388_v48 = vpop.eup %6216  ;;  %v1600_v31 = vmul.f32 1.442695, %v1591_v26  ;;  %v1201_v26 = vpop.f32.mrf.mxu3 }
 0x7eb   :  { %v1613_v62 = vsel %vm368_vm3, %v7388_v48, 0.0 }
 0x7ec   :  { %6218 = vpow2.f32 %v1600_v31  ;;  %1614 = vadd.xlane.f32.xlu2 %v1613_v62 }
 0x7ef   :  { %v1579_v2 = vpop.xlane.xlu1 %1578 }
 0x7f0   :  { %v1592_v33 = vsub.f32 %v7337_v17, %v1579_v2 }
 0x7f2   :  { %v7393_v9 = vpop.eup %6218  ;;  %v1602_v40 = vmul.f32 1.442695, %v1592_v33 }
 0x7f3   :  { %v1616_v44 = vsel %vm368_vm3, %v7393_v9, 0.0 }
 0x7f4   :  { %6220 = vpow2.f32 %v1602_v40  ;;  %1617 = vadd.xlane.f32.xlu1 %v1616_v44  ;;  %v7426_v44 = vmul.f32 0.5, %v1198_v8 }
 0x7f7   :  { %v1582_v13 = vpop.xlane.xlu0 %1581 }
 0x7f8   :  { %v1593_v5 = vsub.f32 %v7341_v21, %v1582_v13 }
 0x7fa   :  { %v7398_v12 = vpop.eup %6220  ;;  %v1604_v45 = vmul.f32 1.442695, %v1593_v5  ;;  %v1204_v5 = vpop.f32.mrf.mxu3 }
 0x7fb   :  { %v1619_v47 = vsel %vm368_vm3, %v7398_v12, 0.0 }
 0x7fc   :  { %6222 = vpow2.f32 %v1604_v45  ;;  %1620 = vadd.xlane.f32.xlu0 %v1619_v47  ;;  %v1226_v45 = vsel %vm368_vm3, %v7426_v44, -inf }
 0x7ff   :  { %v1585_v17 = vpop.xlane.xlu2 %1584 }
 0x800   :  { %v1594_v4 = vsub.f32 %v7345_v53, %v1585_v17 }
 0x802   :  { %v7402_v49 = vpop.eup %6222  ;;  %v1606_v2 = vmul.f32 1.442695, %v1594_v4 }
 0x803   :  { %v1622_v54 = vsel %vm368_vm3, %v7402_v49, 0.0 }
 0x804   :  { %1623 = vadd.xlane.f32.xlu2 %v1622_v54 }
 0x807   :  { %v1746_v55 = vpop.permute.xlu2 %1745 }
 0x808   :  { %1812 = vmatpush.msra.mxu0 %v1746_v55 }
 0x80d   :  { %6054 = vrot.lane.b32.xlu1 %v7125_v28, %s6527_s8 }
 0x80f   :  { %v1588_v10 = vpop.xlane.xlu1 %1587 }
 0x810   :  { %2259 = vrot.lane.b32.xlu0 %v7133_v34, %s6527_s8  ;;  %v1595_v53 = vsub.f32 %v7349_v27, %v1588_v10 }
 0x815   :  { %6064 = vrot.lane.b32.xlu1 %v7095_v57, %s6527_s8 }
 0x81a   :  { %v2075_v21 = vpop.xlane.xlu0 %2074 }
 0x81b   :  { %v2094_v27 = vsub.f32 %v7353_v35, %v2075_v21  ;;  %v1207_v35 = vpop.f32.mrf.mxu3 }
 0x81c   :  { %6059 = vrot.lane.b32.xlu2 %v7099_v19, %s6527_s8 }
 0x81d   :  { %6069 = vrot.lane.b32.xlu1 %v7302_v7, %s6527_s8  ;;  %v2101_v8 = vmul.f32 1.442695, %v2094_v27 }
 0x822   :  { %v2078_v60 = vpop.xlane.xlu0 %2077 }
 0x823   :  { %v2095_v0 = vsub.f32 %v7359_v43, %v2078_v60 }
 0x825   :  { %v2103_v3 = vmul.f32 1.442695, %v2095_v0  ;;  %v7443_v0 = vmul.f32 0.5, %v1201_v26  ;;  %v7458_v26 = vmul.f32 0.5, %v1204_v5 }
 0x827   :  { %6224 = vpow2.f32 %v2103_v3 }
 0x82a   :  { %v2081_v15 = vpop.xlane.xlu0 %2080 }
 0x82b   :  { %v2096_v16 = vsub.f32 %v7363_v6, %v2081_v15 }
 0x82d   :  { %v7421_v23 = vpop.eup %6224  ;;  %v2105_v31 = vmul.f32 1.442695, %v2096_v16  ;;  %v1229_v16 = vsel %vm368_vm3, %v7443_v0, -inf }
 0x82e   :  { %v2118_v43 = vsel %vm368_vm3, %v7421_v23, 0.0 }
 0x82f   :  { %6226 = vpow2.f32 %v2105_v31 }
 0x830   :  { %6228 = vpow2.f32 %v1606_v2  ;;  %v1232_v2 = vsel %vm368_vm3, %v7458_v26, -inf }
 0x832   :  { %v2084_v22 = vpop.xlane.xlu1 %2083 }
 0x833   :  { %v2097_v62 = vsub.f32 %v7367_v58, %v2084_v22  ;;  %v1608_v58 = vmul.f32 1.442695, %v1595_v53 }
 0x835   :  { %v2107_v40 = vmul.f32 1.442695, %v2097_v62  ;;  %v7430_v13 = vpop.eup %6226 }
 0x836   :  { %v7434_v47 = vpop.eup %6228  ;;  %v2121_v54 = vsel %vm368_vm3, %v7430_v13, 0.0 }
 0x837   :  { %6230 = vpow2.f32 %v2107_v40  ;;  %v1625_v60 = vsel %vm368_vm3, %v7434_v47, 0.0 }
 0x838   :  { %6232 = vpow2.f32 %v1608_v58 }
 0x83a   :  { %2119 = vadd.xlane.f32.xlu0 %v2118_v43  ;;  %v2087_v33 = vpop.xlane.xlu0 %2086  ;;  %v1210_v43 = vpop.f32.mrf.mxu3 }
 0x83b   :  { %v2098_v6 = vsub.f32 %v7371_v14, %v2087_v33 }
 0x83d   :  { %v2109_v17 = vmul.f32 1.442695, %v2098_v6  ;;  %v7439_v14 = vpop.eup %6230  ;;  %v7470_v6 = vmul.f32 0.5, %v1210_v43 }
 0x83e   :  { %v2124_v10 = vsel %vm368_vm3, %v7439_v14, 0.0  ;;  %v7448_v15 = vpop.eup %6232 }
 0x83f   :  { %6234 = vpow2.f32 %v2109_v17  ;;  %v1628_v22 = vsel %vm1241_vm1, %v7448_v15, 0.0  ;;  %v1238_v58 = vsel %vm368_vm3, %v7470_v6, -inf }
 0x840   :  { %6236 = vpow2.f32 %v2101_v8 }
 0x842   :  { %1227 = vmax.xlane.f32.xlu0 %v1226_v45  ;;  %v2090_v55 = vpop.xlane.xlu0 %2089  ;;  %v7476_v45 = vmul.f32 0.5, %v1207_v35 }
 0x843   :  { %v2099_v3 = vsub.f32 %v7375_v56, %v2090_v55 }
 0x845   :  { %2122 = vadd.xlane.f32.xlu2 %v2121_v54  ;;  %v2111_v21 = vmul.f32 1.442695, %v2099_v3  ;;  %v7452_v4 = vpop.eup %6234 }
 0x846   :  { %v2127_v31 = vsel %vm368_vm3, %v7452_v4, 0.0  ;;  %v7462_v62 = vpop.eup %6236 }
 0x847   :  { %1626 = vadd.xlane.f32.xlu1 %v1625_v60  ;;  %6238 = vpow2.f32 %v2111_v21  ;;  %v2115_v40 = vsel %vm368_vm3, %v7462_v62, 0.0  ;;  %v1235_v60 = vsel %vm368_vm3, %v7476_v45, -inf }
 0x84a   :  { %2125 = vadd.xlane.f32.xlu0 %v2124_v10  ;;  %v7456_v56 = vpop.xlane.xlu0 %2092 }
 0x84d   :  { %1230 = vmax.xlane.f32.xlu2 %v1229_v16  ;;  %v7466_v33 = vpop.eup %6238 }
 0x84e   :  { %v2130_v5 = vsel %vm368_vm3, %v7466_v33, 0.0 }
 0x84f   :  { %1629 = vadd.xlane.f32.xlu1 %v1628_v22 }
 0x852   :  { %2128 = vadd.xlane.f32.xlu0 %v2127_v31 }
 0x855   :  { %1233 = vmax.xlane.f32.xlu2 %v1232_v2 }
 0x857   :  { %v1612_v53 = vpop.xlane.xlu0 %1611  ;;  %2116 = vadd.xlane.f32.xlu1 %v2115_v40 }
 0x858   :  { %6240 = vrcp.f32 %v1612_v53  ;;  %v1642_v3 = vand.u32 2147483648, %v1612_v53  ;;  %v1640_v10 = vand.u32 2147483647, %v1612_v53  ;;  %vm1636_vm5 = vweird.f32 %v1612_v53 }
 0x85a   :  { %2131 = vadd.xlane.f32.xlu0 %v2130_v5  ;;  %v1643_v35 = vor.u32 1.1754944e-38, %v1642_v3  ;;  %vm1641_vm7 = vcmp.eq.f32.partialorder %v1640_v10, 8.507059e+37 }
 0x85d   :  { %1239 = vmax.xlane.f32.xlu2 %v1238_v58 }
 0x85e   :  { %v6241_v17 = vpop.eup %6240 }
 0x85f   :  { %v1632_v54 = vmul.f32 %v6241_v17, %v1612_v53  ;;  %v1615_v27 = vpop.xlane.xlu2 %1614  ;;  %vm1637_vm2 = vweird.f32 %v6241_v17 }
 0x860   :  { %6242 = vrcp.f32 %v1615_v27  ;;  %vm1638_vm6 = vmor %vm1636_vm5, %vm1637_vm2  ;;  %v1657_v58 = vand.u32 2147483648, %v1615_v27  ;;  %vm1651_vm9 = vweird.f32 %v1615_v27 }
 0x861   :  { %v1633_v55 = vsub.f32 1.0, %v1632_v54 }
 0x862   :  { %1236 = vmax.xlane.f32.xlu0 %v1235_v60  ;;  %v1658_v3 = vor.u32 1.1754944e-38, %v1657_v58 }
 0x863   :  { %v1634_v8 = vmul.f32 %v6241_v17, %v1633_v55  ;;  %v1655_v55 = vand.u32 2147483647, %v1615_v27 }
 0x865   :  { %v1635_v21 = vadd.f32 %v6241_v17, %v1634_v8  ;;  %vm1656_vm11 = vcmp.eq.f32.partialorder %v1655_v55, 8.507059e+37 }
 0x866   :  { %v6243_v16 = vpop.eup %6242 }
 0x867   :  { %v1639_v22 = vsel %vm1638_vm6, %v6241_v17, %v1635_v21  ;;  %v1647_v31 = vmul.f32 %v6243_v16, %v1615_v27  ;;  %v1618_v2 = vpop.xlane.xlu1 %1617  ;;  %vm1652_vm8 = vweird.f32 %v6243_v16 }
 0x868   :  { %6244 = vrcp.f32 %v1618_v2  ;;  %v1644_v43 = vsel %vm1641_vm7, %v1643_v35, %v1639_v22  ;;  %vm1653_vm10 = vmor %vm1651_vm9, %vm1652_vm8  ;;  %v1672_v22 = vand.u32 2147483648, %v1618_v2  ;;  %v1670_v27 = vand.u32 2147483647, %v1618_v2 }
 0x869   :  { %v1648_v40 = vsub.f32 1.0, %v1647_v31  ;;  %v1645_v5 = vmul.f32 %v7383_v20, %v1644_v43  ;;  %vm1666_vm13 = vweird.f32 %v1618_v2 }
 0x86a   :  { %vm1671_vm5 = vcmp.eq.f32.partialorder %v1670_v27, 8.507059e+37 }
 0x86b   :  { %5659 = vmatmul.msk.f32.vlgmr.msra.gmra.mxu0 %vm368_vm3, %v1645_v5  ;;  %v1649_v54 = vmul.f32 %v6243_v16, %v1648_v40 }
 0x86d   :  { %v1650_v60 = vadd.f32 %v6243_v16, %v1649_v54 }
 0x86e   :  { %v6245_v53 = vpop.eup %6244 }
 0x86f   :  { %v1662_v17 = vmul.f32 %v6245_v53, %v1618_v2  ;;  %v1621_v8 = vpop.xlane.xlu0 %1620  ;;  %v1654_v10 = vsel %vm1653_vm10, %v6243_v16, %v1650_v60  ;;  %vm1667_vm12 = vweird.f32 %v6245_v53  ;;  %v1673_v16 = vor.u32 1.1754944e-38, %v1672_v22 }
 0x870   :  { %6246 = vrcp.f32 %v1621_v8  ;;  %2241 = vrot.lane.b32.xlu1 %v7182_v41, %s6527_s8  ;;  %v1659_v20 = vsel %vm1656_vm11, %v1658_v3, %v1654_v10  ;;  %vm1668_vm2 = vmor %vm1666_vm13, %vm1667_vm12  ;;  %v1685_v10 = vand.u32 2147483647, %v1621_v8  ;;  %vm1681_vm7 = vweird.f32 %v1621_v8 }
 0x871   :  { %v1663_v21 = vsub.f32 1.0, %v1662_v17  ;;  %v1660_v35 = vmul.f32 %v7388_v48, %v1659_v20  ;;  %v1687_v17 = vand.u32 2147483648, %v1621_v8 }
 0x872   :  { %vm1686_vm9 = vcmp.eq.f32.partialorder %v1685_v10, 8.507059e+37 }
 0x873   :  { %5660 = vmatmul.msk.f32.gmra.mxu0 %vm368_vm3, %v1660_v35  ;;  %v1664_v31 = vmul.f32 %v6245_v53, %v1663_v21 }
 0x875   :  { %v1665_v43 = vadd.f32 %v6245_v53, %v1664_v31 }
 0x876   :  { %v6247_v40 = vpop.eup %6246 }
 0x877   :  { %v1677_v5 = vmul.f32 %v6247_v40, %v1621_v8  ;;  %v1624_v58 = vpop.xlane.xlu2 %1623  ;;  %v1669_v54 = vsel %vm1668_vm2, %v6245_v53, %v1665_v43  ;;  %vm1682_vm6 = vweird.f32 %v6247_v40  ;;  %v1688_v53 = vor.u32 1.1754944e-38, %v1687_v17 }
 0x878   :  { %6248 = vrcp.f32 %v1624_v58  ;;  %v1674_v55 = vsel %vm1671_vm5, %v1673_v16, %v1669_v54  ;;  %vm1683_vm8 = vmor %vm1681_vm7, %vm1682_vm6  ;;  %v1702_v43 = vand.u32 2147483648, %v1624_v58  ;;  %vm1696_vm11 = vweird.f32 %v1624_v58 }
 0x879   :  { %v1678_v60 = vsub.f32 1.0, %v1677_v5  ;;  %v1675_v48 = vmul.f32 %v7393_v9, %v1674_v55  ;;  %v1700_v55 = vand.u32 2147483647, %v1624_v58  ;;  %vm1858_vm6 = vcmask 1043456  }
 0x87b   :  { %5661 = vmatmul.msk.f32.gmra.mxu0 %vm368_vm3, %v1675_v48  ;;  %v1679_v3 = vmul.f32 %v6247_v40, %v1678_v60  ;;  %v1703_v48 = vor.u32 1.1754944e-38, %v1702_v43  ;;  %vm1701_vm13 = vcmp.eq.f32.partialorder %v1700_v55, 8.507059e+37  ;;  %v7496_v43 = vmul.f32 0.5, %v7416_v59 }
 0x87d   :  { %v1680_v20 = vadd.f32 %v6247_v40, %v1679_v3 }
 0x87e   :  { %v6249_v2 = vpop.eup %6248 }
 0x87f   :  { %v1692_v21 = vmul.f32 %v6249_v2, %v1624_v58  ;;  %v6055_v35 = vpop.permute.xlu1 %6054  ;;  %v1684_v22 = vsel %vm1683_vm8, %v6247_v40, %v1680_v20  ;;  %vm1697_vm10 = vweird.f32 %v6249_v2  ;;  %v6060_v8 = vpop.permute.xlu2 %6059 }
 0x880   :  { %v1689_v27 = vsel %vm1686_vm9, %v1688_v53, %v1684_v22  ;;  %v6056_v54 = vunpack.i.l.bf16 %v6055_v35  ;;  %v6057_v60 = vunpack.i.h.bf16 %v6055_v35  ;;  %vm1698_vm12 = vmor %vm1696_vm11, %vm1697_vm10  ;;  %v6061_v3 = vunpack.i.l.bf16 %v6060_v8 }
 0x881   :  { %v1693_v31 = vsub.f32 1.0, %v1692_v21  ;;  %v1690_v9 = vmul.f32 %v7398_v12, %v1689_v27  ;;  %v6062_v20 = vunpack.i.h.bf16 %v6060_v8  ;;  %v2100_v53 = vsub.f32 %v7379_v61, %v7456_v56 }
 0x882   :  { %v2260_v16 = vpop.permute.xlu0 %2259 }
 0x883   :  { %v1694_v5 = vmul.f32 %v6249_v2, %v1693_v31  ;;  %5699 = vmatpush.msk.msrb.mxu0 %vm1413_vm14, %v2260_v16 }
 0x884   :  { %5662 = vmatmul.msk.f32.gmra.mxu0 %vm368_vm3, %v1690_v9 }
 0x885   :  { %2300 = vmatpush.msrb.mxu0 %v6056_v54  ;;  %v1695_v40 = vadd.f32 %v6249_v2, %v1694_v5  ;;  %v1213_v5 = vpop.f32.mrf.mxu3 }
 0x886   :  { %v7504_v61 = vmul.f32 0.5, %v1213_v5 }
 0x887   :  { %v6065_v17 = vpop.permute.xlu1 %6064  ;;  %2301 = vmatpush.msrb.mxu0 %v6057_v60  ;;  %v1699_v10 = vsel %vm1698_vm12, %v6249_v2, %v1695_v40  ;;  %v2113_v2 = vmul.f32 1.442695, %v2100_v53 }
 0x888   :  { %v1704_v12 = vsel %vm1701_vm13, %v1703_v48, %v1699_v10  ;;  %v6066_v22 = vunpack.i.l.bf16 %v6065_v17  ;;  %v6067_v58 = vunpack.i.h.bf16 %v6065_v17  ;;  %v1242_v56 = vsel %vm1241_vm1, %v7504_v61, -inf }
 0x889   :  { %2302 = vmatpush.msrb.mxu0 %v6061_v3  ;;  %v1705_v21 = vmul.f32 %v7402_v49, %v1704_v12  ;;  %6250 = vpow2.f32 %v2113_v2  ;;  %v1223_v49 = vsel %vm368_vm3, %v7496_v43, -inf }
 0x88b   :  { %2303 = vmatpush.msrb.mxu0 %v6062_v20 }
 0x88c   :  { %5663 = vmatmul.msk.f32.gmra.mxu0 %vm368_vm3, %v1705_v21 }
 0x88d   :  { %2304 = vmatpush.msrb.mxu0 %v6066_v22 }
 0x88f   :  { %v6070_v35 = vpop.permute.xlu1 %6069  ;;  %2305 = vmatpush.msrb.mxu0 %v6067_v58  ;;  %v7500_v16 = vpop.eup %6250 }
 0x890   :  { %v6071_v31 = vunpack.i.l.bf16 %v6070_v35  ;;  %v6072_v27 = vunpack.i.h.bf16 %v6070_v35  ;;  %v2133_v9 = vsel %vm1241_vm1, %v7500_v16, 0.0 }
 0x892   :  { %2306 = vmatpush.msrb.mxu0 %v6071_v31 }
 0x894   :  { %2307 = vmatpush.msrb.mxu0 %v6072_v27 }
 0x89a   :  { %1224 = vmax.xlane.f32.xlu1 %v1223_v49  ;;  %v1122_v49 = vld [vmem:[%s9247_s14] sm:$0xff] }
 0x89b   :  { %v1836_v5 = vrot.slane %v1122_v49, 4  ;;  %5674 = vmatpush.msk.msra.mxu1 %vm1858_vm6, %v1122_v49 }
 0x89d   :  { %5666 = vmatpush.msk.msra.mxu3 %vm1858_vm6, %v1836_v5 }
 0x8a2   :  { %2134 = vadd.xlane.f32.xlu1 %v2133_v9 }
 0x8aa   :  { %1243 = vmax.xlane.f32.xlu1 %v1242_v56 }
 0x8ad   :  { %v7508_v59 = vpop.xlane.xlu0 %2119 }
 0x8b5   :  { %v1228_v54 = vpop.xlane.xlu0 %1227 }
 0x8b6   :  { %v1246_v55 = vsub.f32 %v7426_v44, %v1228_v54 }
 0x8b8   :  { %v1254_v8 = vmul.f32 1.442695, %v1246_v55  ;;  %v7511_v60 = vpop.xlane.xlu2 %2122 }
 0x8ba   :  { %6252 = vpow2.f32 %v1254_v8  ;;  %v1627_v40 = vpop.xlane.xlu1 %1626 }
 0x8bb   :  { %6254 = vrcp.f32 %v1627_v40  ;;  %v1717_v31 = vand.u32 2147483648, %v1627_v40  ;;  %v1715_v27 = vand.u32 2147483647, %v1627_v40  ;;  %vm1711_vm5 = vweird.f32 %v1627_v40 }
 0x8bd   :  { %v7513_v48 = vpop.xlane.xlu0 %2125  ;;  %v1718_v56 = vor.u32 1.1754944e-38, %v1717_v31  ;;  %vm1716_vm8 = vcmp.eq.f32.partialorder %v1715_v27, 8.507059e+37 }
 0x8c0   :  { %v7515_v3 = vpop.eup %6252  ;;  %v1231_v17 = vpop.xlane.xlu2 %1230 }
 0x8c1   :  { %v6255_v10 = vpop.eup %6254  ;;  %v1247_v12 = vsub.f32 %v7443_v0, %v1231_v17  ;;  %v1269_v20 = vsel %vm368_vm3, %v7515_v3, 0.0 }
 0x8c2   :  { %v1707_v21 = vmul.f32 %v6255_v10, %v1627_v40  ;;  %1270 = vadd.xlane.f32.xlu2 %v1269_v20  ;;  %v1630_v44 = vpop.xlane.xlu1 %1629  ;;  %vm1712_vm2 = vweird.f32 %v6255_v10 }
 0x8c3   :  { %v1256_v22 = vmul.f32 1.442695, %v1247_v12  ;;  %6256 = vrcp.f32 %v1630_v44  ;;  %vm1713_vm7 = vmor %vm1711_vm5, %vm1712_vm2  ;;  %vm1726_vm10 = vweird.f32 %v1630_v44 }
 0x8c4   :  { %v1708_v58 = vsub.f32 1.0, %v1707_v21  ;;  %v1732_v21 = vand.u32 2147483648, %v1630_v44 }
 0x8c5   :  { %6258 = vpow2.f32 %v1256_v22  ;;  %v7520_v35 = vpop.xlane.xlu0 %2128 }
 0x8c6   :  { %v1709_v53 = vmul.f32 %v6255_v10, %v1708_v58  ;;  %6260 = vrcp.f32 %v7508_v59  ;;  %v1733_v5 = vor.u32 1.1754944e-38, %v1732_v21 }
 0x8c8   :  { %v7522_v2 = vpop.xlane.xlu2 %1233  ;;  %v1710_v0 = vadd.f32 %v6255_v10, %v1709_v53  ;;  %v1730_v53 = vand.u32 2147483647, %v1630_v44 }
 0x8c9   :  { %v6257_v9 = vpop.eup %6256 }
 0x8ca   :  { %v1722_v54 = vmul.f32 %v6257_v9, %v1630_v44  ;;  %v2117_v55 = vpop.xlane.xlu1 %2116  ;;  %v1714_v8 = vsel %vm1713_vm7, %v6255_v10, %v1710_v0  ;;  %vm1727_vm9 = vweird.f32 %v6257_v9  ;;  %vm1731_vm12 = vcmp.eq.f32.partialorder %v1730_v53, 8.507059e+37 }
 0x8cb   :  { %v7527_v17 = vpop.eup %6258  ;;  %6262 = vrcp.f32 %v2117_v55  ;;  %v1719_v20 = vsel %vm1716_vm8, %v1718_v56, %v1714_v8  ;;  %vm1728_vm11 = vmor %vm1726_vm10, %vm1727_vm9  ;;  %vm2141_vm2 = vweird.f32 %v2117_v55  ;;  %vm2156_vm9 = vweird.f32 %v7508_v59 }
 0x8cc   :  { %v1723_v40 = vsub.f32 1.0, %v1722_v54  ;;  %v1272_v12 = vsel %vm368_vm3, %v7527_v17, 0.0  ;;  %v1720_v10 = vmul.f32 %v7434_v47, %v1719_v20  ;;  %v7535_v31 = vpop.eup %6260  ;;  %6264 = vrcp.f32 %v7511_v60 }
 0x8cd   :  { %1273 = vadd.xlane.f32.xlu1 %v1272_v12  ;;  %v7532_v22 = vpop.xlane.xlu0 %2131  ;;  %v2152_v47 = vmul.f32 %v7535_v31, %v7508_v59  ;;  %vm2157_vm8 = vweird.f32 %v7535_v31 }
 0x8ce   :  { %v1724_v58 = vmul.f32 %v6257_v9, %v1723_v40  ;;  %5664 = vmatmul.msk.f32.gmra.mxu0 %vm368_vm3, %v1720_v10  ;;  %vm2158_vm10 = vmor %vm2156_vm9, %vm2157_vm8  ;;  %vm2186_vm8 = vweird.f32 %v7513_v48 }
 0x8cf   :  { %v2153_v50 = vsub.f32 1.0, %v2152_v47 }
 0x8d0   :  { %v1240_v27 = vpop.xlane.xlu2 %1239  ;;  %v1725_v0 = vadd.f32 %v6257_v9, %v1724_v58 }
 0x8d1   :  { %v6263_v49 = vpop.eup %6262  ;;  %v1250_v56 = vsub.f32 %v7470_v6, %v1240_v27  ;;  %v2147_v27 = vand.u32 2147483648, %v2117_v55 }
 0x8d2   :  { %v2137_v54 = vmul.f32 %v6263_v49, %v2117_v55  ;;  %v1729_v8 = vsel %vm1728_vm11, %v6257_v9, %v1725_v0  ;;  %vm2142_vm13 = vweird.f32 %v6263_v49  ;;  %v6265_v53 = vpop.eup %6264  ;;  %v2145_v0 = vand.u32 2147483647, %v2117_v55 }
 0x8d3   :  { %v1262_v40 = vmul.f32 1.442695, %v1250_v56  ;;  %v1734_v12 = vsel %vm1731_vm12, %v1733_v5, %v1729_v8  ;;  %vm2143_vm5 = vmor %vm2141_vm2, %vm2142_vm13  ;;  %v2148_v8 = vor.u32 1.1754944e-38, %v2147_v27  ;;  %vm2172_vm12 = vweird.f32 %v6265_v53 }
 0x8d4   :  { %v2138_v44 = vsub.f32 1.0, %v2137_v54  ;;  %v1735_v58 = vmul.f32 %v7448_v15, %v1734_v12  ;;  %v2154_v15 = vmul.f32 %v7535_v31, %v2153_v50  ;;  %vm2146_vm7 = vcmp.eq.f32.partialorder %v2145_v0, 8.507059e+37 }
 0x8d5   :  { %6266 = vpow2.f32 %v1262_v40  ;;  %v1237_v20 = vpop.xlane.xlu0 %1236  ;;  %v2162_v50 = vand.u32 2147483648, %v7508_v59  ;;  %vm2171_vm13 = vweird.f32 %v7511_v60 }
 0x8d6   :  { %v2139_v21 = vmul.f32 %v6263_v49, %v2138_v44  ;;  %v1249_v10 = vsub.f32 %v7476_v45, %v1237_v20  ;;  %5665 = vmatmul.msk.f32.gmra.mxu0 %vm368_vm3, %v1735_v58  ;;  %v2167_v45 = vmul.f32 %v6265_v53, %v7511_v60  ;;  %v2155_v47 = vadd.f32 %v7535_v31, %v2154_v15  ;;  %vm2173_vm2 = vmor %vm2171_vm13, %vm2172_vm12 }
 0x8d7   :  { %v2163_v27 = vor.u32 1.1754944e-38, %v2162_v50  ;;  %vm2201_vm12 = vweird.f32 %v7520_v35 }
 0x8d8   :  { %v2140_v6 = vadd.f32 %v6263_v49, %v2139_v21  ;;  %v1260_v9 = vmul.f32 1.442695, %v1249_v10  ;;  %v2168_v55 = vsub.f32 1.0, %v2167_v45  ;;  %v2160_v21 = vand.u32 2147483647, %v7508_v59 }
 0x8d9   :  { %v2177_v59 = vand.u32 2147483648, %v7511_v60 }
 0x8da   :  { %6268 = vpow2.f32 %v1260_v9  ;;  %v2144_v56 = vsel %vm2143_vm5, %v6263_v49, %v2140_v6  ;;  %v2169_v10 = vmul.f32 %v6265_v53, %v2168_v55  ;;  %v2159_v9 = vsel %vm2158_vm10, %v7535_v31, %v2155_v47 }
 0x8db   :  { %v7545_v5 = vpop.eup %6266  ;;  %6270 = vrcp.f32 %v7513_v48  ;;  %v2149_v40 = vsel %vm2146_vm7, %v2148_v8, %v2144_v56  ;;  %vm2161_vm11 = vcmp.eq.f32.partialorder %v2160_v21, 8.507059e+37  ;;  %v2175_v8 = vand.u32 2147483647, %v7511_v60 }
 0x8dc   :  { %v1281_v54 = vsel %vm368_vm3, %v7545_v5, 0.0  ;;  %v2150_v20 = vmul.f32 %v7462_v62, %v2149_v40  ;;  %6272 = vrcp.f32 %v7520_v35  ;;  %v2164_v0 = vsel %vm2161_vm11, %v2163_v27, %v2159_v9 }
 0x8dd   :  { %1282 = vadd.xlane.f32.xlu1 %v1281_v54  ;;  %v2170_v45 = vadd.f32 %v6265_v53, %v2169_v10  ;;  %v2165_v54 = vmul.f32 %v7421_v23, %v2164_v0  ;;  %6274 = vrcp.f32 %v7532_v22  ;;  %v2178_v47 = vor.u32 1.1754944e-38, %v2177_v59 }
 0x8de   :  { %vm2176_vm5 = vcmp.eq.f32.partialorder %v2175_v8, 8.507059e+37  ;;  %v2192_v23 = vand.u32 2147483648, %v7513_v48  ;;  %v2190_v10 = vand.u32 2147483647, %v7513_v48 }
 0x8df   :  { %v2174_v55 = vsel %vm2173_vm2, %v6265_v53, %v2170_v45  ;;  %v2205_v45 = vand.u32 2147483647, %v7520_v35 }
 0x8e0   :  { %v7552_v12 = vpop.eup %6268  ;;  %v2179_v50 = vsel %vm2176_vm5, %v2178_v47, %v2174_v55  ;;  %v2193_v27 = vor.u32 1.1754944e-38, %v2192_v23  ;;  %vm2191_vm10 = vcmp.eq.f32.partialorder %v2190_v10, 8.507059e+37  ;;  %v2222_v55 = vand.u32 2147483648, %v7532_v22 }
 0x8e1   :  { %v6271_v44 = vpop.eup %6270  ;;  %v1278_v49 = vsel %vm368_vm3, %v7552_v12, 0.0  ;;  %v2180_v60 = vmul.f32 %v7430_v13, %v2179_v50  ;;  %vm2206_vm2 = vcmp.eq.f32.partialorder %v2205_v45, 8.507059e+37 }
 0x8e2   :  { %1279 = vadd.xlane.f32.xlu2 %v1278_v49  ;;  %v2242_v58 = vpop.permute.xlu1 %2241  ;;  %v2182_v6 = vmul.f32 %v6271_v44, %v7513_v48  ;;  %v6273_v56 = vpop.eup %6272  ;;  %vm2187_vm7 = vweird.f32 %v6271_v44  ;;  %v2207_v48 = vand.u32 2147483648, %v7520_v35  ;;  %v2223_v50 = vor.u32 1.1754944e-38, %v2222_v55 }
 0x8e3   :  { %2308 = vmatpush.msrb.mxu0 %v2242_v58  ;;  %v2197_v40 = vmul.f32 %v6273_v56, %v7520_v35  ;;  %v6275_v21 = vpop.eup %6274  ;;  %vm2188_vm9 = vmor %vm2186_vm8, %vm2187_vm7  ;;  %vm2202_vm11 = vweird.f32 %v6273_v56  ;;  %vm2216_vm7 = vweird.f32 %v7532_v22  ;;  %v2220_v35 = vand.u32 2147483647, %v7532_v22 }
 0x8e4   :  { %5700 = vmatmul.msk.f32.vlgmr.msrb.gmra.mxu0 %vm368_vm3, %v2150_v20  ;;  %v2183_v62 = vsub.f32 1.0, %v2182_v6  ;;  %v2212_v6 = vmul.f32 %v6275_v21, %v7532_v22  ;;  %vm2203_vm13 = vmor %vm2201_vm12, %vm2202_vm11  ;;  %v2208_v8 = vor.u32 1.1754944e-38, %v2207_v48  ;;  %vm2217_vm5 = vweird.f32 %v6275_v21 }
 0x8e5   :  { %v2198_v49 = vsub.f32 1.0, %v2197_v40  ;;  %vm2218_vm8 = vmor %vm2216_vm7, %vm2217_vm5 }
 0x8e6   :  { %v2184_v31 = vmul.f32 %v6271_v44, %v2183_v62  ;;  %v2213_v62 = vsub.f32 1.0, %v2212_v6 }
 0x8e7   :  { %v2199_v53 = vmul.f32 %v6273_v56, %v2198_v49 }
 0x8e8   :  { %v1814_v15 = vpop.f32.mrf.mxu0  ;;  %v2185_v58 = vadd.f32 %v6271_v44, %v2184_v31  ;;  %v2214_v59 = vmul.f32 %v6275_v21, %v2213_v62 }
 0x8e9   :  { %5667 = vmatmul.msk.f32.vlgmr.msra.gmra.mxu3 %vm1126_vm15, %v1814_v15  ;;  %v2200_v13 = vadd.f32 %v6273_v56, %v2199_v53 }
 0x8ea   :  { %v2189_v9 = vsel %vm2188_vm9, %v6271_v44, %v2185_v58  ;;  %v2215_v40 = vadd.f32 %v6275_v21, %v2214_v59  ;;  %vm2221_vm9 = vcmp.eq.f32.partialorder %v2220_v35, 8.507059e+37 }
 0x8eb   :  { %v2194_v0 = vsel %vm2191_vm10, %v2193_v27, %v2189_v9 }
 0x8ec   :  { %5701 = vmatmul.msk.f32.gmra.mxu0 %vm368_vm3, %v2165_v54  ;;  %v2195_v44 = vmul.f32 %v7439_v14, %v2194_v0  ;;  %v2204_v54 = vsel %vm2203_vm13, %v6273_v56, %v2200_v13  ;;  %v2219_v56 = vsel %vm2218_vm8, %v6275_v21, %v2215_v40  ;;  %v1248_v21 = vsub.f32 %v7458_v26, %v7522_v2 }
 0x8ed   :  { %v2209_v31 = vsel %vm2206_vm2, %v2208_v8, %v2204_v54  ;;  %v2224_v49 = vsel %vm2221_vm9, %v2223_v50, %v2219_v56 }
 0x8ee   :  { %v2210_v14 = vmul.f32 %v7452_v4, %v2209_v31  ;;  %v2225_v4 = vmul.f32 %v7466_v33, %v2224_v49 }
 0x8f0   :  { %v1817_v20 = vpop.f32.mrf.mxu0 }
 0x8f1   :  { %5668 = vmatmul.msk.f32.gmra.mxu3 %vm1126_vm15, %v1817_v20 }
 0x8f4   :  { %5702 = vmatmul.msk.f32.gmra.mxu0 %vm368_vm3, %v2180_v60  ;;  %v1258_v60 = vmul.f32 1.442695, %v1248_v21 }
 0x8f6   :  { %2870 = vrot.lane.b32.xlu1 %v7130_v32, %s6528_s24 }
 0x8f8   :  { %v1820_v15 = vpop.f32.mrf.mxu0 }
 0x8f9   :  { %5669 = vmatmul.msk.f32.gmra.mxu3 %vm1126_vm15, %v1820_v15 }
 0x8fa   :  { %2872 = vrot.lane.b32.xlu2 %v7144_v30, %s6528_s24 }
 0x8fc   :  { %5703 = vmatmul.msk.f32.gmra.mxu0 %vm368_vm3, %v2195_v44 }
 0x8fe   :  { %2862 = vrot.lane.b32.xlu1 %v7114_v25, %s6528_s24 }
 0x901   :  { %v1823_v47 = vpop.f32.mrf.mxu0 }
 0x902   :  { %5670 = vmatmul.msk.f32.gmra.mxu3 %vm1126_vm15, %v1823_v47  ;;  %2866 = vrot.lane.b32.xlu2 %v7105_v18, %s6528_s24 }
 0x904   :  { %5704 = vmatmul.msk.f32.gmra.mxu0 %vm368_vm3, %v2210_v14 }
 0x906   :  { %2856 = vrot.lane.b32.xlu1 %v7167_v39, %s6528_s24 }
 0x909   :  { %v1826_v20 = vpop.f32.mrf.mxu0 }
 0x90a   :  { %5671 = vmatmul.msk.f32.gmra.mxu3 %vm1126_vm15, %v1826_v20  ;;  %2860 = vrot.lane.b32.xlu2 %v7082_v51, %s6528_s24 }
 0x90c   :  { %5705 = vmatmul.msk.f32.gmra.mxu0 %vm368_vm3, %v2225_v4 }
 0x90d   :  { %v1225_v22 = vpop.xlane.xlu1 %1224 }
 0x90e   :  { %v1245_v58 = vsub.f32 %v7496_v43, %v1225_v22  ;;  %2842 = vrot.lane.b32.xlu1 %v7216_v46, %s6528_s24 }
 0x910   :  { %v1252_v23 = vmul.f32 1.442695, %v1245_v58 }
 0x912   :  { %6276 = vpow2.f32 %v1252_v23  ;;  %2854 = vrot.lane.b32.xlu2 %v7190_v36, %s6528_s24 }
 0x915   :  { %v2135_v10 = vpop.xlane.xlu1 %2134 }
 0x916   :  { %6278 = vrcp.f32 %v2135_v10  ;;  %2848 = vrot.lane.b32.xlu1 %v7244_v29, %s6528_s24  ;;  %v2237_v0 = vand.u32 2147483648, %v2135_v10  ;;  %v2235_v48 = vand.u32 2147483647, %v2135_v10  ;;  %vm2231_vm11 = vweird.f32 %v2135_v10 }
 0x917   :  { %6280 = vpow2.f32 %v1258_v60 }
 0x918   :  { %v7617_v33 = vpop.eup %6276  ;;  %v2238_v44 = vor.u32 1.1754944e-38, %v2237_v0  ;;  %vm2236_vm13 = vcmp.eq.f32.partialorder %v2235_v48, 8.507059e+37 }
 0x919   :  { %v1266_v43 = vsel %vm368_vm3, %v7617_v33, 0.0 }
 0x91a   :  { %2844 = vrot.lane.b32.xlu2 %v7214_v42, %s6528_s24  ;;  %1267 = vadd.xlane.f32.xlu0 %v1266_v43 }
 0x91c   :  { %v6279_v26 = vpop.eup %6278 }
 0x91d   :  { %v2227_v2 = vmul.f32 %v6279_v26, %v2135_v10  ;;  %v1244_v53 = vpop.xlane.xlu1 %1243  ;;  %v7623_v6 = vpop.eup %6280  ;;  %vm2232_vm10 = vweird.f32 %v6279_v26 }
 0x91e   :  { %v1251_v9 = vsub.f32 %v7504_v61, %v1244_v53  ;;  %2430 = vrot.lane.b32.xlu1 %v7130_v32, %s6529_s30  ;;  %v1275_v13 = vsel %vm368_vm3, %v7623_v6, 0.0  ;;  %vm2233_vm12 = vmor %vm2231_vm11, %vm2232_vm10 }
 0x91f   :  { %v2228_v27 = vsub.f32 1.0, %v2227_v2 }
 0x920   :  { %v1264_v62 = vmul.f32 1.442695, %v1251_v9 }
 0x921   :  { %v2229_v15 = vmul.f32 %v6279_v26, %v2228_v27 }
 0x922   :  { %6282 = vpow2.f32 %v1264_v62  ;;  %2432 = vrot.lane.b32.xlu2 %v7144_v30, %s6529_s30  ;;  %1276 = vadd.xlane.f32.xlu0 %v1275_v13 }
 0x923   :  { %v2230_v61 = vadd.f32 %v6279_v26, %v2229_v15 }
 0x925   :  { %v2234_v45 = vsel %vm2233_vm12, %v6279_v26, %v2230_v61 }
 0x926   :  { %2426 = vrot.lane.b32.xlu1 %v7105_v18, %s6529_s30  ;;  %v2239_v59 = vsel %vm2236_vm13, %v2238_v44, %v2234_v45 }
 0x927   :  { %v2240_v54 = vmul.f32 %v7500_v16, %v2239_v59  ;;  %v1123_v16 = vld [vmem:[%s9247_s14 + $0x8] sm:$0xff] }
 0x928   :  { %v7635_v8 = vpop.eup %6282  ;;  %5707 = vmatpush.msk.msra.mxu3 %vm1858_vm6, %v1123_v16  ;;  %v2771_v40 = vrot.slane %v1123_v16, 4 }
 0x929   :  { %5706 = vmatmul.msk.f32.gmra.mxu0 %vm368_vm3, %v2240_v54  ;;  %v1284_v31 = vsel %vm1241_vm1, %v7635_v8, 0.0 }
 0x92a   :  { %2428 = vrot.lane.b32.xlu2 %v7117_v24, %s6529_s30  ;;  %1285 = vadd.xlane.f32.xlu0 %v1284_v31 }
 0x92b   :  { %5740 = vmatpush.msk.msra.mxu0 %vm1858_vm6, %v2771_v40 }
 0x92e   :  { %2420 = vrot.lane.b32.xlu1 %v7082_v51, %s6529_s30 }
 0x932   :  { %2424 = vrot.lane.b32.xlu2 %v7141_v37, %s6529_s30 }
 0x935   :  { %v7670_v47 = vpop.xlane.xlu2 %1270 }
 0x936   :  { %2414 = vrot.lane.b32.xlu1 %v7190_v36, %s6529_s30  ;;  %6284 = vrcp.f32 %v7670_v47  ;;  %vm1307_vm10 = vweird.f32 %v7670_v47 }
 0x93a   :  { %2418 = vrot.lane.b32.xlu2 %v7161_v38, %s6529_s30 }
 0x93c   :  { %v6285_v9 = vpop.eup %6284 }
 0x93d   :  { %v1303_v62 = vmul.f32 %v6285_v9, %v7670_v47  ;;  %vm1308_vm8 = vweird.f32 %v6285_v9 }
 0x93e   :  { %2404 = vrot.lane.b32.xlu1 %v7214_v42, %s6529_s30  ;;  %2868 = vrot.lane.b32.xlu0 %v7117_v24, %s6528_s24  ;;  %vm1309_vm11 = vmor %vm1307_vm10, %vm1308_vm8 }
 0x93f   :  { %v1304_v48 = vsub.f32 1.0, %v1303_v62  ;;  %v1313_v62 = vand.u32 2147483648, %v7670_v47 }
 0x940   :  { %v7679_v35 = vpop.xlane.xlu1 %1273 }
 0x941   :  { %v1305_v31 = vmul.f32 %v6285_v9, %v1304_v48 }
 0x942   :  { %2400 = vrot.lane.b32.xlu2 %v7208_v11, %s6529_s30 }
 0x946   :  { %2410 = vrot.lane.b32.xlu1 %v7254_v63, %s6529_s30  ;;  %2864 = vrot.lane.b32.xlu0 %v7141_v37, %s6528_s24 }
 0x94a   :  { %2406 = vrot.lane.b32.xlu2 %v7226_v52, %s6529_s30 }
 0x94b   :  { %v1829_v55 = vpop.f32.mrf.mxu0 }
 0x94c   :  { %5672 = vmatmul.msk.f32.gmra.mxu3 %vm1126_vm15, %v1829_v55 }
 0x94e   :  { %6079 = vrot.lane.b32.xlu1 %v7099_v19, %s6528_s24  ;;  %2858 = vrot.lane.b32.xlu0 %v7161_v38, %s6528_s24 }
 0x950   :  { %v7687_v50 = vpop.xlane.xlu1 %1282 }
 0x952   :  { %2412 = vrot.lane.b32.xlu2 %v7264_v1, %s6529_s30 }
 0x953   :  { %v1832_v14 = vpop.f32.mrf.mxu0 }
 0x954   :  { %5673 = vmatmul.msk.f32.gmra.mxu3 %vm1126_vm15, %v1832_v14 }
 0x955   :  { %v7681_v56 = vpop.xlane.xlu2 %1279 }
 0x956   :  { %6089 = vrot.lane.b32.xlu1 %v7302_v7, %s6528_s24  ;;  %2840 = vrot.lane.b32.xlu0 %v7208_v11, %s6528_s24 }
 0x95a   :  { %3139 = vrot.lane.b32.xlu2 %v7133_v34, %s6528_s24 }
 0x95d   :  { %v2873_v20 = vpop.permute.xlu2 %2872 }
 0x95e   :  { %2846 = vrot.lane.b32.xlu0 %v7226_v52, %s6528_s24 }
 0x961   :  { %v2310_v49 = vpop.f32.mrf.mxu0 }
 0x962   :  { %5708 = vmatmul.msk.f32.vlgmr.msra.gmra.mxu3 %vm1126_vm15, %v2310_v49 }
 0x963   :  { %5748 = vmatpush.xpose.msk.msra.mxu3 %vm1126_vm15, %v2873_v20 }
 0x965   :  { %v7698_v21 = vpop.permute.xlu2 %2866 }
 0x966   :  { %2850 = vrot.lane.b32.xlu0 %v7254_v63, %s6528_s24 }
 0x968   :  { %v2871_v4 = vpop.permute.xlu1 %2870 }
 0x969   :  { %v2313_v22 = vpop.f32.mrf.mxu0  ;;  %5749 = vmatpush.xpose.msk.msra.mxu3 %vm1126_vm15, %v2871_v4 }
 0x96a   :  { %5709 = vmatmul.msk.f32.gmra.mxu3 %vm1126_vm15, %v2313_v22 }
 0x96d   :  { %v7707_v10 = vpop.permute.xlu2 %2860 }
 0x96e   :  { %2852 = vrot.lane.b32.xlu0 %v7264_v1, %s6528_s24 }
 0x970   :  { %v7703_v60 = vpop.permute.xlu1 %2862 }
 0x971   :  { %v2316_v58 = vpop.f32.mrf.mxu0 }
 0x972   :  { %5710 = vmatmul.msk.f32.gmra.mxu3 %vm1126_vm15, %v2316_v58 }
 0x975   :  { %v7715_v53 = vpop.permute.xlu2 %2854 }
 0x976   :  { %2422 = vrot.lane.b32.xlu0 %v7114_v25, %s6529_s30 }
 0x978   :  { %v7710_v26 = vpop.permute.xlu1 %2856 }
 0x979   :  { %v2319_v23 = vpop.f32.mrf.mxu0 }
 0x97a   :  { %5711 = vmatmul.msk.f32.gmra.mxu3 %vm1126_vm15, %v2319_v23  ;;  %v1306_v23 = vadd.f32 %v6285_v9, %v1305_v31 }
 0x97d   :  { %v7724_v15 = vpop.permute.xlu2 %2844 }
 0x97e   :  { %2416 = vrot.lane.b32.xlu0 %v7167_v39, %s6529_s30 }
 0x980   :  { %v7720_v0 = vpop.permute.xlu1 %2842 }
 0x981   :  { %v2322_v43 = vpop.f32.mrf.mxu0 }
 0x982   :  { %5712 = vmatmul.msk.f32.gmra.mxu3 %vm1126_vm15, %v2322_v43 }
 0x985   :  { %v2433_v22 = vpop.permute.xlu2 %2432 }
 0x986   :  { %2402 = vrot.lane.b32.xlu0 %v7216_v46, %s6529_s30 }
 0x988   :  { %v7732_v40 = vpop.permute.xlu1 %2848 }
 0x989   :  { %v2325_v2 = vpop.f32.mrf.mxu0 }
 0x98a   :  { %5713 = vmatmul.msk.f32.gmra.mxu3 %vm1126_vm15, %v2325_v2 }
 0x98d   :  { %v1268_v27 = vpop.xlane.xlu0 %1267 }
 0x98e   :  { %2408 = vrot.lane.b32.xlu0 %v7244_v29, %s6529_s30  ;;  %6286 = vrcp.f32 %v1268_v27  ;;  %v1298_v54 = vand.u32 2147483648, %v1268_v27  ;;  %v1296_v14 = vand.u32 2147483647, %v1268_v27  ;;  %vm1292_vm5 = vweird.f32 %v1268_v27 }
 0x98f   :  { %6288 = vrcp.f32 %v7679_v35 }
 0x990   :  { %v1299_v20 = vor.u32 1.1754944e-38, %v1298_v54  ;;  %vm1297_vm9 = vcmp.eq.f32.partialorder %v1296_v14, 8.507059e+37  ;;  %v1314_v54 = vor.u32 1.1754944e-38, %v1313_v62  ;;  %v2431_v31 = vpop.permute.xlu1 %2430 }
 0x994   :  { %v6287_v13 = vpop.eup %6286 }
 0x995   :  { %v1288_v61 = vmul.f32 %v6287_v13, %v1268_v27  ;;  %v7726_v44 = vpop.xlane.xlu0 %1276  ;;  %v6289_v45 = vpop.eup %6288  ;;  %vm1293_vm2 = vweird.f32 %v6287_v13 }
 0x996   :  { %6074 = vrot.lane.b32.xlu0 %v7125_v28, %s6528_s24  ;;  %6290 = vrcp.f32 %v7726_v44  ;;  %v1318_v16 = vmul.f32 %v6289_v45, %v7679_v35  ;;  %vm1294_vm7 = vmor %vm1292_vm5, %vm1293_vm2  ;;  %vm1323_vm13 = vweird.f32 %v6289_v45  ;;  %vm1322_vm2 = vweird.f32 %v7679_v35 }
 0x997   :  { %v1289_v59 = vsub.f32 1.0, %v1288_v61  ;;  %v1311_v61 = vand.u32 2147483647, %v7670_v47  ;;  %6292 = vrcp.f32 %v7681_v56  ;;  %vm1324_vm5 = vmor %vm1322_vm2, %vm1323_vm13  ;;  %vm1352_vm13 = vweird.f32 %v7681_v56 }
 0x998   :  { %v1319_v4 = vsub.f32 1.0, %v1318_v16  ;;  %6294 = vrcp.f32 %v7687_v50 }
 0x999   :  { %v1290_v55 = vmul.f32 %v6287_v13, %v1289_v59  ;;  %v1310_v59 = vsel %vm1309_vm11, %v6285_v9, %v1306_v23  ;;  %vm1312_vm12 = vcmp.eq.f32.partialorder %v1311_v61, 8.507059e+37  ;;  %v2429_v9 = vpop.permute.xlu2 %2428 }
 0x99a   :  { %v1320_v27 = vmul.f32 %v6289_v45, %v1319_v4 }
 0x99b   :  { %v1291_v49 = vadd.f32 %v6287_v13, %v1290_v55 }
 0x99c   :  { %v7734_v43 = vpop.eup %6290  ;;  %v1321_v47 = vadd.f32 %v6289_v45, %v1320_v27 }
 0x99d   :  { %v1295_v58 = vsel %vm1294_vm7, %v6287_v13, %v1291_v49  ;;  %v1333_v13 = vmul.f32 %v7734_v43, %v7726_v44  ;;  %v7745_v14 = vpop.eup %6292  ;;  %v1328_v49 = vand.u32 2147483648, %v7679_v35  ;;  %vm1338_vm8 = vweird.f32 %v7734_v43 }
 0x99e   :  { %v1300_v2 = vsel %vm1297_vm9, %v1299_v20, %v1295_v58  ;;  %v7751_v20 = vpop.xlane.xlu0 %1285  ;;  %v1348_v58 = vmul.f32 %v7745_v14, %v7681_v56  ;;  %v6295_v27 = vpop.eup %6294  ;;  %vm1337_vm9 = vweird.f32 %v7726_v44 }
 0x99f   :  { %v1301_v48 = vmul.f32 %v7617_v33, %v1300_v2  ;;  %v1315_v33 = vsel %vm1312_vm12, %v1314_v54, %v1310_v59  ;;  %v1334_v16 = vsub.f32 1.0, %v1333_v13  ;;  %v1325_v2 = vsel %vm1324_vm5, %v6289_v45, %v1321_v47  ;;  %vm1339_vm10 = vmor %vm1337_vm9, %vm1338_vm8 }
 0x9a0   :  { %v1316_v4 = vmul.f32 %v7515_v3, %v1315_v33  ;;  %v1329_v62 = vor.u32 1.1754944e-38, %v1328_v49  ;;  %v1349_v61 = vsub.f32 1.0, %v1348_v58  ;;  %v2427_v3 = vpop.permute.xlu1 %2426  ;;  %v1343_v13 = vand.u32 2147483648, %v7726_v44 }
 0x9a1   :  { %5634 = vmatmul.msk.f32.vlgmr.msrb.gmra.mxu1 %vm368_vm3, %v1301_v48  ;;  %v1335_v23 = vmul.f32 %v7734_v43, %v1334_v16  ;;  %v1341_v54 = vand.u32 2147483647, %v7726_v44  ;;  %6296 = vrcp.f32 %v7751_v20  ;;  %v2425_v16 = vpop.permute.xlu2 %2424  ;;  %vm1353_vm12 = vweird.f32 %v7745_v14 }
 0x9a2   :  { %5715 = vmatpush.xpose.msk.msrb.mxu1 %vm1126_vm15, %v2433_v22  ;;  %v1326_v22 = vand.u32 2147483647, %v7679_v35  ;;  %v1350_v33 = vmul.f32 %v7745_v14, %v1349_v61  ;;  %v1344_v47 = vor.u32 1.1754944e-38, %v1343_v13  ;;  %v1356_v58 = vand.u32 2147483647, %v7681_v56  ;;  %vm1354_vm2 = vmor %vm1352_vm13, %vm1353_vm12 }
 0x9a3   :  { %v1336_v35 = vadd.f32 %v7734_v43, %v1335_v23  ;;  %vm1342_vm11 = vcmp.eq.f32.partialorder %v1341_v54, 8.507059e+37  ;;  %vm1367_vm8 = vweird.f32 %v7687_v50  ;;  %v1371_v13 = vand.u32 2147483647, %v7687_v50 }
 0x9a4   :  { %vm1327_vm7 = vcmp.eq.f32.partialorder %v1326_v22, 8.507059e+37  ;;  %v1351_v49 = vadd.f32 %v7745_v14, %v1350_v33  ;;  %vm1357_vm5 = vcmp.eq.f32.partialorder %v1356_v58, 8.507059e+37  ;;  %vm1382_vm12 = vweird.f32 %v7751_v20 }
 0x9a5   :  { %v1330_v48 = vsel %vm1327_vm7, %v1329_v62, %v1325_v2  ;;  %vm1368_vm7 = vweird.f32 %v6295_v27 }
 0x9a6   :  { %v2328_v55 = vpop.f32.mrf.mxu0  ;;  %5716 = vmatpush.xpose.msk.msrb.mxu1 %vm1126_vm15, %v2431_v31  ;;  %v1331_v45 = vmul.f32 %v7527_v17, %v1330_v48  ;;  %v1363_v31 = vmul.f32 %v6295_v27, %v7687_v50  ;;  %v1355_v2 = vsel %vm1354_vm2, %v7745_v14, %v1351_v49  ;;  %vm1369_vm9 = vmor %vm1367_vm8, %vm1368_vm7 }
 0x9a7   :  { %5714 = vmatmul.msk.f32.gmra.mxu3 %vm1126_vm15, %v2328_v55  ;;  %v1340_v55 = vsel %vm1339_vm10, %v7734_v43, %v1336_v35  ;;  %vm1372_vm10 = vcmp.eq.f32.partialorder %v1371_v13, 8.507059e+37 }
 0x9a8   :  { %v1345_v17 = vsel %vm1342_vm11, %v1344_v47, %v1340_v55  ;;  %v1364_v44 = vsub.f32 1.0, %v1363_v31  ;;  %v1388_v31 = vand.u32 2147483648, %v7751_v20  ;;  %v7806_v55 = vpop.f32.mrf.mxu3 }
 0x9a9   :  { %5635 = vmatmul.msk.f32.gmra.mxu1 %vm368_vm3, %v1316_v4  ;;  %v1358_v4 = vand.u32 2147483648, %v7681_v56  ;;  %v1346_v43 = vmul.f32 %v7623_v6, %v1345_v17  ;;  %v1373_v56 = vand.u32 2147483648, %v7687_v50  ;;  %9248 = vst [vmem:[#allocation22_spill] sm:$0xff] %v7806_v55 }
 0x9aa   :  { %5717 = vmatpush.xpose.msk.msrb.mxu1 %vm1126_vm15, %v2429_v9  ;;  %v6297_v9 = vpop.eup %6296  ;;  %v1389_v33 = vor.u32 1.1754944e-38, %v1388_v31 }
 0x9ab   :  { %v1378_v23 = vmul.f32 %v6297_v9, %v7751_v20  ;;  %v1359_v62 = vor.u32 1.1754944e-38, %v1358_v4  ;;  %vm1383_vm11 = vweird.f32 %v6297_v9 }
 0x9ac   :  { %vm1384_vm13 = vmor %vm1382_vm12, %vm1383_vm11 }
 0x9ad   :  { %v1360_v48 = vsel %vm1357_vm5, %v1359_v62, %v1355_v2  ;;  %v1379_v6 = vsub.f32 1.0, %v1378_v23 }
 0x9ae   :  { %5718 = vmatpush.xpose.msk.msrb.mxu1 %vm1126_vm15, %v2427_v3  ;;  %v1361_v35 = vmul.f32 %v7552_v12, %v1360_v48 }
 0x9af   :  { %v1380_v14 = vmul.f32 %v6297_v9, %v1379_v6 }
 0x9b0   :  { %v2869_v59 = vpop.permute.xlu0 %2868 }
 0x9b1   :  { %5750 = vmatpush.xpose.msk.msra.mxu3 %vm1126_vm15, %v2869_v59  ;;  %5636 = vmatmul.msk.f32.gmra.mxu1 %vm368_vm3, %v1331_v45  ;;  %v1374_v59 = vor.u32 1.1754944e-38, %v1373_v56  ;;  %v1381_v54 = vadd.f32 %v6297_v9, %v1380_v14 }
 0x9b2   :  { %5719 = vmatpush.xpose.msk.msrb.mxu1 %vm1126_vm15, %v2425_v16 }
 0x9b5   :  { %5751 = vmatpush.xpose.msk.msra.mxu3 %vm1126_vm15, %v7698_v21  ;;  %v1365_v21 = vmul.f32 %v6295_v27, %v1364_v44 }
 0x9b7   :  { %v1366_v61 = vadd.f32 %v6295_v27, %v1365_v21 }
 0x9b8   :  { %v2865_v22 = vpop.permute.xlu0 %2864 }
 0x9b9   :  { %5752 = vmatpush.xpose.msk.msra.mxu3 %vm1126_vm15, %v2865_v22  ;;  %5637 = vmatmul.msk.f32.gmra.mxu1 %vm368_vm3, %v1346_v43 }
 0x9bd   :  { %5753 = vmatpush.xpose.msk.msra.mxu3 %vm1126_vm15, %v7703_v60  ;;  %v1370_v60 = vsel %vm1369_vm9, %v6295_v27, %v1366_v61  ;;  %v1385_v27 = vsel %vm1384_vm13, %v6297_v9, %v1381_v54  ;;  %v2419_v9 = vpop.permute.xlu2 %2418 }
 0x9be   :  { %v1375_v45 = vsel %vm1372_vm10, %v1374_v59, %v1370_v60 }
 0x9bf   :  { %v1376_v50 = vmul.f32 %v7545_v5, %v1375_v45 }
 0x9c0   :  { %v2859_v3 = vpop.permute.xlu0 %2858 }
 0x9c1   :  { %5754 = vmatpush.xpose.msk.msra.mxu3 %vm1126_vm15, %v7707_v10  ;;  %5638 = vmatmul.msk.f32.gmra.mxu1 %vm368_vm3, %v1361_v35  ;;  %v1386_v10 = vand.u32 2147483647, %v7751_v20 }
 0x9c3   :  { %vm1387_vm2 = vcmp.eq.f32.partialorder %v1386_v10, 8.507059e+37 }
 0x9c4   :  { %v1390_v16 = vsel %vm1387_vm2, %v1389_v33, %v1385_v27 }
 0x9c5   :  { %5755 = vmatpush.xpose.msk.msra.mxu3 %vm1126_vm15, %v2859_v3  ;;  %v1391_v5 = vmul.f32 %v7635_v8, %v1390_v16  ;;  %v2421_v8 = vpop.permute.xlu1 %2420  ;;  %v2401_v43 = vpop.permute.xlu2 %2400 }
 0x9c8   :  { %v2841_v12 = vpop.permute.xlu0 %2840 }
 0x9c9   :  { %5756 = vmatpush.xpose.msk.msra.mxu3 %vm1126_vm15, %v7710_v26  ;;  %5639 = vmatmul.msk.f32.gmra.mxu1 %vm368_vm3, %v1376_v50  ;;  %v7813_v26 = vpop.f32.mrf.mxu3 }
 0x9ca   :  { %9249 = vst [vmem:[#allocation23_spill] sm:$0xff] %v7813_v26 }
 0x9cd   :  { %5757 = vmatpush.xpose.msk.msra.mxu3 %vm1126_vm15, %v7715_v53  ;;  %v2415_v4 = vpop.permute.xlu1 %2414  ;;  %v2407_v21 = vpop.permute.xlu2 %2406 }
 0x9d0   :  { %v2847_v47 = vpop.permute.xlu0 %2846  ;;  %5758 = vmatmul.msk.f32.vlgmr.msra.gmra.mxu3 %vm1126_vm15, %v2841_v12 }
 0x9d1   :  { %5640 = vmatmul.msk.f32.gmra.mxu1 %vm368_vm3, %v1391_v5  ;;  %v7817_v53 = vpop.f32.mrf.mxu3 }
 0x9d2   :  { %9250 = vst [vmem:[#allocation24_spill] sm:$0xff] %v7817_v53 }
 0x9d5   :  { %v2405_v23 = vpop.permute.xlu1 %2404  ;;  %v2413_v48 = vpop.permute.xlu2 %2412 }
 0x9d8   :  { %v2851_v20 = vpop.permute.xlu0 %2850  ;;  %5759 = vmatmul.msk.f32.gmra.mxu3 %vm1126_vm15, %v7720_v0 }
 0x9d9   :  { %v7821_v49 = vpop.f32.mrf.mxu3 }
 0x9da   :  { %9251 = vst [vmem:[#allocation25_spill] sm:$0xff] %v7821_v49 }
 0x9dd   :  { %v2411_v6 = vpop.permute.xlu1 %2410  ;;  %v3140_v35 = vpop.permute.xlu2 %3139 }
 0x9e0   :  { %v2853_v17 = vpop.permute.xlu0 %2852  ;;  %5760 = vmatmul.msk.f32.gmra.mxu3 %vm1126_vm15, %v7724_v15 }
 0x9e1   :  { %v7828_v15 = vpop.f32.mrf.mxu3 }
 0x9e5   :  { %v6080_v14 = vpop.permute.xlu1 %6079 }
 0x9e6   :  { %v6081_v59 = vunpack.i.l.bf16 %v6080_v14  ;;  %v6082_v54 = vunpack.i.h.bf16 %v6080_v14 }
 0x9e8   :  { %v2423_v44 = vpop.permute.xlu0 %2422  ;;  %5761 = vmatmul.msk.f32.gmra.mxu3 %vm1126_vm15, %v2847_v47 }
 0x9e9   :  { %5720 = vmatpush.xpose.msk.msrb.mxu1 %vm1126_vm15, %v2423_v44  ;;  %v7832_v22 = vpop.f32.mrf.mxu3 }
 0x9ea   :  { %9252 = vst [vmem:[#allocation26_spill] sm:$0xff] %v7832_v22 }
 0x9ed   :  { %5721 = vmatpush.xpose.msk.msrb.mxu1 %vm1126_vm15, %v2421_v8 }
 0x9f0   :  { %5762 = vmatmul.msk.f32.gmra.mxu3 %vm1126_vm15, %v7732_v40  ;;  %v2417_v0 = vpop.permute.xlu0 %2416 }
 0x9f1   :  { %5722 = vmatpush.xpose.msk.msrb.mxu1 %vm1126_vm15, %v2419_v9  ;;  %v7835_v58 = vpop.f32.mrf.mxu3 }
 0x9f5   :  { %5723 = vmatpush.xpose.msk.msrb.mxu1 %vm1126_vm15, %v2417_v0 }
 0x9f8   :  { %5763 = vmatmul.msk.f32.gmra.mxu3 %vm1126_vm15, %v2851_v20  ;;  %v2403_v40 = vpop.permute.xlu0 %2402 }
 0x9f9   :  { %5724 = vmatpush.xpose.msk.msrb.mxu1 %vm1126_vm15, %v2415_v4  ;;  %v7837_v2 = vpop.f32.mrf.mxu3 }
 0x9fa   :  { %9253 = vst [vmem:[#allocation27_spill] sm:$0xff] %v7837_v2 }
 0xa00   :  { %5764 = vmatmul.msk.f32.gmra.mxu3 %vm1126_vm15, %v2853_v17  ;;  %v2409_v62 = vpop.permute.xlu0 %2408 }
 0xa01   :  { %v7839_v61 = vpop.f32.mrf.mxu3 }
 0xa02   :  { %9254 = vst [vmem:[#allocation28_spill] sm:$0xff] %v7839_v61 }
 0xa08   :  { %v6075_v56 = vpop.permute.xlu0 %6074 }
 0xa09   :  { %v6076_v13 = vunpack.i.l.bf16 %v6075_v56  ;;  %v6077_v60 = vunpack.i.h.bf16 %v6075_v56  ;;  %v7843_v45 = vpop.f32.mrf.mxu3 }
 0xa0a   :  { %9255 = vst [vmem:[#allocation29_spill] sm:$0xff] %v7843_v45 }
 0xa11   :  { %v7846_v12 = vpop.f32.mrf.mxu3 }
 0xa12   :  { %9256 = vst [vmem:[#allocation30_spill] sm:$0xff] %v7846_v12 }
 0xa19   :  { %v7850_v27 = vpop.f32.mrf.mxu3 }
 0xa1e   :  { %v1434_v3 = vpop.f32.mrf.mxu1 }
 0xa1f   :  { %5675 = vmatmul.msk.f32.vlgmr.msra.gmra.mxu1 %vm1126_vm15, %v1434_v3 }
 0xa20   :  { %5765 = vmatpush.msk.msra.mxu1 %vm1413_vm14, %v3140_v35 }
 0xa21   :  { %v7853_v16 = vpop.f32.mrf.mxu3 }
 0xa22   :  { %3180 = vmatpush.msra.mxu1 %v6076_v13  ;;  %9257 = vst [vmem:[#allocation31_spill] sm:$0xff] %v7853_v16 }
 0xa24   :  { %3181 = vmatpush.msra.mxu1 %v6077_v60 }
 0xa26   :  { %3182 = vmatpush.msra.mxu1 %v6081_v59  ;;  %v1437_v31 = vpop.f32.mrf.mxu1 }
 0xa27   :  { %5676 = vmatmul.msk.f32.gmra.mxu1 %vm1126_vm15, %v1437_v31 }
 0xa28   :  { %3183 = vmatpush.msra.mxu1 %v6082_v54 }
 0xa2a   :  { %v7856_v5 = vpop.f32.mrf.mxu3 }
 0xa2e   :  { %v1440_v50 = vpop.f32.mrf.mxu1 }
 0xa2f   :  { %5677 = vmatmul.msk.f32.gmra.mxu1 %vm1126_vm15, %v1440_v50 }
 0xa36   :  { %v1443_v10 = vpop.f32.mrf.mxu1 }
 0xa37   :  { %5678 = vmatmul.msk.f32.gmra.mxu1 %vm1126_vm15, %v1443_v10 }
 0xa3e   :  { %v1446_v33 = vpop.f32.mrf.mxu1 }
 0xa3f   :  { %5679 = vmatmul.msk.f32.gmra.mxu1 %vm1126_vm15, %v1446_v33 }
 0xa46   :  { %v1449_v47 = vpop.f32.mrf.mxu1 }
 0xa47   :  { %5680 = vmatmul.msk.f32.gmra.mxu1 %vm1126_vm15, %v1449_v47 }
 0xa4e   :  { %v1452_v20 = vpop.f32.mrf.mxu1 }
 0xa4f   :  { %5681 = vmatmul.msk.f32.gmra.mxu1 %vm1126_vm15, %v1452_v20 }
 0xa53   :  { %v2925_v17 = vpop.f32.mrf.mxu3 }
 0xa54   :  { %v2946_v44 = vmul.f32 0.5, %v2925_v17 }
 0xa56   :  { %v2953_v8 = vsel %vm368_vm3, %v2946_v44, -inf }
 0xa57   :  { %2954 = vmax.xlane.f32.xlu0 %v2953_v8  ;;  %5725 = vmatmul.msk.f32.vlgmr.msrb.gmra.mxu1 %vm1126_vm15, %v2401_v43 }
 0xa5b   :  { %v2928_v9 = vpop.f32.mrf.mxu3 }
 0xa5c   :  { %v7905_v8 = vmul.f32 0.5, %v2928_v9 }
 0xa5f   :  { %5726 = vmatmul.msk.f32.gmra.mxu1 %vm1126_vm15, %v2403_v40 }
 0xa63   :  { %v2931_v0 = vpop.f32.mrf.mxu3 }
 0xa64   :  { %v7862_v4 = vmul.f32 0.5, %v2931_v0 }
 0xa66   :  { %v2959_v56 = vsel %vm368_vm3, %v7862_v4, -inf }
 0xa67   :  { %2960 = vmax.xlane.f32.xlu2 %v2959_v56  ;;  %5727 = vmatmul.msk.f32.gmra.mxu1 %vm1126_vm15, %v2405_v23 }
 0xa6b   :  { %6084 = vrot.lane.b32.xlu0 %v7095_v57, %s6528_s24  ;;  %v2934_v3 = vpop.f32.mrf.mxu3 }
 0xa6c   :  { %v7877_v23 = vmul.f32 0.5, %v2934_v3 }
 0xa6e   :  { %v2962_v14 = vsel %vm368_vm3, %v7877_v23, -inf }
 0xa6f   :  { %5728 = vmatmul.msk.f32.gmra.mxu1 %vm1126_vm15, %v2407_v21 }
 0xa73   :  { %v2937_v35 = vpop.f32.mrf.mxu3 }
 0xa77   :  { %5729 = vmatmul.msk.f32.gmra.mxu1 %vm1126_vm15, %v2409_v62 }
 0xa7b   :  { %v2940_v43 = vpop.f32.mrf.mxu3 }
 0xa7c   :  { %v7871_v40 = vmul.f32 0.5, %v2940_v43  ;;  %v6090_v43 = vpop.permute.xlu1 %6089 }
 0xa7e   :  { %v2968_v13 = vsel %vm368_vm3, %v7871_v40, -inf }
 0xa7f   :  { %2969 = vmax.xlane.f32.xlu2 %v2968_v13  ;;  %5730 = vmatmul.msk.f32.gmra.mxu1 %vm1126_vm15, %v2411_v6 }
 0xa83   :  { %v2943_v21 = vpop.f32.mrf.mxu3 }
 0xa84   :  { %v7883_v62 = vmul.f32 0.5, %v2943_v21  ;;  %v6091_v21 = vunpack.i.l.bf16 %v6090_v43 }
 0xa86   :  { %v2971_v60 = vsel %vm1241_vm1, %v7883_v62, -inf }
 0xa87   :  { %5731 = vmatmul.msk.f32.gmra.mxu1 %vm1126_vm15, %v2413_v48 }
 0xa95   :  { %2963 = vmax.xlane.f32.xlu0 %v2962_v14  ;;  %v2956_v14 = vsel %vm368_vm3, %v7905_v8, -inf }
 0xa97   :  { %3121 = vrot.lane.b32.xlu2 %v7182_v41, %s6528_s24 }
 0xa9c   :  { %v7887_v59 = vpop.f32.mrf.mxu1 }
 0xa9d   :  { %9258 = vst [vmem:[#allocation32_spill] sm:$0xff] %v7887_v59  ;;  %2972 = vmax.xlane.f32.xlu0 %v2971_v60  ;;  %v6092_v60 = vunpack.i.h.bf16 %v6090_v43 }
 0xaa4   :  { %v7889_v6 = vpop.f32.mrf.mxu1 }
 0xaa5   :  { %9259 = vst [vmem:[#allocation33_spill] sm:$0xff] %v7889_v6 }
 0xaac   :  { %v7891_v48 = vpop.f32.mrf.mxu1 }
 0xaad   :  { %9260 = vst [vmem:[#allocation34_spill] sm:$0xff] %v7891_v48 }
 0xab4   :  { %v7893_v54 = vpop.f32.mrf.mxu1 }
 0xab5   :  { %9261 = vst [vmem:[#allocation35_spill] sm:$0xff] %v7893_v54 }
 0xabc   :  { %v7895_v31 = vpop.f32.mrf.mxu1 }
 0xac4   :  { %v7897_v50 = vpop.f32.mrf.mxu1 }
 0xac5   :  { %9262 = vst [vmem:[#allocation36_spill] sm:$0xff] %v7897_v50 }
 0xaca   :  { %v2955_v33 = vpop.xlane.xlu0 %2954 }
 0xacb   :  { %v2974_v9 = vsub.f32 %v2946_v44, %v2955_v33 }
 0xacc   :  { %v7899_v10 = vpop.f32.mrf.mxu1 }
 0xacd   :  { %v2981_v22 = vmul.f32 1.442695, %v2974_v9 }
 0xacf   :  { %6298 = vpow2.f32 %v2981_v22 }
 0xad4   :  { %v2485_v47 = vpop.f32.mrf.mxu1 }
 0xad5   :  { %v7901_v20 = vmul.f32 0.5, %v2485_v47  ;;  %v2950_v47 = vmul.f32 0.5, %v2937_v35  ;;  %v7922_v33 = vpop.eup %6298 }
 0xad7   :  { %v2513_v17 = vsel %vm368_vm3, %v7901_v20, -inf }
 0xad8   :  { %2514 = vmax.xlane.f32.xlu1 %v2513_v17  ;;  %v2965_v17 = vsel %vm368_vm3, %v2950_v47, -inf }
 0xada   :  { %v2961_v50 = vpop.xlane.xlu2 %2960 }
 0xadc   :  { %v2488_v0 = vpop.f32.mrf.mxu1 }
 0xadd   :  { %v6085_v56 = vpop.permute.xlu0 %6084 }
 0xade   :  { %v6086_v3 = vunpack.i.l.bf16 %v6085_v56  ;;  %v6087_v13 = vunpack.i.h.bf16 %v6085_v56  ;;  %v7912_v56 = vmul.f32 0.5, %v2488_v0  ;;  %v2995_v0 = vsel %vm368_vm3, %v7922_v33, 0.0 }
 0xae0   :  { %3184 = vmatpush.msra.mxu1 %v6086_v3  ;;  %2957 = vmax.xlane.f32.xlu1 %v2956_v14  ;;  %v2516_v43 = vsel %vm368_vm3, %v7912_v56, -inf }
 0xae2   :  { %3185 = vmatpush.msra.mxu1 %v6087_v13 }
 0xae4   :  { %3186 = vmatpush.msra.mxu1 %v6091_v21  ;;  %v7909_v16 = vpop.f32.mrf.mxu1 }
 0xae6   :  { %3187 = vmatpush.msra.mxu1 %v6092_v60 }
 0xae8   :  { %2966 = vmax.xlane.f32.xlu1 %v2965_v17  ;;  %v2976_v17 = vsub.f32 %v7862_v4, %v2961_v50 }
 0xaec   :  { %v2494_v3 = vpop.f32.mrf.mxu1 }
 0xaed   :  { %v7914_v12 = vmul.f32 0.5, %v2494_v3 }
 0xaef   :  { %v2522_v35 = vsel %vm368_vm3, %v7914_v12, -inf }
 0xaf0   :  { %2517 = vmax.xlane.f32.xlu1 %v2516_v43  ;;  %2523 = vmax.xlane.f32.xlu0 %v2522_v35  ;;  %v2985_v43 = vmul.f32 1.442695, %v2976_v17 }
 0xaf2   :  { %v7920_v44 = vpop.xlane.xlu2 %2969  ;;  %6300 = vpow2.f32 %v2985_v43 }
 0xaf4   :  { %v2497_v13 = vpop.f32.mrf.mxu1 }
 0xaf5   :  { %v7924_v14 = vmul.f32 0.5, %v2497_v13 }
 0xaf7   :  { %v2525_v22 = vsel %vm368_vm3, %v7924_v14, -inf }
 0xaf8   :  { %2996 = vadd.xlane.f32.xlu1 %v2995_v0  ;;  %2526 = vmax.xlane.f32.xlu0 %v2525_v22 }
 0xafa   :  { %v3122_v21 = vpop.permute.xlu2 %3121 }
 0xafb   :  { %3188 = vmatpush.msra.mxu1 %v3122_v21 }
 0xafc   :  { %v2500_v60 = vpop.f32.mrf.mxu1 }
 0xafd   :  { %v7930_v9 = vmul.f32 0.5, %v2500_v60  ;;  %v7940_v60 = vpop.eup %6300 }
 0xafe   :  { %v3001_v4 = vsel %vm368_vm3, %v7940_v60, 0.0 }
 0xaff   :  { %v2528_v3 = vsel %vm368_vm3, %v7930_v9, -inf }
 0xb00   :  { %2529 = vmax.xlane.f32.xlu1 %v2528_v3 }
 0xb04   :  { %v2503_v35 = vpop.f32.mrf.mxu1 }
 0xb05   :  { %v7935_v13 = vmul.f32 0.5, %v2503_v35 }
 0xb07   :  { %v2531_v0 = vsel %vm1241_vm1, %v7935_v13, -inf }
 0xb08   :  { %v2964_v54 = vpop.xlane.xlu0 %2963  ;;  %2532 = vmax.xlane.f32.xlu0 %v2531_v0 }
 0xb09   :  { %v2977_v22 = vsub.f32 %v7877_v23, %v2964_v54 }
 0xb0b   :  { %v2987_v21 = vmul.f32 1.442695, %v2977_v22 }
 0xb0d   :  { %6302 = vpow2.f32 %v2987_v21 }
 0xb10   :  { %3002 = vadd.xlane.f32.xlu0 %v3001_v4 }
 0xb13   :  { %v7944_v50 = vpop.eup %6302 }
 0xb14   :  { %v3004_v17 = vsel %vm368_vm3, %v7944_v50, 0.0 }
 0xb18   :  { %3005 = vadd.xlane.f32.xlu0 %v3004_v17 }
 0xb4b   :  { %v2515_v3 = vpop.xlane.xlu1 %2514 }
 0xb4c   :  { %v2534_v43 = vsub.f32 %v7901_v20, %v2515_v3 }
 0xb4e   :  { %v2541_v35 = vmul.f32 1.442695, %v2534_v43 }
 0xb50   :  { %6304 = vpow2.f32 %v2541_v35 }
 0xb53   :  { %v2958_v23 = vpop.xlane.xlu1 %2957 }
 0xb54   :  { %v2975_v54 = vsub.f32 %v7905_v8, %v2958_v23  ;;  %v7959_v8 = vmul.f32 0.5, %v7909_v16 }
 0xb56   :  { %v7950_v0 = vpop.eup %6304  ;;  %v2983_v22 = vmul.f32 1.442695, %v2975_v54  ;;  %v2519_v35 = vsel %vm368_vm3, %v7959_v8, -inf }
 0xb57   :  { %v2555_v21 = vsel %vm368_vm3, %v7950_v0, 0.0 }
 0xb58   :  { %6306 = vpow2.f32 %v2983_v22  ;;  %2556 = vadd.xlane.f32.xlu1 %v2555_v21 }
 0xb5b   :  { %v2967_v4 = vpop.xlane.xlu1 %2966 }
 0xb5c   :  { %v2978_v49 = vsub.f32 %v2950_v47, %v2967_v4 }
 0xb5e   :  { %v7954_v45 = vpop.eup %6306  ;;  %v2989_v17 = vmul.f32 1.442695, %v2978_v49 }
 0xb5f   :  { %v2998_v20 = vsel %vm368_vm3, %v7954_v45, 0.0 }
 0xb60   :  { %6308 = vpow2.f32 %v2989_v17  ;;  %2999 = vadd.xlane.f32.xlu2 %v2998_v20 }
 0xb63   :  { %v2518_v3 = vpop.xlane.xlu1 %2517 }
 0xb66   :  { %v7961_v43 = vpop.eup %6308 }
 0xb67   :  { %v3007_v47 = vsel %vm368_vm3, %v7961_v43, 0.0 }
 0xb68   :  { %2520 = vmax.xlane.f32.xlu2 %v2519_v35  ;;  %3008 = vadd.xlane.f32.xlu0 %v3007_v47 }
 0xb6b   :  { %v2997_v49 = vpop.xlane.xlu1 %2996 }
 0xb6c   :  { %6310 = vrcp.f32 %v2997_v49  ;;  %v3027_v22 = vand.u32 2147483648, %v2997_v49  ;;  %v3025_v4 = vand.u32 2147483647, %v2997_v49  ;;  %vm3021_vm7 = vweird.f32 %v2997_v49 }
 0xb6e   :  { %v3028_v20 = vor.u32 1.1754944e-38, %v3027_v22  ;;  %vm3026_vm9 = vcmp.eq.f32.partialorder %v3025_v4, 8.507059e+37 }
 0xb71   :  { %6094 = vrot.lane.b32.xlu1 %v7125_v28, %s6529_s30 }
 0xb72   :  { %v6311_v23 = vpop.eup %6310 }
 0xb73   :  { %v3017_v54 = vmul.f32 %v6311_v23, %v2997_v49  ;;  %vm3022_vm5 = vweird.f32 %v6311_v23  ;;  %v2979_v49 = vsub.f32 %v7871_v40, %v7920_v44 }
 0xb74   :  { %vm3023_vm8 = vmor %vm3021_vm7, %vm3022_vm5 }
 0xb75   :  { %v3018_v16 = vsub.f32 1.0, %v3017_v54  ;;  %v2973_v54 = vpop.xlane.xlu0 %2972 }
 0xb77   :  { %v3019_v21 = vmul.f32 %v6311_v23, %v3018_v16 }
 0xb79   :  { %v3020_v17 = vadd.f32 %v6311_v23, %v3019_v21 }
 0xb7b   :  { %v3024_v48 = vsel %vm3023_vm8, %v6311_v23, %v3020_v17  ;;  %v2991_v23 = vmul.f32 1.442695, %v2979_v49 }
 0xb7c   :  { %v3029_v35 = vsel %vm3026_vm9, %v3028_v20, %v3024_v48  ;;  %2699 = vrot.lane.b32.xlu0 %v7133_v34, %s6529_s30  ;;  %v2980_v48 = vsub.f32 %v7883_v62, %v2973_v54 }
 0xb7d   :  { %v3030_v47 = vmul.f32 %v7922_v33, %v3029_v35  ;;  %v2524_v16 = vpop.xlane.xlu0 %2523  ;;  %6312 = vpow2.f32 %v2991_v23  ;;  %v2535_v33 = vsub.f32 %v7912_v56, %v2518_v3 }
 0xb7e   :  { %v2993_v22 = vmul.f32 1.442695, %v2980_v48  ;;  %v2537_v49 = vsub.f32 %v7914_v12, %v2524_v16 }
 0xb7f   :  { %5766 = vmatmul.msk.f32.vlgmr.msra.gmra.mxu1 %vm368_vm3, %v3030_v47  ;;  %v2543_v4 = vmul.f32 1.442695, %v2535_v33  ;;  %v2530_v47 = vpop.xlane.xlu1 %2529 }
 0xb80   :  { %6099 = vrot.lane.b32.xlu2 %v7099_v19, %s6529_s30  ;;  %6314 = vpow2.f32 %v2993_v22  ;;  %v2539_v3 = vsub.f32 %v7930_v9, %v2530_v47  ;;  %v2547_v33 = vmul.f32 1.442695, %v2537_v49 }
 0xb81   :  { %6316 = vpow2.f32 %v2543_v4 }
 0xb83   :  { %v7983_v21 = vpop.eup %6312 }
 0xb84   :  { %v3010_v20 = vsel %vm368_vm3, %v7983_v21, 0.0 }
 0xb85   :  { %v2527_v17 = vpop.xlane.xlu0 %2526 }
 0xb86   :  { %v2538_v40 = vsub.f32 %v7924_v14, %v2527_v17  ;;  %v7988_v44 = vpop.eup %6314  ;;  %v2551_v14 = vmul.f32 1.442695, %v2539_v3 }
 0xb87   :  { %v7990_v62 = vpop.eup %6316  ;;  %v3013_v56 = vsel %vm1241_vm1, %v7988_v44, 0.0 }
 0xb88   :  { %6109 = vrot.lane.b32.xlu2 %v7302_v7, %s6529_s30  ;;  %v2549_v35 = vmul.f32 1.442695, %v2538_v40  ;;  %v2558_v54 = vsel %vm368_vm3, %v7990_v62, 0.0 }
 0xb8a   :  { %6318 = vpow2.f32 %v2549_v35 }
 0xb8b   :  { %6320 = vpow2.f32 %v2551_v14 }
 0xb8c   :  { %6322 = vpow2.f32 %v2547_v33 }
 0xb8d   :  { %v2533_v23 = vpop.xlane.xlu0 %2532 }
 0xb8e   :  { %v2540_v22 = vsub.f32 %v7935_v13, %v2533_v23 }
 0xb90   :  { %2681 = vrot.lane.b32.xlu2 %v7182_v41, %s6529_s30  ;;  %v7998_v48 = vpop.eup %6318  ;;  %v2553_v9 = vmul.f32 1.442695, %v2540_v22 }
 0xb91   :  { %v2567_v4 = vsel %vm368_vm3, %v7998_v48, 0.0  ;;  %v8003_v17 = vpop.eup %6320 }
 0xb92   :  { %6324 = vpow2.f32 %v2553_v9  ;;  %v2570_v12 = vsel %vm368_vm3, %v8003_v17, 0.0 }
 0xb95   :  { %v3003_v35 = vpop.xlane.xlu0 %3002 }
 0xb96   :  { %6326 = vrcp.f32 %v3003_v35  ;;  %vm3051_vm5 = vweird.f32 %v3003_v35  ;;  %v3055_v59 = vand.u32 2147483647, %v3003_v35 }
 0xb98   :  { %vm3056_vm8 = vcmp.eq.f32.partialorder %v3055_v59, 8.507059e+37 }
 0xb9b   :  { %3011 = vadd.xlane.f32.xlu1 %v3010_v20  ;;  %v8005_v20 = vpop.eup %6322 }
 0xb9c   :  { %v2564_v16 = vsel %vm368_vm3, %v8005_v20, 0.0  ;;  %v8011_v13 = vpop.eup %6324 }
 0xb9d   :  { %v2573_v40 = vsel %vm1241_vm1, %v8011_v13, 0.0  ;;  %v6327_v3 = vpop.eup %6326 }
 0xb9e   :  { %vm3052_vm13 = vweird.f32 %v6327_v3 }
 0xb9f   :  { %vm3053_vm7 = vmor %vm3051_vm5, %vm3052_vm13 }
 0xba3   :  { %3014 = vadd.xlane.f32.xlu1 %v3013_v56  ;;  %v8021_v56 = vpop.xlane.xlu0 %3005 }
 0xba6   :  { %2559 = vadd.xlane.f32.xlu0 %v2558_v54  ;;  %v3047_v54 = vmul.f32 %v6327_v3, %v3003_v35 }
 0xba8   :  { %v3048_v33 = vsub.f32 1.0, %v3047_v54 }
 0xbaa   :  { %v3049_v61 = vmul.f32 %v6327_v3, %v3048_v33 }
 0xbac   :  { %v3050_v33 = vadd.f32 %v6327_v3, %v3049_v61 }
 0xbae   :  { %2568 = vadd.xlane.f32.xlu0 %v2567_v4 }
 0xbb6   :  { %2571 = vadd.xlane.f32.xlu0 %v2570_v12 }
 0xbb9   :  { %2565 = vadd.xlane.f32.xlu2 %v2564_v16 }
 0xbbc   :  { %6104 = vrot.lane.b32.xlu1 %v7095_v57, %s6529_s30 }
 0xbbe   :  { %2574 = vadd.xlane.f32.xlu0 %v2573_v40 }
 0xbd1   :  { %3748 = vrot.lane.b32.xlu2 %v7117_v24, %s6530_s6 }
 0xbd2   :  { %3750 = vrot.lane.b32.xlu0 %v7130_v32, %s6530_s6 }
 0xbd3   :  { %v3000_v47 = vpop.xlane.xlu2 %2999 }
 0xbd4   :  { %6328 = vrcp.f32 %v3000_v47  ;;  %v3042_v53 = vand.u32 2147483648, %v3000_v47  ;;  %v3040_v26 = vand.u32 2147483647, %v3000_v47  ;;  %vm3036_vm11 = vweird.f32 %v3000_v47 }
 0xbd5   :  { %6330 = vrcp.f32 %v8021_v56 }
 0xbd6   :  { %v3043_v54 = vor.u32 1.1754944e-38, %v3042_v53  ;;  %vm3041_vm2 = vcmp.eq.f32.partialorder %v3040_v26, 8.507059e+37  ;;  %v3054_v26 = vsel %vm3053_vm7, %v6327_v3, %v3050_v33 }
 0xbd9   :  { %3738 = vrot.lane.b32.xlu2 %v7161_v38, %s6530_s6 }
 0xbda   :  { %v6329_v49 = vpop.eup %6328  ;;  %3746 = vrot.lane.b32.xlu0 %v7105_v18, %s6530_s6 }
 0xbdb   :  { %v3032_v14 = vmul.f32 %v6329_v49, %v3000_v47  ;;  %v2521_v23 = vpop.xlane.xlu2 %2520  ;;  %v8029_v4 = vpop.xlane.xlu0 %3008  ;;  %vm3037_vm10 = vweird.f32 %v6329_v49 }
 0xbdc   :  { %v2536_v22 = vsub.f32 %v7959_v8, %v2521_v23  ;;  %v8031_v9 = vpop.eup %6330  ;;  %6332 = vrcp.f32 %v8029_v4  ;;  %vm3038_vm12 = vmor %vm3036_vm11, %vm3037_vm10  ;;  %vm3066_vm10 = vweird.f32 %v8021_v56 }
 0xbdd   :  { %v3033_v12 = vsub.f32 1.0, %v3032_v14  ;;  %v3062_v6 = vmul.f32 %v8031_v9, %v8021_v56  ;;  %vm3067_vm9 = vweird.f32 %v8031_v9 }
 0xbde   :  { %v2545_v16 = vmul.f32 1.442695, %v2536_v22  ;;  %v8040_v22 = vpop.xlane.xlu1 %2556  ;;  %vm8060_vm11 = vmor %vm3066_vm10, %vm3067_vm9 }
 0xbdf   :  { %v3034_v40 = vmul.f32 %v6329_v49, %v3033_v12  ;;  %v3063_v23 = vsub.f32 1.0, %v3062_v6 }
 0xbe0   :  { %6334 = vpow2.f32 %v2545_v16  ;;  %v3057_v16 = vand.u32 2147483648, %v3003_v35 }
 0xbe1   :  { %3720 = vrot.lane.b32.xlu2 %v7208_v11, %s6530_s6  ;;  %v3035_v8 = vadd.f32 %v6329_v49, %v3034_v40 }
 0xbe2   :  { %3742 = vrot.lane.b32.xlu0 %v7114_v25, %s6530_s6  ;;  %v6333_v12 = vpop.eup %6332  ;;  %v3058_v61 = vor.u32 1.1754944e-38, %v3057_v16 }
 0xbe3   :  { %v3039_v14 = vsel %vm3038_vm12, %v6329_v49, %v3035_v8  ;;  %v3064_v49 = vmul.f32 %v8031_v9, %v3063_v23  ;;  %v3077_v6 = vmul.f32 %v6333_v12, %v8029_v4  ;;  %v3070_v23 = vand.u32 2147483647, %v8021_v56 }
 0xbe4   :  { %v3044_v2 = vsel %vm3041_vm2, %v3043_v54, %v3039_v14  ;;  %v3072_v54 = vand.u32 2147483648, %v8021_v56  ;;  %vm3082_vm13 = vweird.f32 %v6333_v12  ;;  %vm3081_vm2 = vweird.f32 %v8029_v4 }
 0xbe5   :  { %v3045_v40 = vmul.f32 %v7954_v45, %v3044_v2  ;;  %v3059_v2 = vsel %vm3056_vm8, %v3058_v61, %v3054_v26  ;;  %v3078_v45 = vsub.f32 1.0, %v3077_v6  ;;  %v3065_v8 = vadd.f32 %v8031_v9, %v3064_v49  ;;  %vm3083_vm5 = vmor %vm3081_vm2, %vm3082_vm13 }
 0xbe6   :  { %v8042_v47 = vpop.eup %6334  ;;  %v6095_v35 = vpop.permute.xlu1 %6094  ;;  %v3060_v14 = vmul.f32 %v7940_v60, %v3059_v2  ;;  %v3073_v49 = vor.u32 1.1754944e-38, %v3072_v54  ;;  %vm3071_vm12 = vcmp.eq.f32.partialorder %v3070_v23, 8.507059e+37  ;;  %v3087_v61 = vand.u32 2147483648, %v8029_v4 }
 0xbe7   :  { %v2561_v53 = vsel %vm368_vm3, %v8042_v47, 0.0  ;;  %5767 = vmatmul.msk.f32.gmra.mxu1 %vm368_vm3, %v3045_v40  ;;  %v6096_v59 = vunpack.i.l.bf16 %v6095_v35  ;;  %v3079_v16 = vmul.f32 %v6333_v12, %v3078_v45  ;;  %v6100_v40 = vpop.permute.xlu2 %6099  ;;  %v6097_v6 = vunpack.i.h.bf16 %v6095_v35 }
 0xbe8   :  { %2562 = vadd.xlane.f32.xlu1 %v2561_v53  ;;  %v3069_v53 = vsel %vm8060_vm11, %v8031_v9, %v3065_v8  ;;  %v6101_v60 = vunpack.i.l.bf16 %v6100_v40  ;;  %v6102_v2 = vunpack.i.h.bf16 %v6100_v40  ;;  %v3085_v45 = vand.u32 2147483647, %v8029_v4 }
 0xbe9   :  { %3726 = vrot.lane.b32.xlu2 %v7226_v52, %s6530_s6  ;;  %v3074_v56 = vsel %vm3071_vm12, %v3073_v49, %v3069_v53  ;;  %v3080_v26 = vadd.f32 %v6333_v12, %v3079_v16  ;;  %v3088_v8 = vor.u32 1.1754944e-38, %v3087_v61 }
 0xbea   :  { %3736 = vrot.lane.b32.xlu0 %v7167_v39, %s6530_s6  ;;  %v3075_v9 = vmul.f32 %v7944_v50, %v3074_v56  ;;  %vm3086_vm7 = vcmp.eq.f32.partialorder %v3085_v45, 8.507059e+37 }
 0xbeb   :  { %v3084_v35 = vsel %vm3083_vm5, %v6333_v12, %v3080_v26 }
 0xbec   :  { %v3089_v54 = vsel %vm3086_vm7, %v3088_v8, %v3084_v35 }
 0xbee   :  { %v2700_v3 = vpop.permute.xlu0 %2699 }
 0xbef   :  { %5732 = vmatpush.msk.msra.mxu2 %vm1413_vm14, %v2700_v3  ;;  %5768 = vmatmul.msk.f32.gmra.mxu1 %vm368_vm3, %v3060_v14  ;;  %v3090_v3 = vmul.f32 %v7961_v43, %v3089_v54 }
 0xbf1   :  { %3730 = vrot.lane.b32.xlu2 %v7254_v63, %s6530_s6  ;;  %2740 = vmatpush.msra.mxu2 %v6096_v59 }
 0xbf2   :  { %3722 = vrot.lane.b32.xlu0 %v7216_v46, %s6530_s6 }
 0xbf3   :  { %2741 = vmatpush.msra.mxu2 %v6097_v6 }
 0xbf5   :  { %2742 = vmatpush.msra.mxu2 %v6101_v60 }
 0xbf7   :  { %2743 = vmatpush.msra.mxu2 %v6102_v2  ;;  %5769 = vmatmul.msk.f32.gmra.mxu1 %vm368_vm3, %v3075_v9 }
 0xbf9   :  { %3732 = vrot.lane.b32.xlu2 %v7264_v1, %s6530_s6 }
 0xbfa   :  { %3728 = vrot.lane.b32.xlu0 %v7244_v29, %s6530_s6 }
 0xbff   :  { %5770 = vmatmul.msk.f32.gmra.mxu1 %vm368_vm3, %v3090_v3 }
 0xc01   :  { %3752 = vrot.lane.b32.xlu1 %v7144_v30, %s6530_s6  ;;  %3302 = vrot.lane.b32.xlu2 %v7114_v25, %s6531_s12 }
 0xc02   :  { %3310 = vrot.lane.b32.xlu0 %v7130_v32, %s6531_s12 }
 0xc09   :  { %3744 = vrot.lane.b32.xlu1 %v7141_v37, %s6530_s6  ;;  %3296 = vrot.lane.b32.xlu2 %v7167_v39, %s6531_s12 }
 0xc0a   :  { %3306 = vrot.lane.b32.xlu0 %v7105_v18, %s6531_s12 }
 0xc0e   :  { %v3012_v50 = vpop.xlane.xlu1 %3011 }
 0xc0f   :  { %6336 = vrcp.f32 %v3012_v50  ;;  %v3102_v23 = vand.u32 2147483648, %v3012_v50  ;;  %v3100_v59 = vand.u32 2147483647, %v3012_v50  ;;  %vm3096_vm9 = vweird.f32 %v3012_v50 }
 0xc11   :  { %3740 = vrot.lane.b32.xlu1 %v7082_v51, %s6530_s6  ;;  %3282 = vrot.lane.b32.xlu2 %v7216_v46, %s6531_s12  ;;  %v3103_v53 = vor.u32 1.1754944e-38, %v3102_v23  ;;  %vm3101_vm11 = vcmp.eq.f32.partialorder %v3100_v59, 8.507059e+37  ;;  %v6110_v59 = vpop.permute.xlu2 %6109 }
 0xc12   :  { %3300 = vrot.lane.b32.xlu0 %v7082_v51, %s6531_s12 }
 0xc15   :  { %v6337_v43 = vpop.eup %6336 }
 0xc16   :  { %v3092_v4 = vmul.f32 %v6337_v43, %v3012_v50  ;;  %v3015_v12 = vpop.xlane.xlu1 %3014  ;;  %vm3097_vm8 = vweird.f32 %v6337_v43 }
 0xc17   :  { %6338 = vrcp.f32 %v3015_v12  ;;  %vm3098_vm10 = vmor %vm3096_vm9, %vm3097_vm8  ;;  %v3117_v9 = vand.u32 2147483648, %v3015_v12  ;;  %v3115_v8 = vand.u32 2147483647, %v3015_v12  ;;  %vm3111_vm13 = vweird.f32 %v3015_v12 }
 0xc18   :  { %v3093_v14 = vsub.f32 1.0, %v3092_v4  ;;  %6340 = vrcp.f32 %v8040_v22  ;;  %vm2581_vm8 = vweird.f32 %v8040_v22 }
 0xc19   :  { %3734 = vrot.lane.b32.xlu1 %v7190_v36, %s6530_s6  ;;  %3288 = vrot.lane.b32.xlu2 %v7244_v29, %s6531_s12  ;;  %v8109_v6 = vpop.xlane.xlu0 %2559  ;;  %v3118_v54 = vor.u32 1.1754944e-38, %v3117_v9  ;;  %vm3116_vm5 = vcmp.eq.f32.partialorder %v3115_v8, 8.507059e+37  ;;  %v6111_v9 = vunpack.i.l.bf16 %v6110_v59 }
 0xc1a   :  { %v3094_v33 = vmul.f32 %v6337_v43, %v3093_v14  ;;  %3294 = vrot.lane.b32.xlu0 %v7190_v36, %s6531_s12  ;;  %6342 = vrcp.f32 %v8109_v6  ;;  %v2602_v8 = vand.u32 2147483648, %v8109_v6 }
 0xc1c   :  { %v3095_v16 = vadd.f32 %v6337_v43, %v3094_v33 }
 0xc1d   :  { %v6339_v40 = vpop.eup %6338 }
 0xc1e   :  { %v3107_v49 = vmul.f32 %v6339_v40, %v3015_v12  ;;  %v3099_v60 = vsel %vm3098_vm10, %v6337_v43, %v3095_v16  ;;  %v6341_v56 = vpop.eup %6340  ;;  %vm3112_vm12 = vweird.f32 %v6339_v40 }
 0xc1f   :  { %v3104_v26 = vsel %vm3101_vm11, %v3103_v53, %v3099_v60  ;;  %v2577_v45 = vmul.f32 %v6341_v56, %v8040_v22  ;;  %vm3113_vm2 = vmor %vm3111_vm13, %vm3112_vm12  ;;  %vm2582_vm7 = vweird.f32 %v6341_v56  ;;  %vm2596_vm12 = vweird.f32 %v8109_v6 }
 0xc20   :  { %v3108_v61 = vsub.f32 1.0, %v3107_v49  ;;  %v3105_v2 = vmul.f32 %v7983_v21, %v3104_v26  ;;  %v6343_v43 = vpop.eup %6342  ;;  %v2585_v49 = vand.u32 2147483647, %v8040_v22  ;;  %vm2583_vm9 = vmor %vm2581_vm8, %vm2582_vm7 }
 0xc21   :  { %3724 = vrot.lane.b32.xlu1 %v7214_v42, %s6530_s6  ;;  %6114 = vrot.lane.b32.xlu2 %v7125_v28, %s6530_s6  ;;  %v2578_v3 = vsub.f32 1.0, %v2577_v45  ;;  %v2592_v33 = vmul.f32 %v6343_v43, %v8109_v6  ;;  %vm2597_vm11 = vweird.f32 %v6343_v43 }
 0xc22   :  { %v3109_v35 = vmul.f32 %v6339_v40, %v3108_v61  ;;  %3284 = vrot.lane.b32.xlu0 %v7214_v42, %s6531_s12  ;;  %5771 = vmatmul.msk.f32.gmra.mxu1 %vm368_vm3, %v3105_v2  ;;  %vm2586_vm10 = vcmp.eq.f32.partialorder %v2585_v49, 8.507059e+37  ;;  %vm2598_vm13 = vmor %vm2596_vm12, %vm2597_vm11 }
 0xc23   :  { %v2579_v23 = vmul.f32 %v6341_v56, %v2578_v3  ;;  %v2593_v16 = vsub.f32 1.0, %v2592_v33  ;;  %v1124_v33 = vld [vmem:[%s9247_s14 + $0x10] sm:$0xff] }
 0xc24   :  { %v3110_v21 = vadd.f32 %v6339_v40, %v3109_v35  ;;  %v6112_v35 = vunpack.i.h.bf16 %v6110_v59 }
 0xc25   :  { %v2580_v12 = vadd.f32 %v6341_v56, %v2579_v23  ;;  %v2594_v61 = vmul.f32 %v6343_v43, %v2593_v16 }
 0xc26   :  { %v3114_v50 = vsel %vm3113_vm2, %v6339_v40, %v3110_v21 }
 0xc27   :  { %v3119_v4 = vsel %vm3116_vm5, %v3118_v54, %v3114_v50  ;;  %v2584_v26 = vsel %vm2583_vm9, %v6341_v56, %v2580_v12  ;;  %v2682_v54 = vpop.permute.xlu2 %2681  ;;  %v2600_v56 = vand.u32 2147483647, %v8109_v6  ;;  %v2603_v50 = vor.u32 1.1754944e-38, %v2602_v8 }
 0xc28   :  { %v3120_v14 = vmul.f32 %v7988_v44, %v3119_v4  ;;  %v2587_v44 = vand.u32 2147483648, %v8040_v22  ;;  %v2595_v22 = vadd.f32 %v6343_v43, %v2594_v61  ;;  %v8146_v4 = vpop.xlane.xlu0 %2568 }
 0xc29   :  { %3312 = vrot.lane.b32.xlu1 %v7144_v30, %s6531_s12  ;;  %6129 = vrot.lane.b32.xlu2 %v7302_v7, %s6530_s6  ;;  %vm2601_vm2 = vcmp.eq.f32.partialorder %v2600_v56, 8.507059e+37 }
 0xc2a   :  { %3290 = vrot.lane.b32.xlu0 %v7254_v63, %s6531_s12  ;;  %5772 = vmatmul.msk.f32.gmra.mxu1 %vm368_vm3, %v3120_v14  ;;  %v2588_v2 = vor.u32 1.1754944e-38, %v2587_v44  ;;  %v2599_v3 = vsel %vm2598_vm13, %v6343_v43, %v2595_v22 }
 0xc2c   :  { %v2589_v45 = vsel %vm2586_vm10, %v2588_v2, %v2584_v26 }
 0xc2d   :  { %v2590_v21 = vmul.f32 %v7950_v0, %v2589_v45  ;;  %v2604_v0 = vsel %vm2601_vm2, %v2603_v50, %v2599_v3 }
 0xc2e   :  { %v6105_v40 = vpop.permute.xlu1 %6104  ;;  %v2605_v14 = vmul.f32 %v7990_v62, %v2604_v0  ;;  %v3651_v62 = vrot.slane %v1124_v33, 4 }
 0xc2f   :  { %v6106_v53 = vunpack.i.l.bf16 %v6105_v40  ;;  %v6107_v60 = vunpack.i.h.bf16 %v6105_v40  ;;  %v2566_v43 = vpop.xlane.xlu2 %2565 }
 0xc30   :  { %v8152_v6 = vpop.xlane.xlu0 %2571  ;;  %6344 = vrcp.f32 %v2566_v43  ;;  %5806 = vmatpush.msk.msrb.mxu1 %vm1858_vm6, %v3651_v62  ;;  %vm2626_vm11 = vweird.f32 %v2566_v43  ;;  %v2630_v62 = vand.u32 2147483647, %v2566_v43 }
 0xc31   :  { %3308 = vrot.lane.b32.xlu1 %v7117_v24, %s6531_s12  ;;  %2744 = vmatpush.msra.mxu2 %v6106_v53 }
 0xc32   :  { %6119 = vrot.lane.b32.xlu0 %v7099_v19, %s6530_s6  ;;  %vm2631_vm13 = vcmp.eq.f32.partialorder %v2630_v62, 8.507059e+37 }
 0xc33   :  { %2745 = vmatpush.msra.mxu2 %v6107_v60 }
 0xc35   :  { %2746 = vmatpush.msra.mxu2 %v6111_v9 }
 0xc36   :  { %v6345_v16 = vpop.eup %6344 }
 0xc37   :  { %2747 = vmatpush.msra.mxu2 %v6112_v35  ;;  %v2622_v40 = vmul.f32 %v6345_v16, %v2566_v43  ;;  %vm2627_vm9 = vweird.f32 %v6345_v16 }
 0xc38   :  { %v8156_v23 = vpop.xlane.xlu0 %2574  ;;  %vm2628_vm12 = vmor %vm2626_vm11, %vm2627_vm9 }
 0xc39   :  { %3304 = vrot.lane.b32.xlu1 %v7141_v37, %s6531_s12  ;;  %2748 = vmatpush.msra.mxu2 %v2682_v54  ;;  %v2623_v60 = vsub.f32 1.0, %v2622_v40  ;;  %v3749_v40 = vpop.permute.xlu2 %3748 }
 0xc3a   :  { %6124 = vrot.lane.b32.xlu0 %v7095_v57, %s6530_s6  ;;  %5733 = vmatmul.msk.f32.vlgmr.msra.gmra.mxu2 %vm368_vm3, %v2590_v21 }
 0xc3b   :  { %5773 = vmatpush.msk.msrb.mxu2 %vm1858_vm6, %v1124_v33  ;;  %v2624_v45 = vmul.f32 %v6345_v16, %v2623_v60 }
 0xc3d   :  { %v2625_v56 = vadd.f32 %v6345_v16, %v2624_v45 }
 0xc41   :  { %3298 = vrot.lane.b32.xlu1 %v7161_v38, %s6531_s12 }
 0xc42   :  { %5734 = vmatmul.msk.f32.gmra.mxu2 %vm368_vm3, %v2605_v14  ;;  %v2632_v14 = vand.u32 2147483648, %v2566_v43 }
 0xc44   :  { %v8163_v12 = vpop.permute.xlu0 %3750 }
 0xc49   :  { %3280 = vrot.lane.b32.xlu1 %v7208_v11, %s6531_s12 }
 0xc4c   :  { %v8168_v44 = vpop.permute.xlu0 %3746 }
 0xc51   :  { %3286 = vrot.lane.b32.xlu1 %v7226_v52, %s6531_s12 }
 0xc54   :  { %v8176_v3 = vpop.permute.xlu0 %3742 }
 0xc59   :  { %3292 = vrot.lane.b32.xlu1 %v7264_v1, %s6531_s12 }
 0xc5b   :  { %v2563_v59 = vpop.xlane.xlu1 %2562 }
 0xc5c   :  { %6346 = vrcp.f32 %v2563_v59  ;;  %v2617_v9 = vand.u32 2147483648, %v2563_v59  ;;  %v2615_v22 = vand.u32 2147483647, %v2563_v59  ;;  %vm2611_vm7 = vweird.f32 %v2563_v59 }
 0xc5d   :  { %6348 = vrcp.f32 %v8146_v4 }
 0xc5e   :  { %6350 = vrcp.f32 %v8152_v6  ;;  %v2618_v54 = vor.u32 1.1754944e-38, %v2617_v9  ;;  %vm2616_vm10 = vcmp.eq.f32.partialorder %v2615_v22, 8.507059e+37  ;;  %v2647_v22 = vand.u32 2147483648, %v8146_v4 }
 0xc5f   :  { %6352 = vrcp.f32 %v8156_v23 }
 0xc61   :  { %4019 = vrot.lane.b32.xlu1 %v7133_v34, %s6530_s6 }
 0xc62   :  { %v6347_v53 = vpop.eup %6346 }
 0xc63   :  { %v6349_v49 = vpop.eup %6348  ;;  %v2607_v26 = vmul.f32 %v6347_v53, %v2563_v59  ;;  %vm2612_vm5 = vweird.f32 %v6347_v53 }
 0xc64   :  { %v2637_v2 = vmul.f32 %v6349_v49, %v8146_v4  ;;  %vm2613_vm8 = vmor %vm2611_vm7, %vm2612_vm5  ;;  %v6351_v0 = vpop.eup %6350  ;;  %vm2642_vm2 = vweird.f32 %v6349_v49  ;;  %vm2641_vm5 = vweird.f32 %v8146_v4 }
 0xc65   :  { %v2608_v61 = vsub.f32 1.0, %v2607_v26  ;;  %v2652_v26 = vmul.f32 %v6351_v0, %v8152_v6  ;;  %v6353_v43 = vpop.eup %6352  ;;  %vm2643_vm7 = vmor %vm2641_vm5, %vm2642_vm2  ;;  %vm2657_vm9 = vweird.f32 %v6351_v0  ;;  %vm2671_vm2 = vweird.f32 %v8156_v23 }
 0xc66   :  { %v2638_v21 = vsub.f32 1.0, %v2637_v2  ;;  %v2633_v2 = vor.u32 1.1754944e-38, %v2632_v14  ;;  %v2648_v14 = vor.u32 1.1754944e-38, %v2647_v22 }
 0xc67   :  { %v2609_v35 = vmul.f32 %v6347_v53, %v2608_v61  ;;  %v2629_v61 = vsel %vm2628_vm12, %v6345_v16, %v2625_v56  ;;  %v2653_v9 = vsub.f32 1.0, %v2652_v26  ;;  %v3739_v56 = vpop.permute.xlu2 %3738 }
 0xc68   :  { %v2639_v60 = vmul.f32 %v6349_v49, %v2638_v21  ;;  %v2645_v21 = vand.u32 2147483647, %v8146_v4  ;;  %v2662_v4 = vand.u32 2147483648, %v8152_v6 }
 0xc69   :  { %v2610_v8 = vadd.f32 %v6347_v53, %v2609_v35  ;;  %4001 = vrot.lane.b32.xlu1 %v7182_v41, %s6530_s6  ;;  %v2654_v16 = vmul.f32 %v6351_v0, %v2653_v9 }
 0xc6a   :  { %v2640_v35 = vadd.f32 %v6349_v49, %v2639_v60 }
 0xc6b   :  { %v2614_v50 = vsel %vm2613_vm8, %v6347_v53, %v2610_v8  ;;  %v2634_v53 = vsel %vm2631_vm13, %v2633_v2, %v2629_v61  ;;  %vm2646_vm8 = vcmp.eq.f32.partialorder %v2645_v21, 8.507059e+37  ;;  %v2663_v2 = vor.u32 1.1754944e-38, %v2662_v4 }
 0xc6c   :  { %v2619_v33 = vsel %vm2616_vm10, %v2618_v54, %v2614_v50  ;;  %v2635_v8 = vmul.f32 %v8005_v20, %v2634_v53  ;;  %v2667_v54 = vmul.f32 %v6353_v43, %v8156_v23  ;;  %v2644_v50 = vsel %vm2643_vm7, %v6349_v49, %v2640_v35 }
 0xc6d   :  { %v2620_v59 = vmul.f32 %v8042_v47, %v2619_v33  ;;  %v3737_v47 = vpop.permute.xlu0 %3736  ;;  %v2649_v33 = vsel %vm2646_vm8, %v2648_v14, %v2644_v50  ;;  %v2655_v20 = vadd.f32 %v6351_v0, %v2654_v16  ;;  %vm2656_vm10 = vweird.f32 %v8152_v6 }
 0xc6e   :  { %v2668_v62 = vsub.f32 1.0, %v2667_v54  ;;  %v2650_v60 = vmul.f32 %v7998_v48, %v2649_v33  ;;  %v2660_v49 = vand.u32 2147483647, %v8152_v6  ;;  %vm2658_vm11 = vmor %vm2656_vm10, %vm2657_vm9  ;;  %vm2672_vm13 = vweird.f32 %v6353_v43 }
 0xc6f   :  { %5735 = vmatmul.msk.f32.gmra.mxu2 %vm368_vm3, %v2620_v59  ;;  %v8201_v53 = vpop.permute.xlu2 %3720  ;;  %v2677_v6 = vand.u32 2147483648, %v8156_v23  ;;  %vm2673_vm5 = vmor %vm2671_vm2, %vm2672_vm13 }
 0xc70   :  { %v2669_v26 = vmul.f32 %v6353_v43, %v2668_v62  ;;  %vm2661_vm12 = vcmp.eq.f32.partialorder %v2660_v49, 8.507059e+37 }
 0xc71   :  { %v2678_v35 = vor.u32 1.1754944e-38, %v2677_v6 }
 0xc72   :  { %v2670_v9 = vadd.f32 %v6353_v43, %v2669_v26 }
 0xc73   :  { %v3753_v45 = vpop.permute.xlu1 %3752 }
 0xc74   :  { %5814 = vmatpush.xpose.msk.msra.mxu2 %vm1126_vm15, %v3753_v45  ;;  %v2675_v45 = vand.u32 2147483647, %v8156_v23 }
 0xc75   :  { %v8196_v61 = vpop.permute.xlu0 %3722 }
 0xc76   :  { %vm2676_vm7 = vcmp.eq.f32.partialorder %v2675_v45, 8.507059e+37 }
 0xc77   :  { %5736 = vmatmul.msk.f32.gmra.mxu2 %vm368_vm3, %v2635_v8  ;;  %v8213_v21 = vpop.permute.xlu2 %3726 }
 0xc78   :  { %5815 = vmatpush.xpose.msk.msra.mxu2 %vm1126_vm15, %v8163_v12  ;;  %v2659_v12 = vsel %vm2658_vm11, %v6351_v0, %v2655_v20 }
 0xc7b   :  { %v3745_v59 = vpop.permute.xlu1 %3744 }
 0xc7c   :  { %5816 = vmatpush.xpose.msk.msra.mxu2 %vm1126_vm15, %v3749_v40  ;;  %v2664_v40 = vsel %vm2661_vm12, %v2663_v2, %v2659_v12 }
 0xc7d   :  { %v2665_v0 = vmul.f32 %v8003_v17, %v2664_v40  ;;  %v8211_v22 = vpop.permute.xlu0 %3728  ;;  %v3190_v17 = vpop.f32.mrf.mxu1 }
 0xc7f   :  { %5737 = vmatmul.msk.f32.gmra.mxu2 %vm368_vm3, %v2650_v60 }
 0xc80   :  { %5817 = vmatpush.xpose.msk.msra.mxu2 %vm1126_vm15, %v8168_v44  ;;  %v2674_v44 = vsel %vm2673_vm5, %v6353_v43, %v2670_v9 }
 0xc81   :  { %v2679_v8 = vsel %vm2676_vm7, %v2678_v35, %v2674_v44 }
 0xc82   :  { %v2680_v23 = vmul.f32 %v8011_v13, %v2679_v8 }
 0xc83   :  { %v3741_v48 = vpop.permute.xlu1 %3740 }
 0xc84   :  { %5818 = vmatpush.xpose.msk.msra.mxu2 %vm1126_vm15, %v3745_v59 }
 0xc85   :  { %v3311_v43 = vpop.permute.xlu0 %3310  ;;  %v3193_v50 = vpop.f32.mrf.mxu1 }
 0xc87   :  { %5738 = vmatmul.msk.f32.gmra.mxu2 %vm368_vm3, %v2665_v0 }
 0xc88   :  { %5819 = vmatpush.xpose.msk.msra.mxu2 %vm1126_vm15, %v8176_v3  ;;  %v8222_v3 = vpop.permute.xlu2 %3730 }
 0xc8b   :  { %v3735_v16 = vpop.permute.xlu1 %3734 }
 0xc8c   :  { %5820 = vmatpush.xpose.msk.msra.mxu2 %vm1126_vm15, %v3741_v48 }
 0xc8d   :  { %v3307_v13 = vpop.permute.xlu0 %3306 }
 0xc8f   :  { %5739 = vmatmul.msk.f32.gmra.mxu2 %vm368_vm3, %v2680_v23 }
 0xc90   :  { %5821 = vmatpush.xpose.msk.msra.mxu2 %vm1126_vm15, %v3739_v56  ;;  %v8227_v33 = vpop.permute.xlu2 %3732  ;;  %v3196_v56 = vpop.f32.mrf.mxu1 }
 0xc93   :  { %v8219_v54 = vpop.permute.xlu1 %3724 }
 0xc94   :  { %5822 = vmatpush.xpose.msk.msra.mxu2 %vm1126_vm15, %v3737_v47 }
 0xc95   :  { %v3301_v47 = vpop.permute.xlu0 %3300 }
 0xc97   :  { %5774 = vmatmul.msk.f32.vlgmr.msrb.gmra.mxu2 %vm1126_vm15, %v3190_v17 }
 0xc98   :  { %5823 = vmatpush.xpose.msk.msra.mxu2 %vm1126_vm15, %v3735_v16  ;;  %v3303_v59 = vpop.permute.xlu2 %3302  ;;  %v3199_v20 = vpop.f32.mrf.mxu1 }
 0xc9b   :  { %v3313_v14 = vpop.permute.xlu1 %3312 }
 0xc9c   :  { %5781 = vmatpush.xpose.msk.msrb.mxu0 %vm1126_vm15, %v3313_v14 }
 0xc9d   :  { %v3295_v60 = vpop.permute.xlu0 %3294 }
 0xc9f   :  { %5775 = vmatmul.msk.f32.gmra.mxu2 %vm1126_vm15, %v3193_v50 }
 0xca0   :  { %5782 = vmatpush.xpose.msk.msrb.mxu0 %vm1126_vm15, %v3311_v43  ;;  %v3297_v49 = vpop.permute.xlu2 %3296  ;;  %v3202_v12 = vpop.f32.mrf.mxu1 }
 0xca3   :  { %v3309_v62 = vpop.permute.xlu1 %3308 }
 0xca4   :  { %5783 = vmatpush.xpose.msk.msrb.mxu0 %vm1126_vm15, %v3309_v62 }
 0xca5   :  { %v8240_v2 = vpop.permute.xlu0 %3284 }
 0xca7   :  { %5776 = vmatmul.msk.f32.gmra.mxu2 %vm1126_vm15, %v3196_v56 }
 0xca8   :  { %5784 = vmatpush.xpose.msk.msrb.mxu0 %vm1126_vm15, %v3307_v13  ;;  %v3205_v9 = vpop.f32.mrf.mxu1  ;;  %v3283_v48 = vpop.permute.xlu2 %3282 }
 0xcab   :  { %v3305_v4 = vpop.permute.xlu1 %3304 }
 0xcac   :  { %5785 = vmatpush.xpose.msk.msrb.mxu0 %vm1126_vm15, %v3305_v4 }
 0xcad   :  { %v3291_v0 = vpop.permute.xlu0 %3290 }
 0xcaf   :  { %5777 = vmatmul.msk.f32.gmra.mxu2 %vm1126_vm15, %v3199_v20 }
 0xcb0   :  { %5786 = vmatpush.xpose.msk.msrb.mxu0 %vm1126_vm15, %v3303_v59  ;;  %v3208_v35 = vpop.f32.mrf.mxu1  ;;  %v3289_v8 = vpop.permute.xlu2 %3288 }
 0xcb3   :  { %v3299_v26 = vpop.permute.xlu1 %3298 }
 0xcb4   :  { %5787 = vmatpush.xpose.msk.msrb.mxu0 %vm1126_vm15, %v3301_v47 }
 0xcb5   :  { %v6120_v23 = vpop.permute.xlu0 %6119 }
 0xcb6   :  { %v6121_v13 = vunpack.i.l.bf16 %v6120_v23  ;;  %v6122_v62 = vunpack.i.h.bf16 %v6120_v23 }
 0xcb7   :  { %5778 = vmatmul.msk.f32.gmra.mxu2 %vm1126_vm15, %v3202_v12 }
 0xcb8   :  { %5788 = vmatpush.xpose.msk.msrb.mxu0 %vm1126_vm15, %v3299_v26  ;;  %v6115_v17 = vpop.permute.xlu2 %6114 }
 0xcb9   :  { %v6116_v50 = vunpack.i.l.bf16 %v6115_v17  ;;  %v6117_v14 = vunpack.i.h.bf16 %v6115_v17 }
 0xcbb   :  { %v3281_v40 = vpop.permute.xlu1 %3280 }
 0xcbc   :  { %5789 = vmatpush.xpose.msk.msrb.mxu0 %vm1126_vm15, %v3297_v49 }
 0xcbd   :  { %v2750_v6 = vpop.f32.mrf.mxu2  ;;  %v6125_v56 = vpop.permute.xlu0 %6124 }
 0xcbe   :  { %5741 = vmatmul.msk.f32.vlgmr.msra.gmra.mxu0 %vm1126_vm15, %v2750_v6  ;;  %v6126_v47 = vunpack.i.l.bf16 %v6125_v56  ;;  %v6127_v20 = vunpack.i.h.bf16 %v6125_v56 }
 0xcbf   :  { %5779 = vmatmul.msk.f32.gmra.mxu2 %vm1126_vm15, %v3205_v9 }
 0xcc0   :  { %5790 = vmatpush.xpose.msk.msrb.mxu0 %vm1126_vm15, %v3295_v60  ;;  %v6130_v59 = vpop.permute.xlu2 %6129 }
 0xcc1   :  { %v6132_v4 = vunpack.i.h.bf16 %v6130_v59 }
 0xcc3   :  { %v3287_v45 = vpop.permute.xlu1 %3286 }
 0xcc5   :  { %v2753_v44 = vpop.f32.mrf.mxu2 }
 0xcc6   :  { %5742 = vmatmul.msk.f32.gmra.mxu0 %vm1126_vm15, %v2753_v44 }
 0xcc7   :  { %5780 = vmatmul.msk.f32.gmra.mxu2 %vm1126_vm15, %v3208_v35 }
 0xccb   :  { %v3293_v16 = vpop.permute.xlu1 %3292 }
 0xccf   :  { %5824 = vmatmul.msk.f32.vlgmr.msra.gmra.mxu2 %vm1126_vm15, %v8201_v53  ;;  %v6131_v53 = vunpack.i.l.bf16 %v6130_v59 }
 0xcd3   :  { %v4020_v43 = vpop.permute.xlu1 %4019 }
 0xcd4   :  { %5831 = vmatpush.msk.msra.mxu0 %vm1413_vm14, %v4020_v43 }
 0xcd6   :  { %4060 = vmatpush.msra.mxu0 %v6116_v50 }
 0xcd7   :  { %5825 = vmatmul.msk.f32.gmra.mxu2 %vm1126_vm15, %v8196_v61 }
 0xcd8   :  { %4061 = vmatpush.msra.mxu0 %v6117_v14 }
 0xcda   :  { %4062 = vmatpush.msra.mxu0 %v6121_v13 }
 0xcdb   :  { %v4002_v60 = vpop.permute.xlu1 %4001 }
 0xcdc   :  { %4063 = vmatpush.msra.mxu0 %v6122_v62 }
 0xcde   :  { %4064 = vmatpush.msra.mxu0 %v6126_v47 }
 0xcdf   :  { %5826 = vmatmul.msk.f32.gmra.mxu2 %vm1126_vm15, %v8219_v54 }
 0xce0   :  { %4065 = vmatpush.msra.mxu0 %v6127_v20 }
 0xce2   :  { %4066 = vmatpush.msra.mxu0 %v6131_v53 }
 0xce4   :  { %4067 = vmatpush.msra.mxu0 %v6132_v4 }
 0xce6   :  { %4068 = vmatpush.msra.mxu0 %v4002_v60 }
 0xce7   :  { %5827 = vmatmul.msk.f32.gmra.mxu2 %vm1126_vm15, %v8213_v21 }
 0xcef   :  { %5828 = vmatmul.msk.f32.gmra.mxu2 %vm1126_vm15, %v8211_v22 }
 0xcf2   :  { %v2756_v61 = vpop.f32.mrf.mxu2 }
 0xcf3   :  { %5743 = vmatmul.msk.f32.gmra.mxu0 %vm1126_vm15, %v2756_v61 }
 0xcf7   :  { %5829 = vmatmul.msk.f32.gmra.mxu2 %vm1126_vm15, %v8222_v3 }
 0xcfa   :  { %v2759_v54 = vpop.f32.mrf.mxu2 }
 0xcfb   :  { %5744 = vmatmul.msk.f32.gmra.mxu0 %vm1126_vm15, %v2759_v54 }
 0xcff   :  { %5830 = vmatmul.msk.f32.gmra.mxu2 %vm1126_vm15, %v8227_v33 }
 0xd02   :  { %v2762_v49 = vpop.f32.mrf.mxu2 }
 0xd03   :  { %5745 = vmatmul.msk.f32.gmra.mxu0 %vm1126_vm15, %v2762_v49 }
 0xd0a   :  { %v2765_v26 = vpop.f32.mrf.mxu2 }
 0xd0b   :  { %5746 = vmatmul.msk.f32.gmra.mxu0 %vm1126_vm15, %v2765_v26 }
 0xd12   :  { %v2768_v21 = vpop.f32.mrf.mxu2 }
 0xd13   :  { %5747 = vmatmul.msk.f32.gmra.mxu0 %vm1126_vm15, %v2768_v21 }
 0xd1a   :  { %v8268_v22 = vpop.f32.mrf.mxu2 }
 0xd1b   :  { %9265 = vst [vmem:[#allocation37_spill] sm:$0xff] %v8268_v22  ;;  %5791 = vmatmul.msk.f32.vlgmr.msrb.gmra.mxu0 %vm1126_vm15, %v3281_v40 }
 0xd22   :  { %v8271_v3 = vpop.f32.mrf.mxu2 }
 0xd23   :  { %9266 = vst [vmem:[#allocation38_spill] sm:$0xff] %v8271_v3  ;;  %5792 = vmatmul.msk.f32.gmra.mxu0 %vm1126_vm15, %v3283_v48 }
 0xd2a   :  { %v8274_v12 = vpop.f32.mrf.mxu2 }
 0xd2b   :  { %9267 = vst [vmem:[#allocation39_spill] sm:$0xff] %v8274_v12  ;;  %5793 = vmatmul.msk.f32.gmra.mxu0 %vm1126_vm15, %v8240_v2 }
 0xd32   :  { %v8278_v33 = vpop.f32.mrf.mxu2 }
 0xd33   :  { %9268 = vst [vmem:[#allocation40_spill] sm:$0xff] %v8278_v33  ;;  %5794 = vmatmul.msk.f32.gmra.mxu0 %vm1126_vm15, %v3287_v45 }
 0xd3a   :  { %v8281_v9 = vpop.f32.mrf.mxu2 }
 0xd3b   :  { %5795 = vmatmul.msk.f32.gmra.mxu0 %vm1126_vm15, %v3289_v8  ;;  %v8291_v23 = vpop.f32.mrf.mxu0 }
 0xd3c   :  { %9270 = vst [vmem:[#allocation42_spill] sm:$0xff] %v8291_v23 }
 0xd42   :  { %v8284_v6 = vpop.f32.mrf.mxu2 }
 0xd43   :  { %9269 = vst [vmem:[#allocation41_spill] sm:$0xff] %v8284_v6  ;;  %5796 = vmatmul.msk.f32.gmra.mxu0 %vm1126_vm15, %v3291_v0  ;;  %v8297_v0 = vpop.f32.mrf.mxu0 }
 0xd44   :  { %9271 = vst [vmem:[#allocation43_spill] sm:$0xff] %v8297_v0 }
 0xd4a   :  { %v8287_v40 = vpop.f32.mrf.mxu2 }
 0xd4b   :  { %5797 = vmatmul.msk.f32.gmra.mxu0 %vm1126_vm15, %v3293_v16 }
 0xd52   :  { %v3805_v48 = vpop.f32.mrf.mxu2 }
 0xd5a   :  { %v3808_v44 = vpop.f32.mrf.mxu2 }
 0xd5b   :  { %v3827_v35 = vmul.f32 0.5, %v3808_v44 }
 0xd5d   :  { %v3836_v2 = vsel %vm368_vm3, %v3827_v35, -inf }
 0xd5e   :  { %3837 = vmax.xlane.f32.xlu0 %v3836_v2  ;;  %v3826_v2 = vmul.f32 0.5, %v3805_v48 }
 0xd62   :  { %v3811_v45 = vpop.f32.mrf.mxu2 }
 0xd63   :  { %v8293_v17 = vmul.f32 0.5, %v3811_v45 }
 0xd65   :  { %v3839_v8 = vsel %vm368_vm3, %v8293_v17, -inf }
 0xd66   :  { %3840 = vmax.xlane.f32.xlu1 %v3839_v8 }
 0xd6a   :  { %v3814_v43 = vpop.f32.mrf.mxu2 }
 0xd70   :  { %v8299_v50 = vpop.f32.mrf.mxu0 }
 0xd71   :  { %9272 = vst [vmem:[#allocation44_spill] sm:$0xff] %v8299_v50 }
 0xd72   :  { %v3817_v16 = vpop.f32.mrf.mxu2 }
 0xd78   :  { %v8301_v14 = vpop.f32.mrf.mxu0 }
 0xd79   :  { %9273 = vst [vmem:[#allocation45_spill] sm:$0xff] %v8301_v14 }
 0xd7a   :  { %v3820_v13 = vpop.f32.mrf.mxu2 }
 0xd7b   :  { %v3831_v56 = vmul.f32 0.5, %v3820_v13  ;;  %v3833_v13 = vsel %vm368_vm3, %v3826_v2, -inf }
 0xd7d   :  { %v3848_v62 = vsel %vm368_vm3, %v3831_v56, -inf }
 0xd7e   :  { %3849 = vmax.xlane.f32.xlu1 %v3848_v62 }
 0xd80   :  { %v8304_v47 = vpop.f32.mrf.mxu0 }
 0xd88   :  { %v8306_v59 = vpop.f32.mrf.mxu0 }
 0xd89   :  { %9274 = vst [vmem:[#allocation46_spill] sm:$0xff] %v8306_v59 }
 0xd90   :  { %v8308_v20 = vpop.f32.mrf.mxu0 }
 0xd98   :  { %v3365_v53 = vpop.f32.mrf.mxu0 }
 0xd99   :  { %v3386_v4 = vmul.f32 0.5, %v3365_v53 }
 0xd9b   :  { %v3393_v60 = vsel %vm368_vm3, %v3386_v4, -inf }
 0xd9c   :  { %3394 = vmax.xlane.f32.xlu2 %v3393_v60 }
 0xda0   :  { %v3368_v61 = vpop.f32.mrf.mxu0 }
 0xda1   :  { %v8311_v54 = vmul.f32 0.5, %v3368_v61 }
 0xda3   :  { %v3396_v49 = vsel %vm368_vm3, %v8311_v54, -inf }
 0xda4   :  { %3397 = vmax.xlane.f32.xlu2 %v3396_v49  ;;  %v8328_v49 = vmul.f32 0.5, %v3817_v16 }
 0xda8   :  { %v3371_v26 = vpop.f32.mrf.mxu0 }
 0xda9   :  { %v8315_v21 = vmul.f32 0.5, %v3371_v26 }
 0xdab   :  { %v3399_v44 = vsel %vm368_vm3, %v8315_v21, -inf }
 0xdac   :  { %3400 = vmax.xlane.f32.xlu2 %v3399_v44  ;;  %v3845_v44 = vsel %vm368_vm3, %v8328_v49, -inf }
 0xdb0   :  { %v3374_v45 = vpop.f32.mrf.mxu0 }
 0xdb1   :  { %v8319_v8 = vmul.f32 0.5, %v3374_v45 }
 0xdb3   :  { %v3402_v62 = vsel %vm368_vm3, %v8319_v8, -inf }
 0xdb4   :  { %3834 = vmax.xlane.f32.xlu2 %v3833_v13  ;;  %3403 = vmax.xlane.f32.xlu0 %v3402_v62  ;;  %v3829_v13 = vmul.f32 0.5, %v3814_v43 }
 0xdb6   :  { %v3842_v6 = vsel %vm368_vm3, %v3829_v13, -inf }
 0xdb8   :  { %v3377_v53 = vpop.f32.mrf.mxu0 }
 0xdb9   :  { %v8324_v60 = vmul.f32 0.5, %v3377_v53 }
 0xdbb   :  { %v3405_v61 = vsel %vm368_vm3, %v8324_v60, -inf }
 0xdbc   :  { %3406 = vmax.xlane.f32.xlu0 %v3405_v61 }
 0xdc0   :  { %v3380_v48 = vpop.f32.mrf.mxu0 }
 0xdc1   :  { %v8330_v26 = vmul.f32 0.5, %v3380_v48 }
 0xdc3   :  { %v3408_v45 = vsel %vm368_vm3, %v8330_v26, -inf }
 0xdc4   :  { %3846 = vmax.xlane.f32.xlu0 %v3845_v44  ;;  %3409 = vmax.xlane.f32.xlu2 %v3408_v45 }
 0xdc8   :  { %v3383_v62 = vpop.f32.mrf.mxu0 }
 0xdc9   :  { %v8336_v53 = vmul.f32 0.5, %v3383_v62 }
 0xdcb   :  { %v3411_v16 = vsel %vm1241_vm1, %v8336_v53, -inf }
 0xdcc   :  { %3843 = vmax.xlane.f32.xlu2 %v3842_v6  ;;  %3412 = vmax.xlane.f32.xlu0 %v3411_v16 }
 0xdd1   :  { %v3838_v61 = vpop.xlane.xlu0 %3837 }
 0xdd2   :  { %v3855_v48 = vsub.f32 %v3827_v35, %v3838_v61 }
 0xdd4   :  { %v3863_v59 = vmul.f32 1.442695, %v3855_v48  ;;  %v3823_v48 = vpop.f32.mrf.mxu2 }
 0xdd5   :  { %v8353_v50 = vmul.f32 0.5, %v3823_v48 }
 0xdd6   :  { %6354 = vpow2.f32 %v3863_v59 }
 0xdd9   :  { %v3841_v43 = vpop.xlane.xlu1 %3840 }
 0xddc   :  { %v8341_v33 = vpop.eup %6354 }
 0xddd   :  { %v3878_v44 = vsel %vm368_vm3, %v8341_v33, 0.0 }
 0xdde   :  { %3879 = vadd.xlane.f32.xlu1 %v3878_v44 }
 0xdf1   :  { %v3850_v45 = vpop.xlane.xlu1 %3849 }
 0xdf2   :  { %v3859_v62 = vsub.f32 %v3831_v56, %v3850_v45  ;;  %v3856_v45 = vsub.f32 %v8293_v17, %v3841_v43 }
 0xdf4   :  { %v3871_v16 = vmul.f32 1.442695, %v3859_v62 }
 0xdf7   :  { %6139 = vrot.lane.b32.xlu1 %v7099_v19, %s6531_s12 }
 0xe0f   :  { %v3395_v14 = vpop.xlane.xlu2 %3394 }
 0xe10   :  { %v3414_v12 = vsub.f32 %v3386_v4, %v3395_v14  ;;  %v3851_v14 = vsel %vm1241_vm1, %v8353_v50, -inf }
 0xe12   :  { %v3421_v6 = vmul.f32 1.442695, %v3414_v12 }
 0xe14   :  { %6356 = vpow2.f32 %v3421_v6 }
 0xe15   :  { %6358 = vpow2.f32 %v3871_v16  ;;  %v3865_v16 = vmul.f32 1.442695, %v3856_v45 }
 0xe17   :  { %v3398_v35 = vpop.xlane.xlu2 %3397 }
 0xe1a   :  { %v8347_v59 = vpop.eup %6356 }
 0xe1b   :  { %v3435_v61 = vsel %vm368_vm3, %v8347_v59, 0.0  ;;  %v8351_v44 = vpop.eup %6358 }
 0xe1c   :  { %3436 = vadd.xlane.f32.xlu2 %v3435_v61  ;;  %v3890_v12 = vsel %vm368_vm3, %v8351_v44, 0.0 }
 0xe1f   :  { %v8355_v3 = vpop.xlane.xlu2 %3400 }
 0xe21   :  { %3891 = vadd.xlane.f32.xlu1 %v3890_v12 }
 0xe24   :  { %3852 = vmax.xlane.f32.xlu2 %v3851_v14 }
 0xe27   :  { %v3835_v56 = vpop.xlane.xlu2 %3834  ;;  %v3404_v6 = vpop.xlane.xlu0 %3403 }
 0xe28   :  { %v3854_v4 = vsub.f32 %v3826_v2, %v3835_v56 }
 0xe2a   :  { %v3861_v62 = vmul.f32 1.442695, %v3854_v4 }
 0xe2c   :  { %6360 = vpow2.f32 %v3861_v62 }
 0xe2d   :  { %6362 = vpow2.f32 %v3865_v16 }
 0xe2f   :  { %v3407_v12 = vpop.xlane.xlu0 %3406 }
 0xe32   :  { %v8362_v61 = vpop.eup %6360 }
 0xe33   :  { %v3875_v48 = vsel %vm368_vm3, %v8362_v61, 0.0  ;;  %v8366_v22 = vpop.eup %6362 }
 0xe34   :  { %3876 = vadd.xlane.f32.xlu0 %v3875_v48  ;;  %v3881_v17 = vsel %vm368_vm3, %v8366_v22, 0.0 }
 0xe37   :  { %v3410_v0 = vpop.xlane.xlu2 %3409  ;;  %v3847_v2 = vpop.xlane.xlu0 %3846 }
 0xe38   :  { %v3858_v56 = vsub.f32 %v8328_v49, %v3847_v2 }
 0xe3a   :  { %3561 = vrot.lane.b32.xlu1 %v7182_v41, %s6531_s12  ;;  %v3869_v45 = vmul.f32 1.442695, %v3858_v56 }
 0xe3c   :  { %6134 = vrot.lane.b32.xlu2 %v7125_v28, %s6531_s12  ;;  %3882 = vadd.xlane.f32.xlu0 %v3881_v17  ;;  %v3417_v17 = vsub.f32 %v8319_v8, %v3404_v6  ;;  %v3415_v8 = vsub.f32 %v8311_v54, %v3398_v35 }
 0xe3e   :  { %v3423_v6 = vmul.f32 1.442695, %v3415_v8 }
 0xe3f   :  { %v3844_v43 = vpop.xlane.xlu2 %3843 }
 0xe40   :  { %v3857_v14 = vsub.f32 %v3829_v13, %v3844_v43  ;;  %v3427_v13 = vmul.f32 1.442695, %v3417_v17 }
 0xe42   :  { %v3867_v4 = vmul.f32 1.442695, %v3857_v14  ;;  %v3418_v14 = vsub.f32 %v8324_v60, %v3407_v12 }
 0xe44   :  { %6364 = vpow2.f32 %v3867_v4  ;;  %6144 = vrot.lane.b32.xlu2 %v7095_v57, %s6531_s12  ;;  %v3429_v56 = vmul.f32 1.442695, %v3418_v14 }
 0xe45   :  { %6366 = vpow2.f32 %v3869_v45 }
 0xe46   :  { %6368 = vpow2.f32 %v3427_v13 }
 0xe47   :  { %6370 = vpow2.f32 %v3423_v6 }
 0xe48   :  { %6372 = vpow2.f32 %v3429_v56 }
 0xe4a   :  { %v8377_v62 = vpop.eup %6364 }
 0xe4b   :  { %v3884_v16 = vsel %vm368_vm3, %v8377_v62, 0.0  ;;  %v8381_v48 = vpop.eup %6366 }
 0xe4c   :  { %3885 = vadd.xlane.f32.xlu0 %v3884_v16  ;;  %v3887_v49 = vsel %vm368_vm3, %v8381_v48, 0.0  ;;  %v8386_v2 = vpop.eup %6368 }
 0xe4d   :  { %v3444_v43 = vsel %vm368_vm3, %v8386_v2, 0.0  ;;  %v8400_v4 = vpop.eup %6370 }
 0xe4e   :  { %v3438_v54 = vsel %vm368_vm3, %v8400_v4, 0.0  ;;  %v8409_v60 = vpop.eup %6372 }
 0xe54   :  { %3888 = vadd.xlane.f32.xlu0 %v3887_v49 }
 0xe64   :  { %3445 = vadd.xlane.f32.xlu1 %v3444_v43 }
 0xe68   :  { %3579 = vrot.lane.b32.xlu0 %v7133_v34, %s6531_s12 }
 0xe7d   :  { %4188 = vrot.lane.b32.xlu1 %v7117_v24, %s6532_s20  ;;  %v3419_v24 = vsub.f32 %v8330_v26, %v3410_v0  ;;  %v3447_v0 = vsel %vm368_vm3, %v8409_v60, 0.0 }
 0xe7f   :  { %v3431_v35 = vmul.f32 1.442695, %v3419_v24 }
 0xe81   :  { %6374 = vpow2.f32 %v3431_v35 }
 0xe85   :  { %4178 = vrot.lane.b32.xlu1 %v7161_v38, %s6532_s20  ;;  %v3413_v38 = vpop.xlane.xlu0 %3412 }
 0xe87   :  { %v8417_v49 = vpop.eup %6374 }
 0xe88   :  { %v3450_v13 = vsel %vm368_vm3, %v8417_v49, 0.0 }
 0xe8d   :  { %4160 = vrot.lane.b32.xlu1 %v7208_v11, %s6532_s20  ;;  %v3420_v11 = vsub.f32 %v8336_v53, %v3413_v38 }
 0xe8f   :  { %v8402_v45 = vpop.xlane.xlu2 %3436  ;;  %v3433_v17 = vmul.f32 1.442695, %v3420_v11 }
 0xe92   :  { %3439 = vadd.xlane.f32.xlu0 %v3438_v54 }
 0xe95   :  { %4166 = vrot.lane.b32.xlu1 %v7226_v52, %s6532_s20  ;;  %v3880_v52 = vpop.xlane.xlu1 %3879 }
 0xe96   :  { %vm3916_vm13 = vweird.f32 %v3880_v52 }
 0xe97   :  { %v3853_v12 = vpop.xlane.xlu2 %3852 }
 0xe98   :  { %v3860_v16 = vsub.f32 %v8353_v50, %v3853_v12 }
 0xe9a   :  { %v3873_v26 = vmul.f32 1.442695, %v3860_v16  ;;  %3448 = vadd.xlane.f32.xlu0 %v3447_v0 }
 0xe9c   :  { %6376 = vpow2.f32 %v3873_v26 }
 0xe9d   :  { %4172 = vrot.lane.b32.xlu1 %v7264_v1, %s6532_s20  ;;  %6378 = vpow2.f32 %v3433_v17  ;;  %v8431_v23 = vpop.permute.xlu1 %6139 }
 0xe9e   :  { %6380 = vrcp.f32 %v3880_v52 }
 0xea2   :  { %v8421_v53 = vpop.eup %6376  ;;  %3451 = vadd.xlane.f32.xlu0 %v3450_v13 }
 0xea3   :  { %v3893_v50 = vsel %vm1241_vm1, %v8421_v53, 0.0  ;;  %v8427_v43 = vpop.eup %6378 }
 0xea4   :  { %3894 = vadd.xlane.f32.xlu2 %v3893_v50  ;;  %v6381_v8 = vpop.eup %6380  ;;  %v3453_v6 = vsel %vm1241_vm1, %v8427_v43, 0.0 }
 0xea5   :  { %4459 = vrot.lane.b32.xlu1 %v7133_v34, %s6532_s20  ;;  %v3912_v14 = vmul.f32 %v6381_v8, %v3880_v52  ;;  %vm3917_vm10 = vweird.f32 %v6381_v8 }
 0xea6   :  { %vm3918_vm2 = vmor %vm3916_vm13, %vm3917_vm10 }
 0xea7   :  { %v3877_v1 = vpop.xlane.xlu0 %3876  ;;  %v3913_v24 = vsub.f32 1.0, %v3912_v14  ;;  %v3922_v14 = vand.u32 2147483648, %v3880_v52 }
 0xea8   :  { %6382 = vrcp.f32 %v3877_v1  ;;  %v3907_v12 = vand.u32 2147483648, %v3877_v1  ;;  %v3905_v34 = vand.u32 2147483647, %v3877_v1  ;;  %vm3901_vm9 = vweird.f32 %v3877_v1 }
 0xea9   :  { %v3914_v11 = vmul.f32 %v6381_v8, %v3913_v24  ;;  %v3923_v41 = vor.u32 1.1754944e-38, %v3922_v14 }
 0xeaa   :  { %3454 = vadd.xlane.f32.xlu0 %v3453_v6  ;;  %v3908_v17 = vor.u32 1.1754944e-38, %v3907_v12  ;;  %vm3906_vm12 = vcmp.eq.f32.partialorder %v3905_v34, 8.507059e+37 }
 0xeab   :  { %v3915_v13 = vadd.f32 %v6381_v8, %v3914_v11  ;;  %v8439_v11 = vpop.xlane.xlu1 %3891 }
 0xeae   :  { %v6383_v56 = vpop.eup %6382 }
 0xeaf   :  { %v3897_v54 = vmul.f32 %v6383_v56, %v3877_v1  ;;  %v3883_v35 = vpop.xlane.xlu0 %3882  ;;  %vm3902_vm8 = vweird.f32 %v6383_v56  ;;  %v3919_v1 = vsel %vm3918_vm2, %v6381_v8, %v3915_v13 }
 0xeb0   :  { %6384 = vrcp.f32 %v3883_v35  ;;  %vm3903_vm11 = vmor %vm3901_vm9, %vm3902_vm8  ;;  %vm3931_vm8 = vweird.f32 %v3883_v35 }
 0xeb1   :  { %v3898_v38 = vsub.f32 1.0, %v3897_v54  ;;  %v3920_v54 = vand.u32 2147483647, %v3880_v52 }
 0xeb3   :  { %v3899_v16 = vmul.f32 %v6383_v56, %v3898_v38  ;;  %vm3921_vm5 = vcmp.eq.f32.partialorder %v3920_v54, 8.507059e+37 }
 0xeb5   :  { %v3900_v0 = vadd.f32 %v6383_v56, %v3899_v16 }
 0xeb6   :  { %v6385_v26 = vpop.eup %6384 }
 0xeb7   :  { %v3904_v50 = vsel %vm3903_vm11, %v6383_v56, %v3900_v0  ;;  %v3927_v6 = vmul.f32 %v6385_v26, %v3883_v35  ;;  %v3924_v56 = vsel %vm3921_vm5, %v3923_v41, %v3919_v1  ;;  %vm3932_vm7 = vweird.f32 %v6385_v26 }
 0xeb8   :  { %v3909_v55 = vsel %vm3906_vm12, %v3908_v17, %v3904_v50  ;;  %v3925_v8 = vmul.f32 %v8341_v33, %v3924_v56  ;;  %vm3933_vm9 = vmor %vm3931_vm8, %vm3932_vm7 }
 0xeb9   :  { %v3910_v24 = vmul.f32 %v8362_v61, %v3909_v55  ;;  %v3928_v38 = vsub.f32 1.0, %v3927_v6  ;;  %v3937_v55 = vand.u32 2147483648, %v3883_v35  ;;  %v3935_v61 = vand.u32 2147483647, %v3883_v35 }
 0xebb   :  { %v3929_v16 = vmul.f32 %v6385_v26, %v3928_v38  ;;  %5832 = vmatmul.msk.f32.vlgmr.msra.gmra.mxu0 %vm368_vm3, %v3910_v24  ;;  %v3938_v0 = vor.u32 1.1754944e-38, %v3937_v55  ;;  %vm3936_vm10 = vcmp.eq.f32.partialorder %v3935_v61, 8.507059e+37  ;;  %v3416_v61 = vsub.f32 %v8315_v21, %v8355_v3 }
 0xebc   :  { %6149 = vrot.lane.b32.xlu2 %v7302_v7, %s6531_s12  ;;  %v3982_v3 = vand.u32 2147483648, %v8439_v11 }
 0xebd   :  { %v3930_v12 = vadd.f32 %v6385_v26, %v3929_v16 }
 0xebe   :  { %4190 = vrot.lane.b32.xlu0 %v7130_v32, %s6532_s20 }
 0xebf   :  { %v3886_v52 = vpop.xlane.xlu0 %3885  ;;  %v3934_v34 = vsel %vm3933_vm9, %v6385_v26, %v3930_v12 }
 0xec0   :  { %6386 = vrcp.f32 %v3886_v52  ;;  %v3939_v41 = vsel %vm3936_vm10, %v3938_v0, %v3934_v34  ;;  %v3952_v6 = vand.u32 2147483648, %v3886_v52  ;;  %v3950_v54 = vand.u32 2147483647, %v3886_v52 }
 0xec1   :  { %6388 = vrcp.f32 %v8439_v11  ;;  %v3940_v33 = vmul.f32 %v8366_v22, %v3939_v41  ;;  %vm3946_vm12 = vweird.f32 %v3886_v52 }
 0xec2   :  { %vm3951_vm2 = vcmp.eq.f32.partialorder %v3950_v54, 8.507059e+37  ;;  %v3983_v54 = vor.u32 1.1754944e-38, %v3982_v3 }
 0xec3   :  { %5833 = vmatmul.msk.f32.gmra.mxu0 %vm368_vm3, %v3925_v8 }
 0xec6   :  { %v6387_v32 = vpop.eup %6386  ;;  %4184 = vrot.lane.b32.xlu0 %v7141_v37, %s6532_s20  ;;  %v3953_v37 = vor.u32 1.1754944e-38, %v3952_v6 }
 0xec7   :  { %v3942_v17 = vmul.f32 %v6387_v32, %v3886_v52  ;;  %v3889_v13 = vpop.xlane.xlu0 %3888  ;;  %v6389_v50 = vpop.eup %6388  ;;  %vm3947_vm11 = vweird.f32 %v6387_v32 }
 0xec8   :  { %6390 = vrcp.f32 %v3889_v13  ;;  %v3972_v26 = vmul.f32 %v6389_v50, %v8439_v11  ;;  %vm3948_vm13 = vmor %vm3946_vm12, %vm3947_vm11  ;;  %v3967_v52 = vand.u32 2147483648, %v3889_v13  ;;  %v3965_v0 = vand.u32 2147483647, %v3889_v13 }
 0xec9   :  { %v3943_v35 = vsub.f32 1.0, %v3942_v17  ;;  %vm3961_vm7 = vweird.f32 %v3889_v13  ;;  %vm3977_vm9 = vweird.f32 %v6389_v50  ;;  %vm3976_vm11 = vweird.f32 %v8439_v11 }
 0xeca   :  { %v3973_v22 = vsub.f32 1.0, %v3972_v26  ;;  %v3968_v17 = vor.u32 1.1754944e-38, %v3967_v52  ;;  %vm3966_vm10 = vcmp.eq.f32.partialorder %v3965_v0, 8.507059e+37  ;;  %vm3978_vm12 = vmor %vm3976_vm11, %vm3977_vm9 }
 0xecb   :  { %v3944_v14 = vmul.f32 %v6387_v32, %v3943_v35  ;;  %5834 = vmatmul.msk.f32.gmra.mxu0 %vm368_vm3, %v3940_v33  ;;  %v3980_v33 = vand.u32 2147483647, %v8439_v11  ;;  %v6141_v11 = vunpack.i.l.bf16 %v8431_v23 }
 0xecc   :  { %v3974_v34 = vmul.f32 %v6389_v50, %v3973_v22 }
 0xecd   :  { %v3945_v24 = vadd.f32 %v6387_v32, %v3944_v14 }
 0xece   :  { %v6391_v38 = vpop.eup %6390  ;;  %4180 = vrot.lane.b32.xlu0 %v7082_v51, %s6532_s20  ;;  %v6135_v51 = vpop.permute.xlu2 %6134  ;;  %v3975_v35 = vadd.f32 %v6389_v50, %v3974_v34 }
 0xecf   :  { %v3957_v16 = vmul.f32 %v6391_v38, %v3889_v13  ;;  %v3949_v1 = vsel %vm3948_vm13, %v6387_v32, %v3945_v24  ;;  %vm3962_vm5 = vweird.f32 %v6391_v38  ;;  %v3425_v32 = vmul.f32 1.442695, %v3416_v61  ;;  %v8466_v24 = vpop.permute.xlu1 %3561 }
 0xed0   :  { %v3954_v56 = vsel %vm3951_vm2, %v3953_v37, %v3949_v1  ;;  %vm3963_vm8 = vmor %vm3961_vm7, %vm3962_vm5  ;;  %v6136_v14 = vunpack.i.l.bf16 %v6135_v51  ;;  %v6137_v26 = vunpack.i.h.bf16 %v6135_v51  ;;  %vm3981_vm13 = vcmp.eq.f32.partialorder %v3980_v33, 8.507059e+37 }
 0xed1   :  { %v3958_v12 = vsub.f32 1.0, %v3957_v16  ;;  %v3955_v55 = vmul.f32 %v8377_v62, %v3954_v56  ;;  %6392 = vpow2.f32 %v3425_v32  ;;  %v6142_v16 = vunpack.i.h.bf16 %v8431_v23 }
 0xed2   :  { %6394 = vrcp.f32 %v8402_v45  ;;  %vm3461_vm5 = vweird.f32 %v8402_v45 }
 0xed3   :  { %v3959_v8 = vmul.f32 %v6391_v38, %v3958_v12  ;;  %5835 = vmatmul.msk.f32.gmra.mxu0 %vm368_vm3, %v3955_v55 }
 0xed5   :  { %v3960_v41 = vadd.f32 %v6391_v38, %v3959_v8 }
 0xed6   :  { %4174 = vrot.lane.b32.xlu0 %v7190_v36, %s6532_s20  ;;  %v3979_v36 = vsel %vm3978_vm12, %v6389_v50, %v3975_v35 }
 0xed7   :  { %v3964_v62 = vsel %vm3963_vm8, %v6391_v38, %v3960_v41  ;;  %v6145_v38 = vpop.permute.xlu2 %6144  ;;  %v8468_v37 = vpop.eup %6392 }
 0xed8   :  { %v3969_v21 = vsel %vm3966_vm10, %v3968_v17, %v3964_v62  ;;  %v6146_v1 = vunpack.i.l.bf16 %v6145_v38  ;;  %v6147_v22 = vunpack.i.h.bf16 %v6145_v38  ;;  %v8477_v56 = vpop.xlane.xlu1 %3445  ;;  %v6395_v61 = vpop.eup %6394  ;;  %v3467_v17 = vand.u32 2147483648, %v8402_v45 }
 0xed9   :  { %v3970_v13 = vmul.f32 %v8381_v48, %v3969_v21  ;;  %v3984_v48 = vsel %vm3981_vm13, %v3983_v54, %v3979_v36  ;;  %v3457_v8 = vmul.f32 %v6395_v61, %v8402_v45  ;;  %vm3462_vm2 = vweird.f32 %v6395_v61 }
 0xeda   :  { %v3580_v6 = vpop.permute.xlu0 %3579  ;;  %v3985_v50 = vmul.f32 %v8351_v44, %v3984_v48  ;;  %v3465_v62 = vand.u32 2147483647, %v8402_v45  ;;  %vm3463_vm7 = vmor %vm3461_vm5, %vm3462_vm2 }
 0xedb   :  { %5798 = vmatpush.msk.msra.mxu3 %vm1413_vm14, %v3580_v6  ;;  %5836 = vmatmul.msk.f32.gmra.mxu0 %vm368_vm3, %v3970_v13  ;;  %v3468_v6 = vor.u32 1.1754944e-38, %v3467_v17 }
 0xedd   :  { %3620 = vmatpush.msra.mxu3 %v6136_v14 }
 0xede   :  { %4164 = vrot.lane.b32.xlu0 %v7214_v42, %s6532_s20  ;;  %v3441_v42 = vsel %vm368_vm3, %v8468_v37, 0.0 }
 0xedf   :  { %3621 = vmatpush.msra.mxu3 %v6137_v26 }
 0xee1   :  { %3622 = vmatpush.msra.mxu3 %v6141_v11 }
 0xee3   :  { %3623 = vmatpush.msra.mxu3 %v6142_v16  ;;  %5837 = vmatmul.msk.f32.gmra.mxu0 %vm368_vm3, %v3985_v50 }
 0xee5   :  { %3442 = vadd.xlane.f32.xlu2 %v3441_v42  ;;  %3624 = vmatpush.msra.mxu3 %v6146_v1 }
 0xee6   :  { %4170 = vrot.lane.b32.xlu0 %v7254_v63, %s6532_s20 }
 0xee7   :  { %3625 = vmatpush.msra.mxu3 %v6147_v22 }
 0xeef   :  { %v8479_v23 = vpop.permute.xlu1 %4188 }
 0xef7   :  { %v8481_v12 = vpop.permute.xlu1 %4178 }
 0xefd   :  { %4192 = vrot.lane.b32.xlu2 %v7144_v30, %s6532_s20  ;;  %v3458_v30 = vsub.f32 1.0, %v3457_v8 }
 0xeff   :  { %v8485_v44 = vpop.permute.xlu1 %4160 }
 0xf05   :  { %4186 = vrot.lane.b32.xlu2 %v7105_v18, %s6532_s20  ;;  %v3440_v63 = vpop.xlane.xlu0 %3439  ;;  %v3459_v18 = vmul.f32 %v6395_v61, %v3458_v30 }
 0xf06   :  { %6396 = vrcp.f32 %v3440_v63  ;;  %vm3476_vm10 = vweird.f32 %v3440_v63  ;;  %v3480_v50 = vand.u32 2147483647, %v3440_v63 }
 0xf07   :  { %v8490_v55 = vpop.permute.xlu1 %4166  ;;  %v3460_v32 = vadd.f32 %v6395_v61, %v3459_v18 }
 0xf08   :  { %vm3481_vm5 = vcmp.eq.f32.partialorder %v3480_v50, 8.507059e+37 }
 0xf09   :  { %v3464_v35 = vsel %vm3463_vm7, %v6395_v61, %v3460_v32 }
 0xf0c   :  { %v6397_v34 = vpop.eup %6396 }
 0xf0d   :  { %4182 = vrot.lane.b32.xlu2 %v7114_v25, %s6532_s20  ;;  %v3472_v0 = vmul.f32 %v6397_v34, %v3440_v63  ;;  %vm3477_vm8 = vweird.f32 %v6397_v34 }
 0xf0e   :  { %vm8506_vm11 = vmor %vm3476_vm10, %vm3477_vm8 }
 0xf0f   :  { %v8495_v52 = vpop.permute.xlu1 %4172  ;;  %v3473_v25 = vsub.f32 1.0, %v3472_v0 }
 0xf11   :  { %v3474_v3 = vmul.f32 %v6397_v34, %v3473_v25 }
 0xf13   :  { %v3475_v11 = vadd.f32 %v6397_v34, %v3474_v3 }
 0xf15   :  { %4176 = vrot.lane.b32.xlu2 %v7167_v39, %s6532_s20 }
 0xf17   :  { %v3895_v41 = vpop.xlane.xlu2 %3894  ;;  %v4460_v51 = vpop.permute.xlu1 %4459 }
 0xf18   :  { %6398 = vrcp.f32 %v3895_v41  ;;  %5864 = vmatpush.msk.msrb.mxu2 %vm1413_vm14, %v4460_v51  ;;  %vm3466_vm14 = vcmp.eq.f32.partialorder %v3465_v62, 8.507059e+37  ;;  %v3997_v54 = vand.u32 2147483648, %v3895_v41  ;;  %v3995_v48 = vand.u32 2147483647, %v3895_v41 }
 0xf19   :  { %v3469_v36 = vsel %vm3466_vm14, %v3468_v6, %v3464_v35  ;;  %vm3991_vm12 = vweird.f32 %v3895_v41  ;;  %6400 = vrcp.f32 %v8477_v56 }
 0xf1a   :  { %v3470_v38 = vmul.f32 %v8347_v59, %v3469_v36  ;;  %v3998_v42 = vor.u32 1.1754944e-38, %v3997_v54  ;;  %vm3996_vm2 = vcmp.eq.f32.partialorder %v3995_v48, 8.507059e+37  ;;  %v3479_v59 = vsel %vm8506_vm11, %v6397_v34, %v3475_v11 }
 0xf1b   :  { %vm3506_vm11 = vweird.f32 %v8477_v56 }
 0xf1d   :  { %4162 = vrot.lane.b32.xlu2 %v7216_v46, %s6532_s20  ;;  %v3482_v46 = vand.u32 2147483648, %v3440_v63 }
 0xf1e   :  { %v6399_v39 = vpop.eup %6398 }
 0xf1f   :  { %v3987_v21 = vmul.f32 %v6399_v39, %v3895_v41  ;;  %v6150_v33 = vpop.permute.xlu2 %6149  ;;  %vm3992_vm9 = vweird.f32 %v6399_v39  ;;  %v3483_v61 = vor.u32 1.1754944e-38, %v3482_v46  ;;  %v6401_v18 = vpop.eup %6400  ;;  %v3510_v46 = vand.u32 2147483647, %v8477_v56 }
 0xf20   :  { %v6151_v13 = vunpack.i.l.bf16 %v6150_v33  ;;  %v6152_v26 = vunpack.i.h.bf16 %v6150_v33  ;;  %vm3993_vm13 = vmor %vm3991_vm12, %vm3992_vm9  ;;  %vm3507_vm8 = vweird.f32 %v6401_v18 }
 0xf21   :  { %v3988_v14 = vsub.f32 1.0, %v3987_v21  ;;  %v3484_v30 = vsel %vm3481_vm5, %v3483_v61, %v3479_v59  ;;  %vm3508_vm12 = vmor %vm3506_vm11, %vm3507_vm8 }
 0xf22   :  { %3626 = vmatpush.msra.mxu3 %v6151_v13 }
 0xf23   :  { %v3989_v45 = vmul.f32 %v6399_v39, %v3988_v14 }
 0xf24   :  { %3627 = vmatpush.msra.mxu3 %v6152_v26 }
 0xf25   :  { %v3990_v1 = vadd.f32 %v6399_v39, %v3989_v45  ;;  %4168 = vrot.lane.b32.xlu2 %v7244_v29, %s6532_s20  ;;  %v3485_v29 = vmul.f32 %v8400_v4, %v3484_v30  ;;  %v3512_v45 = vand.u32 2147483648, %v8477_v56 }
 0xf26   :  { %3628 = vmatpush.msra.mxu3 %v8466_v24  ;;  %v8522_v24 = vpop.xlane.xlu0 %3448 }
 0xf27   :  { %5799 = vmatmul.msk.f32.vlgmr.msra.gmra.mxu3 %vm368_vm3, %v3470_v38  ;;  %v3994_v22 = vsel %vm3993_vm13, %v6399_v39, %v3990_v1  ;;  %vm3511_vm13 = vcmp.eq.f32.partialorder %v3510_v46, 8.507059e+37  ;;  %vm3521_vm5 = vweird.f32 %v8522_v24  ;;  %v3525_v30 = vand.u32 2147483647, %v8522_v24 }
 0xf28   :  { %v3999_v8 = vsel %vm3996_vm2, %v3998_v42, %v3994_v22 }
 0xf29   :  { %v4000_v63 = vmul.f32 %v8421_v53, %v3999_v8  ;;  %v3502_v53 = vmul.f32 %v6401_v18, %v8477_v56  ;;  %v3527_v8 = vand.u32 2147483648, %v8522_v24 }
 0xf2b   :  { %5838 = vmatmul.msk.f32.gmra.mxu0 %vm368_vm3, %v4000_v63  ;;  %v3503_v51 = vsub.f32 1.0, %v3502_v53  ;;  %v1125_v63 = vld [vmem:[%s9247_s14 + $0x18] sm:$0xff] }
 0xf2c   :  { %5839 = vmatpush.msk.msra.mxu3 %vm1858_vm6, %v1125_v63 }
 0xf2d   :  { %6154 = vrot.lane.b32.xlu2 %v7125_v28, %s6532_s20  ;;  %v3504_v62 = vmul.f32 %v6401_v18, %v3503_v51  ;;  %v3528_v51 = vor.u32 1.1754944e-38, %v3527_v8  ;;  %v4813_v8 = vld [vmem:[%s6553_s13 + $0x10] sm:$0xff] }
 0xf2e   :  { %v8525_v34 = vpop.xlane.xlu0 %3451 }
 0xf2f   :  { %5800 = vmatmul.msk.f32.gmra.mxu3 %vm368_vm3, %v3485_v29  ;;  %v3505_v14 = vadd.f32 %v6401_v18, %v3504_v62  ;;  %v3542_v62 = vand.u32 2147483648, %v8525_v34 }
 0xf31   :  { %v3509_v1 = vsel %vm3508_vm12, %v6401_v18, %v3505_v14  ;;  %v4531_v18 = vrot.slane %v1125_v63, 4  ;;  %v4814_v63 = vld [vmem:[%s6553_s13 + $0x18] sm:$0xff] }
 0xf33   :  { %5872 = vmatpush.msk.msrb.mxu0 %vm1858_vm6, %v4531_v18  ;;  %v4816_v18 = vld [vmem:[%s6553_s13 + $0x28] sm:$0xff] }
 0xf36   :  { %v8529_v41 = vpop.xlane.xlu0 %3454 }
 0xf37   :  { %v3557_v14 = vand.u32 2147483648, %v8529_v41  ;;  %vm3551_vm12 = vweird.f32 %v8529_v41 }
 0xf3e   :  { %v4191_v3 = vpop.permute.xlu0 %4190 }
 0xf46   :  { %v4185_v42 = vpop.permute.xlu0 %4184 }
 0xf58   :  { %v3443_v0 = vpop.xlane.xlu2 %3442 }
 0xf59   :  { %6402 = vrcp.f32 %v3443_v0  ;;  %v3497_v39 = vand.u32 2147483648, %v3443_v0  ;;  %v3495_v33 = vand.u32 2147483647, %v3443_v0  ;;  %vm3491_vm14 = vweird.f32 %v3443_v0 }
 0xf5a   :  { %6404 = vrcp.f32 %v8522_v24 }
 0xf5b   :  { %6406 = vrcp.f32 %v8525_v34  ;;  %v3498_v13 = vor.u32 1.1754944e-38, %v3497_v39  ;;  %vm3496_vm10 = vcmp.eq.f32.partialorder %v3495_v33, 8.507059e+37 }
 0xf5c   :  { %6408 = vrcp.f32 %v8529_v41 }
 0xf5f   :  { %v6403_v28 = vpop.eup %6402 }
 0xf60   :  { %v3487_v4 = vmul.f32 %v6403_v28, %v3443_v0  ;;  %v4193_v32 = vpop.permute.xlu2 %4192  ;;  %v8531_v25 = vpop.eup %6404  ;;  %vm3492_vm7 = vweird.f32 %v6403_v28 }
 0xf61   :  { %5847 = vmatpush.xpose.msk.msra.mxu1 %vm1126_vm15, %v4193_v32  ;;  %v3517_v35 = vmul.f32 %v8531_v25, %v8522_v24  ;;  %vm3493_vm9 = vmor %vm3491_vm14, %vm3492_vm7  ;;  %v6407_v11 = vpop.eup %6406  ;;  %vm3522_vm2 = vweird.f32 %v8531_v25  ;;  %vm3526_vm14 = vcmp.eq.f32.partialorder %v3525_v30, 8.507059e+37  ;;  %v4181_v32 = vpop.permute.xlu0 %4180  ;;  %v4815_v30 = vld [vmem:[%s6553_s13 + $0x20] sm:$0xff] }
 0xf62   :  { %v3488_v17 = vsub.f32 1.0, %v3487_v4  ;;  %v3532_v50 = vmul.f32 %v6407_v11, %v8525_v34  ;;  %v6409_v61 = vpop.eup %6408  ;;  %vm3523_vm7 = vmor %vm3521_vm5, %vm3522_vm2  ;;  %vm3537_vm8 = vweird.f32 %v6407_v11 }
 0xf63   :  { %v3518_v36 = vsub.f32 1.0, %v3517_v35  ;;  %v3547_v53 = vmul.f32 %v6409_v61, %v8529_v41  ;;  %vm3552_vm11 = vweird.f32 %v6409_v61 }
 0xf64   :  { %v3489_v21 = vmul.f32 %v6403_v28, %v3488_v17  ;;  %v3533_v22 = vsub.f32 1.0, %v3532_v50  ;;  %v4828_v50 = vld [vmem:[%s9277_s27 + $0x8] sm:$0xff] }
 0xf65   :  { %5848 = vmatpush.xpose.msk.msra.mxu1 %vm1126_vm15, %v4191_v3  ;;  %v3519_v16 = vmul.f32 %v8531_v25, %v3518_v36 }
 0xf66   :  { %v3490_v6 = vadd.f32 %v6403_v28, %v3489_v21  ;;  %v3534_v0 = vmul.f32 %v6407_v11, %v3533_v22  ;;  %v3543_v21 = vor.u32 1.1754944e-38, %v3542_v62  ;;  %v4821_v62 = vld [vmem:[%s6553_s13 + $0x50] sm:$0xff] }
 0xf68   :  { %v4187_v54 = vpop.permute.xlu2 %4186  ;;  %v3494_v26 = vsel %vm3493_vm9, %v6403_v28, %v3490_v6  ;;  %v3535_v4 = vadd.f32 %v6407_v11, %v3534_v0  ;;  %vm3536_vm9 = vweird.f32 %v8525_v34 }
 0xf69   :  { %5849 = vmatpush.xpose.msk.msra.mxu1 %vm1126_vm15, %v8479_v23  ;;  %v3499_v48 = vsel %vm3496_vm10, %v3498_v13, %v3494_v26  ;;  %v3513_v23 = vor.u32 1.1754944e-38, %v3512_v45  ;;  %vm3538_vm6 = vmor %vm3536_vm9, %vm3537_vm8  ;;  %v4175_v36 = vpop.permute.xlu0 %4174  ;;  %v4070_v45 = vpop.f32.mrf.mxu0 }
 0xf6a   :  { %v3500_v38 = vmul.f32 %v8468_v37, %v3499_v48  ;;  %v3520_v37 = vadd.f32 %v8531_v25, %v3519_v16  ;;  %v3539_v3 = vsel %vm3538_vm6, %v6407_v11, %v3535_v4  ;;  %v4819_v4 = vld [vmem:[%s6553_s13 + $0x40] sm:$0xff] }
 0xf6b   :  { %v3514_v56 = vsel %vm3511_vm13, %v3513_v23, %v3509_v1  ;;  %vm3553_vm13 = vmor %vm3551_vm12, %vm3552_vm11  ;;  %v4827_v1 = vld [vmem:[%s9277_s27] sm:$0xff] }
 0xf6c   :  { %5801 = vmatmul.msk.f32.gmra.mxu3 %vm368_vm3, %v3500_v38  ;;  %v3515_v29 = vmul.f32 %v8386_v2, %v3514_v56  ;;  %v3524_v28 = vsel %vm3523_vm7, %v8531_v25, %v3520_v37  ;;  %v3548_v2 = vsub.f32 1.0, %v3547_v53  ;;  %v3540_v25 = vand.u32 2147483647, %v8525_v34  ;;  %v4817_v53 = vld [vmem:[%s6553_s13 + $0x30] sm:$0xff] }
 0xf6d   :  { %5850 = vmatpush.xpose.msk.msra.mxu1 %vm1126_vm15, %v4187_v54  ;;  %v3529_v24 = vsel %vm3526_vm14, %v3528_v51, %v3524_v28  ;;  %v3558_v54 = vor.u32 1.1754944e-38, %v3557_v14  ;;  %v4818_v51 = vld [vmem:[%s6553_s13 + $0x38] sm:$0xff] }
 0xf6e   :  { %v3530_v39 = vmul.f32 %v8409_v60, %v3529_v24  ;;  %v3549_v35 = vmul.f32 %v6409_v61, %v3548_v2  ;;  %vm3541_vm10 = vcmp.eq.f32.partialorder %v3540_v25, 8.507059e+37  ;;  %v3555_v60 = vand.u32 2147483647, %v8529_v41 }
 0xf6f   :  { %v3544_v33 = vsel %vm3541_vm10, %v3543_v21, %v3539_v3  ;;  %v4823_v21 = vld [vmem:[%s6553_s13 + $0x60] sm:$0xff] }
 0xf70   :  { %v4183_v59 = vpop.permute.xlu2 %4182  ;;  %v3550_v6 = vadd.f32 %v6409_v61, %v3549_v35  ;;  %v3545_v34 = vmul.f32 %v8417_v49, %v3544_v33  ;;  %vm3556_vm2 = vcmp.eq.f32.partialorder %v3555_v60, 8.507059e+37  ;;  %v4824_v33 = vld [vmem:[%s6553_s13 + $0x68] sm:$0xff] }
 0xf71   :  { %5851 = vmatpush.xpose.msk.msra.mxu1 %vm1126_vm15, %v4185_v42  ;;  %v4073_v46 = vpop.f32.mrf.mxu0  ;;  %v4165_v35 = vpop.permute.xlu0 %4164 }
 0xf74   :  { %5802 = vmatmul.msk.f32.gmra.mxu3 %vm368_vm3, %v3515_v29 }
 0xf75   :  { %5852 = vmatpush.xpose.msk.msra.mxu1 %vm1126_vm15, %v4183_v59  ;;  %v4811_v59 = vld [vmem:[%s6553_s13] sm:$0xff] }
 0xf78   :  { %v4177_v17 = vpop.permute.xlu2 %4176 }
 0xf79   :  { %5853 = vmatpush.xpose.msk.msra.mxu1 %vm1126_vm15, %v4181_v32  ;;  %v4076_v16 = vpop.f32.mrf.mxu0  ;;  %v4820_v32 = vld [vmem:[%s6553_s13 + $0x48] sm:$0xff]  ;;  %v4171_v14 = vpop.permute.xlu0 %4170 }
 0xf7c   :  { %5803 = vmatmul.msk.f32.gmra.mxu3 %vm368_vm3, %v3530_v39  ;;  %v4822_v39 = vld [vmem:[%s6553_s13 + $0x58] sm:$0xff] }
 0xf7d   :  { %5854 = vmatpush.xpose.msk.msra.mxu1 %vm1126_vm15, %v8481_v12  ;;  %v3554_v12 = vsel %vm3553_vm13, %v6409_v61, %v3550_v6  ;;  %v4812_v61 = vld [vmem:[%s6553_s13 + $0x8] sm:$0xff] }
 0xf7e   :  { %v3559_v26 = vsel %vm3556_vm2, %v3558_v54, %v3554_v12 }
 0xf7f   :  { %v3560_v48 = vmul.f32 %v8427_v43, %v3559_v26 }
 0xf80   :  { %v8572_v13 = vpop.permute.xlu2 %4162 }
 0xf81   :  { %5855 = vmatpush.xpose.msk.msra.mxu1 %vm1126_vm15, %v4177_v17  ;;  %v4079_v43 = vpop.f32.mrf.mxu0 }
 0xf84   :  { %5804 = vmatmul.msk.f32.gmra.mxu3 %vm368_vm3, %v3545_v34  ;;  %v4826_v34 = vld [vmem:[%s6553_s13 + $0x78] sm:$0xff] }
 0xf85   :  { %5856 = vmatpush.xpose.msk.msra.mxu1 %vm1126_vm15, %v4175_v36 }
 0xf88   :  { %v8581_v11 = vpop.permute.xlu2 %4168 }
 0xf89   :  { %v4082_v42 = vpop.f32.mrf.mxu0 }
 0xf8c   :  { %5805 = vmatmul.msk.f32.gmra.mxu3 %vm368_vm3, %v3560_v48 }
 0xf90   :  { %v6155_v49 = vpop.permute.xlu2 %6154 }
 0xf91   :  { %v6156_v41 = vunpack.i.l.bf16 %v6155_v49  ;;  %v6157_v38 = vunpack.i.h.bf16 %v6155_v49  ;;  %v4085_v37 = vpop.f32.mrf.mxu0 }
 0xf93   :  { %4500 = vmatpush.msrb.mxu2 %v6156_v41 }
 0xf94   :  { %5840 = vmatmul.msk.f32.vlgmr.msra.gmra.mxu3 %vm1126_vm15, %v4070_v45 }
 0xf95   :  { %4501 = vmatpush.msrb.mxu2 %v6157_v38  ;;  %4892 = vmatpush.msra.mxu3 %v4828_v50 }
 0xf97   :  { %4893 = vmatpush.msra.mxu3 %v4827_v1 }
 0xf9c   :  { %5841 = vmatmul.msk.f32.gmra.mxu3 %vm1126_vm15, %v4073_v46  ;;  %v1952_v46 = vadd.f32 %v7895_v31, %v7828_v15  ;;  %v1958_v15 = vadd.f32 %v7899_v10, %v7835_v58 }
 0xfa4   :  { %5842 = vmatmul.msk.f32.gmra.mxu3 %vm1126_vm15, %v4076_v16  ;;  %v2397_v16 = vadd.f32 %v7850_v27, %v1952_v46  ;;  %v2399_v27 = vadd.f32 %v7856_v5, %v1958_v15 }
 0xfa6   :  { %v2837_v1 = vadd.f32 %v8304_v47, %v2397_v16 }
 0xfa8   :  { %v4088_v22 = vpop.f32.mrf.mxu0 }
 0xfaa   :  { %v3630_v23 = vpop.f32.mrf.mxu3 }
 0xfab   :  { %5807 = vmatmul.msk.f32.vlgmr.msrb.gmra.mxu1 %vm1126_vm15, %v3630_v23  ;;  %v3277_v23 = vadd.f32 %v8281_v9, %v2837_v1 }
 0xfac   :  { %5843 = vmatmul.msk.f32.gmra.mxu3 %vm1126_vm15, %v4079_v43 }
 0xfb2   :  { %v3633_v56 = vpop.f32.mrf.mxu3 }
 0xfb3   :  { %5808 = vmatmul.msk.f32.gmra.mxu1 %vm1126_vm15, %v3633_v56 }
 0xfb4   :  { %5844 = vmatmul.msk.f32.gmra.mxu3 %vm1126_vm15, %v4082_v42 }
 0xfbc   :  { %5845 = vmatmul.msk.f32.gmra.mxu3 %vm1126_vm15, %v4085_v37 }
 0xfc4   :  { %5846 = vmatmul.msk.f32.gmra.mxu3 %vm1126_vm15, %v4088_v22 }
 0xfcc   :  { %5880 = vmatmul.msk.f32.vlgmr.msra.gmra.mxu3 %vm257_vm0, %v4811_v59  ;;  %v2839_v59 = vadd.f32 %v8308_v20, %v2399_v27 }
 0xfd4   :  { %5881 = vmatmul.msk.f32.gmra.mxu3 %vm257_vm0, %v4812_v61  ;;  %v3279_v61 = vadd.f32 %v8287_v40, %v2839_v59 }
 0xfdc   :  { %5882 = vmatmul.msk.f32.gmra.mxu3 %vm257_vm0, %v4813_v8 }
 0xfe4   :  { %5883 = vmatmul.msk.f32.gmra.mxu3 %vm257_vm0, %v4814_v63 }
 0xfec   :  { %5884 = vmatmul.msk.f32.gmra.mxu3 %vm257_vm0, %v4815_v30 }
 0xfef   :  { %v3636_v29 = vpop.f32.mrf.mxu3 }
 0xff0   :  { %5809 = vmatmul.msk.f32.gmra.mxu1 %vm1126_vm15, %v3636_v29 }
 0xff4   :  { %5885 = vmatmul.msk.f32.gmra.mxu3 %vm257_vm0, %v4816_v18 }
 0xff7   :  { %v3639_v0 = vpop.f32.mrf.mxu3 }
 0xff8   :  { %5810 = vmatmul.msk.f32.gmra.mxu1 %vm1126_vm15, %v3639_v0 }
 0xffc   :  { %5886 = vmatmul.msk.f32.gmra.mxu3 %vm257_vm0, %v4817_v53 }
 0xfff   :  { %v3642_v28 = vpop.f32.mrf.mxu3 }
0x1000   :  { %5811 = vmatmul.msk.f32.gmra.mxu1 %vm1126_vm15, %v3642_v28 }
0x1004   :  { %5887 = vmatmul.msk.f32.gmra.mxu3 %vm257_vm0, %v4818_v51 }
0x1007   :  { %v3645_v24 = vpop.f32.mrf.mxu3 }
0x1008   :  { %5812 = vmatmul.msk.f32.gmra.mxu1 %vm1126_vm15, %v3645_v24 }
0x100c   :  { %5888 = vmatmul.msk.f32.gmra.mxu3 %vm257_vm0, %v4819_v4 }
0x100f   :  { %v3648_v2 = vpop.f32.mrf.mxu3 }
0x1010   :  { %5813 = vmatmul.msk.f32.gmra.mxu1 %vm1126_vm15, %v3648_v2 }
0x1014   :  { %5889 = vmatmul.msk.f32.gmra.mxu3 %vm257_vm0, %v4820_v32 }
0x1017   :  { %v8621_v17 = vpop.f32.mrf.mxu3 }
0x1018   :  { %5857 = vmatmul.msk.f32.vlgmr.msra.gmra.mxu1 %vm1126_vm15, %v8485_v44 }
0x101c   :  { %5890 = vmatmul.msk.f32.gmra.mxu3 %vm257_vm0, %v4821_v62 }
0x101f   :  { %v8627_v25 = vpop.f32.mrf.mxu3 }
0x1020   :  { %5858 = vmatmul.msk.f32.gmra.mxu1 %vm1126_vm15, %v8572_v13  ;;  %v4825_v13 = vld [vmem:[%s6553_s13 + $0x70] sm:$0xff]  ;;  %s9279_s13 = sld [smem:[#allocation5_spill]] }
0x1024   :  { %5891 = vmatmul.msk.f32.gmra.mxu3 %vm257_vm0, %v4822_v39 }
0x1027   :  { %v8633_v3 = vpop.f32.mrf.mxu3 }
0x1028   :  { %5859 = vmatmul.msk.f32.gmra.mxu1 %vm1126_vm15, %v4165_v35  ;;  %v8665_v26 = vpop.f32.mrf.mxu1 }
0x102c   :  { %5892 = vmatmul.msk.f32.gmra.mxu3 %vm257_vm0, %v4823_v21 }
0x102f   :  { %v8638_v44 = vpop.f32.mrf.mxu3 }
0x1030   :  { %5860 = vmatmul.msk.f32.gmra.mxu1 %vm1126_vm15, %v8490_v55  ;;  %v8669_v45 = vpop.f32.mrf.mxu1 }
0x1034   :  { %5893 = vmatmul.msk.f32.gmra.mxu3 %vm257_vm0, %v4824_v33 }
0x1037   :  { %v8644_v6 = vpop.f32.mrf.mxu3 }
0x1038   :  { %5861 = vmatmul.msk.f32.gmra.mxu1 %vm1126_vm15, %v8581_v11 }
0x103c   :  { %5894 = vmatmul.msk.f32.gmra.mxu3 %vm257_vm0, %v4825_v13 }
0x103f   :  { %v8650_v60 = vpop.f32.mrf.mxu3 }
0x1040   :  { %5862 = vmatmul.msk.f32.gmra.mxu1 %vm1126_vm15, %v4171_v14 }
0x1044   :  { %5895 = vmatmul.msk.f32.gmra.mxu3 %vm257_vm0, %v4826_v34 }
0x1047   :  { %v8655_v55 = vpop.f32.mrf.mxu3 }
0x1048   :  { %5863 = vmatmul.msk.f32.gmra.mxu1 %vm1126_vm15, %v8495_v52 }
0x104f   :  { %v8659_v36 = vpop.f32.mrf.mxu3 }
0x1057   :  { %v8661_v12 = vpop.f32.mrf.mxu3 }
0x1058   :  { %v4943_v54 = vpack.c.bf16 %v8661_v12, %v8659_v36 }
0x105f   :  { %v8667_v11 = vpop.f32.mrf.mxu3 }
0x1067   :  { %v8671_v48 = vpop.f32.mrf.mxu3 }
0x1068   :  { %v4944_v49 = vpack.c.bf16 %v8671_v48, %v8667_v11 }
0x106d   :  { %v8675_v41 = vpop.f32.mrf.mxu1 }
0x106f   :  { %v8677_v52 = vpop.f32.mrf.mxu3 }
0x1075   :  { %v8681_v38 = vpop.f32.mrf.mxu1 }
0x1077   :  { %v8684_v50 = vpop.f32.mrf.mxu3 }
0x1078   :  { %v4945_v43 = vpack.c.bf16 %v8684_v50, %v8677_v52 }
0x107d   :  { %v3704_v42 = vpop.f32.mrf.mxu1 }
0x107e   :  { %v8690_v56 = vadd.f32 %v3704_v42, %v3277_v23 }
0x107f   :  { %v4913_v37 = vpop.f32.mrf.mxu3 }
0x1085   :  { %v8694_v31 = vpop.f32.mrf.mxu1 }
0x1087   :  { %v4916_v22 = vpop.f32.mrf.mxu3 }
0x1088   :  { %v4946_v47 = vpack.c.bf16 %v4916_v22, %v4913_v37 }
0x108d   :  { %v3710_v8 = vpop.f32.mrf.mxu1 }
0x108e   :  { %v8699_v63 = vadd.f32 %v3710_v8, %v3279_v61 }
0x108f   :  { %v4919_v9 = vpop.f32.mrf.mxu3 }
0x1095   :  { %v4245_v30 = vpop.f32.mrf.mxu1 }
0x1096   :  { %v4266_v29 = vmul.f32 0.5, %v4245_v30 }
0x1097   :  { %v4922_v18 = vpop.f32.mrf.mxu3 }
0x1098   :  { %v4273_v0 = vsel %vm368_vm3, %v4266_v29, -inf  ;;  %v4947_v37 = vpack.c.bf16 %v4922_v18, %v4919_v9 }
0x1099   :  { %4274 = vmax.xlane.f32.xlu2 %v4273_v0  ;;  %v8738_v0 = vld [vmem:[%s9279_s13] sm:$0xff] }
0x109d   :  { %v4248_v58 = vpop.f32.mrf.mxu1 }
0x109e   :  { %v4267_v10 = vmul.f32 0.5, %v4248_v58 }
0x109f   :  { %v4925_v53 = vpop.f32.mrf.mxu3 }
0x10a0   :  { %v4276_v5 = vsel %vm368_vm3, %v4267_v10, -inf }
0x10a1   :  { %4277 = vmax.xlane.f32.xlu0 %v4276_v5 }
0x10a5   :  { %v4251_v20 = vpop.f32.mrf.mxu1 }
0x10a6   :  { %v4268_v28 = vmul.f32 0.5, %v4251_v20 }
0x10a7   :  { %v4928_v51 = vpop.f32.mrf.mxu3 }
0x10a8   :  { %v4279_v40 = vsel %vm368_vm3, %v4268_v28, -inf  ;;  %v4948_v42 = vpack.c.bf16 %v4928_v51, %v4925_v53 }
0x10a9   :  { %4280 = vmax.xlane.f32.xlu1 %v4279_v40 }
0x10ad   :  { %v4254_v24 = vpop.f32.mrf.mxu1 }
0x10ae   :  { %v4269_v4 = vmul.f32 0.5, %v4254_v24  ;;  %v8750_v24 = vld [vmem:[%s9279_s13 + $0x8] sm:$0xff] }
0x10af   :  { %v4931_v2 = vpop.f32.mrf.mxu3 }
0x10b0   :  { %v4282_v32 = vsel %vm368_vm3, %v4269_v4, -inf }
0x10b1   :  { %4283 = vmax.xlane.f32.xlu2 %v4282_v32 }
0x10b5   :  { %v4257_v62 = vpop.f32.mrf.mxu1 }
0x10b6   :  { %v4270_v39 = vmul.f32 0.5, %v4257_v62 }
0x10b7   :  { %v4934_v35 = vpop.f32.mrf.mxu3 }
0x10b8   :  { %v4285_v21 = vsel %vm368_vm3, %v4270_v39, -inf  ;;  %v4949_v23 = vpack.c.bf16 %v4934_v35, %v4931_v2 }
0x10b9   :  { %4286 = vmax.xlane.f32.xlu0 %v4285_v21 }
0x10bd   :  { %v4260_v33 = vpop.f32.mrf.mxu1 }
0x10be   :  { %v4271_v13 = vmul.f32 0.5, %v4260_v33 }
0x10bf   :  { %v4937_v14 = vpop.f32.mrf.mxu3 }
0x10c0   :  { %v4288_v34 = vsel %vm368_vm3, %v4271_v13, -inf }
0x10c1   :  { %4289 = vmax.xlane.f32.xlu1 %v4288_v34  ;;  %v8763_v34 = vld [vmem:[%s9279_s13 + $0x10] sm:$0xff] }
0x10c5   :  { %v4263_v52 = vpop.f32.mrf.mxu1 }
0x10c6   :  { %v8707_v46 = vmul.f32 0.5, %v4263_v52 }
0x10c7   :  { %v4940_v16 = vpop.f32.mrf.mxu3 }
0x10c8   :  { %v4950_v50 = vpack.c.bf16 %v4940_v16, %v4937_v14  ;;  %v4291_v1 = vsel %vm1241_vm1, %v8707_v46, -inf }
0x10c9   :  { %4292 = vmax.xlane.f32.xlu2 %v4291_v1 }
0x10ca   :  { %5002 = vmatpush.bf16.msrb.mxu1 %v4950_v50 }
0x10cd   :  { %6159 = vrot.lane.b32.xlu0 %v7099_v19, %s6532_s20  ;;  %v9278_v19 = vld [vmem:[#allocation21_spill] sm:$0xff] }
0x10ce   :  { %5003 = vmatpush.bf16.msrb.mxu1 %v4949_v23 }
0x10d2   :  { %5004 = vmatpush.bf16.msrb.mxu1 %v4948_v42 }
0x10d6   :  { %5005 = vmatpush.bf16.msrb.mxu1 %v4947_v37  ;;  %v8767_v37 = vld [vmem:[%s9279_s13 + $0x18] sm:$0xff] }
0x10da   :  { %6164 = vrot.lane.b32.xlu1 %v7095_v57, %s6532_s20  ;;  %5006 = vmatpush.bf16.msrb.mxu1 %v4946_v47 }
0x10de   :  { %5007 = vmatpush.bf16.msrb.mxu1 %v4945_v43 }
0x10e1   :  { %6169 = vrot.lane.b32.xlu2 %v7302_v7, %s6532_s20 }
0x10e2   :  { %5008 = vmatpush.bf16.msrb.mxu1 %v4944_v49 }
0x10e6   :  { %5009 = vmatpush.bf16.msrb.mxu1 %v4943_v54 }
0x10e9   :  { %4441 = vrot.lane.b32.xlu2 %v9278_v19, %s6532_s20  ;;  %5010 = vmatmul.bf16.vlgmr.msrb.gmra.mxu1 %v8738_v0  ;;  %v8771_v19 = vld [vmem:[%s9279_s13 + $0x20] sm:$0xff] }
0x10f9   :  { %5015 = vmatmul.bf16.gmra.mxu1 %v8750_v24 }
0x1109   :  { %5020 = vmatmul.bf16.gmra.mxu1 %v8763_v34 }
0x110c   :  { %v4275_v15 = vpop.xlane.xlu2 %4274 }
0x110d   :  { %v4294_v27 = vsub.f32 %v4266_v29, %v4275_v15  ;;  %v8775_v15 = vld [vmem:[%s9279_s13 + $0x28] sm:$0xff] }
0x110f   :  { %v4301_v22 = vmul.f32 1.442695, %v4294_v27 }
0x1111   :  { %6410 = vpow2.f32 %v4301_v22 }
0x1114   :  { %v4278_v57 = vpop.xlane.xlu0 %4277 }
0x1115   :  { %v4295_v43 = vsub.f32 %v4267_v10, %v4278_v57  ;;  %v8779_v57 = vld [vmem:[%s9279_s13 + $0x30] sm:$0xff] }
0x1117   :  { %v8725_v59 = vpop.eup %6410  ;;  %v4303_v7 = vmul.f32 1.442695, %v4295_v43 }
0x1118   :  { %v4315_v11 = vsel %vm368_vm3, %v8725_v59, 0.0 }
0x1119   :  { %6412 = vpow2.f32 %v4303_v7  ;;  %4316 = vadd.xlane.f32.xlu0 %v4315_v11  ;;  %5025 = vmatmul.bf16.gmra.mxu1 %v8767_v37 }
0x111c   :  { %v4281_v48 = vpop.xlane.xlu1 %4280 }
0x111d   :  { %v4296_v36 = vsub.f32 %v4268_v28, %v4281_v48 }
0x111f   :  { %v8729_v12 = vpop.eup %6412  ;;  %v4305_v54 = vmul.f32 1.442695, %v4296_v36 }
0x1120   :  { %v4318_v49 = vsel %vm368_vm3, %v8729_v12, 0.0 }
0x1121   :  { %6414 = vpow2.f32 %v4305_v54  ;;  %4319 = vadd.xlane.f32.xlu0 %v4318_v49 }
0x1124   :  { %v4284_v47 = vpop.xlane.xlu2 %4283 }
0x1125   :  { %v4297_v61 = vsub.f32 %v4269_v4, %v4284_v47 }
0x1127   :  { %v8733_v8 = vpop.eup %6414  ;;  %v4307_v9 = vmul.f32 1.442695, %v4297_v61 }
0x1128   :  { %v4321_v30 = vsel %vm368_vm3, %v8733_v8, 0.0 }
0x1129   :  { %6416 = vpow2.f32 %v4307_v9  ;;  %4322 = vadd.xlane.f32.xlu1 %v4321_v30  ;;  %5030 = vmatmul.bf16.gmra.mxu1 %v8771_v19 }
0x112c   :  { %v4287_v29 = vpop.xlane.xlu0 %4286 }
0x112d   :  { %v4298_v18 = vsub.f32 %v4270_v39, %v4287_v29 }
0x112f   :  { %v8740_v58 = vpop.eup %6416  ;;  %v4309_v10 = vmul.f32 1.442695, %v4298_v18 }
0x1130   :  { %v4324_v53 = vsel %vm368_vm3, %v8740_v58, 0.0 }
0x1131   :  { %6418 = vpow2.f32 %v4309_v10  ;;  %4325 = vadd.xlane.f32.xlu2 %v4324_v53 }
0x1134   :  { %v4290_v5 = vpop.xlane.xlu1 %4289 }
0x1135   :  { %v4299_v20 = vsub.f32 %v4271_v13, %v4290_v5 }
0x1137   :  { %v8745_v28 = vpop.eup %6418  ;;  %v4311_v51 = vmul.f32 1.442695, %v4299_v20 }
0x1138   :  { %v4327_v40 = vsel %vm368_vm3, %v8745_v28, 0.0 }
0x1139   :  { %6420 = vpow2.f32 %v4311_v51  ;;  %4328 = vadd.xlane.f32.xlu0 %v4327_v40  ;;  %5035 = vmatmul.bf16.gmra.mxu1 %v8775_v15 }
0x113c   :  { %v4293_v4 = vpop.xlane.xlu2 %4292 }
0x113d   :  { %v4300_v2 = vsub.f32 %v8707_v46, %v4293_v4 }
0x113f   :  { %v8753_v32 = vpop.eup %6420  ;;  %v4313_v62 = vmul.f32 1.442695, %v4300_v2  ;;  %v6160_v39 = vpop.permute.xlu0 %6159  ;;  %v8785_v2 = vld [vmem:[%s9279_s13 + $0x38] sm:$0xff] }
0x1140   :  { %v6161_v35 = vunpack.i.l.bf16 %v6160_v39  ;;  %v4330_v21 = vsel %vm368_vm3, %v8753_v32, 0.0  ;;  %v6162_v33 = vunpack.i.h.bf16 %v6160_v39 }
0x1141   :  { %6422 = vpow2.f32 %v4313_v62  ;;  %4331 = vadd.xlane.f32.xlu0 %v4330_v21 }
0x1142   :  { %4502 = vmatpush.msrb.mxu2 %v6161_v35 }
0x1144   :  { %4503 = vmatpush.msrb.mxu2 %v6162_v33  ;;  %v6170_v52 = vpop.permute.xlu2 %6169 }
0x1145   :  { %v6171_v1 = vunpack.i.l.bf16 %v6170_v52  ;;  %v6172_v23 = vunpack.i.h.bf16 %v6170_v52 }
0x1147   :  { %v8758_v13 = vpop.eup %6422 }
0x1148   :  { %v4333_v14 = vsel %vm1241_vm1, %v8758_v13, 0.0 }
0x1149   :  { %4334 = vadd.xlane.f32.xlu1 %v4333_v14  ;;  %5040 = vmatmul.bf16.gmra.mxu1 %v8779_v57 }
0x114c   :  { %v6165_v46 = vpop.permute.xlu1 %6164  ;;  %v4442_v42 = vpop.permute.xlu2 %4441 }
0x114d   :  { %v6166_v16 = vunpack.i.l.bf16 %v6165_v46  ;;  %v6167_v50 = vunpack.i.h.bf16 %v6165_v46 }
0x114f   :  { %4504 = vmatpush.msrb.mxu2 %v6166_v16 }
0x1151   :  { %4505 = vmatpush.msrb.mxu2 %v6167_v50 }
0x1153   :  { %4506 = vmatpush.msrb.mxu2 %v6171_v1 }
0x1155   :  { %4507 = vmatpush.msrb.mxu2 %v6172_v23 }
0x1157   :  { %4508 = vmatpush.msrb.mxu2 %v4442_v42 }
0x1159   :  { %5045 = vmatmul.bf16.gmra.mxu1 %v8785_v2 }
0x118c   :  { %v4317_v27 = vpop.xlane.xlu0 %4316 }
0x118d   :  { %6424 = vrcp.f32 %v4317_v27  ;;  %v4347_v48 = vand.u32 2147483648, %v4317_v27  ;;  %v4345_v54 = vand.u32 2147483647, %v4317_v27  ;;  %vm4341_vm1 = vweird.f32 %v4317_v27 }
0x118f   :  { %v4348_v61 = vor.u32 1.1754944e-38, %v4347_v48  ;;  %vm4346_vm7 = vcmp.eq.f32.partialorder %v4345_v54, 8.507059e+37  ;;  %v5070_v54 = vld [vmem:[%s9280_s28 + $0x18] sm:$0xff] }
0x1190   :  { %5132 = vmatpush.msra.mxu2 %v5070_v54 }
0x1193   :  { %v6425_v22 = vpop.eup %6424 }
0x1194   :  { %v4337_v43 = vmul.f32 %v6425_v22, %v4317_v27  ;;  %v4320_v7 = vpop.xlane.xlu0 %4319  ;;  %vm4342_vm0 = vweird.f32 %v6425_v22 }
0x1195   :  { %6426 = vrcp.f32 %v4320_v7  ;;  %vm4343_vm5 = vmor %vm4341_vm1, %vm4342_vm0  ;;  %v4362_v20 = vand.u32 2147483648, %v4320_v7  ;;  %v4360_v51 = vand.u32 2147483647, %v4320_v7  ;;  %vm4356_vm8 = vweird.f32 %v4320_v7 }
0x1196   :  { %v4338_v11 = vsub.f32 1.0, %v4337_v43 }
0x1197   :  { %v4363_v62 = vor.u32 1.1754944e-38, %v4362_v20  ;;  %vm4361_vm6 = vcmp.eq.f32.partialorder %v4360_v51, 8.507059e+37 }
0x1198   :  { %v4339_v36 = vmul.f32 %v6425_v22, %v4338_v11 }
0x119a   :  { %v4340_v49 = vadd.f32 %v6425_v22, %v4339_v36 }
0x119b   :  { %v6427_v47 = vpop.eup %6426 }
0x119c   :  { %v4344_v9 = vsel %vm4343_vm5, %v6425_v22, %v4340_v49  ;;  %v4352_v30 = vmul.f32 %v6427_v47, %v4320_v7  ;;  %v4323_v29 = vpop.xlane.xlu1 %4322  ;;  %vm4357_vm14 = vweird.f32 %v6427_v47  ;;  %v5069_v49 = vld [vmem:[%s9280_s28 + $0x10] sm:$0xff] }
0x119d   :  { %v4349_v18 = vsel %vm4346_vm7, %v4348_v61, %v4344_v9  ;;  %6428 = vrcp.f32 %v4323_v29  ;;  %vm4358_vm9 = vmor %vm4356_vm8, %vm4357_vm14  ;;  %v4377_v46 = vand.u32 2147483648, %v4323_v29  ;;  %v4375_v16 = vand.u32 2147483647, %v4323_v29  ;;  %v8794_v61 = vpop.f32.mrf.mxu1  ;;  %5133 = vmatpush.msra.mxu2 %v5069_v49 }
0x119e   :  { %v4350_v10 = vmul.f32 %v8725_v59, %v4349_v18  ;;  %v4353_v53 = vsub.f32 1.0, %v4352_v30  ;;  %vm4371_vm11 = vweird.f32 %v4323_v29  ;;  %v5068_v30 = vld [vmem:[%s9280_s28 + $0x8] sm:$0xff] }
0x119f   :  { %v4378_v23 = vor.u32 1.1754944e-38, %v4377_v46  ;;  %vm4376_vm13 = vcmp.eq.f32.partialorder %v4375_v16, 8.507059e+37  ;;  %5134 = vmatpush.msra.mxu2 %v5068_v30 }
0x11a0   :  { %v4354_v5 = vmul.f32 %v6427_v47, %v4353_v53  ;;  %5865 = vmatmul.msk.f32.vlgmr.msrb.gmra.mxu2 %vm368_vm3, %v4350_v10  ;;  %v5067_v53 = vld [vmem:[%s9280_s28] sm:$0xff] }
0x11a1   :  { %5135 = vmatpush.msra.mxu2 %v5067_v53 }
0x11a2   :  { %v4355_v40 = vadd.f32 %v6427_v47, %v4354_v5 }
0x11a3   :  { %v6429_v4 = vpop.eup %6428 }
0x11a4   :  { %v4367_v39 = vmul.f32 %v6429_v4, %v4323_v29  ;;  %v4326_v35 = vpop.xlane.xlu2 %4325  ;;  %v4359_v21 = vsel %vm4358_vm9, %v6427_v47, %v4355_v40  ;;  %vm4372_vm10 = vweird.f32 %v6429_v4 }
0x11a5   :  { %6430 = vrcp.f32 %v4326_v35  ;;  %v4364_v33 = vsel %vm4361_vm6, %v4363_v62, %v4359_v21  ;;  %vm4373_vm12 = vmor %vm4371_vm11, %vm4372_vm10  ;;  %v4392_v48 = vand.u32 2147483648, %v4326_v35  ;;  %v4390_v36 = vand.u32 2147483647, %v4326_v35 }
0x11a6   :  { %v4368_v59 = vsub.f32 1.0, %v4367_v39  ;;  %v4365_v14 = vmul.f32 %v8729_v12, %v4364_v33  ;;  %vm4386_vm0 = vweird.f32 %v4326_v35 }
0x11a7   :  { %v4393_v29 = vor.u32 1.1754944e-38, %v4392_v48  ;;  %vm4391_vm5 = vcmp.eq.f32.partialorder %v4390_v36, 8.507059e+37 }
0x11a8   :  { %v4369_v52 = vmul.f32 %v6429_v4, %v4368_v59  ;;  %5866 = vmatmul.msk.f32.gmra.mxu2 %vm368_vm3, %v4365_v14 }
0x11aa   :  { %v4370_v50 = vadd.f32 %v6429_v4, %v4369_v52  ;;  %v5013_v52 = vpop.f32.mrf.mxu1 }
0x11ab   :  { %v6431_v1 = vpop.eup %6430 }
0x11ac   :  { %v4382_v42 = vmul.f32 %v6431_v1, %v4326_v35  ;;  %v4329_v27 = vpop.xlane.xlu0 %4328  ;;  %v4374_v22 = vsel %vm4373_vm12, %v6429_v4, %v4370_v50  ;;  %vm4387_vm2 = vweird.f32 %v6431_v1 }
0x11ad   :  { %6432 = vrcp.f32 %v4329_v27  ;;  %v4379_v12 = vsel %vm4376_vm13, %v4378_v23, %v4374_v22  ;;  %vm4388_vm1 = vmor %vm4386_vm0, %vm4387_vm2  ;;  %v4407_v4 = vand.u32 2147483648, %v4329_v27  ;;  %v4405_v62 = vand.u32 2147483647, %v4329_v27 }
0x11ae   :  { %v4383_v43 = vsub.f32 1.0, %v4382_v42  ;;  %v4380_v7 = vmul.f32 %v8733_v8, %v4379_v12  ;;  %vm4401_vm14 = vweird.f32 %v4329_v27 }
0x11af   :  { %v4408_v21 = vor.u32 1.1754944e-38, %v4407_v4  ;;  %vm4406_vm9 = vcmp.eq.f32.partialorder %v4405_v62, 8.507059e+37 }
0x11b0   :  { %v4384_v11 = vmul.f32 %v6431_v1, %v4383_v43  ;;  %5867 = vmatmul.msk.f32.gmra.mxu2 %vm368_vm3, %v4380_v7 }
0x11b2   :  { %v4385_v47 = vadd.f32 %v6431_v1, %v4384_v11  ;;  %v5016_v36 = vpop.f32.mrf.mxu1 }
0x11b3   :  { %v6433_v9 = vpop.eup %6432 }
0x11b4   :  { %v4397_v18 = vmul.f32 %v6433_v9, %v4329_v27  ;;  %v4332_v8 = vpop.xlane.xlu0 %4331  ;;  %v4389_v10 = vsel %vm4388_vm1, %v6431_v1, %v4385_v47  ;;  %vm4402_vm7 = vweird.f32 %v6433_v9 }
0x11b5   :  { %6434 = vrcp.f32 %v4332_v8  ;;  %v4394_v20 = vsel %vm4391_vm5, %v4393_v29, %v4389_v10  ;;  %vm4403_vm8 = vmor %vm4401_vm14, %vm4402_vm7  ;;  %v4422_v16 = vand.u32 2147483648, %v4332_v8  ;;  %v4420_v23 = vand.u32 2147483647, %v4332_v8  ;;  %v8805_v29 = vld [vmem:[%s9281_s1] ss:$0 sm:$0xff] }
0x11b6   :  { %v4398_v5 = vsub.f32 1.0, %v4397_v18  ;;  %v4395_v51 = vmul.f32 %v8740_v58, %v4394_v20  ;;  %vm4416_vm10 = vweird.f32 %v4332_v8  ;;  %v5014_v20 = vadd.f32 %v8805_v29, %v5013_v52 }
0x11b7   :  { %v4423_v22 = vor.u32 1.1754944e-38, %v4422_v16  ;;  %vm4421_vm12 = vcmp.eq.f32.partialorder %v4420_v23, 8.507059e+37 }
0x11b8   :  { %v4399_v40 = vmul.f32 %v6433_v9, %v4398_v5  ;;  %5868 = vmatmul.msk.f32.gmra.mxu2 %vm368_vm3, %v4395_v51  ;;  %v5052_v51 = vmax.f32 %v5014_v20, 0.0 }
0x11ba   :  { %v4400_v39 = vadd.f32 %v6433_v9, %v4399_v40  ;;  %v5018_v10 = vpop.f32.mrf.mxu1  ;;  %v5017_v40 = vadd.f32 %v8805_v29, %v5016_v36 }
0x11bb   :  { %v6435_v35 = vpop.eup %6434 }
0x11bc   :  { %v4412_v59 = vmul.f32 %v6435_v35, %v4332_v8  ;;  %v4335_v33 = vpop.xlane.xlu1 %4334  ;;  %v4404_v14 = vsel %vm4403_vm8, %v6433_v9, %v4400_v39  ;;  %vm4417_vm6 = vweird.f32 %v6435_v35  ;;  %v5053_v62 = vmax.f32 %v5017_v40, 0.0 }
0x11bd   :  { %6436 = vrcp.f32 %v4335_v33  ;;  %v4409_v58 = vsel %vm4406_vm9, %v4408_v21, %v4404_v14  ;;  %vm4418_vm11 = vmor %vm4416_vm10, %vm4417_vm6  ;;  %v4435_v49 = vand.u32 2147483647, %v4335_v33  ;;  %vm4431_vm2 = vweird.f32 %v4335_v33 }
0x11be   :  { %v4413_v46 = vsub.f32 1.0, %v4412_v59  ;;  %v4410_v50 = vmul.f32 %v8745_v28, %v4409_v58  ;;  %v4437_v28 = vand.u32 2147483648, %v4335_v33 }
0x11bf   :  { %vm4436_vm1 = vcmp.eq.f32.partialorder %v4435_v49, 8.507059e+37 }
0x11c0   :  { %v4414_v1 = vmul.f32 %v6435_v35, %v4413_v46  ;;  %5869 = vmatmul.msk.f32.gmra.mxu2 %vm368_vm3, %v4410_v50  ;;  %v4438_v9 = vor.u32 1.1754944e-38, %v4437_v28 }
0x11c2   :  { %v4415_v42 = vadd.f32 %v6435_v35, %v4414_v1  ;;  %v5021_v5 = vpop.f32.mrf.mxu1 }
0x11c3   :  { %v6437_v27 = vpop.eup %6436 }
0x11c4   :  { %v4427_v43 = vmul.f32 %v6437_v27, %v4335_v33  ;;  %v4419_v12 = vsel %vm4418_vm11, %v6435_v35, %v4415_v42  ;;  %vm4432_vm13 = vweird.f32 %v6437_v27  ;;  %v5022_v35 = vadd.f32 %v8805_v29, %v5021_v5 }
0x11c5   :  { %v4424_v7 = vsel %vm4421_vm12, %v4423_v22, %v4419_v12  ;;  %vm4433_vm0 = vmor %vm4431_vm2, %vm4432_vm13 }
0x11c6   :  { %v4428_v11 = vsub.f32 1.0, %v4427_v43  ;;  %v4425_v48 = vmul.f32 %v8753_v32, %v4424_v7  ;;  %v5012_v32 = vadd.f32 %v8805_v29, %v8794_v61  ;;  %v5055_v21 = vmax.f32 %v5022_v35, 0.0 }
0x11c8   :  { %v4429_v54 = vmul.f32 %v6437_v27, %v4428_v11  ;;  %5870 = vmatmul.msk.f32.gmra.mxu2 %vm368_vm3, %v4425_v48  ;;  %v5051_v53 = vmax.f32 %v5012_v32, 0.0 }
0x11ca   :  { %v4430_v47 = vadd.f32 %v6437_v27, %v4429_v54  ;;  %v5023_v4 = vpop.f32.mrf.mxu1 }
0x11cb   :  { %v5024_v33 = vadd.f32 %v8805_v29, %v5023_v4 }
0x11cc   :  { %v4434_v30 = vsel %vm4433_vm0, %v6437_v27, %v4430_v47 }
0x11cd   :  { %v4439_v18 = vsel %vm4436_vm1, %v4438_v9, %v4434_v30  ;;  %v5056_v14 = vmax.f32 %v5024_v33, 0.0 }
0x11ce   :  { %v4440_v8 = vmul.f32 %v8758_v13, %v4439_v18  ;;  %v5019_v13 = vadd.f32 %v8805_v29, %v5018_v10 }
0x11d0   :  { %5871 = vmatmul.msk.f32.gmra.mxu2 %vm368_vm3, %v4440_v8  ;;  %v5054_v39 = vmax.f32 %v5019_v13, 0.0  ;;  %vm4631_vm3 = vcmask 256000  }
0x11d2   :  { %v5026_v61 = vpop.f32.mrf.mxu1 }
0x11d3   :  { %v5027_v52 = vadd.f32 %v8805_v29, %v5026_v61 }
0x11d5   :  { %v5057_v58 = vmax.f32 %v5027_v52, 0.0 }
0x11d8   :  { %5928 = vmatmul.msk.f32.vlgmr.msra.gmra.mxu2 %vm440_vm4, %v5051_v53 }
0x11da   :  { %v5028_v59 = vpop.f32.mrf.mxu1 }
0x11db   :  { %v5029_v16 = vadd.f32 %v8805_v29, %v5028_v59 }
0x11dd   :  { %v5058_v1 = vmax.f32 %v5029_v16, 0.0  ;;  %v9283_v16 = vld [vmem:[#allocation22_spill] sm:$0xff] }
0x11e0   :  { %5929 = vmatmul.msk.f32.gmra.mxu2 %vm440_vm4, %v5052_v51 }
0x11e2   :  { %v5031_v46 = vpop.f32.mrf.mxu1 }
0x11e3   :  { %v5032_v23 = vadd.f32 %v8805_v29, %v5031_v46 }
0x11e5   :  { %v5059_v42 = vmax.f32 %v5032_v23, 0.0  ;;  %v9285_v23 = vld [vmem:[#allocation27_spill] sm:$0xff] }
0x11e8   :  { %5930 = vmatmul.msk.f32.gmra.mxu2 %vm440_vm4, %v5053_v62 }
0x11ea   :  { %v5033_v50 = vpop.f32.mrf.mxu1 }
0x11eb   :  { %v5034_v22 = vadd.f32 %v8805_v29, %v5033_v50  ;;  %v9284_v50 = vld [vmem:[#allocation32_spill] sm:$0xff] }
0x11ed   :  { %v5060_v43 = vmax.f32 %v5034_v22, 0.0 }
0x11f0   :  { %5931 = vmatmul.msk.f32.gmra.mxu2 %vm440_vm4, %v5054_v39 }
0x11f2   :  { %v5036_v27 = vpop.f32.mrf.mxu1 }
0x11f3   :  { %v5037_v7 = vadd.f32 %v8805_v29, %v5036_v27 }
0x11f5   :  { %v5061_v48 = vmax.f32 %v5037_v7, 0.0  ;;  %v9287_v7 = vld [vmem:[#allocation23_spill] sm:$0xff] }
0x11f8   :  { %5932 = vmatmul.msk.f32.gmra.mxu2 %vm440_vm4, %v5055_v21 }
0x11fa   :  { %v5038_v12 = vpop.f32.mrf.mxu1 }
0x11fb   :  { %v5039_v28 = vadd.f32 %v8805_v29, %v5038_v12 }
0x11fd   :  { %v5062_v49 = vmax.f32 %v5039_v28, 0.0 }
0x1200   :  { %5933 = vmatmul.msk.f32.gmra.mxu2 %vm440_vm4, %v5056_v14 }
0x1202   :  { %v5041_v36 = vpop.f32.mrf.mxu1 }
0x1203   :  { %v5042_v47 = vadd.f32 %v8805_v29, %v5041_v36  ;;  %v9289_v36 = vld [vmem:[#allocation37_spill] sm:$0xff] }
0x1205   :  { %v5063_v18 = vmax.f32 %v5042_v47, 0.0  ;;  %v9290_v47 = vld [vmem:[#allocation28_spill] sm:$0xff] }
0x1208   :  { %5934 = vmatmul.msk.f32.gmra.mxu2 %vm440_vm4, %v5057_v58 }
0x120a   :  { %v5043_v30 = vpop.f32.mrf.mxu1 }
0x120b   :  { %v5044_v8 = vadd.f32 %v8805_v29, %v5043_v30  ;;  %v9291_v30 = vld [vmem:[#allocation43_spill] sm:$0xff] }
0x120d   :  { %v5064_v53 = vmax.f32 %v5044_v8, 0.0 }
0x1210   :  { %5935 = vmatmul.msk.f32.gmra.mxu2 %vm440_vm4, %v5058_v1  ;;  %v1940_v1 = vadd.f32 %v9284_v50, %v9283_v16  ;;  %v9296_v50 = vld [vmem:[#allocation44_spill] sm:$0xff] }
0x1212   :  { %v5046_v32 = vpop.f32.mrf.mxu1 }
0x1213   :  { %v5047_v5 = vadd.f32 %v8805_v29, %v5046_v32  ;;  %v9292_v32 = vld [vmem:[#allocation24_spill] sm:$0xff] }
0x1215   :  { %v5065_v51 = vmax.f32 %v5047_v5, 0.0 }
0x1218   :  { %5936 = vmatmul.msk.f32.gmra.mxu2 %vm440_vm4, %v5059_v42  ;;  %v2393_v42 = vadd.f32 %v9285_v23, %v1940_v1  ;;  %v9297_v23 = vld [vmem:[#allocation25_spill] sm:$0xff] }
0x121a   :  { %v5048_v40 = vpop.f32.mrf.mxu1 }
0x121b   :  { %v5049_v4 = vadd.f32 %v8805_v29, %v5048_v40  ;;  %v9294_v40 = vld [vmem:[#allocation38_spill] sm:$0xff] }
0x121d   :  { %v5066_v13 = vmax.f32 %v5049_v4, 0.0 }
0x1220   :  { %5937 = vmatmul.msk.f32.gmra.mxu2 %vm440_vm4, %v5060_v43  ;;  %v9286_v43 = vld [vmem:[#allocation42_spill] sm:$0xff] }
0x1221   :  { %v2833_v12 = vadd.f32 %v9286_v43, %v2393_v42  ;;  %v9298_v42 = vld [vmem:[#allocation35_spill] sm:$0xff] }
0x1222   :  { %v1949_v43 = vadd.f32 %v9298_v42, %v9297_v23  ;;  %v9305_v23 = vld [vmem:[#allocation31_spill] sm:$0xff] }
0x1223   :  { %v4510_v11 = vpop.f32.mrf.mxu2  ;;  %v3273_v28 = vadd.f32 %v9289_v36, %v2833_v12 }
0x1224   :  { %5873 = vmatmul.msk.f32.vlgmr.msrb.gmra.mxu0 %vm1126_vm15, %v4510_v11  ;;  %v9288_v11 = vld [vmem:[#allocation33_spill] sm:$0xff] }
0x1228   :  { %5938 = vmatmul.msk.f32.gmra.mxu2 %vm440_vm4, %v5061_v48  ;;  %v1943_v48 = vadd.f32 %v9288_v11, %v9287_v7  ;;  %v9299_v11 = vld [vmem:[#allocation39_spill] sm:$0xff] }
0x122b   :  { %v4513_v54 = vpop.f32.mrf.mxu2 }
0x122c   :  { %5874 = vmatmul.msk.f32.gmra.mxu0 %vm1126_vm15, %v4513_v54  ;;  %v3713_v54 = vadd.f32 %v8665_v26, %v3273_v28 }
0x122e   :  { %v4153_v8 = vadd.f32 %v8621_v17, %v3713_v54  ;;  %v9300_v54 = vld [vmem:[#allocation30_spill] sm:$0xff] }
0x1230   :  { %5939 = vmatmul.msk.f32.gmra.mxu2 %vm440_vm4, %v5062_v49 }
0x1233   :  { %v4516_v9 = vpop.f32.mrf.mxu2 }
0x1234   :  { %5875 = vmatmul.msk.f32.gmra.mxu0 %vm1126_vm15, %v4516_v9  ;;  %v2394_v9 = vadd.f32 %v9290_v47, %v1943_v48  ;;  %v2396_v47 = vadd.f32 %v9300_v54, %v1949_v43 }
0x1238   :  { %5940 = vmatmul.msk.f32.gmra.mxu2 %vm440_vm4, %v5063_v18  ;;  %v2834_v18 = vadd.f32 %v9291_v30, %v2394_v9  ;;  %v9301_v30 = vld [vmem:[#allocation45_spill] sm:$0xff] }
0x123a   :  { %v3274_v4 = vadd.f32 %v9294_v40, %v2834_v18  ;;  %v2836_v18 = vadd.f32 %v9301_v30, %v2396_v47 }
0x123b   :  { %v4519_v10 = vpop.f32.mrf.mxu2 }
0x123c   :  { %5876 = vmatmul.msk.f32.gmra.mxu0 %vm1126_vm15, %v4519_v10  ;;  %v8887_v10 = vld [vmem:[%s9282_s2] ss:$0 sm:$0xff]  ;;  %v3714_v16 = vadd.f32 %v8669_v45, %v3274_v4 }
0x123e   :  { %v4154_v12 = vadd.f32 %v8627_v25, %v3714_v16 }
0x1240   :  { %5941 = vmatmul.msk.f32.gmra.mxu2 %vm440_vm4, %v5064_v53  ;;  %v9293_v53 = vld [vmem:[#allocation34_spill] sm:$0xff] }
0x1241   :  { %v1946_v5 = vadd.f32 %v9293_v53, %v9292_v32  ;;  %v9302_v53 = vld [vmem:[#allocation40_spill] sm:$0xff] }
0x1243   :  { %v4522_v20 = vpop.f32.mrf.mxu2 }
0x1244   :  { %5877 = vmatmul.msk.f32.gmra.mxu0 %vm1126_vm15, %v4522_v20 }
0x1248   :  { %5942 = vmatmul.msk.f32.gmra.mxu2 %vm440_vm4, %v5065_v51 }
0x124b   :  { %v4525_v62 = vpop.f32.mrf.mxu2 }
0x124c   :  { %5878 = vmatmul.msk.f32.gmra.mxu0 %vm1126_vm15, %v4525_v62 }
0x1250   :  { %5943 = vmatmul.msk.f32.gmra.mxu2 %vm440_vm4, %v5066_v13  ;;  %v9295_v13 = vld [vmem:[#allocation29_spill] sm:$0xff] }
0x1253   :  { %v4528_v61 = vpop.f32.mrf.mxu2 }
0x1254   :  { %5879 = vmatmul.msk.f32.gmra.mxu0 %vm1126_vm15, %v4528_v61  ;;  %v2395_v61 = vadd.f32 %v9295_v13, %v1946_v5  ;;  %v3276_v5 = vadd.f32 %v9302_v53, %v2836_v18  ;;  %v9303_v13 = vld [vmem:[#allocation26_spill] sm:$0xff] }
0x1256   :  { %v2835_v1 = vadd.f32 %v9296_v50, %v2395_v61  ;;  %v3716_v40 = vadd.f32 %v8681_v38, %v3276_v5  ;;  %v9304_v61 = vld [vmem:[#allocation36_spill] sm:$0xff]  ;;  %v9306_v38 = vld [vmem:[#allocation46_spill] sm:$0xff] }
0x1257   :  { %v1955_v16 = vadd.f32 %v9304_v61, %v9303_v13 }
0x1258   :  { %v3275_v48 = vadd.f32 %v9299_v11, %v2835_v1  ;;  %v4157_v11 = vadd.f32 %v8644_v6, %v8690_v56  ;;  %v4159_v56 = vadd.f32 %v8655_v55, %v8699_v63  ;;  %v9308_v63 = vld [vmem:[#allocation20_spill] sm:$0xff] }
0x1259   :  { %v2398_v42 = vadd.f32 %v9305_v23, %v1955_v16 }
0x125a   :  { %v3715_v45 = vadd.f32 %v8675_v41, %v3275_v48 }
0x125b   :  { %v8849_v39 = vpop.f32.mrf.mxu2 }
0x125c   :  { %v4155_v25 = vadd.f32 %v8633_v3, %v3715_v45 }
0x1263   :  { %v8851_v35 = vpop.f32.mrf.mxu2 }
0x1264   :  { %v5185_v21 = vpack.c.bf16 %v8851_v35, %v8849_v39 }
0x126b   :  { %v8855_v59 = vpop.f32.mrf.mxu2 }
0x1273   :  { %v8857_v33 = vpop.f32.mrf.mxu2 }
0x1274   :  { %v5186_v29 = vpack.c.bf16 %v8857_v33, %v8855_v59 }
0x127b   :  { %v8861_v14 = vpop.f32.mrf.mxu2 }
0x1283   :  { %v8863_v52 = vpop.f32.mrf.mxu2 }
0x1284   :  { %v5187_v46 = vpack.c.bf16 %v8863_v52, %v8861_v14 }
0x128b   :  { %v8867_v58 = vpop.f32.mrf.mxu2 }
0x1293   :  { %v8872_v27 = vpop.f32.mrf.mxu2 }
0x1294   :  { %v5188_v22 = vpack.c.bf16 %v8872_v27, %v8867_v58 }
0x129b   :  { %v8881_v49 = vpop.f32.mrf.mxu2 }
0x12a1   :  { %v4572_v20 = vpop.f32.mrf.mxu0 }
0x12a2   :  { %v4593_v51 = vadd.f32 %v4572_v20, %v4153_v8 }
0x12a3   :  { %v8895_v26 = vpop.f32.mrf.mxu2 }
0x12a4   :  { %v8893_v62 = vadd.f32 %v8887_v10, %v4593_v51 }
0x12a6   :  { %v4613_v17 = vsel %vm440_vm4, %v8893_v62, 0.0 }
0x12a7   :  { %4614 = vadd.xlane.f32.xlu0 %v4613_v17  ;;  %v4156_v17 = vadd.f32 %v8638_v44, %v3716_v40 }
0x12a9   :  { %v4575_v7 = vpop.f32.mrf.mxu0 }
0x12aa   :  { %v4594_v36 = vadd.f32 %v4575_v7, %v4154_v12  ;;  %v2838_v12 = vadd.f32 %v9306_v38, %v2398_v42 }
0x12ab   :  { %v5167_v28 = vpop.f32.mrf.mxu2 }
0x12ac   :  { %v8909_v9 = vadd.f32 %v8887_v10, %v4594_v36  ;;  %v9307_v36 = vld [vmem:[#allocation41_spill] sm:$0xff] }
0x12ad   :  { %v3278_v44 = vadd.f32 %v9307_v36, %v2838_v12 }
0x12ae   :  { %v4616_v8 = vsel %vm440_vm4, %v8909_v9, 0.0 }
0x12af   :  { %4617 = vadd.xlane.f32.xlu1 %v4616_v8  ;;  %v3718_v45 = vadd.f32 %v8694_v31, %v3278_v44 }
0x12b1   :  { %v4578_v32 = vpop.f32.mrf.mxu0  ;;  %v4158_v8 = vadd.f32 %v8650_v60, %v3718_v45 }
0x12b2   :  { %v4595_v20 = vadd.f32 %v4578_v32, %v4155_v25 }
0x12b3   :  { %v5170_v51 = vpop.f32.mrf.mxu2 }
0x12b4   :  { %v8918_v41 = vadd.f32 %v8887_v10, %v4595_v20  ;;  %v5190_v16 = vpack.c.bf16 %v5170_v51, %v5167_v28 }
0x12b6   :  { %v4619_v4 = vsel %vm440_vm4, %v8918_v41, 0.0 }
0x12b7   :  { %4620 = vadd.xlane.f32.xlu2 %v4619_v4 }
0x12b9   :  { %v4581_v3 = vpop.f32.mrf.mxu0 }
0x12ba   :  { %v4596_v50 = vadd.f32 %v4581_v3, %v4156_v17  ;;  %v5189_v17 = vpack.c.bf16 %v8895_v26, %v8881_v49 }
0x12bb   :  { %v5173_v1 = vpop.f32.mrf.mxu2 }
0x12bc   :  { %v8927_v43 = vadd.f32 %v8887_v10, %v4596_v50 }
0x12be   :  { %v4622_v7 = vsel %vm440_vm4, %v8927_v43, 0.0 }
0x12bf   :  { %4623 = vadd.xlane.f32.xlu0 %v4622_v7 }
0x12c1   :  { %v4584_v48 = vpop.f32.mrf.mxu0 }
0x12c2   :  { %v4597_v54 = vadd.f32 %v4584_v48, %v4157_v11 }
0x12c3   :  { %v5176_v47 = vpop.f32.mrf.mxu2 }
0x12c4   :  { %v4608_v30 = vadd.f32 %v8887_v10, %v4597_v54  ;;  %v5191_v61 = vpack.c.bf16 %v5176_v47, %v5173_v1 }
0x12c6   :  { %v4625_v18 = vsel %vm440_vm4, %v4608_v30, 0.0 }
0x12c7   :  { %4626 = vadd.xlane.f32.xlu1 %v4625_v18 }
0x12c9   :  { %v4587_v25 = vpop.f32.mrf.mxu0 }
0x12ca   :  { %v4598_v32 = vadd.f32 %v4587_v25, %v4158_v8 }
0x12cb   :  { %v5179_v53 = vpop.f32.mrf.mxu2 }
0x12cc   :  { %v4609_v5 = vadd.f32 %v8887_v10, %v4598_v32 }
0x12ce   :  { %v4628_v6 = vsel %vm440_vm4, %v4609_v5, 0.0 }
0x12cf   :  { %4629 = vadd.xlane.f32.xlu2 %v4628_v6 }
0x12d1   :  { %v4590_v20 = vpop.f32.mrf.mxu0 }
0x12d2   :  { %v4599_v31 = vadd.f32 %v4590_v20, %v4159_v56 }
0x12d3   :  { %v5182_v40 = vpop.f32.mrf.mxu2 }
0x12d4   :  { %v4610_v4 = vadd.f32 %v8887_v10, %v4599_v31  ;;  %v5192_v13 = vpack.c.bf16 %v5182_v40, %v5179_v53 }
0x12d6   :  { %5196 = vmatpush.bf16.msra.mxu0 %v5192_v13  ;;  %v4632_v60 = vsel %vm4631_vm3, %v4610_v4, 0.0 }
0x12d7   :  { %4633 = vadd.xlane.f32.xlu0 %v4632_v60  ;;  %v9031_v60 = vld [vmem:[%s9309_s7] ss:$0 sm:$0xff] }
0x12da   :  { %5197 = vmatpush.bf16.msra.mxu0 %v5191_v61 }
0x12de   :  { %5198 = vmatpush.bf16.msra.mxu0 %v5190_v16 }
0x12e2   :  { %5199 = vmatpush.bf16.msra.mxu0 %v5189_v17 }
0x12e6   :  { %5200 = vmatpush.bf16.msra.mxu0 %v5188_v22 }
0x12ea   :  { %5201 = vmatpush.bf16.msra.mxu0 %v5187_v46 }
0x12ee   :  { %5202 = vmatpush.bf16.msra.mxu0 %v5186_v29 }
0x12f2   :  { %5203 = vmatpush.bf16.msra.mxu0 %v5185_v21 }
0x12f5   :  { %5204 = vmatmul.bf16.vlgmr.msra.gmra.mxu0 %v8738_v0 }
0x1305   :  { %5209 = vmatmul.bf16.gmra.mxu0 %v8750_v24 }
0x1315   :  { %5214 = vmatmul.bf16.gmra.mxu0 %v8763_v34 }
0x131a   :  { %v4615_v55 = vpop.xlane.xlu0 %4614 }
0x131b   :  { %v4635_v58 = vmul.f32 %v4615_v55, %v9308_v63 }
0x131d   :  { %v8964_v14 = vsub.f32 %v8893_v62, %v4635_v58  ;;  %v9037_v58 = vld [vmem:[%s9310_s10] ss:$0 sm:$0xff] }
0x131f   :  { %v4649_v59 = vmul.f32 %v8964_v14, %v8964_v14 }
0x1321   :  { %v4656_v33 = vsel %vm440_vm4, %v4649_v59, 0.0 }
0x1322   :  { %4657 = vadd.xlane.f32.xlu1 %v4656_v33  ;;  %v4618_v39 = vpop.xlane.xlu1 %4617 }
0x1323   :  { %v4636_v35 = vmul.f32 %v4618_v39, %v9308_v63 }
0x1325   :  { %v8971_v0 = vsub.f32 %v8909_v9, %v4636_v35  ;;  %5219 = vmatmul.bf16.gmra.mxu0 %v8767_v37 }
0x1327   :  { %v4650_v24 = vmul.f32 %v8971_v0, %v8971_v0 }
0x1329   :  { %v4659_v34 = vsel %vm440_vm4, %v4650_v24, 0.0 }
0x132a   :  { %v4621_v21 = vpop.xlane.xlu2 %4620  ;;  %4660 = vadd.xlane.f32.xlu2 %v4659_v34 }
0x132b   :  { %v4637_v29 = vmul.f32 %v4621_v21, %v9308_v63 }
0x132d   :  { %v8979_v52 = vsub.f32 %v8918_v41, %v4637_v29 }
0x132f   :  { %v4651_v46 = vmul.f32 %v8979_v52, %v8979_v52 }
0x1331   :  { %v4662_v27 = vsel %vm440_vm4, %v4651_v46, 0.0 }
0x1332   :  { %v4624_v22 = vpop.xlane.xlu0 %4623  ;;  %4663 = vadd.xlane.f32.xlu0 %v4662_v27 }
0x1333   :  { %v4638_v37 = vmul.f32 %v4624_v22, %v9308_v63 }
0x1335   :  { %v8986_v49 = vsub.f32 %v8927_v43, %v4638_v37  ;;  %5224 = vmatmul.bf16.gmra.mxu0 %v8771_v19  ;;  %v5276_v37 = vld [vmem:[%s9311_s11 + $0x78] sm:$0xff] }
0x1336   :  { %5967 = vmatpush.lsf.msrb.mxu3 %v5276_v37 }
0x1337   :  { %v4652_v10 = vmul.f32 %v8986_v49, %v8986_v49 }
0x1339   :  { %v4665_v62 = vsel %vm440_vm4, %v4652_v10, 0.0 }
0x133a   :  { %4666 = vadd.xlane.f32.xlu1 %v4665_v62  ;;  %v4627_v26 = vpop.xlane.xlu1 %4626 }
0x133b   :  { %v4639_v28 = vmul.f32 %v4627_v26, %v9308_v63 }
0x133d   :  { %v8993_v9 = vsub.f32 %v4608_v30, %v4639_v28 }
0x133f   :  { %v4653_v51 = vmul.f32 %v8993_v9, %v8993_v9 }
0x1341   :  { %v4668_v41 = vsel %vm440_vm4, %v4653_v51, 0.0  ;;  %v5275_v51 = vld [vmem:[%s9311_s11 + $0x70] sm:$0xff] }
0x1342   :  { %4669 = vadd.xlane.f32.xlu2 %v4668_v41  ;;  %v4630_v3 = vpop.xlane.xlu2 %4629  ;;  %5968 = vmatpush.lsf.msrb.mxu3 %v5275_v51 }
0x1343   :  { %v4640_v19 = vmul.f32 %v4630_v3, %v9308_v63 }
0x1345   :  { %v8999_v50 = vsub.f32 %v4609_v5, %v4640_v19  ;;  %5229 = vmatmul.bf16.gmra.mxu0 %v8775_v15 }
0x1347   :  { %v4654_v1 = vmul.f32 %v8999_v50, %v8999_v50 }
0x1349   :  { %v4671_v23 = vsel %vm440_vm4, %v4654_v1, 0.0  ;;  %v5274_v1 = vld [vmem:[%s9311_s11 + $0x68] sm:$0xff] }
0x134a   :  { %4672 = vadd.xlane.f32.xlu0 %v4671_v23  ;;  %v4634_v42 = vpop.xlane.xlu0 %4633  ;;  %5969 = vmatpush.lsf.msrb.mxu3 %v5274_v1 }
0x134b   :  { %v4641_v43 = vmul.f32 %v4634_v42, %v9308_v63 }
0x134d   :  { %v9006_v38 = vsub.f32 %v4610_v4, %v4641_v43 }
0x134f   :  { %v4655_v12 = vmul.f32 %v9006_v38, %v9006_v38 }
0x1351   :  { %v4674_v7 = vsel %vm4631_vm3, %v4655_v12, 0.0 }
0x1352   :  { %4675 = vadd.xlane.f32.xlu1 %v4674_v7  ;;  %v5273_v7 = vld [vmem:[%s9311_s11 + $0x60] sm:$0xff] }
0x1353   :  { %5970 = vmatpush.lsf.msrb.mxu3 %v5273_v7 }
0x1355   :  { %5234 = vmatmul.bf16.gmra.mxu0 %v8779_v57 }
0x1365   :  { %5239 = vmatmul.bf16.gmra.mxu0 %v8785_v2 }
0x1372   :  { %v9013_v15 = vpop.f32.mrf.mxu0 }
0x137a   :  { %v9015_v11 = vpop.f32.mrf.mxu0 }
0x1382   :  { %v9017_v48 = vpop.f32.mrf.mxu0 }
0x138a   :  { %v9019_v36 = vpop.f32.mrf.mxu0 }
0x1392   :  { %v9021_v44 = vpop.f32.mrf.mxu0 }
0x1395   :  { %v4658_v54 = vpop.xlane.xlu1 %4657 }
0x1396   :  { %v4677_v47 = vmul.f32 %v4658_v54, %v9308_v63  ;;  %v5272_v54 = vld [vmem:[%s9311_s11 + $0x58] sm:$0xff] }
0x1397   :  { %5971 = vmatpush.lsf.msrb.mxu3 %v5272_v54 }
0x1398   :  { %v4684_v45 = vadd.f32 1e-05, %v4677_v47 }
0x139a   :  { %6438 = vrsqrt.f32 %v4684_v45  ;;  %v9024_v30 = vpop.f32.mrf.mxu0  ;;  %vm4697_vm5 = vweird.f32 %v4684_v45 }
0x139d   :  { %v4661_v57 = vpop.xlane.xlu2 %4660 }
0x139e   :  { %v4678_v2 = vmul.f32 %v4661_v57, %v9308_v63  ;;  %v5271_v57 = vld [vmem:[%s9311_s11 + $0x50] sm:$0xff] }
0x139f   :  { %5972 = vmatpush.lsf.msrb.mxu3 %v5271_v57 }
0x13a0   :  { %v6439_v18 = vpop.eup %6438  ;;  %v4685_v25 = vadd.f32 1e-05, %v4678_v2 }
0x13a1   :  { %v4692_v8 = vmul.f32 %v6439_v18, %v4684_v45  ;;  %vm4698_vm15 = vweird.f32 %v6439_v18 }
0x13a2   :  { %6440 = vrsqrt.f32 %v4685_v25  ;;  %v9027_v53 = vpop.f32.mrf.mxu0  ;;  %vm4699_vm7 = vmor %vm4697_vm5, %vm4698_vm15  ;;  %vm4707_vm8 = vweird.f32 %v4685_v25 }
0x13a3   :  { %v4693_v32 = vmul.f32 %v6439_v18, %v4692_v8 }
0x13a5   :  { %v4694_v5 = vmul.f32 0.5, %v4693_v32  ;;  %v4664_v6 = vpop.xlane.xlu0 %4663  ;;  %v5270_v32 = vld [vmem:[%s9311_s11 + $0x48] sm:$0xff] }
0x13a6   :  { %v4679_v20 = vmul.f32 %v4664_v6, %v9308_v63  ;;  %5973 = vmatpush.lsf.msrb.mxu3 %v5270_v32 }
0x13a7   :  { %v4695_v56 = vsub.f32 1.5, %v4694_v5 }
0x13a8   :  { %v6441_v31 = vpop.eup %6440  ;;  %v4686_v4 = vadd.f32 1e-05, %v4679_v20  ;;  %v5269_v20 = vld [vmem:[%s9311_s11 + $0x40] sm:$0xff] }
0x13a9   :  { %v4696_v40 = vmul.f32 %v6439_v18, %v4695_v56  ;;  %v4702_v13 = vmul.f32 %v6441_v31, %v4685_v25  ;;  %vm4708_vm14 = vweird.f32 %v6441_v31  ;;  %5974 = vmatpush.lsf.msrb.mxu3 %v5269_v20 }
0x13aa   :  { %6442 = vrsqrt.f32 %v4686_v4  ;;  %v9033_v61 = vpop.f32.mrf.mxu0  ;;  %vm4709_vm9 = vmor %vm4707_vm8, %vm4708_vm14  ;;  %vm4717_vm10 = vweird.f32 %v4686_v4 }
0x13ab   :  { %v4700_v16 = vsel %vm4699_vm7, %v6439_v18, %v4696_v40  ;;  %v4703_v17 = vmul.f32 %v6441_v31, %v4702_v13 }
0x13ac   :  { %v4761_v55 = vmul.f32 %v4700_v16, %v8964_v14  ;;  %v5268_v16 = vld [vmem:[%s9311_s11 + $0x38] sm:$0xff] }
0x13ad   :  { %v4704_v59 = vmul.f32 0.5, %v4703_v17  ;;  %v4667_v33 = vpop.xlane.xlu1 %4666  ;;  %5975 = vmatpush.lsf.msrb.mxu3 %v5268_v16  ;;  %v6187_v16 = vld [vmem:[%s6688_s4] ss:$0 sm:$0xff] }
0x13ae   :  { %v4771_v39 = vmul.f32 %v9031_v60, %v4761_v55  ;;  %v4680_v35 = vmul.f32 %v4667_v33, %v9308_v63 }
0x13af   :  { %v4705_v24 = vsub.f32 1.5, %v4704_v59  ;;  %v5267_v59 = vld [vmem:[%s9311_s11 + $0x30] sm:$0xff] }
0x13b0   :  { %v9042_v34 = vadd.f32 %v9037_v58, %v4771_v39  ;;  %v6443_v21 = vpop.eup %6442  ;;  %v4687_v29 = vadd.f32 1e-05, %v4680_v35  ;;  %5976 = vmatpush.lsf.msrb.mxu3 %v5267_v59 }
0x13b1   :  { %v4706_v46 = vmul.f32 %v6441_v31, %v4705_v24  ;;  %v4712_v14 = vmul.f32 %v6443_v21, %v4686_v4  ;;  %vm4718_vm6 = vweird.f32 %v6443_v21 }
0x13b2   :  { %4788 = vst.msk [vmem:[%s6698_s9] sm:$0xff] %vm440_vm4, %v9042_v34  ;;  %6444 = vrsqrt.f32 %v4687_v29  ;;  %v9047_v27 = vpop.f32.mrf.mxu0  ;;  %vm4719_vm11 = vmor %vm4717_vm10, %vm4718_vm6  ;;  %vm4727_vm13 = vweird.f32 %v4687_v29 }
0x13b3   :  { %v4713_v22 = vmul.f32 %v6443_v21, %v4712_v14  ;;  %v4710_v10 = vsel %vm4709_vm9, %v6441_v31, %v4706_v46 }
0x13b4   :  { %v4762_v62 = vmul.f32 %v4710_v10, %v8971_v0 }
0x13b5   :  { %v4714_v26 = vmul.f32 0.5, %v4713_v22  ;;  %v4670_v28 = vpop.xlane.xlu2 %4669  ;;  %v5265_v22 = vld [vmem:[%s9311_s11 + $0x20] sm:$0xff] }
0x13b6   :  { %v4681_v41 = vmul.f32 %v4670_v28, %v9308_v63  ;;  %v4772_v3 = vmul.f32 %v9031_v60, %v4762_v62  ;;  %v5264_v28 = vld [vmem:[%s9311_s11 + $0x18] sm:$0xff] }
0x13b7   :  { %v4715_v19 = vsub.f32 1.5, %v4714_v26 }
0x13b8   :  { %v6445_v23 = vpop.eup %6444  ;;  %v4688_v42 = vadd.f32 1e-05, %v4681_v41  ;;  %v9056_v0 = vadd.f32 %v9037_v58, %v4772_v3  ;;  %v5263_v41 = vld [vmem:[%s9311_s11 + $0x10] sm:$0xff] }
0x13b9   :  { %v4716_v43 = vmul.f32 %v6443_v21, %v4715_v19  ;;  %v4722_v12 = vmul.f32 %v6445_v23, %v4687_v29  ;;  %vm4728_vm12 = vweird.f32 %v6445_v23 }
0x13ba   :  { %6446 = vrsqrt.f32 %v4688_v42  ;;  %v9060_v47 = vpop.f32.mrf.mxu0  ;;  %4789 = vst.msk [vmem:[%s6698_s9 + $0x8] sm:$0xff] %vm440_vm4, %v9056_v0  ;;  %vm4729_vm2 = vmor %vm4727_vm13, %vm4728_vm12  ;;  %vm4737_vm1 = vweird.f32 %v4688_v42 }
0x13bb   :  { %v4723_v45 = vmul.f32 %v6445_v23, %v4722_v12  ;;  %v4720_v2 = vsel %vm4719_vm11, %v6443_v21, %v4716_v43  ;;  %v5266_v21 = vld [vmem:[%s9311_s11 + $0x28] sm:$0xff]  ;;  %v5261_v12 = vld [vmem:[%s9311_s11] sm:$0xff] }
0x13bc   :  { %v4763_v18 = vmul.f32 %v4720_v2, %v8979_v52  ;;  %5977 = vmatpush.lsf.msrb.mxu3 %v5266_v21 }
0x13bd   :  { %v4724_v8 = vmul.f32 0.5, %v4723_v45  ;;  %v4673_v25 = vpop.xlane.xlu0 %4672 }
0x13be   :  { %v4682_v5 = vmul.f32 %v4673_v25, %v9308_v63  ;;  %v4773_v6 = vmul.f32 %v9031_v60, %v4763_v18  ;;  %5978 = vmatpush.lsf.msrb.mxu3 %v5265_v22  ;;  %v5226_v22 = vadd.f32 %v6187_v16, %v9047_v27  ;;  %v5213_v27 = vadd.f32 %v6187_v16, %v9019_v36 }
0x13bf   :  { %v4725_v56 = vsub.f32 1.5, %v4724_v8 }
0x13c0   :  { %v6447_v31 = vpop.eup %6446  ;;  %v4689_v40 = vadd.f32 1e-05, %v4682_v5  ;;  %v9072_v4 = vadd.f32 %v9037_v58, %v4773_v6  ;;  %5979 = vmatpush.lsf.msrb.mxu3 %v5264_v28  ;;  %v5253_v28 = vmax.f32 %v5226_v22, 0.0 }
0x13c1   :  { %v4726_v52 = vmul.f32 %v6445_v23, %v4725_v56  ;;  %v4732_v13 = vmul.f32 %v6447_v31, %v4688_v42  ;;  %vm4738_vm0 = vweird.f32 %v6447_v31 }
0x13c2   :  { %6448 = vrsqrt.f32 %v4689_v40  ;;  %v9075_v17 = vpop.f32.mrf.mxu0  ;;  %4790 = vst.msk [vmem:[%s6698_s9 + $0x10] sm:$0xff] %vm440_vm4, %v9072_v4  ;;  %vm4739_vm15 = vmor %vm4737_vm1, %vm4738_vm0  ;;  %5980 = vmatpush.lsf.msrb.mxu3 %v5263_v41  ;;  %vm4747_vm7 = vweird.f32 %v4689_v40 }
0x13c3   :  { %v4733_v55 = vmul.f32 %v6447_v31, %v4732_v13  ;;  %v4730_v33 = vsel %vm4729_vm2, %v6445_v23, %v4726_v52  ;;  %v5262_v23 = vld [vmem:[%s9311_s11 + $0x8] sm:$0xff] }
0x13c4   :  { %v4764_v39 = vmul.f32 %v4730_v33, %v8986_v49  ;;  %5981 = vmatpush.lsf.msrb.mxu3 %v5262_v23 }
0x13c5   :  { %v4734_v35 = vmul.f32 0.5, %v4733_v55  ;;  %v4676_v24 = vpop.xlane.xlu1 %4675 }
0x13c6   :  { %v4683_v29 = vmul.f32 %v4676_v24, %v9308_v63  ;;  %v4774_v46 = vmul.f32 %v9031_v60, %v4764_v39  ;;  %5982 = vmatpush.lsf.msrb.mxu3 %v5261_v12 }
0x13c7   :  { %v4735_v14 = vsub.f32 1.5, %v4734_v35  ;;  %5983 = vllmr.7.mxu3 }
0x13c8   :  { %v6449_v37 = vpop.eup %6448  ;;  %v4690_v10 = vadd.f32 1e-05, %v4683_v29  ;;  %v9087_v62 = vadd.f32 %v9037_v58, %v4774_v46  ;;  %v5228_v46 = vadd.f32 %v6187_v16, %v9060_v47  ;;  %v5216_v47 = vadd.f32 %v6187_v16, %v9021_v44 }
0x13c9   :  { %v4736_v49 = vmul.f32 %v6447_v31, %v4735_v14  ;;  %v4742_v26 = vmul.f32 %v6449_v37, %v4689_v40  ;;  %vm4748_vm5 = vweird.f32 %v6449_v37 }
0x13ca   :  { %6450 = vrsqrt.f32 %v4690_v10  ;;  %v5232_v63 = vpop.f32.mrf.mxu0  ;;  %4791 = vst.msk [vmem:[%s6698_s9 + $0x18] sm:$0xff] %vm440_vm4, %v9087_v62  ;;  %vm4749_vm14 = vmor %vm4747_vm7, %vm4748_vm5  ;;  %vm4757_vm9 = vweird.f32 %v4690_v10 }
0x13cb   :  { %v4743_v51 = vmul.f32 %v6449_v37, %v4742_v26  ;;  %v4740_v3 = vsel %vm4739_vm15, %v6447_v31, %v4736_v49  ;;  %v5233_v29 = vadd.f32 %v6187_v16, %v5232_v63  ;;  %v5254_v49 = vmax.f32 %v5228_v46, 0.0 }
0x13cc   :  { %v4765_v19 = vmul.f32 %v4740_v3, %v8993_v9  ;;  %v5221_v26 = vadd.f32 %v6187_v16, %v9027_v53  ;;  %v5249_v3 = vmax.f32 %v5216_v47, 0.0  ;;  %v5208_v53 = vadd.f32 %v6187_v16, %v9015_v11 }
0x13cd   :  { %v4744_v1 = vmul.f32 0.5, %v4743_v51  ;;  %v5256_v14 = vmax.f32 %v5233_v29, 0.0 }
0x13ce   :  { %v4775_v42 = vmul.f32 %v9031_v60, %v4765_v19  ;;  %v5251_v51 = vmax.f32 %v5221_v26, 0.0  ;;  %v5248_v19 = vmax.f32 %v5213_v27, 0.0  ;;  %v5246_v23 = vmax.f32 %v5208_v53, 0.0 }
0x13cf   :  { %v4745_v43 = vsub.f32 1.5, %v4744_v1 }
0x13d0   :  { %v6451_v7 = vpop.eup %6450  ;;  %v9099_v54 = vadd.f32 %v9037_v58, %v4775_v42 }
0x13d1   :  { %v4746_v45 = vmul.f32 %v6449_v37, %v4745_v43  ;;  %v4752_v57 = vmul.f32 %v6451_v7, %v4690_v10  ;;  %vm4758_vm8 = vweird.f32 %v6451_v7  ;;  %v5223_v10 = vadd.f32 %v6187_v16, %v9033_v61 }
0x13d2   :  { %v5235_v2 = vpop.f32.mrf.mxu0  ;;  %4792 = vst.msk [vmem:[%s6698_s9 + $0x20] sm:$0xff] %vm440_vm4, %v9099_v54  ;;  %vm4759_vm6 = vmor %vm4757_vm9, %vm4758_vm8  ;;  %v5211_v61 = vadd.f32 %v6187_v16, %v9017_v48  ;;  %vm5471_vm8 = vcmask 1042432  }
0x13d3   :  { %v4753_v9 = vmul.f32 %v6451_v7, %v4752_v57  ;;  %v4750_v18 = vsel %vm4749_vm14, %v6449_v37, %v4746_v45  ;;  %v5236_v24 = vadd.f32 %v6187_v16, %v5235_v2  ;;  %v5252_v63 = vmax.f32 %v5223_v10, 0.0 }
0x13d4   :  { %v4766_v8 = vmul.f32 %v4750_v18, %v8999_v50  ;;  %v5247_v1 = vmax.f32 %v5211_v61, 0.0 }
0x13d5   :  { %v4754_v25 = vmul.f32 0.5, %v4753_v9 }
0x13d6   :  { %v4776_v32 = vmul.f32 %v9031_v60, %v4766_v8 }
0x13d7   :  { %v4755_v5 = vsub.f32 1.5, %v4754_v25 }
0x13d8   :  { %v9107_v6 = vadd.f32 %v9037_v58, %v4776_v32 }
0x13d9   :  { %v4756_v56 = vmul.f32 %v6451_v7, %v4755_v5 }
0x13da   :  { %v5237_v20 = vpop.f32.mrf.mxu0  ;;  %4793 = vst.msk [vmem:[%s6698_s9 + $0x28] sm:$0xff] %vm440_vm4, %v9107_v6 }
0x13db   :  { %v4760_v31 = vsel %vm4759_vm6, %v6451_v7, %v4756_v56  ;;  %v5238_v39 = vadd.f32 %v6187_v16, %v5237_v20  ;;  %vm5481_vm6 = vcmask 0  }
0x13dc   :  { %v4767_v50 = vmul.f32 %v4760_v31, %v9006_v38 }
0x13dd   :  { %v5258_v38 = vmax.f32 %v5238_v39, 0.0 }
0x13de   :  { %v4777_v40 = vmul.f32 %v9031_v60, %v4767_v50  ;;  %v5231_v60 = vadd.f32 %v6187_v16, %v9075_v17  ;;  %v5218_v17 = vadd.f32 %v6187_v16, %v9024_v30  ;;  %v5206_v30 = vadd.f32 %v6187_v16, %v9013_v15 }
0x13e0   :  { %v9115_v52 = vadd.f32 %v9037_v58, %v4777_v40  ;;  %v5257_v58 = vmax.f32 %v5236_v24, 0.0  ;;  %v5255_v37 = vmax.f32 %v5231_v60, 0.0  ;;  %v5250_v41 = vmax.f32 %v5218_v17, 0.0 }
0x13e1   :  { %v5245_v44 = vmax.f32 %v5206_v30, 0.0 }
0x13e2   :  { %v5240_v13 = vpop.f32.mrf.mxu0  ;;  %4794 = vst.msk [vmem:[%s6698_s9 + $0x30] sm:$0x7] %vm4631_vm3, %v9115_v52  ;;  %s6533_s9 = smov [#allocation2]  }
0x13e3   :  { %v5241_v59 = vadd.f32 %v6187_v16, %v5240_v13  ;;  %s5492_s4 = sshll.u32 %s6533_s9, 4  ;;  %s5493_s4 = int_to_ptr.vmem [resolvable:$true] %s5492_s4 }
0x13e5   :  { %v5259_v21 = vmax.f32 %v5241_v59, 0.0 }
0x13ea   :  { %v5242_v55 = vpop.f32.mrf.mxu0 }
0x13eb   :  { %v5243_v33 = vadd.f32 %v6187_v16, %v5242_v55 }
0x13ed   :  { %v5260_v35 = vmax.f32 %v5243_v33, 0.0 }
0x13ef   :  { %5309 = vmatpush.msra.mxu3 %v5260_v35 }
0x13f1   :  { %5310 = vmatpush.msra.mxu3 %v5259_v21 }
0x13f3   :  { %5311 = vmatpush.msra.mxu3 %v5258_v38 }
0x13f5   :  { %5312 = vmatpush.msra.mxu3 %v5257_v58 }
0x13f7   :  { %5313 = vmatpush.msra.mxu3 %v5256_v14 }
0x13f9   :  { %5314 = vmatpush.msra.mxu3 %v5255_v37 }
0x13fb   :  { %5315 = vmatpush.msra.mxu3 %v5254_v49 }
0x13fd   :  { %5316 = vmatpush.msra.mxu3 %v5253_v28 }
0x13ff   :  { %5317 = vmatpush.msra.mxu3 %v5252_v63 }
0x1401   :  { %5318 = vmatpush.msra.mxu3 %v5251_v51 }
0x1403   :  { %5319 = vmatpush.msra.mxu3 %v5250_v41 }
0x1405   :  { %5320 = vmatpush.msra.mxu3 %v5249_v3 }
0x1407   :  { %5321 = vmatpush.msra.mxu3 %v5248_v19 }
0x1409   :  { %5322 = vmatpush.msra.mxu3 %v5247_v1 }
0x140b   :  { %5323 = vmatpush.msra.mxu3 %v5246_v23 }
0x140d   :  { %5324 = vmatpush.msra.mxu3 %v5245_v44 }
0x140e   :  { %5984 = vmatmul.lmr.bf16.vlgmr.msra.gmra.7.mxu3 }
0x1416   :  { %5985 = vmatmul.lmr.bf16.gmra.7.mxu3 }
0x141e   :  { %5986 = vmatmul.lmr.bf16.gmra.7.mxu3 }
0x1426   :  { %5987 = vmatmul.lmr.bf16.gmra.7.mxu3 }
0x142e   :  { %5988 = vmatmul.lmr.bf16.gmra.7.mxu3 }
0x1436   :  { %5989 = vmatmul.lmr.bf16.gmra.7.mxu3 }
0x143e   :  { %5990 = vmatmul.lmr.bf16.gmra.7.mxu3 }
0x1491   :  { %v5326_v48 = vpop.f32.mrf.mxu3 }
0x1492   :  { %v5347_v11 = vsub.f32 %v5326_v48, %v9042_v34 }
0x1494   :  { %v5354_v36 = vmul.f32 %v5347_v11, %v5347_v11 }
0x1496   :  { %v5361_v15 = vsel %vm440_vm4, %v5354_v36, 0.0 }
0x1497   :  { %5362 = vadd.xlane.f32.xlu2 %v5361_v15 }
0x1499   :  { %v5329_v42 = vpop.f32.mrf.mxu3 }
0x149a   :  { %v5348_v43 = vsub.f32 %v5329_v42, %v9056_v0 }
0x149c   :  { %v5355_v12 = vmul.f32 %v5348_v43, %v5348_v43 }
0x149e   :  { %v5364_v7 = vsel %vm440_vm4, %v5355_v12, 0.0 }
0x149f   :  { %5365 = vadd.xlane.f32.xlu0 %v5364_v7 }
0x14a1   :  { %v5332_v45 = vpop.f32.mrf.mxu3 }
0x14a2   :  { %v5349_v57 = vsub.f32 %v5332_v45, %v9072_v4 }
0x14a4   :  { %v5356_v2 = vmul.f32 %v5349_v57, %v5349_v57 }
0x14a6   :  { %v5367_v9 = vsel %vm440_vm4, %v5356_v2, 0.0 }
0x14a7   :  { %5368 = vadd.xlane.f32.xlu1 %v5367_v9 }
0x14a9   :  { %v5335_v18 = vpop.f32.mrf.mxu3 }
0x14aa   :  { %v5350_v34 = vsub.f32 %v5335_v18, %v9087_v62 }
0x14ac   :  { %v5357_v8 = vmul.f32 %v5350_v34, %v5350_v34 }
0x14ae   :  { %v5370_v25 = vsel %vm440_vm4, %v5357_v8, 0.0 }
0x14af   :  { %5371 = vadd.xlane.f32.xlu2 %v5370_v25 }
0x14b1   :  { %v5338_v32 = vpop.f32.mrf.mxu3 }
0x14b2   :  { %v5351_v0 = vsub.f32 %v5338_v32, %v9099_v54 }
0x14b4   :  { %v5358_v5 = vmul.f32 %v5351_v0, %v5351_v0 }
0x14b6   :  { %v5373_v56 = vsel %vm440_vm4, %v5358_v5, 0.0 }
0x14b7   :  { %5374 = vadd.xlane.f32.xlu0 %v5373_v56 }
0x14b9   :  { %v5341_v20 = vpop.f32.mrf.mxu3 }
0x14ba   :  { %v5352_v4 = vsub.f32 %v5341_v20, %v9107_v6 }
0x14bc   :  { %v5359_v31 = vmul.f32 %v5352_v4, %v5352_v4 }
0x14be   :  { %v5376_v50 = vsel %vm440_vm4, %v5359_v31, 0.0 }
0x14bf   :  { %5377 = vadd.xlane.f32.xlu1 %v5376_v50 }
0x14c1   :  { %v5344_v40 = vpop.f32.mrf.mxu3 }
0x14c2   :  { %v5353_v62 = vsub.f32 %v5344_v40, %v9115_v52 }
0x14c4   :  { %v5360_v13 = vmul.f32 %v5353_v62, %v5353_v62 }
0x14c6   :  { %v5379_v16 = vsel %vm4631_vm3, %v5360_v13, 0.0 }
0x14c7   :  { %5380 = vadd.xlane.f32.xlu2 %v5379_v16 }
0x150a   :  { %v9146_v55 = vpop.xlane.xlu2 %5362 }
0x150b   :  { %vm5389_vm4 = vcmp.eq.f32.partialorder %v9146_v55, inf  ;;  %vm5391_vm10 = vcmp.eq.f32.partialorder %v9146_v55, 0.0  ;;  %v5392_v32 = vand.u32 2147483648, %v9146_v55 }
0x1512   :  { %v9148_v54 = vpop.xlane.xlu0 %5365 }
0x1513   :  { %6452 = vrsqrt.f32 %v9148_v54  ;;  %vm5401_vm3 = vcmp.eq.f32.partialorder %v9148_v54, inf  ;;  %v5404_v9 = vand.u32 2147483648, %v9148_v54  ;;  %vm5403_vm12 = vcmp.eq.f32.partialorder %v9148_v54, 0.0 }
0x1514   :  { %6454 = vrsqrt.f32 %v9146_v55 }
0x1519   :  { %v6453_v52 = vpop.eup %6452 }
0x151a   :  { %v9150_v59 = vpop.xlane.xlu1 %5368  ;;  %v6455_v33 = vpop.eup %6454  ;;  %v5395_v35 = vmul.f32 %v6453_v52, %v9148_v54 }
0x151b   :  { %6456 = vrsqrt.f32 %v9150_v59  ;;  %v5383_v21 = vmul.f32 %v6455_v33, %v9146_v55  ;;  %vm5413_vm11 = vcmp.eq.f32.partialorder %v9150_v59, inf  ;;  %v5416_v20 = vand.u32 2147483648, %v9150_v59 }
0x151c   :  { %v5396_v60 = vmul.f32 %v6453_v52, %v5395_v35  ;;  %vm5415_vm2 = vcmp.eq.f32.partialorder %v9150_v59, 0.0 }
0x151d   :  { %v5384_v46 = vmul.f32 %v6455_v33, %v5383_v21 }
0x151e   :  { %v5397_v37 = vmul.f32 0.5, %v5396_v60 }
0x151f   :  { %v5385_v49 = vmul.f32 0.5, %v5384_v46 }
0x1520   :  { %v5398_v47 = vsub.f32 1.5, %v5397_v37 }
0x1521   :  { %v6457_v39 = vpop.eup %6456  ;;  %v5386_v27 = vsub.f32 1.5, %v5385_v49 }
0x1522   :  { %v9155_v6 = vpop.xlane.xlu2 %5371  ;;  %v5407_v38 = vmul.f32 %v6457_v39, %v9150_v59  ;;  %v5399_v53 = vmul.f32 %v6453_v52, %v5398_v47 }
0x1523   :  { %6458 = vrsqrt.f32 %v9155_v6  ;;  %v5387_v30 = vmul.f32 %v6455_v33, %v5386_v27  ;;  %vm5425_vm13 = vcmp.eq.f32.partialorder %v9155_v6, inf  ;;  %v5428_v13 = vand.u32 2147483648, %v9155_v6 }
0x1524   :  { %v5408_v14 = vmul.f32 %v6457_v39, %v5407_v38  ;;  %v5400_v36 = vmul.f32 %v5399_v53, %v9148_v54  ;;  %vm5427_vm1 = vcmp.eq.f32.partialorder %v9155_v6, 0.0 }
0x1525   :  { %v5388_v42 = vmul.f32 %v5387_v30, %v9146_v55 }
0x1526   :  { %v5409_v17 = vmul.f32 0.5, %v5408_v14  ;;  %v5402_v2 = vsel %vm5401_vm3, %v9148_v54, %v5400_v36 }
0x1527   :  { %v5390_v34 = vsel %vm5389_vm4, %v9146_v55, %v5388_v42  ;;  %v5405_v56 = vsel %vm5403_vm12, %v5404_v9, %v5402_v2 }
0x1528   :  { %v5410_v41 = vsub.f32 1.5, %v5409_v17  ;;  %v5393_v31 = vsel %vm5391_vm10, %v5392_v32, %v5390_v34 }
0x1529   :  { %v6459_v24 = vpop.eup %6458  ;;  %v5466_v54 = vadd.f32 %v5405_v56, %v5393_v31 }
0x152a   :  { %v9160_v29 = vpop.xlane.xlu0 %5374  ;;  %v5419_v58 = vmul.f32 %v6459_v24, %v9155_v6  ;;  %v5411_v44 = vmul.f32 %v6457_v39, %v5410_v41 }
0x152b   :  { %6460 = vrsqrt.f32 %v9160_v29  ;;  %vm5437_vm0 = vcmp.eq.f32.partialorder %v9160_v29, inf  ;;  %v5440_v55 = vand.u32 2147483648, %v9160_v29  ;;  %vm5439_vm5 = vcmp.eq.f32.partialorder %v9160_v29, 0.0 }
0x152c   :  { %v5420_v10 = vmul.f32 %v6459_v24, %v5419_v58  ;;  %v5412_v12 = vmul.f32 %v5411_v44, %v9150_v59 }
0x152e   :  { %v5421_v51 = vmul.f32 0.5, %v5420_v10  ;;  %v5414_v0 = vsel %vm5413_vm11, %v9150_v59, %v5412_v12 }
0x152f   :  { %v5417_v62 = vsel %vm5415_vm2, %v5416_v20, %v5414_v0 }
0x1530   :  { %v5422_v19 = vsub.f32 1.5, %v5421_v51  ;;  %v5467_v39 = vadd.f32 %v5466_v54, %v5417_v62 }
0x1531   :  { %v6461_v22 = vpop.eup %6460 }
0x1532   :  { %v5431_v26 = vmul.f32 %v6461_v22, %v9160_v29  ;;  %v9166_v28 = vpop.xlane.xlu1 %5377  ;;  %v5423_v15 = vmul.f32 %v6459_v24, %v5422_v19 }
0x1533   :  { %6462 = vrsqrt.f32 %v9166_v28  ;;  %vm5449_vm15 = vcmp.eq.f32.partialorder %v9166_v28, inf  ;;  %v5452_v21 = vand.u32 2147483648, %v9166_v28  ;;  %vm5451_vm7 = vcmp.eq.f32.partialorder %v9166_v28, 0.0 }
0x1534   :  { %v5432_v63 = vmul.f32 %v6461_v22, %v5431_v26  ;;  %v5424_v18 = vmul.f32 %v5423_v15, %v9155_v6 }
0x1536   :  { %v5433_v61 = vmul.f32 0.5, %v5432_v63  ;;  %v5426_v50 = vsel %vm5425_vm13, %v9155_v6, %v5424_v18 }
0x1537   :  { %v5429_v33 = vsel %vm5427_vm1, %v5428_v13, %v5426_v50 }
0x1538   :  { %v5434_v48 = vsub.f32 1.5, %v5433_v61  ;;  %v5468_v60 = vadd.f32 %v5467_v39, %v5429_v33 }
0x1539   :  { %v6463_v3 = vpop.eup %6462 }
0x153a   :  { %v5443_v1 = vmul.f32 %v6463_v3, %v9166_v28  ;;  %v9170_v23 = vpop.xlane.xlu2 %5380  ;;  %v5435_v7 = vmul.f32 %v6461_v22, %v5434_v48 }
0x153b   :  { %6464 = vrsqrt.f32 %v9170_v23  ;;  %vm5461_vm14 = vcmp.eq.f32.partialorder %v9170_v23, inf  ;;  %v5464_v14 = vand.u32 2147483648, %v9170_v23  ;;  %vm5463_vm9 = vcmp.eq.f32.partialorder %v9170_v23, 0.0 }
0x153c   :  { %v5444_v11 = vmul.f32 %v6463_v3, %v5443_v1  ;;  %v5436_v5 = vmul.f32 %v5435_v7, %v9160_v29 }
0x153e   :  { %v5445_v43 = vmul.f32 0.5, %v5444_v11  ;;  %v5438_v52 = vsel %vm5437_vm0, %v9160_v29, %v5436_v5 }
0x153f   :  { %v5441_v24 = vsel %vm5439_vm5, %v5440_v55, %v5438_v52 }
0x1540   :  { %v5446_v45 = vsub.f32 1.5, %v5445_v43  ;;  %v5469_v46 = vadd.f32 %v5468_v60, %v5441_v24 }
0x1541   :  { %v6465_v57 = vpop.eup %6464 }
0x1542   :  { %v5447_v8 = vmul.f32 %v6463_v3, %v5446_v45  ;;  %v5455_v25 = vmul.f32 %v6465_v57, %v9170_v23 }
0x1544   :  { %v5456_v4 = vmul.f32 %v6465_v57, %v5455_v25  ;;  %v5448_v40 = vmul.f32 %v5447_v8, %v9166_v28 }
0x1546   :  { %v5457_v16 = vmul.f32 0.5, %v5456_v4  ;;  %v5450_v35 = vsel %vm5449_vm15, %v9166_v28, %v5448_v40 }
0x1547   :  { %v5453_v6 = vsel %vm5451_vm7, %v5452_v21, %v5450_v35 }
0x1548   :  { %v5458_v59 = vsub.f32 1.5, %v5457_v16  ;;  %v5470_v37 = vadd.f32 %v5469_v46, %v5453_v6 }
0x154a   :  { %v5459_v38 = vmul.f32 %v6465_v57, %v5458_v59 }
0x154c   :  { %v5460_v58 = vmul.f32 %v5459_v38, %v9170_v23 }
0x154e   :  { %v5462_v29 = vsel %vm5461_vm14, %v9170_v23, %v5460_v58 }
0x154f   :  { %v5465_v22 = vsel %vm5463_vm9, %v5464_v14, %v5462_v29 }
0x1550   :  { %v5472_v10 = vsel %vm5471_vm8, %v5465_v22, 0.0 }
0x1551   :  { %v5473_v49 = vadd.f32 %v5472_v10, %v5470_v37 }
0x1553   :  { %v5474_v26 = vrot.slane %v5473_v49, 4 }
0x1555   :  { %v5475_v28 = vadd.f32 %v5474_v26, %v5473_v49 }
0x1557   :  { %v5476_v17 = vrot.slane %v5475_v28, 2 }
0x1559   :  { %v5477_v63 = vadd.f32 %v5476_v17, %v5475_v28 }
0x155b   :  { %v5478_v47 = vrot.slane %v5477_v63, 1 }
0x155d   :  { %v5479_v51 = vadd.f32 %v5478_v47, %v5477_v63 }
0x155f   :  { %v5480_v27 = vmul.f32 0.019607844, %v5479_v51 }
0x1561   :  { %5482 = vst.msk [vmem:[#allocation2] sm:$0x1] %vm5481_vm6, %v5480_v27 }
0x1562   :  { %6489 = shalt.err (!%p6486_p4)
}
0x1563   :  { %5497 = dma.vmem_to_hbm [thread:$0]  %s5493_s4, 16, %s5495_s15, [#allocation3]  }
0x1564   :  { %6490 = dma.done.wait [#allocation3], 16  }
0x1565   :  { %6491 = vsyncadd [#allocation3], 4294967280 }
0x1566   :  { %5506 = vsyncpa [#allocation3], 1 }

</bundles_post_ra>
